<compile_context>
chip_gen: v6e
topology: v6e:2x2x1
jax: 0.10.0
libtpu: 0.0.40
codegen_flags: <defaults>
</compile_context>

<pallas_src>
import jax
import jax.numpy as jnp
from jax.experimental import pallas as pl
from jax.experimental.pallas import tpu as pltpu

CP = 32   # padded channel (lane) width used for all activations / weights


# ---------------------------------------------------------------------------
# in-kernel helpers (traced inside the Pallas kernel; H/W are Python ints)
# ---------------------------------------------------------------------------
def _upsample2x(v):
    """Nearest-neighbour 2x upsample of a (1, H, W, CP) value."""
    _, H, W, _ = v.shape
    rows = []
    for i in range(H):
        r = v[:, i:i + 1]
        rows.append(r)
        rows.append(r)
    v = jnp.concatenate(rows, axis=1)            # (1, 2H, W, CP)
    cols = []
    for j in range(W):
        c = v[:, :, j:j + 1]
        cols.append(c)
        cols.append(c)
    return jnp.concatenate(cols, axis=2)         # (1, 2H, 2W, CP)


def _subsample2x(v):
    """Take even rows/cols of a (1, H, W, CP) value (stride-2 anchor positions)."""
    _, H, W, _ = v.shape
    v = jnp.concatenate([v[:, i:i + 1] for i in range(0, H, 2)], axis=1)
    v = jnp.concatenate([v[:, :, j:j + 1] for j in range(0, W, 2)], axis=2)
    return v


def _conv3x3(src_ref, Hin, Win, w_ref, b_ref, act):
    """Stride-1 3x3 conv over the zero-padded activation held in src_ref.

    src_ref[:, :Hin+2, :Win+2, :] holds the activation with a 1-pixel zero ring and
    channels padded to CP.  w_ref is (3, 3, CP, CP), b_ref is (1, CP).
    Returns a (1, Hin, Win, CP) float32 value (bias + activation fused).
    """
    M = Hin * Win
    acc = jnp.zeros((M, CP), jnp.float32)
    for kh in range(3):
        for kw in range(3):
            patch = src_ref[0, kh:kh + Hin, kw:kw + Win, :]        # (Hin, Win, CP)
            acc = acc + jnp.dot(patch.reshape(M, CP), w_ref[kh, kw],
                                preferred_element_type=jnp.float32)
    acc = acc + b_ref[...]                                          # (1, CP) broadcast
    if act == "relu6":
        acc = jnp.clip(acc, 0.0, 6.0)
    elif act == "relu":
        acc = jnp.maximum(acc, 0.0)
    return acc.reshape(1, Hin, Win, CP)


def _store_interior(dst_ref, val, H, W):
    """Write a (1, H, W, CP) activation into dst_ref at offset (1,1).

    The zero halo ring is NOT rewritten here; both scratch buffers are zero-filled
    once at the top of every grid step and interior writes only ever grow, so the
    ring stays zero for the whole step.
    """
    dst_ref[:, 1:H + 1, 1:W + 1, :] = val


# ---------------------------------------------------------------------------
# fused kernel: whole encoder-decoder for one batch element
# ---------------------------------------------------------------------------
def _fused_kernel(x_ref,
                  w1, b1, w2, b2, w3, b3, w4, b4, w5, b5, w6, b6,
                  o_ref, buf_a, buf_b):
    # x_ref : (1, 18, 18, CP)  input, already spatially padded + channel padded
    # wN    : (3, 3, CP, CP)   (dec3: (1, 1, CP, CP));  bN : (1, CP)
    # o_ref : (1, 16, 16, 1)
    # buf_a, buf_b : (1, 18, 18, CP) VMEM scratch ping-pong activation buffers

    # zero the halo/padding regions once per grid step (scratch persists across steps)
    buf_a[...] = jnp.zeros_like(buf_a)
    buf_b[...] = jnp.zeros_like(buf_b)

    # --- encoder (mobilenet.features, simplified) ---
    # enc1: 3x3 s2 3->8, ReLU6  (stride-2 = stride-1 conv + even-index selection in VMEM)
    y = _conv3x3(x_ref, 16, 16, w1, b1, "relu6")   # (1, 16, 16, CP)
    y = _subsample2x(y)                            # (1, 8, 8, CP)
    _store_interior(buf_a, y, 8, 8)

    # enc2: 3x3 s1 8->16, ReLU6
    y = _conv3x3(buf_a, 8, 8, w2, b2, "relu6")     # (1, 8, 8, CP)
    _store_interior(buf_b, y, 8, 8)

    # enc3: 3x3 s2 16->32, ReLU6
    y = _conv3x3(buf_b, 8, 8, w3, b3, "relu6")     # (1, 8, 8, CP)
    y = _subsample2x(y)                            # (1, 4, 4, CP)

    # --- decoder ---
    # nearest-up x2 + 3x3 s1 32->16, ReLU
    y = _upsample2x(y)                             # (1, 8, 8, CP)
    _store_interior(buf_a, y, 8, 8)
    y = _conv3x3(buf_a, 8, 8, w4, b4, "relu")      # (1, 8, 8, CP)

    # nearest-up x2 + 3x3 s1 16->8, ReLU
    y = _upsample2x(y)                             # (1, 16, 16, CP)
    _store_interior(buf_b, y, 16, 16)
    y = _conv3x3(buf_b, 16, 16, w5, b5, "relu")    # (1, 16, 16, CP)

    # 1x1 conv 8->1, linear (operate on the value directly; no padding needed)
    m = y.reshape(16 * 16, CP)
    out = jnp.dot(m, w6[0, 0], preferred_element_type=jnp.float32) + b6[...]
    o_ref[...] = out[:, 0:1].reshape(1, 16, 16, 1).astype(o_ref.dtype)


# ---------------------------------------------------------------------------
# host-side wrapper
# ---------------------------------------------------------------------------
def _pad_weight(w):
    kh, kw, cin, cout = w.shape
    return jnp.pad(w, ((0, 0), (0, 0), (0, CP - cin), (0, CP - cout)))


def _pad_bias(b):
    return jnp.pad(b, (0, CP - b.shape[0])).reshape(1, CP)


_LAYER_NAMES = ["enc1", "enc2", "enc3", "dec1", "dec2", "dec3"]


@jax.jit
def encoder_decoder_forward(params, x_nchw):
    """Forward pass matching EncoderDecoder.forward: encoder features -> decoder."""
    N = x_nchw.shape[0]

    # NCHW -> NHWC, then pad: 1-pixel spatial halo for the first conv + channels -> CP.
    x = jnp.transpose(x_nchw, (0, 2, 3, 1))
    x = jnp.pad(x, ((0, 0), (1, 1), (1, 1), (0, CP - x.shape[-1])))   # (N, 18, 18, CP)

    wb = []
    for nm in _LAYER_NAMES:
        w, b = params[nm]
        wb.append(_pad_weight(w))
        wb.append(_pad_bias(b))

    def w_spec(shape):
        return pl.BlockSpec(shape, lambda n: (0, 0, 0, 0))

    b_spec = pl.BlockSpec((1, CP), lambda n: (0, 0))

    in_specs = [pl.BlockSpec((1, 18, 18, CP), lambda n: (n, 0, 0, 0))]
    for i in range(len(_LAYER_NAMES)):
        in_specs.append(w_spec(wb[2 * i].shape))
        in_specs.append(b_spec)

    out = pl.pallas_call(
        _fused_kernel,
        out_shape=jax.ShapeDtypeStruct((N, 16, 16, 1), jnp.float32),
        grid=(N,),
        in_specs=in_specs,
        out_specs=pl.BlockSpec((1, 16, 16, 1), lambda n: (n, 0, 0, 0)),
        scratch_shapes=[pltpu.VMEM((1, 18, 18, CP), jnp.float32),
                        pltpu.VMEM((1, 18, 18, CP), jnp.float32)],
        compiler_params=pltpu.CompilerParams(
            dimension_semantics=("parallel",),
            vmem_limit_bytes=32 * 1024 * 1024),
    )(x, *wb)

    # NHWC (N,16,16,1) -> NCHW (N,1,16,16); channel dim is 1 so this is just a reshape.
    return jnp.transpose(out, (0, 3, 1, 2))


# ---------------------------------------------------------------------------
# deterministic synthetic parameters + pure-JAX reference (for correctness check)
# ---------------------------------------------------------------------------
def init_params(key):
    """Deterministic parameter init; returns dict of (weight, bias) per layer."""
    def conv_init(k, kh, kw, cin, cout):
        wkey, _ = jax.random.split(k)
        fan_in = kh * kw * cin
        w = jax.random.normal(wkey, (kh, kw, cin, cout), jnp.float32) / jnp.sqrt(fan_in)
        b = jnp.zeros((cout,), jnp.float32) + 0.01
        return w, b

    keys = jax.random.split(key, 6)
    return {
        "enc1": conv_init(keys[0], 3, 3, 3, 8),     # stride 2, ReLU6
        "enc2": conv_init(keys[1], 3, 3, 8, 16),    # stride 1, ReLU6
        "enc3": conv_init(keys[2], 3, 3, 16, 32),   # stride 2, ReLU6
        "dec1": conv_init(keys[3], 3, 3, 32, 16),   # after up x2, ReLU
        "dec2": conv_init(keys[4], 3, 3, 16, 8),    # after up x2, ReLU
        "dec3": conv_init(keys[5], 1, 1, 8, 1),     # 1x1, linear
    }


def _reference_forward(params, x_nchw):
    """Pure-JAX (lax.conv) reference of the same forward pass."""
    def conv(x, w, b, stride, pad, act):
        y = jax.lax.conv_general_dilated(
            x, w, window_strides=(stride, stride),
            padding=((pad, pad), (pad, pad)),
            dimension_numbers=("NHWC", "HWIO", "NHWC"))
        y = y + b.reshape(1, 1, 1, -1)
        if act == "relu6":
            y = jnp.clip(y, 0.0, 6.0)
        elif act == "relu":
            y = jnp.maximum(y, 0.0)
        return y

    def up(x):
        return jnp.repeat(jnp.repeat(x, 2, axis=1), 2, axis=2)

    x = jnp.transpose(x_nchw, (0, 2, 3, 1))
    w, b = params["enc1"]; x = conv(x, w, b, 2, 1, "relu6")
    w, b = params["enc2"]; x = conv(x, w, b, 1, 1, "relu6")
    w, b = params["enc3"]; x = conv(x, w, b, 2, 1, "relu6")
    x = up(x); w, b = params["dec1"]; x = conv(x, w, b, 1, 1, "relu")
    x = up(x); w, b = params["dec2"]; x = conv(x, w, b, 1, 1, "relu")
    w, b = params["dec3"]; x = conv(x, w, b, 1, 0, "linear")
    return jnp.transpose(x, (0, 3, 1, 2))


if __name__ == "__main__":
    key = jax.random.PRNGKey(0)
    pkey, xkey = jax.random.split(key)

    params = init_params(pkey)
    # Input: batch=2, channels=3 (RGB), 16x16 spatial, NCHW like PyTorch.
    x = jax.random.normal(xkey, (2, 3, 16, 16), jnp.float32)

    out = encoder_decoder_forward(params, x)
    out = jax.block_until_ready(out)

    assert out.shape == (2, 1, 16, 16), out.shape
    assert jnp.all(jnp.isfinite(out))

    ref = _reference_forward(params, x)
    err = float(jnp.max(jnp.abs(out - ref)))
    assert err < 1e-2, f"max abs err vs reference: {err}"

    print("KERNEL_OK")
</pallas_src>

<mosaic_0001>
module attributes {stable_mosaic.version = 11 : i64} {
  func.func @_fused_kernel(%arg0: i32, %arg1: memref<1x18x18x32xf32, #tpu.memory_space<vmem>>, %arg2: memref<3x3x32x32xf32, #tpu.memory_space<vmem>>, %arg3: memref<1x32xf32, #tpu.memory_space<vmem>>, %arg4: memref<3x3x32x32xf32, #tpu.memory_space<vmem>>, %arg5: memref<1x32xf32, #tpu.memory_space<vmem>>, %arg6: memref<3x3x32x32xf32, #tpu.memory_space<vmem>>, %arg7: memref<1x32xf32, #tpu.memory_space<vmem>>, %arg8: memref<3x3x32x32xf32, #tpu.memory_space<vmem>>, %arg9: memref<1x32xf32, #tpu.memory_space<vmem>>, %arg10: memref<3x3x32x32xf32, #tpu.memory_space<vmem>>, %arg11: memref<1x32xf32, #tpu.memory_space<vmem>>, %arg12: memref<1x1x32x32xf32, #tpu.memory_space<vmem>>, %arg13: memref<1x32xf32, #tpu.memory_space<vmem>>, %arg14: memref<1x16x16x1xf32, #tpu.memory_space<vmem>>, %arg15: memref<1x18x18x32xf32, #tpu.memory_space<vmem>>, %arg16: memref<1x18x18x32xf32, #tpu.memory_space<vmem>>) attributes {dimension_semantics = [#tpu.dimension_semantics<parallel>], iteration_bounds = array<i64: 2>, scalar_prefetch = 0 : i64, scratch_operands = 2 : i64, tpu.core_type = #tpu.core_type<tc>, window_params = [{transform_indices = @transform_0, window_bounds = array<i64: 1, 18, 18, 32>}, {pipeline_mode = #tpu.pipeline_mode<synchronous>, transform_indices = @transform_1, window_bounds = array<i64: 3, 3, 32, 32>}, {pipeline_mode = #tpu.pipeline_mode<synchronous>, transform_indices = @transform_2, window_bounds = array<i64: 1, 32>}, {pipeline_mode = #tpu.pipeline_mode<synchronous>, transform_indices = @transform_3, window_bounds = array<i64: 3, 3, 32, 32>}, {pipeline_mode = #tpu.pipeline_mode<synchronous>, transform_indices = @transform_4, window_bounds = array<i64: 1, 32>}, {pipeline_mode = #tpu.pipeline_mode<synchronous>, transform_indices = @transform_5, window_bounds = array<i64: 3, 3, 32, 32>}, {pipeline_mode = #tpu.pipeline_mode<synchronous>, transform_indices = @transform_6, window_bounds = array<i64: 1, 32>}, {pipeline_mode = #tpu.pipeline_mode<synchronous>, transform_indices = @transform_7, window_bounds = array<i64: 3, 3, 32, 32>}, {pipeline_mode = #tpu.pipeline_mode<synchronous>, transform_indices = @transform_8, window_bounds = array<i64: 1, 32>}, {pipeline_mode = #tpu.pipeline_mode<synchronous>, transform_indices = @transform_9, window_bounds = array<i64: 3, 3, 32, 32>}, {pipeline_mode = #tpu.pipeline_mode<synchronous>, transform_indices = @transform_10, window_bounds = array<i64: 1, 32>}, {pipeline_mode = #tpu.pipeline_mode<synchronous>, transform_indices = @transform_11, window_bounds = array<i64: 1, 1, 32, 32>}, {pipeline_mode = #tpu.pipeline_mode<synchronous>, transform_indices = @transform_12, window_bounds = array<i64: 1, 32>}, {transform_indices = @transform_13, window_bounds = array<i64: 1, 16, 16, 1>}]} {
    %cst = arith.constant 0.000000e+00 : f32
    %0 = vector.broadcast %cst : f32 to vector<1x18x18x32xf32>
    %c0 = arith.constant 0 : index
    %c0_0 = arith.constant 0 : index
    %c0_1 = arith.constant 0 : index
    %c0_2 = arith.constant 0 : index
    %1 = vector.load %arg15[%c0, %c0_0, %c0_1, %c0_2] : memref<1x18x18x32xf32, #tpu.memory_space<vmem>>, vector<1x18x18x32xf32>
    tpu.vector_store %arg15[%c0, %c0_0, %c0_1, %c0_2], %0 {strides = array<i32>} : memref<1x18x18x32xf32, #tpu.memory_space<vmem>>, vector<1x18x18x32xf32>,
    %cst_3 = arith.constant 0.000000e+00 : f32
    %2 = vector.broadcast %cst_3 : f32 to vector<1x18x18x32xf32>
    %c0_4 = arith.constant 0 : index
    %c0_5 = arith.constant 0 : index
    %c0_6 = arith.constant 0 : index
    %c0_7 = arith.constant 0 : index
    %3 = vector.load %arg16[%c0_4, %c0_5, %c0_6, %c0_7] : memref<1x18x18x32xf32, #tpu.memory_space<vmem>>, vector<1x18x18x32xf32>
    tpu.vector_store %arg16[%c0_4, %c0_5, %c0_6, %c0_7], %2 {strides = array<i32>} : memref<1x18x18x32xf32, #tpu.memory_space<vmem>>, vector<1x18x18x32xf32>,
    %cst_8 = arith.constant 0.000000e+00 : f32
    %4 = vector.broadcast %cst_8 : f32 to vector<256x32xf32>
    %c0_9 = arith.constant 0 : index
    %c0_10 = arith.constant 0 : index
    %c0_11 = arith.constant 0 : index
    %c0_12 = arith.constant 0 : index
    %5 = vector.load %arg1[%c0_9, %c0_10, %c0_11, %c0_12] : memref<1x18x18x32xf32, #tpu.memory_space<vmem>>, vector<1x16x16x32xf32>
    %6 = vector.shape_cast %5 : vector<1x16x16x32xf32> to vector<16x16x32xf32>
    %7 = vector.shape_cast %6 : vector<16x16x32xf32> to vector<256x32xf32>
    %c0_13 = arith.constant 0 : index
    %c0_14 = arith.constant 0 : index
    %c0_15 = arith.constant 0 : index
    %c0_16 = arith.constant 0 : index
    %8 = vector.load %arg2[%c0_13, %c0_14, %c0_15, %c0_16] : memref<3x3x32x32xf32, #tpu.memory_space<vmem>>, vector<1x1x32x32xf32>
    %9 = vector.shape_cast %8 : vector<1x1x32x32xf32> to vector<32x32xf32>
    %cst_17 = arith.constant dense<0.000000e+00> : vector<256x32xf32>
    %10 = tpu.matmul %7, %9, %cst_17 {dimension_numbers = #tpu.dot_dimension_numbers<[1], [0], [0], [1], [0, 0, 1, 1], [], []>} : vector<256x32xf32>, vector<32x32xf32>, vector<256x32xf32> -> vector<256x32xf32>
    %11 = arith.addf %4, %10 : vector<256x32xf32>
    %c0_18 = arith.constant 0 : index
    %c0_19 = arith.constant 0 : index
    %c1 = arith.constant 1 : index
    %c0_20 = arith.constant 0 : index
    %12 = vector.load %arg1[%c0_18, %c0_19, %c1, %c0_20] : memref<1x18x18x32xf32, #tpu.memory_space<vmem>>, vector<1x16x16x32xf32>
    %13 = vector.shape_cast %12 : vector<1x16x16x32xf32> to vector<16x16x32xf32>
    %14 = vector.shape_cast %13 : vector<16x16x32xf32> to vector<256x32xf32>
    %c0_21 = arith.constant 0 : index
    %c1_22 = arith.constant 1 : index
    %c0_23 = arith.constant 0 : index
    %c0_24 = arith.constant 0 : index
    %15 = vector.load %arg2[%c0_21, %c1_22, %c0_23, %c0_24] : memref<3x3x32x32xf32, #tpu.memory_space<vmem>>, vector<1x1x32x32xf32>
    %16 = vector.shape_cast %15 : vector<1x1x32x32xf32> to vector<32x32xf32>
    %cst_25 = arith.constant dense<0.000000e+00> : vector<256x32xf32>
    %17 = tpu.matmul %14, %16, %cst_25 {dimension_numbers = #tpu.dot_dimension_numbers<[1], [0], [0], [1], [0, 0, 1, 1], [], []>} : vector<256x32xf32>, vector<32x32xf32>, vector<256x32xf32> -> vector<256x32xf32>
    %18 = arith.addf %11, %17 : vector<256x32xf32>
    %c0_26 = arith.constant 0 : index
    %c0_27 = arith.constant 0 : index
    %c2 = arith.constant 2 : index
    %c0_28 = arith.constant 0 : index
    %19 = vector.load %arg1[%c0_26, %c0_27, %c2, %c0_28] : memref<1x18x18x32xf32, #tpu.memory_space<vmem>>, vector<1x16x16x32xf32>
    %20 = vector.shape_cast %19 : vector<1x16x16x32xf32> to vector<16x16x32xf32>
    %21 = vector.shape_cast %20 : vector<16x16x32xf32> to vector<256x32xf32>
    %c0_29 = arith.constant 0 : index
    %c2_30 = arith.constant 2 : index
    %c0_31 = arith.constant 0 : index
    %c0_32 = arith.constant 0 : index
    %22 = vector.load %arg2[%c0_29, %c2_30, %c0_31, %c0_32] : memref<3x3x32x32xf32, #tpu.memory_space<vmem>>, vector<1x1x32x32xf32>
    %23 = vector.shape_cast %22 : vector<1x1x32x32xf32> to vector<32x32xf32>
    %cst_33 = arith.constant dense<0.000000e+00> : vector<256x32xf32>
    %24 = tpu.matmul %21, %23, %cst_33 {dimension_numbers = #tpu.dot_dimension_numbers<[1], [0], [0], [1], [0, 0, 1, 1], [], []>} : vector<256x32xf32>, vector<32x32xf32>, vector<256x32xf32> -> vector<256x32xf32>
    %25 = arith.addf %18, %24 : vector<256x32xf32>
    %c0_34 = arith.constant 0 : index
    %c1_35 = arith.constant 1 : index
    %c0_36 = arith.constant 0 : index
    %c0_37 = arith.constant 0 : index
    %26 = vector.load %arg1[%c0_34, %c1_35, %c0_36, %c0_37] : memref<1x18x18x32xf32, #tpu.memory_space<vmem>>, vector<1x16x16x32xf32>
    %27 = vector.shape_cast %26 : vector<1x16x16x32xf32> to vector<16x16x32xf32>
    %28 = vector.shape_cast %27 : vector<16x16x32xf32> to vector<256x32xf32>
    %c1_38 = arith.constant 1 : index
    %c0_39 = arith.constant 0 : index
    %c0_40 = arith.constant 0 : index
    %c0_41 = arith.constant 0 : index
    %29 = vector.load %arg2[%c1_38, %c0_39, %c0_40, %c0_41] : memref<3x3x32x32xf32, #tpu.memory_space<vmem>>, vector<1x1x32x32xf32>
    %30 = vector.shape_cast %29 : vector<1x1x32x32xf32> to vector<32x32xf32>
    %cst_42 = arith.constant dense<0.000000e+00> : vector<256x32xf32>
    %31 = tpu.matmul %28, %30, %cst_42 {dimension_numbers = #tpu.dot_dimension_numbers<[1], [0], [0], [1], [0, 0, 1, 1], [], []>} : vector<256x32xf32>, vector<32x32xf32>, vector<256x32xf32> -> vector<256x32xf32>
    %32 = arith.addf %25, %31 : vector<256x32xf32>
    %c0_43 = arith.constant 0 : index
    %c1_44 = arith.constant 1 : index
    %c1_45 = arith.constant 1 : index
    %c0_46 = arith.constant 0 : index
    %33 = vector.load %arg1[%c0_43, %c1_44, %c1_45, %c0_46] : memref<1x18x18x32xf32, #tpu.memory_space<vmem>>, vector<1x16x16x32xf32>
    %34 = vector.shape_cast %33 : vector<1x16x16x32xf32> to vector<16x16x32xf32>
    %35 = vector.shape_cast %34 : vector<16x16x32xf32> to vector<256x32xf32>
    %c1_47 = arith.constant 1 : index
    %c1_48 = arith.constant 1 : index
    %c0_49 = arith.constant 0 : index
    %c0_50 = arith.constant 0 : index
    %36 = vector.load %arg2[%c1_47, %c1_48, %c0_49, %c0_50] : memref<3x3x32x32xf32, #tpu.memory_space<vmem>>, vector<1x1x32x32xf32>
    %37 = vector.shape_cast %36 : vector<1x1x32x32xf32> to vector<32x32xf32>
    %cst_51 = arith.constant dense<0.000000e+00> : vector<256x32xf32>
    %38 = tpu.matmul %35, %37, %cst_51 {dimension_numbers = #tpu.dot_dimension_numbers<[1], [0], [0], [1], [0, 0, 1, 1], [], []>} : vector<256x32xf32>, vector<32x32xf32>, vector<256x32xf32> -> vector<256x32xf32>
    %39 = arith.addf %32, %38 : vector<256x32xf32>
    %c0_52 = arith.constant 0 : index
    %c1_53 = arith.constant 1 : index
    %c2_54 = arith.constant 2 : index
    %c0_55 = arith.constant 0 : index
    %40 = vector.load %arg1[%c0_52, %c1_53, %c2_54, %c0_55] : memref<1x18x18x32xf32, #tpu.memory_space<vmem>>, vector<1x16x16x32xf32>
    %41 = vector.shape_cast %40 : vector<1x16x16x32xf32> to vector<16x16x32xf32>
    %42 = vector.shape_cast %41 : vector<16x16x32xf32> to vector<256x32xf32>
    %c1_56 = arith.constant 1 : index
    %c2_57 = arith.constant 2 : index
    %c0_58 = arith.constant 0 : index
    %c0_59 = arith.constant 0 : index
    %43 = vector.load %arg2[%c1_56, %c2_57, %c0_58, %c0_59] : memref<3x3x32x32xf32, #tpu.memory_space<vmem>>, vector<1x1x32x32xf32>
    %44 = vector.shape_cast %43 : vector<1x1x32x32xf32> to vector<32x32xf32>
    %cst_60 = arith.constant dense<0.000000e+00> : vector<256x32xf32>
    %45 = tpu.matmul %42, %44, %cst_60 {dimension_numbers = #tpu.dot_dimension_numbers<[1], [0], [0], [1], [0, 0, 1, 1], [], []>} : vector<256x32xf32>, vector<32x32xf32>, vector<256x32xf32> -> vector<256x32xf32>
    %46 = arith.addf %39, %45 : vector<256x32xf32>
    %c0_61 = arith.constant 0 : index
    %c2_62 = arith.constant 2 : index
    %c0_63 = arith.constant 0 : index
    %c0_64 = arith.constant 0 : index
    %47 = vector.load %arg1[%c0_61, %c2_62, %c0_63, %c0_64] : memref<1x18x18x32xf32, #tpu.memory_space<vmem>>, vector<1x16x16x32xf32>
    %48 = vector.shape_cast %47 : vector<1x16x16x32xf32> to vector<16x16x32xf32>
    %49 = vector.shape_cast %48 : vector<16x16x32xf32> to vector<256x32xf32>
    %c2_65 = arith.constant 2 : index
    %c0_66 = arith.constant 0 : index
    %c0_67 = arith.constant 0 : index
    %c0_68 = arith.constant 0 : index
    %50 = vector.load %arg2[%c2_65, %c0_66, %c0_67, %c0_68] : memref<3x3x32x32xf32, #tpu.memory_space<vmem>>, vector<1x1x32x32xf32>
    %51 = vector.shape_cast %50 : vector<1x1x32x32xf32> to vector<32x32xf32>
    %cst_69 = arith.constant dense<0.000000e+00> : vector<256x32xf32>
    %52 = tpu.matmul %49, %51, %cst_69 {dimension_numbers = #tpu.dot_dimension_numbers<[1], [0], [0], [1], [0, 0, 1, 1], [], []>} : vector<256x32xf32>, vector<32x32xf32>, vector<256x32xf32> -> vector<256x32xf32>
    %53 = arith.addf %46, %52 : vector<256x32xf32>
    %c0_70 = arith.constant 0 : index
    %c2_71 = arith.constant 2 : index
    %c1_72 = arith.constant 1 : index
    %c0_73 = arith.constant 0 : index
    %54 = vector.load %arg1[%c0_70, %c2_71, %c1_72, %c0_73] : memref<1x18x18x32xf32, #tpu.memory_space<vmem>>, vector<1x16x16x32xf32>
    %55 = vector.shape_cast %54 : vector<1x16x16x32xf32> to vector<16x16x32xf32>
    %56 = vector.shape_cast %55 : vector<16x16x32xf32> to vector<256x32xf32>
    %c2_74 = arith.constant 2 : index
    %c1_75 = arith.constant 1 : index
    %c0_76 = arith.constant 0 : index
    %c0_77 = arith.constant 0 : index
    %57 = vector.load %arg2[%c2_74, %c1_75, %c0_76, %c0_77] : memref<3x3x32x32xf32, #tpu.memory_space<vmem>>, vector<1x1x32x32xf32>
    %58 = vector.shape_cast %57 : vector<1x1x32x32xf32> to vector<32x32xf32>
    %cst_78 = arith.constant dense<0.000000e+00> : vector<256x32xf32>
    %59 = tpu.matmul %56, %58, %cst_78 {dimension_numbers = #tpu.dot_dimension_numbers<[1], [0], [0], [1], [0, 0, 1, 1], [], []>} : vector<256x32xf32>, vector<32x32xf32>, vector<256x32xf32> -> vector<256x32xf32>
    %60 = arith.addf %53, %59 : vector<256x32xf32>
    %c0_79 = arith.constant 0 : index
    %c2_80 = arith.constant 2 : index
    %c2_81 = arith.constant 2 : index
    %c0_82 = arith.constant 0 : index
    %61 = vector.load %arg1[%c0_79, %c2_80, %c2_81, %c0_82] : memref<1x18x18x32xf32, #tpu.memory_space<vmem>>, vector<1x16x16x32xf32>
    %62 = vector.shape_cast %61 : vector<1x16x16x32xf32> to vector<16x16x32xf32>
    %63 = vector.shape_cast %62 : vector<16x16x32xf32> to vector<256x32xf32>
    %c2_83 = arith.constant 2 : index
    %c2_84 = arith.constant 2 : index
    %c0_85 = arith.constant 0 : index
    %c0_86 = arith.constant 0 : index
    %64 = vector.load %arg2[%c2_83, %c2_84, %c0_85, %c0_86] : memref<3x3x32x32xf32, #tpu.memory_space<vmem>>, vector<1x1x32x32xf32>
    %65 = vector.shape_cast %64 : vector<1x1x32x32xf32> to vector<32x32xf32>
    %cst_87 = arith.constant dense<0.000000e+00> : vector<256x32xf32>
    %66 = tpu.matmul %63, %65, %cst_87 {dimension_numbers = #tpu.dot_dimension_numbers<[1], [0], [0], [1], [0, 0, 1, 1], [], []>} : vector<256x32xf32>, vector<32x32xf32>, vector<256x32xf32> -> vector<256x32xf32>
    %67 = arith.addf %60, %66 : vector<256x32xf32>
    %c0_88 = arith.constant 0 : index
    %c0_89 = arith.constant 0 : index
    %68 = vector.load %arg3[%c0_88, %c0_89] : memref<1x32xf32, #tpu.memory_space<vmem>>, vector<1x32xf32>
    %69 = vector.broadcast %68 : vector<1x32xf32> to vector<256x32xf32>
    %70 = arith.addf %67, %69 : vector<256x32xf32>
    %cst_90 = arith.constant 0.000000e+00 : f32
    %cst_91 = arith.constant 6.000000e+00 : f32
    %71 = vector.broadcast %cst_90 : f32 to vector<256x32xf32>
    %72 = arith.maximumf %71, %70 : vector<256x32xf32>
    %73 = vector.broadcast %cst_91 : f32 to vector<256x32xf32>
    %74 = arith.minimumf %73, %72 : vector<256x32xf32>
    %75 = vector.shape_cast %74 : vector<256x32xf32> to vector<1x16x16x32xf32>
    %76 = vector.extract_strided_slice %75 {offsets = [0, 0, 0, 0], sizes = [1, 1, 16, 32], strides = [1, 1, 1, 1]} : vector<1x16x16x32xf32> to vector<1x1x16x32xf32>
    %77 = vector.extract_strided_slice %75 {offsets = [0, 2, 0, 0], sizes = [1, 1, 16, 32], strides = [1, 1, 1, 1]} : vector<1x16x16x32xf32> to vector<1x1x16x32xf32>
    %78 = vector.extract_strided_slice %75 {offsets = [0, 4, 0, 0], sizes = [1, 1, 16, 32], strides = [1, 1, 1, 1]} : vector<1x16x16x32xf32> to vector<1x1x16x32xf32>
    %79 = vector.extract_strided_slice %75 {offsets = [0, 6, 0, 0], sizes = [1, 1, 16, 32], strides = [1, 1, 1, 1]} : vector<1x16x16x32xf32> to vector<1x1x16x32xf32>
    %80 = vector.extract_strided_slice %75 {offsets = [0, 8, 0, 0], sizes = [1, 1, 16, 32], strides = [1, 1, 1, 1]} : vector<1x16x16x32xf32> to vector<1x1x16x32xf32>
    %81 = vector.extract_strided_slice %75 {offsets = [0, 10, 0, 0], sizes = [1, 1, 16, 32], strides = [1, 1, 1, 1]} : vector<1x16x16x32xf32> to vector<1x1x16x32xf32>
    %82 = vector.extract_strided_slice %75 {offsets = [0, 12, 0, 0], sizes = [1, 1, 16, 32], strides = [1, 1, 1, 1]} : vector<1x16x16x32xf32> to vector<1x1x16x32xf32>
    %83 = vector.extract_strided_slice %75 {offsets = [0, 14, 0, 0], sizes = [1, 1, 16, 32], strides = [1, 1, 1, 1]} : vector<1x16x16x32xf32> to vector<1x1x16x32xf32>
    %84 = tpu.concatenate %76, %77, %78, %79, %80, %81, %82, %83 in 1 : vector<1x1x16x32xf32>, vector<1x1x16x32xf32>, vector<1x1x16x32xf32>, vector<1x1x16x32xf32>, vector<1x1x16x32xf32>, vector<1x1x16x32xf32>, vector<1x1x16x32xf32>, vector<1x1x16x32xf32> -> vector<1x8x16x32xf32>
    %85 = vector.extract_strided_slice %84 {offsets = [0, 0, 0, 0], sizes = [1, 8, 1, 32], strides = [1, 1, 1, 1]} : vector<1x8x16x32xf32> to vector<1x8x1x32xf32>
    %86 = vector.extract_strided_slice %84 {offsets = [0, 0, 2, 0], sizes = [1, 8, 1, 32], strides = [1, 1, 1, 1]} : vector<1x8x16x32xf32> to vector<1x8x1x32xf32>
    %87 = vector.extract_strided_slice %84 {offsets = [0, 0, 4, 0], sizes = [1, 8, 1, 32], strides = [1, 1, 1, 1]} : vector<1x8x16x32xf32> to vector<1x8x1x32xf32>
    %88 = vector.extract_strided_slice %84 {offsets = [0, 0, 6, 0], sizes = [1, 8, 1, 32], strides = [1, 1, 1, 1]} : vector<1x8x16x32xf32> to vector<1x8x1x32xf32>
    %89 = vector.extract_strided_slice %84 {offsets = [0, 0, 8, 0], sizes = [1, 8, 1, 32], strides = [1, 1, 1, 1]} : vector<1x8x16x32xf32> to vector<1x8x1x32xf32>
    %90 = vector.extract_strided_slice %84 {offsets = [0, 0, 10, 0], sizes = [1, 8, 1, 32], strides = [1, 1, 1, 1]} : vector<1x8x16x32xf32> to vector<1x8x1x32xf32>
    %91 = vector.extract_strided_slice %84 {offsets = [0, 0, 12, 0], sizes = [1, 8, 1, 32], strides = [1, 1, 1, 1]} : vector<1x8x16x32xf32> to vector<1x8x1x32xf32>
    %92 = vector.extract_strided_slice %84 {offsets = [0, 0, 14, 0], sizes = [1, 8, 1, 32], strides = [1, 1, 1, 1]} : vector<1x8x16x32xf32> to vector<1x8x1x32xf32>
    %93 = tpu.concatenate %85, %86, %87, %88, %89, %90, %91, %92 in 2 : vector<1x8x1x32xf32>, vector<1x8x1x32xf32>, vector<1x8x1x32xf32>, vector<1x8x1x32xf32>, vector<1x8x1x32xf32>, vector<1x8x1x32xf32>, vector<1x8x1x32xf32>, vector<1x8x1x32xf32> -> vector<1x8x8x32xf32>
    %c0_92 = arith.constant 0 : index
    %c1_93 = arith.constant 1 : index
    %c1_94 = arith.constant 1 : index
    %c0_95 = arith.constant 0 : index
    %94 = vector.load %arg15[%c0_92, %c1_93, %c1_94, %c0_95] : memref<1x18x18x32xf32, #tpu.memory_space<vmem>>, vector<1x8x8x32xf32>
    tpu.vector_store %arg15[%c0_92, %c1_93, %c1_94, %c0_95], %93 {strides = array<i32>} : memref<1x18x18x32xf32, #tpu.memory_space<vmem>>, vector<1x8x8x32xf32>,
    %cst_96 = arith.constant 0.000000e+00 : f32
    %95 = vector.broadcast %cst_96 : f32 to vector<64x32xf32>
    %c0_97 = arith.constant 0 : index
    %c0_98 = arith.constant 0 : index
    %c0_99 = arith.constant 0 : index
    %c0_100 = arith.constant 0 : index
    %96 = vector.load %arg15[%c0_97, %c0_98, %c0_99, %c0_100] : memref<1x18x18x32xf32, #tpu.memory_space<vmem>>, vector<1x8x8x32xf32>
    %97 = vector.shape_cast %96 : vector<1x8x8x32xf32> to vector<8x8x32xf32>
    %98 = vector.shape_cast %97 : vector<8x8x32xf32> to vector<64x32xf32>
    %c0_101 = arith.constant 0 : index
    %c0_102 = arith.constant 0 : index
    %c0_103 = arith.constant 0 : index
    %c0_104 = arith.constant 0 : index
    %99 = vector.load %arg4[%c0_101, %c0_102, %c0_103, %c0_104] : memref<3x3x32x32xf32, #tpu.memory_space<vmem>>, vector<1x1x32x32xf32>
    %100 = vector.shape_cast %99 : vector<1x1x32x32xf32> to vector<32x32xf32>
    %cst_105 = arith.constant dense<0.000000e+00> : vector<64x32xf32>
    %101 = tpu.matmul %98, %100, %cst_105 {dimension_numbers = #tpu.dot_dimension_numbers<[1], [0], [0], [1], [0, 0, 1, 1], [], []>} : vector<64x32xf32>, vector<32x32xf32>, vector<64x32xf32> -> vector<64x32xf32>
    %102 = arith.addf %95, %101 : vector<64x32xf32>
    %c0_106 = arith.constant 0 : index
    %c0_107 = arith.constant 0 : index
    %c1_108 = arith.constant 1 : index
    %c0_109 = arith.constant 0 : index
    %103 = vector.load %arg15[%c0_106, %c0_107, %c1_108, %c0_109] : memref<1x18x18x32xf32, #tpu.memory_space<vmem>>, vector<1x8x8x32xf32>
    %104 = vector.shape_cast %103 : vector<1x8x8x32xf32> to vector<8x8x32xf32>
    %105 = vector.shape_cast %104 : vector<8x8x32xf32> to vector<64x32xf32>
    %c0_110 = arith.constant 0 : index
    %c1_111 = arith.constant 1 : index
    %c0_112 = arith.constant 0 : index
    %c0_113 = arith.constant 0 : index
    %106 = vector.load %arg4[%c0_110, %c1_111, %c0_112, %c0_113] : memref<3x3x32x32xf32, #tpu.memory_space<vmem>>, vector<1x1x32x32xf32>
    %107 = vector.shape_cast %106 : vector<1x1x32x32xf32> to vector<32x32xf32>
    %cst_114 = arith.constant dense<0.000000e+00> : vector<64x32xf32>
    %108 = tpu.matmul %105, %107, %cst_114 {dimension_numbers = #tpu.dot_dimension_numbers<[1], [0], [0], [1], [0, 0, 1, 1], [], []>} : vector<64x32xf32>, vector<32x32xf32>, vector<64x32xf32> -> vector<64x32xf32>
    %109 = arith.addf %102, %108 : vector<64x32xf32>
    %c0_115 = arith.constant 0 : index
    %c0_116 = arith.constant 0 : index
    %c2_117 = arith.constant 2 : index
    %c0_118 = arith.constant 0 : index
    %110 = vector.load %arg15[%c0_115, %c0_116, %c2_117, %c0_118] : memref<1x18x18x32xf32, #tpu.memory_space<vmem>>, vector<1x8x8x32xf32>
    %111 = vector.shape_cast %110 : vector<1x8x8x32xf32> to vector<8x8x32xf32>
    %112 = vector.shape_cast %111 : vector<8x8x32xf32> to vector<64x32xf32>
    %c0_119 = arith.constant 0 : index
    %c2_120 = arith.constant 2 : index
    %c0_121 = arith.constant 0 : index
    %c0_122 = arith.constant 0 : index
    %113 = vector.load %arg4[%c0_119, %c2_120, %c0_121, %c0_122] : memref<3x3x32x32xf32, #tpu.memory_space<vmem>>, vector<1x1x32x32xf32>
    %114 = vector.shape_cast %113 : vector<1x1x32x32xf32> to vector<32x32xf32>
    %cst_123 = arith.constant dense<0.000000e+00> : vector<64x32xf32>
    %115 = tpu.matmul %112, %114, %cst_123 {dimension_numbers = #tpu.dot_dimension_numbers<[1], [0], [0], [1], [0, 0, 1, 1], [], []>} : vector<64x32xf32>, vector<32x32xf32>, vector<64x32xf32> -> vector<64x32xf32>
    %116 = arith.addf %109, %115 : vector<64x32xf32>
    %c0_124 = arith.constant 0 : index
    %c1_125 = arith.constant 1 : index
    %c0_126 = arith.constant 0 : index
    %c0_127 = arith.constant 0 : index
    %117 = vector.load %arg15[%c0_124, %c1_125, %c0_126, %c0_127] : memref<1x18x18x32xf32, #tpu.memory_space<vmem>>, vector<1x8x8x32xf32>
    %118 = vector.shape_cast %117 : vector<1x8x8x32xf32> to vector<8x8x32xf32>
    %119 = vector.shape_cast %118 : vector<8x8x32xf32> to vector<64x32xf32>
    %c1_128 = arith.constant 1 : index
    %c0_129 = arith.constant 0 : index
    %c0_130 = arith.constant 0 : index
    %c0_131 = arith.constant 0 : index
    %120 = vector.load %arg4[%c1_128, %c0_129, %c0_130, %c0_131] : memref<3x3x32x32xf32, #tpu.memory_space<vmem>>, vector<1x1x32x32xf32>
    %121 = vector.shape_cast %120 : vector<1x1x32x32xf32> to vector<32x32xf32>
    %cst_132 = arith.constant dense<0.000000e+00> : vector<64x32xf32>
    %122 = tpu.matmul %119, %121, %cst_132 {dimension_numbers = #tpu.dot_dimension_numbers<[1], [0], [0], [1], [0, 0, 1, 1], [], []>} : vector<64x32xf32>, vector<32x32xf32>, vector<64x32xf32> -> vector<64x32xf32>
    %123 = arith.addf %116, %122 : vector<64x32xf32>
    %c0_133 = arith.constant 0 : index
    %c1_134 = arith.constant 1 : index
    %c1_135 = arith.constant 1 : index
    %c0_136 = arith.constant 0 : index
    %124 = vector.load %arg15[%c0_133, %c1_134, %c1_135, %c0_136] : memref<1x18x18x32xf32, #tpu.memory_space<vmem>>, vector<1x8x8x32xf32>
    %125 = vector.shape_cast %124 : vector<1x8x8x32xf32> to vector<8x8x32xf32>
    %126 = vector.shape_cast %125 : vector<8x8x32xf32> to vector<64x32xf32>
    %c1_137 = arith.constant 1 : index
    %c1_138 = arith.constant 1 : index
    %c0_139 = arith.constant 0 : index
    %c0_140 = arith.constant 0 : index
    %127 = vector.load %arg4[%c1_137, %c1_138, %c0_139, %c0_140] : memref<3x3x32x32xf32, #tpu.memory_space<vmem>>, vector<1x1x32x32xf32>
    %128 = vector.shape_cast %127 : vector<1x1x32x32xf32> to vector<32x32xf32>
    %cst_141 = arith.constant dense<0.000000e+00> : vector<64x32xf32>
    %129 = tpu.matmul %126, %128, %cst_141 {dimension_numbers = #tpu.dot_dimension_numbers<[1], [0], [0], [1], [0, 0, 1, 1], [], []>} : vector<64x32xf32>, vector<32x32xf32>, vector<64x32xf32> -> vector<64x32xf32>
    %130 = arith.addf %123, %129 : vector<64x32xf32>
    %c0_142 = arith.constant 0 : index
    %c1_143 = arith.constant 1 : index
    %c2_144 = arith.constant 2 : index
    %c0_145 = arith.constant 0 : index
    %131 = vector.load %arg15[%c0_142, %c1_143, %c2_144, %c0_145] : memref<1x18x18x32xf32, #tpu.memory_space<vmem>>, vector<1x8x8x32xf32>
    %132 = vector.shape_cast %131 : vector<1x8x8x32xf32> to vector<8x8x32xf32>
    %133 = vector.shape_cast %132 : vector<8x8x32xf32> to vector<64x32xf32>
    %c1_146 = arith.constant 1 : index
    %c2_147 = arith.constant 2 : index
    %c0_148 = arith.constant 0 : index
    %c0_149 = arith.constant 0 : index
    %134 = vector.load %arg4[%c1_146, %c2_147, %c0_148, %c0_149] : memref<3x3x32x32xf32, #tpu.memory_space<vmem>>, vector<1x1x32x32xf32>
    %135 = vector.shape_cast %134 : vector<1x1x32x32xf32> to vector<32x32xf32>
    %cst_150 = arith.constant dense<0.000000e+00> : vector<64x32xf32>
    %136 = tpu.matmul %133, %135, %cst_150 {dimension_numbers = #tpu.dot_dimension_numbers<[1], [0], [0], [1], [0, 0, 1, 1], [], []>} : vector<64x32xf32>, vector<32x32xf32>, vector<64x32xf32> -> vector<64x32xf32>
    %137 = arith.addf %130, %136 : vector<64x32xf32>
    %c0_151 = arith.constant 0 : index
    %c2_152 = arith.constant 2 : index
    %c0_153 = arith.constant 0 : index
    %c0_154 = arith.constant 0 : index
    %138 = vector.load %arg15[%c0_151, %c2_152, %c0_153, %c0_154] : memref<1x18x18x32xf32, #tpu.memory_space<vmem>>, vector<1x8x8x32xf32>
    %139 = vector.shape_cast %138 : vector<1x8x8x32xf32> to vector<8x8x32xf32>
    %140 = vector.shape_cast %139 : vector<8x8x32xf32> to vector<64x32xf32>
    %c2_155 = arith.constant 2 : index
    %c0_156 = arith.constant 0 : index
    %c0_157 = arith.constant 0 : index
    %c0_158 = arith.constant 0 : index
    %141 = vector.load %arg4[%c2_155, %c0_156, %c0_157, %c0_158] : memref<3x3x32x32xf32, #tpu.memory_space<vmem>>, vector<1x1x32x32xf32>
    %142 = vector.shape_cast %141 : vector<1x1x32x32xf32> to vector<32x32xf32>
    %cst_159 = arith.constant dense<0.000000e+00> : vector<64x32xf32>
    %143 = tpu.matmul %140, %142, %cst_159 {dimension_numbers = #tpu.dot_dimension_numbers<[1], [0], [0], [1], [0, 0, 1, 1], [], []>} : vector<64x32xf32>, vector<32x32xf32>, vector<64x32xf32> -> vector<64x32xf32>
    %144 = arith.addf %137, %143 : vector<64x32xf32>
    %c0_160 = arith.constant 0 : index
    %c2_161 = arith.constant 2 : index
    %c1_162 = arith.constant 1 : index
    %c0_163 = arith.constant 0 : index
    %145 = vector.load %arg15[%c0_160, %c2_161, %c1_162, %c0_163] : memref<1x18x18x32xf32, #tpu.memory_space<vmem>>, vector<1x8x8x32xf32>
    %146 = vector.shape_cast %145 : vector<1x8x8x32xf32> to vector<8x8x32xf32>
    %147 = vector.shape_cast %146 : vector<8x8x32xf32> to vector<64x32xf32>
    %c2_164 = arith.constant 2 : index
    %c1_165 = arith.constant 1 : index
    %c0_166 = arith.constant 0 : index
    %c0_167 = arith.constant 0 : index
    %148 = vector.load %arg4[%c2_164, %c1_165, %c0_166, %c0_167] : memref<3x3x32x32xf32, #tpu.memory_space<vmem>>, vector<1x1x32x32xf32>
    %149 = vector.shape_cast %148 : vector<1x1x32x32xf32> to vector<32x32xf32>
    %cst_168 = arith.constant dense<0.000000e+00> : vector<64x32xf32>
    %150 = tpu.matmul %147, %149, %cst_168 {dimension_numbers = #tpu.dot_dimension_numbers<[1], [0], [0], [1], [0, 0, 1, 1], [], []>} : vector<64x32xf32>, vector<32x32xf32>, vector<64x32xf32> -> vector<64x32xf32>
    %151 = arith.addf %144, %150 : vector<64x32xf32>
    %c0_169 = arith.constant 0 : index
    %c2_170 = arith.constant 2 : index
    %c2_171 = arith.constant 2 : index
    %c0_172 = arith.constant 0 : index
    %152 = vector.load %arg15[%c0_169, %c2_170, %c2_171, %c0_172] : memref<1x18x18x32xf32, #tpu.memory_space<vmem>>, vector<1x8x8x32xf32>
    %153 = vector.shape_cast %152 : vector<1x8x8x32xf32> to vector<8x8x32xf32>
    %154 = vector.shape_cast %153 : vector<8x8x32xf32> to vector<64x32xf32>
    %c2_173 = arith.constant 2 : index
    %c2_174 = arith.constant 2 : index
    %c0_175 = arith.constant 0 : index
    %c0_176 = arith.constant 0 : index
    %155 = vector.load %arg4[%c2_173, %c2_174, %c0_175, %c0_176] : memref<3x3x32x32xf32, #tpu.memory_space<vmem>>, vector<1x1x32x32xf32>
    %156 = vector.shape_cast %155 : vector<1x1x32x32xf32> to vector<32x32xf32>
    %cst_177 = arith.constant dense<0.000000e+00> : vector<64x32xf32>
    %157 = tpu.matmul %154, %156, %cst_177 {dimension_numbers = #tpu.dot_dimension_numbers<[1], [0], [0], [1], [0, 0, 1, 1], [], []>} : vector<64x32xf32>, vector<32x32xf32>, vector<64x32xf32> -> vector<64x32xf32>
    %158 = arith.addf %151, %157 : vector<64x32xf32>
    %c0_178 = arith.constant 0 : index
    %c0_179 = arith.constant 0 : index
    %159 = vector.load %arg5[%c0_178, %c0_179] : memref<1x32xf32, #tpu.memory_space<vmem>>, vector<1x32xf32>
    %160 = vector.broadcast %159 : vector<1x32xf32> to vector<64x32xf32>
    %161 = arith.addf %158, %160 : vector<64x32xf32>
    %cst_180 = arith.constant 0.000000e+00 : f32
    %cst_181 = arith.constant 6.000000e+00 : f32
    %162 = vector.broadcast %cst_180 : f32 to vector<64x32xf32>
    %163 = arith.maximumf %162, %161 : vector<64x32xf32>
    %164 = vector.broadcast %cst_181 : f32 to vector<64x32xf32>
    %165 = arith.minimumf %164, %163 : vector<64x32xf32>
    %166 = vector.shape_cast %165 : vector<64x32xf32> to vector<1x8x8x32xf32>
    %c0_182 = arith.constant 0 : index
    %c1_183 = arith.constant 1 : index
    %c1_184 = arith.constant 1 : index
    %c0_185 = arith.constant 0 : index
    %167 = vector.load %arg16[%c0_182, %c1_183, %c1_184, %c0_185] : memref<1x18x18x32xf32, #tpu.memory_space<vmem>>, vector<1x8x8x32xf32>
    tpu.vector_store %arg16[%c0_182, %c1_183, %c1_184, %c0_185], %166 {strides = array<i32>} : memref<1x18x18x32xf32, #tpu.memory_space<vmem>>, vector<1x8x8x32xf32>,
    %cst_186 = arith.constant 0.000000e+00 : f32
    %168 = vector.broadcast %cst_186 : f32 to vector<64x32xf32>
    %c0_187 = arith.constant 0 : index
    %c0_188 = arith.constant 0 : index
    %c0_189 = arith.constant 0 : index
    %c0_190 = arith.constant 0 : index
    %169 = vector.load %arg16[%c0_187, %c0_188, %c0_189, %c0_190] : memref<1x18x18x32xf32, #tpu.memory_space<vmem>>, vector<1x8x8x32xf32>
    %170 = vector.shape_cast %169 : vector<1x8x8x32xf32> to vector<8x8x32xf32>
    %171 = vector.shape_cast %170 : vector<8x8x32xf32> to vector<64x32xf32>
    %c0_191 = arith.constant 0 : index
    %c0_192 = arith.constant 0 : index
    %c0_193 = arith.constant 0 : index
    %c0_194 = arith.constant 0 : index
    %172 = vector.load %arg6[%c0_191, %c0_192, %c0_193, %c0_194] : memref<3x3x32x32xf32, #tpu.memory_space<vmem>>, vector<1x1x32x32xf32>
    %173 = vector.shape_cast %172 : vector<1x1x32x32xf32> to vector<32x32xf32>
    %cst_195 = arith.constant dense<0.000000e+00> : vector<64x32xf32>
    %174 = tpu.matmul %171, %173, %cst_195 {dimension_numbers = #tpu.dot_dimension_numbers<[1], [0], [0], [1], [0, 0, 1, 1], [], []>} : vector<64x32xf32>, vector<32x32xf32>, vector<64x32xf32> -> vector<64x32xf32>
    %175 = arith.addf %168, %174 : vector<64x32xf32>
    %c0_196 = arith.constant 0 : index
    %c0_197 = arith.constant 0 : index
    %c1_198 = arith.constant 1 : index
    %c0_199 = arith.constant 0 : index
    %176 = vector.load %arg16[%c0_196, %c0_197, %c1_198, %c0_199] : memref<1x18x18x32xf32, #tpu.memory_space<vmem>>, vector<1x8x8x32xf32>
    %177 = vector.shape_cast %176 : vector<1x8x8x32xf32> to vector<8x8x32xf32>
    %178 = vector.shape_cast %177 : vector<8x8x32xf32> to vector<64x32xf32>
    %c0_200 = arith.constant 0 : index
    %c1_201 = arith.constant 1 : index
    %c0_202 = arith.constant 0 : index
    %c0_203 = arith.constant 0 : index
    %179 = vector.load %arg6[%c0_200, %c1_201, %c0_202, %c0_203] : memref<3x3x32x32xf32, #tpu.memory_space<vmem>>, vector<1x1x32x32xf32>
    %180 = vector.shape_cast %179 : vector<1x1x32x32xf32> to vector<32x32xf32>
    %cst_204 = arith.constant dense<0.000000e+00> : vector<64x32xf32>
    %181 = tpu.matmul %178, %180, %cst_204 {dimension_numbers = #tpu.dot_dimension_numbers<[1], [0], [0], [1], [0, 0, 1, 1], [], []>} : vector<64x32xf32>, vector<32x32xf32>, vector<64x32xf32> -> vector<64x32xf32>
    %182 = arith.addf %175, %181 : vector<64x32xf32>
    %c0_205 = arith.constant 0 : index
    %c0_206 = arith.constant 0 : index
    %c2_207 = arith.constant 2 : index
    %c0_208 = arith.constant 0 : index
    %183 = vector.load %arg16[%c0_205, %c0_206, %c2_207, %c0_208] : memref<1x18x18x32xf32, #tpu.memory_space<vmem>>, vector<1x8x8x32xf32>
    %184 = vector.shape_cast %183 : vector<1x8x8x32xf32> to vector<8x8x32xf32>
    %185 = vector.shape_cast %184 : vector<8x8x32xf32> to vector<64x32xf32>
    %c0_209 = arith.constant 0 : index
    %c2_210 = arith.constant 2 : index
    %c0_211 = arith.constant 0 : index
    %c0_212 = arith.constant 0 : index
    %186 = vector.load %arg6[%c0_209, %c2_210, %c0_211, %c0_212] : memref<3x3x32x32xf32, #tpu.memory_space<vmem>>, vector<1x1x32x32xf32>
    %187 = vector.shape_cast %186 : vector<1x1x32x32xf32> to vector<32x32xf32>
    %cst_213 = arith.constant dense<0.000000e+00> : vector<64x32xf32>
    %188 = tpu.matmul %185, %187, %cst_213 {dimension_numbers = #tpu.dot_dimension_numbers<[1], [0], [0], [1], [0, 0, 1, 1], [], []>} : vector<64x32xf32>, vector<32x32xf32>, vector<64x32xf32> -> vector<64x32xf32>
    %189 = arith.addf %182, %188 : vector<64x32xf32>
    %c0_214 = arith.constant 0 : index
    %c1_215 = arith.constant 1 : index
    %c0_216 = arith.constant 0 : index
    %c0_217 = arith.constant 0 : index
    %190 = vector.load %arg16[%c0_214, %c1_215, %c0_216, %c0_217] : memref<1x18x18x32xf32, #tpu.memory_space<vmem>>, vector<1x8x8x32xf32>
    %191 = vector.shape_cast %190 : vector<1x8x8x32xf32> to vector<8x8x32xf32>
    %192 = vector.shape_cast %191 : vector<8x8x32xf32> to vector<64x32xf32>
    %c1_218 = arith.constant 1 : index
    %c0_219 = arith.constant 0 : index
    %c0_220 = arith.constant 0 : index
    %c0_221 = arith.constant 0 : index
    %193 = vector.load %arg6[%c1_218, %c0_219, %c0_220, %c0_221] : memref<3x3x32x32xf32, #tpu.memory_space<vmem>>, vector<1x1x32x32xf32>
    %194 = vector.shape_cast %193 : vector<1x1x32x32xf32> to vector<32x32xf32>
    %cst_222 = arith.constant dense<0.000000e+00> : vector<64x32xf32>
    %195 = tpu.matmul %192, %194, %cst_222 {dimension_numbers = #tpu.dot_dimension_numbers<[1], [0], [0], [1], [0, 0, 1, 1], [], []>} : vector<64x32xf32>, vector<32x32xf32>, vector<64x32xf32> -> vector<64x32xf32>
    %196 = arith.addf %189, %195 : vector<64x32xf32>
    %c0_223 = arith.constant 0 : index
    %c1_224 = arith.constant 1 : index
    %c1_225 = arith.constant 1 : index
    %c0_226 = arith.constant 0 : index
    %197 = vector.load %arg16[%c0_223, %c1_224, %c1_225, %c0_226] : memref<1x18x18x32xf32, #tpu.memory_space<vmem>>, vector<1x8x8x32xf32>
    %198 = vector.shape_cast %197 : vector<1x8x8x32xf32> to vector<8x8x32xf32>
    %199 = vector.shape_cast %198 : vector<8x8x32xf32> to vector<64x32xf32>
    %c1_227 = arith.constant 1 : index
    %c1_228 = arith.constant 1 : index
    %c0_229 = arith.constant 0 : index
    %c0_230 = arith.constant 0 : index
    %200 = vector.load %arg6[%c1_227, %c1_228, %c0_229, %c0_230] : memref<3x3x32x32xf32, #tpu.memory_space<vmem>>, vector<1x1x32x32xf32>
    %201 = vector.shape_cast %200 : vector<1x1x32x32xf32> to vector<32x32xf32>
    %cst_231 = arith.constant dense<0.000000e+00> : vector<64x32xf32>
    %202 = tpu.matmul %199, %201, %cst_231 {dimension_numbers = #tpu.dot_dimension_numbers<[1], [0], [0], [1], [0, 0, 1, 1], [], []>} : vector<64x32xf32>, vector<32x32xf32>, vector<64x32xf32> -> vector<64x32xf32>
    %203 = arith.addf %196, %202 : vector<64x32xf32>
    %c0_232 = arith.constant 0 : index
    %c1_233 = arith.constant 1 : index
    %c2_234 = arith.constant 2 : index
    %c0_235 = arith.constant 0 : index
    %204 = vector.load %arg16[%c0_232, %c1_233, %c2_234, %c0_235] : memref<1x18x18x32xf32, #tpu.memory_space<vmem>>, vector<1x8x8x32xf32>
    %205 = vector.shape_cast %204 : vector<1x8x8x32xf32> to vector<8x8x32xf32>
    %206 = vector.shape_cast %205 : vector<8x8x32xf32> to vector<64x32xf32>
    %c1_236 = arith.constant 1 : index
    %c2_237 = arith.constant 2 : index
    %c0_238 = arith.constant 0 : index
    %c0_239 = arith.constant 0 : index
    %207 = vector.load %arg6[%c1_236, %c2_237, %c0_238, %c0_239] : memref<3x3x32x32xf32, #tpu.memory_space<vmem>>, vector<1x1x32x32xf32>
    %208 = vector.shape_cast %207 : vector<1x1x32x32xf32> to vector<32x32xf32>
    %cst_240 = arith.constant dense<0.000000e+00> : vector<64x32xf32>
    %209 = tpu.matmul %206, %208, %cst_240 {dimension_numbers = #tpu.dot_dimension_numbers<[1], [0], [0], [1], [0, 0, 1, 1], [], []>} : vector<64x32xf32>, vector<32x32xf32>, vector<64x32xf32> -> vector<64x32xf32>
    %210 = arith.addf %203, %209 : vector<64x32xf32>
    %c0_241 = arith.constant 0 : index
    %c2_242 = arith.constant 2 : index
    %c0_243 = arith.constant 0 : index
    %c0_244 = arith.constant 0 : index
    %211 = vector.load %arg16[%c0_241, %c2_242, %c0_243, %c0_244] : memref<1x18x18x32xf32, #tpu.memory_space<vmem>>, vector<1x8x8x32xf32>
    %212 = vector.shape_cast %211 : vector<1x8x8x32xf32> to vector<8x8x32xf32>
    %213 = vector.shape_cast %212 : vector<8x8x32xf32> to vector<64x32xf32>
    %c2_245 = arith.constant 2 : index
    %c0_246 = arith.constant 0 : index
    %c0_247 = arith.constant 0 : index
    %c0_248 = arith.constant 0 : index
    %214 = vector.load %arg6[%c2_245, %c0_246, %c0_247, %c0_248] : memref<3x3x32x32xf32, #tpu.memory_space<vmem>>, vector<1x1x32x32xf32>
    %215 = vector.shape_cast %214 : vector<1x1x32x32xf32> to vector<32x32xf32>
    %cst_249 = arith.constant dense<0.000000e+00> : vector<64x32xf32>
    %216 = tpu.matmul %213, %215, %cst_249 {dimension_numbers = #tpu.dot_dimension_numbers<[1], [0], [0], [1], [0, 0, 1, 1], [], []>} : vector<64x32xf32>, vector<32x32xf32>, vector<64x32xf32> -> vector<64x32xf32>
    %217 = arith.addf %210, %216 : vector<64x32xf32>
    %c0_250 = arith.constant 0 : index
    %c2_251 = arith.constant 2 : index
    %c1_252 = arith.constant 1 : index
    %c0_253 = arith.constant 0 : index
    %218 = vector.load %arg16[%c0_250, %c2_251, %c1_252, %c0_253] : memref<1x18x18x32xf32, #tpu.memory_space<vmem>>, vector<1x8x8x32xf32>
    %219 = vector.shape_cast %218 : vector<1x8x8x32xf32> to vector<8x8x32xf32>
    %220 = vector.shape_cast %219 : vector<8x8x32xf32> to vector<64x32xf32>
    %c2_254 = arith.constant 2 : index
    %c1_255 = arith.constant 1 : index
    %c0_256 = arith.constant 0 : index
    %c0_257 = arith.constant 0 : index
    %221 = vector.load %arg6[%c2_254, %c1_255, %c0_256, %c0_257] : memref<3x3x32x32xf32, #tpu.memory_space<vmem>>, vector<1x1x32x32xf32>
    %222 = vector.shape_cast %221 : vector<1x1x32x32xf32> to vector<32x32xf32>
    %cst_258 = arith.constant dense<0.000000e+00> : vector<64x32xf32>
    %223 = tpu.matmul %220, %222, %cst_258 {dimension_numbers = #tpu.dot_dimension_numbers<[1], [0], [0], [1], [0, 0, 1, 1], [], []>} : vector<64x32xf32>, vector<32x32xf32>, vector<64x32xf32> -> vector<64x32xf32>
    %224 = arith.addf %217, %223 : vector<64x32xf32>
    %c0_259 = arith.constant 0 : index
    %c2_260 = arith.constant 2 : index
    %c2_261 = arith.constant 2 : index
    %c0_262 = arith.constant 0 : index
    %225 = vector.load %arg16[%c0_259, %c2_260, %c2_261, %c0_262] : memref<1x18x18x32xf32, #tpu.memory_space<vmem>>, vector<1x8x8x32xf32>
    %226 = vector.shape_cast %225 : vector<1x8x8x32xf32> to vector<8x8x32xf32>
    %227 = vector.shape_cast %226 : vector<8x8x32xf32> to vector<64x32xf32>
    %c2_263 = arith.constant 2 : index
    %c2_264 = arith.constant 2 : index
    %c0_265 = arith.constant 0 : index
    %c0_266 = arith.constant 0 : index
    %228 = vector.load %arg6[%c2_263, %c2_264, %c0_265, %c0_266] : memref<3x3x32x32xf32, #tpu.memory_space<vmem>>, vector<1x1x32x32xf32>
    %229 = vector.shape_cast %228 : vector<1x1x32x32xf32> to vector<32x32xf32>
    %cst_267 = arith.constant dense<0.000000e+00> : vector<64x32xf32>
    %230 = tpu.matmul %227, %229, %cst_267 {dimension_numbers = #tpu.dot_dimension_numbers<[1], [0], [0], [1], [0, 0, 1, 1], [], []>} : vector<64x32xf32>, vector<32x32xf32>, vector<64x32xf32> -> vector<64x32xf32>
    %231 = arith.addf %224, %230 : vector<64x32xf32>
    %c0_268 = arith.constant 0 : index
    %c0_269 = arith.constant 0 : index
    %232 = vector.load %arg7[%c0_268, %c0_269] : memref<1x32xf32, #tpu.memory_space<vmem>>, vector<1x32xf32>
    %233 = vector.broadcast %232 : vector<1x32xf32> to vector<64x32xf32>
    %234 = arith.addf %231, %233 : vector<64x32xf32>
    %cst_270 = arith.constant 0.000000e+00 : f32
    %cst_271 = arith.constant 6.000000e+00 : f32
    %235 = vector.broadcast %cst_270 : f32 to vector<64x32xf32>
    %236 = arith.maximumf %235, %234 : vector<64x32xf32>
    %237 = vector.broadcast %cst_271 : f32 to vector<64x32xf32>
    %238 = arith.minimumf %237, %236 : vector<64x32xf32>
    %239 = vector.shape_cast %238 : vector<64x32xf32> to vector<1x8x8x32xf32>
    %240 = vector.extract_strided_slice %239 {offsets = [0, 0, 0, 0], sizes = [1, 1, 8, 32], strides = [1, 1, 1, 1]} : vector<1x8x8x32xf32> to vector<1x1x8x32xf32>
    %241 = vector.extract_strided_slice %239 {offsets = [0, 2, 0, 0], sizes = [1, 1, 8, 32], strides = [1, 1, 1, 1]} : vector<1x8x8x32xf32> to vector<1x1x8x32xf32>
    %242 = vector.extract_strided_slice %239 {offsets = [0, 4, 0, 0], sizes = [1, 1, 8, 32], strides = [1, 1, 1, 1]} : vector<1x8x8x32xf32> to vector<1x1x8x32xf32>
    %243 = vector.extract_strided_slice %239 {offsets = [0, 6, 0, 0], sizes = [1, 1, 8, 32], strides = [1, 1, 1, 1]} : vector<1x8x8x32xf32> to vector<1x1x8x32xf32>
    %244 = tpu.concatenate %240, %241, %242, %243 in 1 : vector<1x1x8x32xf32>, vector<1x1x8x32xf32>, vector<1x1x8x32xf32>, vector<1x1x8x32xf32> -> vector<1x4x8x32xf32>
    %245 = vector.extract_strided_slice %244 {offsets = [0, 0, 0, 0], sizes = [1, 4, 1, 32], strides = [1, 1, 1, 1]} : vector<1x4x8x32xf32> to vector<1x4x1x32xf32>
    %246 = vector.extract_strided_slice %244 {offsets = [0, 0, 2, 0], sizes = [1, 4, 1, 32], strides = [1, 1, 1, 1]} : vector<1x4x8x32xf32> to vector<1x4x1x32xf32>
    %247 = vector.extract_strided_slice %244 {offsets = [0, 0, 4, 0], sizes = [1, 4, 1, 32], strides = [1, 1, 1, 1]} : vector<1x4x8x32xf32> to vector<1x4x1x32xf32>
    %248 = vector.extract_strided_slice %244 {offsets = [0, 0, 6, 0], sizes = [1, 4, 1, 32], strides = [1, 1, 1, 1]} : vector<1x4x8x32xf32> to vector<1x4x1x32xf32>
    %249 = tpu.concatenate %245, %246, %247, %248 in 2 : vector<1x4x1x32xf32>, vector<1x4x1x32xf32>, vector<1x4x1x32xf32>, vector<1x4x1x32xf32> -> vector<1x4x4x32xf32>
    %250 = vector.extract_strided_slice %249 {offsets = [0, 0, 0, 0], sizes = [1, 1, 4, 32], strides = [1, 1, 1, 1]} : vector<1x4x4x32xf32> to vector<1x1x4x32xf32>
    %251 = vector.extract_strided_slice %249 {offsets = [0, 1, 0, 0], sizes = [1, 1, 4, 32], strides = [1, 1, 1, 1]} : vector<1x4x4x32xf32> to vector<1x1x4x32xf32>
    %252 = vector.extract_strided_slice %249 {offsets = [0, 2, 0, 0], sizes = [1, 1, 4, 32], strides = [1, 1, 1, 1]} : vector<1x4x4x32xf32> to vector<1x1x4x32xf32>
    %253 = vector.extract_strided_slice %249 {offsets = [0, 3, 0, 0], sizes = [1, 1, 4, 32], strides = [1, 1, 1, 1]} : vector<1x4x4x32xf32> to vector<1x1x4x32xf32>
    %254 = tpu.concatenate %250, %250, %251, %251, %252, %252, %253, %253 in 1 : vector<1x1x4x32xf32>, vector<1x1x4x32xf32>, vector<1x1x4x32xf32>, vector<1x1x4x32xf32>, vector<1x1x4x32xf32>, vector<1x1x4x32xf32>, vector<1x1x4x32xf32>, vector<1x1x4x32xf32> -> vector<1x8x4x32xf32>
    %255 = vector.extract_strided_slice %254 {offsets = [0, 0, 0, 0], sizes = [1, 8, 1, 32], strides = [1, 1, 1, 1]} : vector<1x8x4x32xf32> to vector<1x8x1x32xf32>
    %256 = vector.extract_strided_slice %254 {offsets = [0, 0, 1, 0], sizes = [1, 8, 1, 32], strides = [1, 1, 1, 1]} : vector<1x8x4x32xf32> to vector<1x8x1x32xf32>
    %257 = vector.extract_strided_slice %254 {offsets = [0, 0, 2, 0], sizes = [1, 8, 1, 32], strides = [1, 1, 1, 1]} : vector<1x8x4x32xf32> to vector<1x8x1x32xf32>
    %258 = vector.extract_strided_slice %254 {offsets = [0, 0, 3, 0], sizes = [1, 8, 1, 32], strides = [1, 1, 1, 1]} : vector<1x8x4x32xf32> to vector<1x8x1x32xf32>
    %259 = tpu.concatenate %255, %255, %256, %256, %257, %257, %258, %258 in 2 : vector<1x8x1x32xf32>, vector<1x8x1x32xf32>, vector<1x8x1x32xf32>, vector<1x8x1x32xf32>, vector<1x8x1x32xf32>, vector<1x8x1x32xf32>, vector<1x8x1x32xf32>, vector<1x8x1x32xf32> -> vector<1x8x8x32xf32>
    %c0_272 = arith.constant 0 : index
    %c1_273 = arith.constant 1 : index
    %c1_274 = arith.constant 1 : index
    %c0_275 = arith.constant 0 : index
    %260 = vector.load %arg15[%c0_272, %c1_273, %c1_274, %c0_275] : memref<1x18x18x32xf32, #tpu.memory_space<vmem>>, vector<1x8x8x32xf32>
    tpu.vector_store %arg15[%c0_272, %c1_273, %c1_274, %c0_275], %259 {strides = array<i32>} : memref<1x18x18x32xf32, #tpu.memory_space<vmem>>, vector<1x8x8x32xf32>,
    %cst_276 = arith.constant 0.000000e+00 : f32
    %261 = vector.broadcast %cst_276 : f32 to vector<64x32xf32>
    %c0_277 = arith.constant 0 : index
    %c0_278 = arith.constant 0 : index
    %c0_279 = arith.constant 0 : index
    %c0_280 = arith.constant 0 : index
    %262 = vector.load %arg15[%c0_277, %c0_278, %c0_279, %c0_280] : memref<1x18x18x32xf32, #tpu.memory_space<vmem>>, vector<1x8x8x32xf32>
    %263 = vector.shape_cast %262 : vector<1x8x8x32xf32> to vector<8x8x32xf32>
    %264 = vector.shape_cast %263 : vector<8x8x32xf32> to vector<64x32xf32>
    %c0_281 = arith.constant 0 : index
    %c0_282 = arith.constant 0 : index
    %c0_283 = arith.constant 0 : index
    %c0_284 = arith.constant 0 : index
    %265 = vector.load %arg8[%c0_281, %c0_282, %c0_283, %c0_284] : memref<3x3x32x32xf32, #tpu.memory_space<vmem>>, vector<1x1x32x32xf32>
    %266 = vector.shape_cast %265 : vector<1x1x32x32xf32> to vector<32x32xf32>
    %cst_285 = arith.constant dense<0.000000e+00> : vector<64x32xf32>
    %267 = tpu.matmul %264, %266, %cst_285 {dimension_numbers = #tpu.dot_dimension_numbers<[1], [0], [0], [1], [0, 0, 1, 1], [], []>} : vector<64x32xf32>, vector<32x32xf32>, vector<64x32xf32> -> vector<64x32xf32>
    %268 = arith.addf %261, %267 : vector<64x32xf32>
    %c0_286 = arith.constant 0 : index
    %c0_287 = arith.constant 0 : index
    %c1_288 = arith.constant 1 : index
    %c0_289 = arith.constant 0 : index
    %269 = vector.load %arg15[%c0_286, %c0_287, %c1_288, %c0_289] : memref<1x18x18x32xf32, #tpu.memory_space<vmem>>, vector<1x8x8x32xf32>
    %270 = vector.shape_cast %269 : vector<1x8x8x32xf32> to vector<8x8x32xf32>
    %271 = vector.shape_cast %270 : vector<8x8x32xf32> to vector<64x32xf32>
    %c0_290 = arith.constant 0 : index
    %c1_291 = arith.constant 1 : index
    %c0_292 = arith.constant 0 : index
    %c0_293 = arith.constant 0 : index
    %272 = vector.load %arg8[%c0_290, %c1_291, %c0_292, %c0_293] : memref<3x3x32x32xf32, #tpu.memory_space<vmem>>, vector<1x1x32x32xf32>
    %273 = vector.shape_cast %272 : vector<1x1x32x32xf32> to vector<32x32xf32>
    %cst_294 = arith.constant dense<0.000000e+00> : vector<64x32xf32>
    %274 = tpu.matmul %271, %273, %cst_294 {dimension_numbers = #tpu.dot_dimension_numbers<[1], [0], [0], [1], [0, 0, 1, 1], [], []>} : vector<64x32xf32>, vector<32x32xf32>, vector<64x32xf32> -> vector<64x32xf32>
    %275 = arith.addf %268, %274 : vector<64x32xf32>
    %c0_295 = arith.constant 0 : index
    %c0_296 = arith.constant 0 : index
    %c2_297 = arith.constant 2 : index
    %c0_298 = arith.constant 0 : index
    %276 = vector.load %arg15[%c0_295, %c0_296, %c2_297, %c0_298] : memref<1x18x18x32xf32, #tpu.memory_space<vmem>>, vector<1x8x8x32xf32>
    %277 = vector.shape_cast %276 : vector<1x8x8x32xf32> to vector<8x8x32xf32>
    %278 = vector.shape_cast %277 : vector<8x8x32xf32> to vector<64x32xf32>
    %c0_299 = arith.constant 0 : index
    %c2_300 = arith.constant 2 : index
    %c0_301 = arith.constant 0 : index
    %c0_302 = arith.constant 0 : index
    %279 = vector.load %arg8[%c0_299, %c2_300, %c0_301, %c0_302] : memref<3x3x32x32xf32, #tpu.memory_space<vmem>>, vector<1x1x32x32xf32>
    %280 = vector.shape_cast %279 : vector<1x1x32x32xf32> to vector<32x32xf32>
    %cst_303 = arith.constant dense<0.000000e+00> : vector<64x32xf32>
    %281 = tpu.matmul %278, %280, %cst_303 {dimension_numbers = #tpu.dot_dimension_numbers<[1], [0], [0], [1], [0, 0, 1, 1], [], []>} : vector<64x32xf32>, vector<32x32xf32>, vector<64x32xf32> -> vector<64x32xf32>
    %282 = arith.addf %275, %281 : vector<64x32xf32>
    %c0_304 = arith.constant 0 : index
    %c1_305 = arith.constant 1 : index
    %c0_306 = arith.constant 0 : index
    %c0_307 = arith.constant 0 : index
    %283 = vector.load %arg15[%c0_304, %c1_305, %c0_306, %c0_307] : memref<1x18x18x32xf32, #tpu.memory_space<vmem>>, vector<1x8x8x32xf32>
    %284 = vector.shape_cast %283 : vector<1x8x8x32xf32> to vector<8x8x32xf32>
    %285 = vector.shape_cast %284 : vector<8x8x32xf32> to vector<64x32xf32>
    %c1_308 = arith.constant 1 : index
    %c0_309 = arith.constant 0 : index
    %c0_310 = arith.constant 0 : index
    %c0_311 = arith.constant 0 : index
    %286 = vector.load %arg8[%c1_308, %c0_309, %c0_310, %c0_311] : memref<3x3x32x32xf32, #tpu.memory_space<vmem>>, vector<1x1x32x32xf32>
    %287 = vector.shape_cast %286 : vector<1x1x32x32xf32> to vector<32x32xf32>
    %cst_312 = arith.constant dense<0.000000e+00> : vector<64x32xf32>
    %288 = tpu.matmul %285, %287, %cst_312 {dimension_numbers = #tpu.dot_dimension_numbers<[1], [0], [0], [1], [0, 0, 1, 1], [], []>} : vector<64x32xf32>, vector<32x32xf32>, vector<64x32xf32> -> vector<64x32xf32>
    %289 = arith.addf %282, %288 : vector<64x32xf32>
    %c0_313 = arith.constant 0 : index
    %c1_314 = arith.constant 1 : index
    %c1_315 = arith.constant 1 : index
    %c0_316 = arith.constant 0 : index
    %290 = vector.load %arg15[%c0_313, %c1_314, %c1_315, %c0_316] : memref<1x18x18x32xf32, #tpu.memory_space<vmem>>, vector<1x8x8x32xf32>
    %291 = vector.shape_cast %290 : vector<1x8x8x32xf32> to vector<8x8x32xf32>
    %292 = vector.shape_cast %291 : vector<8x8x32xf32> to vector<64x32xf32>
    %c1_317 = arith.constant 1 : index
    %c1_318 = arith.constant 1 : index
    %c0_319 = arith.constant 0 : index
    %c0_320 = arith.constant 0 : index
    %293 = vector.load %arg8[%c1_317, %c1_318, %c0_319, %c0_320] : memref<3x3x32x32xf32, #tpu.memory_space<vmem>>, vector<1x1x32x32xf32>
    %294 = vector.shape_cast %293 : vector<1x1x32x32xf32> to vector<32x32xf32>
    %cst_321 = arith.constant dense<0.000000e+00> : vector<64x32xf32>
    %295 = tpu.matmul %292, %294, %cst_321 {dimension_numbers = #tpu.dot_dimension_numbers<[1], [0], [0], [1], [0, 0, 1, 1], [], []>} : vector<64x32xf32>, vector<32x32xf32>, vector<64x32xf32> -> vector<64x32xf32>
    %296 = arith.addf %289, %295 : vector<64x32xf32>
    %c0_322 = arith.constant 0 : index
    %c1_323 = arith.constant 1 : index
    %c2_324 = arith.constant 2 : index
    %c0_325 = arith.constant 0 : index
    %297 = vector.load %arg15[%c0_322, %c1_323, %c2_324, %c0_325] : memref<1x18x18x32xf32, #tpu.memory_space<vmem>>, vector<1x8x8x32xf32>
    %298 = vector.shape_cast %297 : vector<1x8x8x32xf32> to vector<8x8x32xf32>
    %299 = vector.shape_cast %298 : vector<8x8x32xf32> to vector<64x32xf32>
    %c1_326 = arith.constant 1 : index
    %c2_327 = arith.constant 2 : index
    %c0_328 = arith.constant 0 : index
    %c0_329 = arith.constant 0 : index
    %300 = vector.load %arg8[%c1_326, %c2_327, %c0_328, %c0_329] : memref<3x3x32x32xf32, #tpu.memory_space<vmem>>, vector<1x1x32x32xf32>
    %301 = vector.shape_cast %300 : vector<1x1x32x32xf32> to vector<32x32xf32>
    %cst_330 = arith.constant dense<0.000000e+00> : vector<64x32xf32>
    %302 = tpu.matmul %299, %301, %cst_330 {dimension_numbers = #tpu.dot_dimension_numbers<[1], [0], [0], [1], [0, 0, 1, 1], [], []>} : vector<64x32xf32>, vector<32x32xf32>, vector<64x32xf32> -> vector<64x32xf32>
    %303 = arith.addf %296, %302 : vector<64x32xf32>
    %c0_331 = arith.constant 0 : index
    %c2_332 = arith.constant 2 : index
    %c0_333 = arith.constant 0 : index
    %c0_334 = arith.constant 0 : index
    %304 = vector.load %arg15[%c0_331, %c2_332, %c0_333, %c0_334] : memref<1x18x18x32xf32, #tpu.memory_space<vmem>>, vector<1x8x8x32xf32>
    %305 = vector.shape_cast %304 : vector<1x8x8x32xf32> to vector<8x8x32xf32>
    %306 = vector.shape_cast %305 : vector<8x8x32xf32> to vector<64x32xf32>
    %c2_335 = arith.constant 2 : index
    %c0_336 = arith.constant 0 : index
    %c0_337 = arith.constant 0 : index
    %c0_338 = arith.constant 0 : index
    %307 = vector.load %arg8[%c2_335, %c0_336, %c0_337, %c0_338] : memref<3x3x32x32xf32, #tpu.memory_space<vmem>>, vector<1x1x32x32xf32>
    %308 = vector.shape_cast %307 : vector<1x1x32x32xf32> to vector<32x32xf32>
    %cst_339 = arith.constant dense<0.000000e+00> : vector<64x32xf32>
    %309 = tpu.matmul %306, %308, %cst_339 {dimension_numbers = #tpu.dot_dimension_numbers<[1], [0], [0], [1], [0, 0, 1, 1], [], []>} : vector<64x32xf32>, vector<32x32xf32>, vector<64x32xf32> -> vector<64x32xf32>
    %310 = arith.addf %303, %309 : vector<64x32xf32>
    %c0_340 = arith.constant 0 : index
    %c2_341 = arith.constant 2 : index
    %c1_342 = arith.constant 1 : index
    %c0_343 = arith.constant 0 : index
    %311 = vector.load %arg15[%c0_340, %c2_341, %c1_342, %c0_343] : memref<1x18x18x32xf32, #tpu.memory_space<vmem>>, vector<1x8x8x32xf32>
    %312 = vector.shape_cast %311 : vector<1x8x8x32xf32> to vector<8x8x32xf32>
    %313 = vector.shape_cast %312 : vector<8x8x32xf32> to vector<64x32xf32>
    %c2_344 = arith.constant 2 : index
    %c1_345 = arith.constant 1 : index
    %c0_346 = arith.constant 0 : index
    %c0_347 = arith.constant 0 : index
    %314 = vector.load %arg8[%c2_344, %c1_345, %c0_346, %c0_347] : memref<3x3x32x32xf32, #tpu.memory_space<vmem>>, vector<1x1x32x32xf32>
    %315 = vector.shape_cast %314 : vector<1x1x32x32xf32> to vector<32x32xf32>
    %cst_348 = arith.constant dense<0.000000e+00> : vector<64x32xf32>
    %316 = tpu.matmul %313, %315, %cst_348 {dimension_numbers = #tpu.dot_dimension_numbers<[1], [0], [0], [1], [0, 0, 1, 1], [], []>} : vector<64x32xf32>, vector<32x32xf32>, vector<64x32xf32> -> vector<64x32xf32>
    %317 = arith.addf %310, %316 : vector<64x32xf32>
    %c0_349 = arith.constant 0 : index
    %c2_350 = arith.constant 2 : index
    %c2_351 = arith.constant 2 : index
    %c0_352 = arith.constant 0 : index
    %318 = vector.load %arg15[%c0_349, %c2_350, %c2_351, %c0_352] : memref<1x18x18x32xf32, #tpu.memory_space<vmem>>, vector<1x8x8x32xf32>
    %319 = vector.shape_cast %318 : vector<1x8x8x32xf32> to vector<8x8x32xf32>
    %320 = vector.shape_cast %319 : vector<8x8x32xf32> to vector<64x32xf32>
    %c2_353 = arith.constant 2 : index
    %c2_354 = arith.constant 2 : index
    %c0_355 = arith.constant 0 : index
    %c0_356 = arith.constant 0 : index
    %321 = vector.load %arg8[%c2_353, %c2_354, %c0_355, %c0_356] : memref<3x3x32x32xf32, #tpu.memory_space<vmem>>, vector<1x1x32x32xf32>
    %322 = vector.shape_cast %321 : vector<1x1x32x32xf32> to vector<32x32xf32>
    %cst_357 = arith.constant dense<0.000000e+00> : vector<64x32xf32>
    %323 = tpu.matmul %320, %322, %cst_357 {dimension_numbers = #tpu.dot_dimension_numbers<[1], [0], [0], [1], [0, 0, 1, 1], [], []>} : vector<64x32xf32>, vector<32x32xf32>, vector<64x32xf32> -> vector<64x32xf32>
    %324 = arith.addf %317, %323 : vector<64x32xf32>
    %c0_358 = arith.constant 0 : index
    %c0_359 = arith.constant 0 : index
    %325 = vector.load %arg9[%c0_358, %c0_359] : memref<1x32xf32, #tpu.memory_space<vmem>>, vector<1x32xf32>
    %326 = vector.broadcast %325 : vector<1x32xf32> to vector<64x32xf32>
    %327 = arith.addf %324, %326 : vector<64x32xf32>
    %cst_360 = arith.constant 0.000000e+00 : f32
    %328 = vector.broadcast %cst_360 : f32 to vector<64x32xf32>
    %329 = arith.maximumf %327, %328 : vector<64x32xf32>
    %330 = vector.shape_cast %329 : vector<64x32xf32> to vector<1x8x8x32xf32>
    %331 = vector.extract_strided_slice %330 {offsets = [0, 0, 0, 0], sizes = [1, 1, 8, 32], strides = [1, 1, 1, 1]} : vector<1x8x8x32xf32> to vector<1x1x8x32xf32>
    %332 = vector.extract_strided_slice %330 {offsets = [0, 1, 0, 0], sizes = [1, 1, 8, 32], strides = [1, 1, 1, 1]} : vector<1x8x8x32xf32> to vector<1x1x8x32xf32>
    %333 = vector.extract_strided_slice %330 {offsets = [0, 2, 0, 0], sizes = [1, 1, 8, 32], strides = [1, 1, 1, 1]} : vector<1x8x8x32xf32> to vector<1x1x8x32xf32>
    %334 = vector.extract_strided_slice %330 {offsets = [0, 3, 0, 0], sizes = [1, 1, 8, 32], strides = [1, 1, 1, 1]} : vector<1x8x8x32xf32> to vector<1x1x8x32xf32>
    %335 = vector.extract_strided_slice %330 {offsets = [0, 4, 0, 0], sizes = [1, 1, 8, 32], strides = [1, 1, 1, 1]} : vector<1x8x8x32xf32> to vector<1x1x8x32xf32>
    %336 = vector.extract_strided_slice %330 {offsets = [0, 5, 0, 0], sizes = [1, 1, 8, 32], strides = [1, 1, 1, 1]} : vector<1x8x8x32xf32> to vector<1x1x8x32xf32>
    %337 = vector.extract_strided_slice %330 {offsets = [0, 6, 0, 0], sizes = [1, 1, 8, 32], strides = [1, 1, 1, 1]} : vector<1x8x8x32xf32> to vector<1x1x8x32xf32>
    %338 = vector.extract_strided_slice %330 {offsets = [0, 7, 0, 0], sizes = [1, 1, 8, 32], strides = [1, 1, 1, 1]} : vector<1x8x8x32xf32> to vector<1x1x8x32xf32>
    %339 = tpu.concatenate %331, %331, %332, %332, %333, %333, %334, %334, %335, %335, %336, %336, %337, %337, %338, %338 in 1 : vector<1x1x8x32xf32>, vector<1x1x8x32xf32>, vector<1x1x8x32xf32>, vector<1x1x8x32xf32>, vector<1x1x8x32xf32>, vector<1x1x8x32xf32>, vector<1x1x8x32xf32>, vector<1x1x8x32xf32>, vector<1x1x8x32xf32>, vector<1x1x8x32xf32>, vector<1x1x8x32xf32>, vector<1x1x8x32xf32>, vector<1x1x8x32xf32>, vector<1x1x8x32xf32>, vector<1x1x8x32xf32>, vector<1x1x8x32xf32> -> vector<1x16x8x32xf32>
    %340 = vector.extract_strided_slice %339 {offsets = [0, 0, 0, 0], sizes = [1, 16, 1, 32], strides = [1, 1, 1, 1]} : vector<1x16x8x32xf32> to vector<1x16x1x32xf32>
    %341 = vector.extract_strided_slice %339 {offsets = [0, 0, 1, 0], sizes = [1, 16, 1, 32], strides = [1, 1, 1, 1]} : vector<1x16x8x32xf32> to vector<1x16x1x32xf32>
    %342 = vector.extract_strided_slice %339 {offsets = [0, 0, 2, 0], sizes = [1, 16, 1, 32], strides = [1, 1, 1, 1]} : vector<1x16x8x32xf32> to vector<1x16x1x32xf32>
    %343 = vector.extract_strided_slice %339 {offsets = [0, 0, 3, 0], sizes = [1, 16, 1, 32], strides = [1, 1, 1, 1]} : vector<1x16x8x32xf32> to vector<1x16x1x32xf32>
    %344 = vector.extract_strided_slice %339 {offsets = [0, 0, 4, 0], sizes = [1, 16, 1, 32], strides = [1, 1, 1, 1]} : vector<1x16x8x32xf32> to vector<1x16x1x32xf32>
    %345 = vector.extract_strided_slice %339 {offsets = [0, 0, 5, 0], sizes = [1, 16, 1, 32], strides = [1, 1, 1, 1]} : vector<1x16x8x32xf32> to vector<1x16x1x32xf32>
    %346 = vector.extract_strided_slice %339 {offsets = [0, 0, 6, 0], sizes = [1, 16, 1, 32], strides = [1, 1, 1, 1]} : vector<1x16x8x32xf32> to vector<1x16x1x32xf32>
    %347 = vector.extract_strided_slice %339 {offsets = [0, 0, 7, 0], sizes = [1, 16, 1, 32], strides = [1, 1, 1, 1]} : vector<1x16x8x32xf32> to vector<1x16x1x32xf32>
    %348 = tpu.concatenate %340, %340, %341, %341, %342, %342, %343, %343, %344, %344, %345, %345, %346, %346, %347, %347 in 2 : vector<1x16x1x32xf32>, vector<1x16x1x32xf32>, vector<1x16x1x32xf32>, vector<1x16x1x32xf32>, vector<1x16x1x32xf32>, vector<1x16x1x32xf32>, vector<1x16x1x32xf32>, vector<1x16x1x32xf32>, vector<1x16x1x32xf32>, vector<1x16x1x32xf32>, vector<1x16x1x32xf32>, vector<1x16x1x32xf32>, vector<1x16x1x32xf32>, vector<1x16x1x32xf32>, vector<1x16x1x32xf32>, vector<1x16x1x32xf32> -> vector<1x16x16x32xf32>
    %c0_361 = arith.constant 0 : index
    %c1_362 = arith.constant 1 : index
    %c1_363 = arith.constant 1 : index
    %c0_364 = arith.constant 0 : index
    %349 = vector.load %arg16[%c0_361, %c1_362, %c1_363, %c0_364] : memref<1x18x18x32xf32, #tpu.memory_space<vmem>>, vector<1x16x16x32xf32>
    tpu.vector_store %arg16[%c0_361, %c1_362, %c1_363, %c0_364], %348 {strides = array<i32>} : memref<1x18x18x32xf32, #tpu.memory_space<vmem>>, vector<1x16x16x32xf32>,
    %cst_365 = arith.constant 0.000000e+00 : f32
    %350 = vector.broadcast %cst_365 : f32 to vector<256x32xf32>
    %c0_366 = arith.constant 0 : index
    %c0_367 = arith.constant 0 : index
    %c0_368 = arith.constant 0 : index
    %c0_369 = arith.constant 0 : index
    %351 = vector.load %arg16[%c0_366, %c0_367, %c0_368, %c0_369] : memref<1x18x18x32xf32, #tpu.memory_space<vmem>>, vector<1x16x16x32xf32>
    %352 = vector.shape_cast %351 : vector<1x16x16x32xf32> to vector<16x16x32xf32>
    %353 = vector.shape_cast %352 : vector<16x16x32xf32> to vector<256x32xf32>
    %c0_370 = arith.constant 0 : index
    %c0_371 = arith.constant 0 : index
    %c0_372 = arith.constant 0 : index
    %c0_373 = arith.constant 0 : index
    %354 = vector.load %arg10[%c0_370, %c0_371, %c0_372, %c0_373] : memref<3x3x32x32xf32, #tpu.memory_space<vmem>>, vector<1x1x32x32xf32>
    %355 = vector.shape_cast %354 : vector<1x1x32x32xf32> to vector<32x32xf32>
    %cst_374 = arith.constant dense<0.000000e+00> : vector<256x32xf32>
    %356 = tpu.matmul %353, %355, %cst_374 {dimension_numbers = #tpu.dot_dimension_numbers<[1], [0], [0], [1], [0, 0, 1, 1], [], []>} : vector<256x32xf32>, vector<32x32xf32>, vector<256x32xf32> -> vector<256x32xf32>
    %357 = arith.addf %350, %356 : vector<256x32xf32>
    %c0_375 = arith.constant 0 : index
    %c0_376 = arith.constant 0 : index
    %c1_377 = arith.constant 1 : index
    %c0_378 = arith.constant 0 : index
    %358 = vector.load %arg16[%c0_375, %c0_376, %c1_377, %c0_378] : memref<1x18x18x32xf32, #tpu.memory_space<vmem>>, vector<1x16x16x32xf32>
    %359 = vector.shape_cast %358 : vector<1x16x16x32xf32> to vector<16x16x32xf32>
    %360 = vector.shape_cast %359 : vector<16x16x32xf32> to vector<256x32xf32>
    %c0_379 = arith.constant 0 : index
    %c1_380 = arith.constant 1 : index
    %c0_381 = arith.constant 0 : index
    %c0_382 = arith.constant 0 : index
    %361 = vector.load %arg10[%c0_379, %c1_380, %c0_381, %c0_382] : memref<3x3x32x32xf32, #tpu.memory_space<vmem>>, vector<1x1x32x32xf32>
    %362 = vector.shape_cast %361 : vector<1x1x32x32xf32> to vector<32x32xf32>
    %cst_383 = arith.constant dense<0.000000e+00> : vector<256x32xf32>
    %363 = tpu.matmul %360, %362, %cst_383 {dimension_numbers = #tpu.dot_dimension_numbers<[1], [0], [0], [1], [0, 0, 1, 1], [], []>} : vector<256x32xf32>, vector<32x32xf32>, vector<256x32xf32> -> vector<256x32xf32>
    %364 = arith.addf %357, %363 : vector<256x32xf32>
    %c0_384 = arith.constant 0 : index
    %c0_385 = arith.constant 0 : index
    %c2_386 = arith.constant 2 : index
    %c0_387 = arith.constant 0 : index
    %365 = vector.load %arg16[%c0_384, %c0_385, %c2_386, %c0_387] : memref<1x18x18x32xf32, #tpu.memory_space<vmem>>, vector<1x16x16x32xf32>
    %366 = vector.shape_cast %365 : vector<1x16x16x32xf32> to vector<16x16x32xf32>
    %367 = vector.shape_cast %366 : vector<16x16x32xf32> to vector<256x32xf32>
    %c0_388 = arith.constant 0 : index
    %c2_389 = arith.constant 2 : index
    %c0_390 = arith.constant 0 : index
    %c0_391 = arith.constant 0 : index
    %368 = vector.load %arg10[%c0_388, %c2_389, %c0_390, %c0_391] : memref<3x3x32x32xf32, #tpu.memory_space<vmem>>, vector<1x1x32x32xf32>
    %369 = vector.shape_cast %368 : vector<1x1x32x32xf32> to vector<32x32xf32>
    %cst_392 = arith.constant dense<0.000000e+00> : vector<256x32xf32>
    %370 = tpu.matmul %367, %369, %cst_392 {dimension_numbers = #tpu.dot_dimension_numbers<[1], [0], [0], [1], [0, 0, 1, 1], [], []>} : vector<256x32xf32>, vector<32x32xf32>, vector<256x32xf32> -> vector<256x32xf32>
    %371 = arith.addf %364, %370 : vector<256x32xf32>
    %c0_393 = arith.constant 0 : index
    %c1_394 = arith.constant 1 : index
    %c0_395 = arith.constant 0 : index
    %c0_396 = arith.constant 0 : index
    %372 = vector.load %arg16[%c0_393, %c1_394, %c0_395, %c0_396] : memref<1x18x18x32xf32, #tpu.memory_space<vmem>>, vector<1x16x16x32xf32>
    %373 = vector.shape_cast %372 : vector<1x16x16x32xf32> to vector<16x16x32xf32>
    %374 = vector.shape_cast %373 : vector<16x16x32xf32> to vector<256x32xf32>
    %c1_397 = arith.constant 1 : index
    %c0_398 = arith.constant 0 : index
    %c0_399 = arith.constant 0 : index
    %c0_400 = arith.constant 0 : index
    %375 = vector.load %arg10[%c1_397, %c0_398, %c0_399, %c0_400] : memref<3x3x32x32xf32, #tpu.memory_space<vmem>>, vector<1x1x32x32xf32>
    %376 = vector.shape_cast %375 : vector<1x1x32x32xf32> to vector<32x32xf32>
    %cst_401 = arith.constant dense<0.000000e+00> : vector<256x32xf32>
    %377 = tpu.matmul %374, %376, %cst_401 {dimension_numbers = #tpu.dot_dimension_numbers<[1], [0], [0], [1], [0, 0, 1, 1], [], []>} : vector<256x32xf32>, vector<32x32xf32>, vector<256x32xf32> -> vector<256x32xf32>
    %378 = arith.addf %371, %377 : vector<256x32xf32>
    %c0_402 = arith.constant 0 : index
    %c1_403 = arith.constant 1 : index
    %c1_404 = arith.constant 1 : index
    %c0_405 = arith.constant 0 : index
    %379 = vector.load %arg16[%c0_402, %c1_403, %c1_404, %c0_405] : memref<1x18x18x32xf32, #tpu.memory_space<vmem>>, vector<1x16x16x32xf32>
    %380 = vector.shape_cast %379 : vector<1x16x16x32xf32> to vector<16x16x32xf32>
    %381 = vector.shape_cast %380 : vector<16x16x32xf32> to vector<256x32xf32>
    %c1_406 = arith.constant 1 : index
    %c1_407 = arith.constant 1 : index
    %c0_408 = arith.constant 0 : index
    %c0_409 = arith.constant 0 : index
    %382 = vector.load %arg10[%c1_406, %c1_407, %c0_408, %c0_409] : memref<3x3x32x32xf32, #tpu.memory_space<vmem>>, vector<1x1x32x32xf32>
    %383 = vector.shape_cast %382 : vector<1x1x32x32xf32> to vector<32x32xf32>
    %cst_410 = arith.constant dense<0.000000e+00> : vector<256x32xf32>
    %384 = tpu.matmul %381, %383, %cst_410 {dimension_numbers = #tpu.dot_dimension_numbers<[1], [0], [0], [1], [0, 0, 1, 1], [], []>} : vector<256x32xf32>, vector<32x32xf32>, vector<256x32xf32> -> vector<256x32xf32>
    %385 = arith.addf %378, %384 : vector<256x32xf32>
    %c0_411 = arith.constant 0 : index
    %c1_412 = arith.constant 1 : index
    %c2_413 = arith.constant 2 : index
    %c0_414 = arith.constant 0 : index
    %386 = vector.load %arg16[%c0_411, %c1_412, %c2_413, %c0_414] : memref<1x18x18x32xf32, #tpu.memory_space<vmem>>, vector<1x16x16x32xf32>
    %387 = vector.shape_cast %386 : vector<1x16x16x32xf32> to vector<16x16x32xf32>
    %388 = vector.shape_cast %387 : vector<16x16x32xf32> to vector<256x32xf32>
    %c1_415 = arith.constant 1 : index
    %c2_416 = arith.constant 2 : index
    %c0_417 = arith.constant 0 : index
    %c0_418 = arith.constant 0 : index
    %389 = vector.load %arg10[%c1_415, %c2_416, %c0_417, %c0_418] : memref<3x3x32x32xf32, #tpu.memory_space<vmem>>, vector<1x1x32x32xf32>
    %390 = vector.shape_cast %389 : vector<1x1x32x32xf32> to vector<32x32xf32>
    %cst_419 = arith.constant dense<0.000000e+00> : vector<256x32xf32>
    %391 = tpu.matmul %388, %390, %cst_419 {dimension_numbers = #tpu.dot_dimension_numbers<[1], [0], [0], [1], [0, 0, 1, 1], [], []>} : vector<256x32xf32>, vector<32x32xf32>, vector<256x32xf32> -> vector<256x32xf32>
    %392 = arith.addf %385, %391 : vector<256x32xf32>
    %c0_420 = arith.constant 0 : index
    %c2_421 = arith.constant 2 : index
    %c0_422 = arith.constant 0 : index
    %c0_423 = arith.constant 0 : index
    %393 = vector.load %arg16[%c0_420, %c2_421, %c0_422, %c0_423] : memref<1x18x18x32xf32, #tpu.memory_space<vmem>>, vector<1x16x16x32xf32>
    %394 = vector.shape_cast %393 : vector<1x16x16x32xf32> to vector<16x16x32xf32>
    %395 = vector.shape_cast %394 : vector<16x16x32xf32> to vector<256x32xf32>
    %c2_424 = arith.constant 2 : index
    %c0_425 = arith.constant 0 : index
    %c0_426 = arith.constant 0 : index
    %c0_427 = arith.constant 0 : index
    %396 = vector.load %arg10[%c2_424, %c0_425, %c0_426, %c0_427] : memref<3x3x32x32xf32, #tpu.memory_space<vmem>>, vector<1x1x32x32xf32>
    %397 = vector.shape_cast %396 : vector<1x1x32x32xf32> to vector<32x32xf32>
    %cst_428 = arith.constant dense<0.000000e+00> : vector<256x32xf32>
    %398 = tpu.matmul %395, %397, %cst_428 {dimension_numbers = #tpu.dot_dimension_numbers<[1], [0], [0], [1], [0, 0, 1, 1], [], []>} : vector<256x32xf32>, vector<32x32xf32>, vector<256x32xf32> -> vector<256x32xf32>
    %399 = arith.addf %392, %398 : vector<256x32xf32>
    %c0_429 = arith.constant 0 : index
    %c2_430 = arith.constant 2 : index
    %c1_431 = arith.constant 1 : index
    %c0_432 = arith.constant 0 : index
    %400 = vector.load %arg16[%c0_429, %c2_430, %c1_431, %c0_432] : memref<1x18x18x32xf32, #tpu.memory_space<vmem>>, vector<1x16x16x32xf32>
    %401 = vector.shape_cast %400 : vector<1x16x16x32xf32> to vector<16x16x32xf32>
    %402 = vector.shape_cast %401 : vector<16x16x32xf32> to vector<256x32xf32>
    %c2_433 = arith.constant 2 : index
    %c1_434 = arith.constant 1 : index
    %c0_435 = arith.constant 0 : index
    %c0_436 = arith.constant 0 : index
    %403 = vector.load %arg10[%c2_433, %c1_434, %c0_435, %c0_436] : memref<3x3x32x32xf32, #tpu.memory_space<vmem>>, vector<1x1x32x32xf32>
    %404 = vector.shape_cast %403 : vector<1x1x32x32xf32> to vector<32x32xf32>
    %cst_437 = arith.constant dense<0.000000e+00> : vector<256x32xf32>
    %405 = tpu.matmul %402, %404, %cst_437 {dimension_numbers = #tpu.dot_dimension_numbers<[1], [0], [0], [1], [0, 0, 1, 1], [], []>} : vector<256x32xf32>, vector<32x32xf32>, vector<256x32xf32> -> vector<256x32xf32>
    %406 = arith.addf %399, %405 : vector<256x32xf32>
    %c0_438 = arith.constant 0 : index
    %c2_439 = arith.constant 2 : index
    %c2_440 = arith.constant 2 : index
    %c0_441 = arith.constant 0 : index
    %407 = vector.load %arg16[%c0_438, %c2_439, %c2_440, %c0_441] : memref<1x18x18x32xf32, #tpu.memory_space<vmem>>, vector<1x16x16x32xf32>
    %408 = vector.shape_cast %407 : vector<1x16x16x32xf32> to vector<16x16x32xf32>
    %409 = vector.shape_cast %408 : vector<16x16x32xf32> to vector<256x32xf32>
    %c2_442 = arith.constant 2 : index
    %c2_443 = arith.constant 2 : index
    %c0_444 = arith.constant 0 : index
    %c0_445 = arith.constant 0 : index
    %410 = vector.load %arg10[%c2_442, %c2_443, %c0_444, %c0_445] : memref<3x3x32x32xf32, #tpu.memory_space<vmem>>, vector<1x1x32x32xf32>
    %411 = vector.shape_cast %410 : vector<1x1x32x32xf32> to vector<32x32xf32>
    %cst_446 = arith.constant dense<0.000000e+00> : vector<256x32xf32>
    %412 = tpu.matmul %409, %411, %cst_446 {dimension_numbers = #tpu.dot_dimension_numbers<[1], [0], [0], [1], [0, 0, 1, 1], [], []>} : vector<256x32xf32>, vector<32x32xf32>, vector<256x32xf32> -> vector<256x32xf32>
    %413 = arith.addf %406, %412 : vector<256x32xf32>
    %c0_447 = arith.constant 0 : index
    %c0_448 = arith.constant 0 : index
    %414 = vector.load %arg11[%c0_447, %c0_448] : memref<1x32xf32, #tpu.memory_space<vmem>>, vector<1x32xf32>
    %415 = vector.broadcast %414 : vector<1x32xf32> to vector<256x32xf32>
    %416 = arith.addf %413, %415 : vector<256x32xf32>
    %cst_449 = arith.constant 0.000000e+00 : f32
    %417 = vector.broadcast %cst_449 : f32 to vector<256x32xf32>
    %418 = arith.maximumf %416, %417 : vector<256x32xf32>
    %419 = vector.shape_cast %418 : vector<256x32xf32> to vector<1x16x16x32xf32>
    %420 = vector.shape_cast %419 : vector<1x16x16x32xf32> to vector<256x32xf32>
    %c0_450 = arith.constant 0 : index
    %c0_451 = arith.constant 0 : index
    %c0_452 = arith.constant 0 : index
    %c0_453 = arith.constant 0 : index
    %421 = vector.load %arg12[%c0_450, %c0_451, %c0_452, %c0_453] : memref<1x1x32x32xf32, #tpu.memory_space<vmem>>, vector<1x1x32x32xf32>
    %422 = vector.shape_cast %421 : vector<1x1x32x32xf32> to vector<32x32xf32>
    %cst_454 = arith.constant dense<0.000000e+00> : vector<256x32xf32>
    %423 = tpu.matmul %420, %422, %cst_454 {dimension_numbers = #tpu.dot_dimension_numbers<[1], [0], [0], [1], [0, 0, 1, 1], [], []>} : vector<256x32xf32>, vector<32x32xf32>, vector<256x32xf32> -> vector<256x32xf32>
    %c0_455 = arith.constant 0 : index
    %c0_456 = arith.constant 0 : index
    %424 = vector.load %arg13[%c0_455, %c0_456] : memref<1x32xf32, #tpu.memory_space<vmem>>, vector<1x32xf32>
    %425 = vector.broadcast %424 : vector<1x32xf32> to vector<256x32xf32>
    %426 = arith.addf %423, %425 : vector<256x32xf32>
    %427 = vector.extract_strided_slice %426 {offsets = [0, 0], sizes = [256, 1], strides = [1, 1]} : vector<256x32xf32> to vector<256x1xf32>
    %428 = vector.shape_cast %427 : vector<256x1xf32> to vector<1x16x16x1xf32>
    %c0_457 = arith.constant 0 : index
    %c0_458 = arith.constant 0 : index
    %c0_459 = arith.constant 0 : index
    %c0_460 = arith.constant 0 : index
    %429 = vector.load %arg14[%c0_457, %c0_458, %c0_459, %c0_460] : memref<1x16x16x1xf32, #tpu.memory_space<vmem>>, vector<1x16x16x1xf32>
    tpu.vector_store %arg14[%c0_457, %c0_458, %c0_459, %c0_460], %428 {strides = array<i32>} : memref<1x16x16x1xf32, #tpu.memory_space<vmem>>, vector<1x16x16x1xf32>,
    return
  }
  func.func @transform_0(%arg0: i32) -> (i32, i32, i32, i32) {
    %c0_i32 = arith.constant 0 : i32
    %c0_i32_0 = arith.constant 0 : i32
    %c0_i32_1 = arith.constant 0 : i32
    %c0_i32_2 = arith.constant 0 : i32
    return %arg0, %c0_i32, %c0_i32_0, %c0_i32_1 : i32, i32, i32, i32
  }
  func.func @transform_1(%arg0: i32) -> (i32, i32, i32, i32) {
    %c0_i32 = arith.constant 0 : i32
    %c0_i32_0 = arith.constant 0 : i32
    %c0_i32_1 = arith.constant 0 : i32
    %c0_i32_2 = arith.constant 0 : i32
    %c0_i32_3 = arith.constant 0 : i32
    return %c0_i32, %c0_i32_0, %c0_i32_1, %c0_i32_2 : i32, i32, i32, i32
  }
  func.func @transform_2(%arg0: i32) -> (i32, i32) {
    %c0_i32 = arith.constant 0 : i32
    %c0_i32_0 = arith.constant 0 : i32
    %c0_i32_1 = arith.constant 0 : i32
    return %c0_i32, %c0_i32_0 : i32, i32
  }
  func.func @transform_3(%arg0: i32) -> (i32, i32, i32, i32) {
    %c0_i32 = arith.constant 0 : i32
    %c0_i32_0 = arith.constant 0 : i32
    %c0_i32_1 = arith.constant 0 : i32
    %c0_i32_2 = arith.constant 0 : i32
    %c0_i32_3 = arith.constant 0 : i32
    return %c0_i32, %c0_i32_0, %c0_i32_1, %c0_i32_2 : i32, i32, i32, i32
  }
  func.func @transform_4(%arg0: i32) -> (i32, i32) {
    %c0_i32 = arith.constant 0 : i32
    %c0_i32_0 = arith.constant 0 : i32
    %c0_i32_1 = arith.constant 0 : i32
    return %c0_i32, %c0_i32_0 : i32, i32
  }
  func.func @transform_5(%arg0: i32) -> (i32, i32, i32, i32) {
    %c0_i32 = arith.constant 0 : i32
    %c0_i32_0 = arith.constant 0 : i32
    %c0_i32_1 = arith.constant 0 : i32
    %c0_i32_2 = arith.constant 0 : i32
    %c0_i32_3 = arith.constant 0 : i32
    return %c0_i32, %c0_i32_0, %c0_i32_1, %c0_i32_2 : i32, i32, i32, i32
  }
  func.func @transform_6(%arg0: i32) -> (i32, i32) {
    %c0_i32 = arith.constant 0 : i32
    %c0_i32_0 = arith.constant 0 : i32
    %c0_i32_1 = arith.constant 0 : i32
    return %c0_i32, %c0_i32_0 : i32, i32
  }
  func.func @transform_7(%arg0: i32) -> (i32, i32, i32, i32) {
    %c0_i32 = arith.constant 0 : i32
    %c0_i32_0 = arith.constant 0 : i32
    %c0_i32_1 = arith.constant 0 : i32
    %c0_i32_2 = arith.constant 0 : i32
    %c0_i32_3 = arith.constant 0 : i32
    return %c0_i32, %c0_i32_0, %c0_i32_1, %c0_i32_2 : i32, i32, i32, i32
  }
  func.func @transform_8(%arg0: i32) -> (i32, i32) {
    %c0_i32 = arith.constant 0 : i32
    %c0_i32_0 = arith.constant 0 : i32
    %c0_i32_1 = arith.constant 0 : i32
    return %c0_i32, %c0_i32_0 : i32, i32
  }
  func.func @transform_9(%arg0: i32) -> (i32, i32, i32, i32) {
    %c0_i32 = arith.constant 0 : i32
    %c0_i32_0 = arith.constant 0 : i32
    %c0_i32_1 = arith.constant 0 : i32
    %c0_i32_2 = arith.constant 0 : i32
    %c0_i32_3 = arith.constant 0 : i32
    return %c0_i32, %c0_i32_0, %c0_i32_1, %c0_i32_2 : i32, i32, i32, i32
  }
  func.func @transform_10(%arg0: i32) -> (i32, i32) {
    %c0_i32 = arith.constant 0 : i32
    %c0_i32_0 = arith.constant 0 : i32
    %c0_i32_1 = arith.constant 0 : i32
    return %c0_i32, %c0_i32_0 : i32, i32
  }
  func.func @transform_11(%arg0: i32) -> (i32, i32, i32, i32) {
    %c0_i32 = arith.constant 0 : i32
    %c0_i32_0 = arith.constant 0 : i32
    %c0_i32_1 = arith.constant 0 : i32
    %c0_i32_2 = arith.constant 0 : i32
    %c0_i32_3 = arith.constant 0 : i32
    return %c0_i32, %c0_i32_0, %c0_i32_1, %c0_i32_2 : i32, i32, i32, i32
  }
  func.func @transform_12(%arg0: i32) -> (i32, i32) {
    %c0_i32 = arith.constant 0 : i32
    %c0_i32_0 = arith.constant 0 : i32
    %c0_i32_1 = arith.constant 0 : i32
    return %c0_i32, %c0_i32_0 : i32, i32
  }
  func.func @transform_13(%arg0: i32) -> (i32, i32, i32, i32) {
    %c0_i32 = arith.constant 0 : i32
    %c0_i32_0 = arith.constant 0 : i32
    %c0_i32_1 = arith.constant 0 : i32
    %c0_i32_2 = arith.constant 0 : i32
    return %arg0, %c0_i32, %c0_i32_0, %c0_i32_1 : i32, i32, i32, i32
  }
}

</mosaic_0001>

<bundles_post_ra>
// kernel: encoder_decoder_forward.1
= control target key start
LH: loop header
LB: loop body
LE: loop exit
PB: predicated region body
PF: predicated region fallthrough
CT: control target
= control target key end

     0   :  { %s16230_s25 = smov 0   ;;  %s20625_s0 = inlined_call_operand.vmem [shape: f32[2,18,18,32], index: 0, kind: input, shape index: {}]   ;;  %s20626_s1 = inlined_call_operand.vmem [shape: f32[3,3,32,32], index: 1, kind: input, shape index: {}]   ;;  %s20627_s2 = inlined_call_operand.vmem [shape: f32[1,32], index: 2, kind: input, shape index: {}]   ;;  %s20628_s3 = inlined_call_operand.vmem [shape: f32[3,3,32,32], index: 3, kind: input, shape index: {}]   ;;  %s20629_s4 = inlined_call_operand.vmem [shape: f32[1,32], index: 4, kind: input, shape index: {}]   ;;  %s20630_s5 = inlined_call_operand.vmem [shape: f32[3,3,32,32], index: 5, kind: input, shape index: {}]   ;;  %s20631_s6 = inlined_call_operand.vmem [shape: f32[1,32], index: 6, kind: input, shape index: {}]   ;;  %s20632_s7 = inlined_call_operand.vmem [shape: f32[3,3,32,32], index: 7, kind: input, shape index: {}]   ;;  %s20633_s8 = inlined_call_operand.vmem [shape: f32[1,32], index: 8, kind: input, shape index: {}]   ;;  %s20634_s9 = inlined_call_operand.vmem [shape: f32[3,3,32,32], index: 9, kind: input, shape index: {}]   ;;  %s20635_s10 = inlined_call_operand.vmem [shape: f32[1,32], index: 10, kind: input, shape index: {}]   ;;  %s20636_s11 = inlined_call_operand.vmem [shape: f32[1,1,32,32], index: 11, kind: input, shape index: {}]   ;;  %s20637_s12 = inlined_call_operand.vmem [shape: f32[1,32], index: 12, kind: input, shape index: {}]   ;;  %s20638_s13 = inlined_call_operand.vmem [shape: f32[2,16,16,1], index: 13, kind: output, shape index: {}]  }
   0x1 LB: > { %s12328_s26 = sadd.s32 4294967295, %s16157_s25   ;;  %p12332_p0 = scmp.ge.s32.totalorder %s16157_s25, 1  ;;  %s16157_s25 = sphi %s16230_s25, %s23_s25  }
   0x2   : > { %p387_p1 = scmp.lt.s32.totalorder %s16157_s25, 3 }
   0x4   : > { %p388_p2 = pnand %p12332_p0, %p387_p1 }
   0x6   : > { %391 = sbr.rel (%p388_p2) target bundleno = 2108 (0x83c), region = 72 }
   0xb   : > { %v12339_v0 = vld [vmem:[%s20626_s1 + $0x38] sm:$0xff]  ;;  %v12338_v1 = vld [vmem:[%s20626_s1 + $0x30] sm:$0xff]  ;;  %p431_p3 = scmp.lt.s32.totalorder %s12328_s26, 1  ;;  %v12337_v2 = vld [vmem:[%s20626_s1 + $0x28] sm:$0xff]  ;;  %vm441_vm0 = vcmask 261120   ;;  %vm3925_vm1 = vcmask 1040384  }
   0xc   : > { %14529 = vmatprep.subr.mxu0 %v12339_v0  ;;  %16133 = vmatprep.subr.mxu1 %v12339_v0  ;;  %v12336_v3 = vld [vmem:[%s20626_s1 + $0x20] sm:$0xff]  ;;  %v586_v8 = vld [vmem:[%s20626_s1 + $0x18] sm:$0xff]  ;;  %v585_v10 = vld [vmem:[%s20626_s1 + $0x10] sm:$0xff]  ;;  %vm3934_vm2 = vcmask 1041408   ;;  %vm3943_vm3 = vcmask 1042432   ;;  %vm3952_vm4 = vcmask 1043456  }
   0xd   : > { %14530 = vmatpush3.msra.mxu0 %v12339_v0  ;;  %16137 = vmatpush3.msra.mxu1 %v12339_v0  ;;  %s20933_s26 = smov (!%p431_p3, %s12328_s26), 1  ;;  %v12407_v9 = vld [vmem:[%s20626_s1 + $0x58] sm:$0xff]  ;;  %v584_v15 = vld [vmem:[%s20626_s1 + $0x8] sm:$0xff]  ;;  %v583_v18 = vld [vmem:[%s20626_s1] sm:$0xff]  ;;  %vm3961_vm5 = vcmask 1044480   ;;  %vm3970_vm6 = vcmask 1045504  }
   0xe   : > { %14531 = vmatprep.subr.mxu0 %v12338_v1  ;;  %16134 = vmatprep.subr.mxu1 %v12338_v1  ;;  %s16141_s18 = smul.u32 432, %s20933_s26  ;;  %v12406_v19 = vld [vmem:[%s20626_s1 + $0x50] sm:$0xff]  ;;  %v12405_v24 = vld [vmem:[%s20626_s1 + $0x48] sm:$0xff]  ;;  %v12475_v25 = vld [vmem:[%s20626_s1 + $0x78] sm:$0xff]  ;;  %vm3979_vm7 = vcmask 1046528   ;;  %vm444_vm8 = vcmask 254976  }
   0xf   : > { %14532 = vmatpush3.msra.mxu0 %v12338_v1  ;;  %16138 = vmatpush3.msra.mxu1 %v12338_v1  ;;  %v12404_v30 = vld [vmem:[%s20626_s1 + $0x40] sm:$0xff]  ;;  %v12474_v31 = vld [vmem:[%s20626_s1 + $0x70] sm:$0xff]  ;;  %v16383_v36 = vld [vmem:[%s20626_s1 + $0x98] sm:$0xff]  ;;  %s13520_s22 = sshll.u32 %s20933_s26, 8  ;;  %vm12240_vm9 = vcmask 7168  }
  0x10   : > { %14533 = vmatprep.subr.mxu0 %v12337_v2  ;;  %16135 = vmatprep.subr.mxu1 %v12337_v2  ;;  %s16256_s21 = scalar_lea.vmem %s20625_s0, %s16141_s18  ;;  %v12473_v37 = vld [vmem:[%s20626_s1 + $0x68] sm:$0xff]  ;;  %v12472_v42 = vld [vmem:[%s20626_s1 + $0x60] sm:$0xff]  ;;  %v16422_v44 = vld [vmem:[%s20626_s1 + $0xb8] sm:$0xff]  ;;  %s20524_s29 = scalar_lea.vmem %s20638_s13, %s13520_s22 }
  0x11   : > { %14534 = vmatpush3.msra.mxu0 %v12337_v2  ;;  %16139 = vmatpush3.msra.mxu1 %v12337_v2  ;;  %v587_v4 = vld [vmem:[%s16256_s21 + $0x1] sm:$0xff]  ;;  %v16260_v5 = vld [vmem:[%s16256_s21 + $0x151] sm:$0xff]  ;;  %v588_v6 = vld [vmem:[%s16256_s21 + $0x9] sm:$0xff] }
  0x12   : > { %14535 = vmatprep.subr.mxu0 %v12336_v3  ;;  %16136 = vmatprep.subr.mxu1 %v12336_v3  ;;  %20685 = vst [vmem:[#allocation4_spill] sm:$0xff] %v16260_v5  ;;  %v16264_v7 = vld [vmem:[%s16256_s21 + $0x159] sm:$0xff]  ;;  %v16285_v12 = vld [vmem:[%s16256_s21 + $0x169] sm:$0xff]  ;;  %v16288_v13 = vld [vmem:[%s16256_s21 + $0x21] sm:$0xff] }
  0x13   : > { %14536 = vmatpush3.msra.mxu0 %v12336_v3  ;;  %16140 = vmatpush3.msra.mxu1 %v12336_v3  ;;  %20686 = vst [vmem:[#allocation5_spill] sm:$0xff] %v16264_v7  ;;  %v16282_v11 = vld [vmem:[%s16256_s21 + $0x19] sm:$0xff]  ;;  %20687 = vst [vmem:[#allocation6_spill] sm:$0xff] %v16285_v12  ;;  %v16291_v14 = vld [vmem:[%s16256_s21 + $0x171] sm:$0xff] }
  0x14   : > { %14537 = vmatprep.mubr.msk.f32.mxu0 %vm441_vm0, %v587_v4  ;;  %14579 = vmatprep.mubr.msk.f32.mxu1 %vm441_vm0, %v16260_v5  ;;  %20688 = vst [vmem:[#allocation7_spill] sm:$0xff] %v16291_v14  ;;  %v16299_v16 = vld [vmem:[%s16256_s21 + $0x31] sm:$0xff]  ;;  %v551_v17 = vld [vmem:[%s16256_s21] sm:$0xff]  ;;  %v552_v21 = vld [vmem:[%s16256_s21 + $0x8] sm:$0xff] }
  0x15   : > { %14538 = vmatmul.mubr.msk.f32.vlgmr.msra.gmra.mxu0 %vm441_vm0, %v588_v6  ;;  %14580 = vmatmul.mubr.msk.f32.vlgmr.msra.gmra.mxu1 %vm441_vm0, %v16264_v7  ;;  %v16317_v20 = vld [vmem:[%s16256_s21 + $0x39] sm:$0xff]  ;;  %v16322_v22 = vld [vmem:[%s16256_s21 + $0x49] sm:$0xff]  ;;  %v16339_v26 = vld [vmem:[%s16256_s21 + $0x51] sm:$0xff] }
  0x16   : > { %14585 = vmatprep.subr.mxu1 %v586_v8  ;;  %14641 = vmatprep.subr.mxu0 %v12407_v9  ;;  %v16325_v23 = vld [vmem:[%s16256_s21 + $0x18] sm:$0xff]  ;;  %v16344_v27 = vld [vmem:[%s16256_s21 + $0x20] sm:$0xff]  ;;  %v16350_v29 = vld [vmem:[%s16256_s21 + $0x30] sm:$0xff] }
  0x17   : > { %14586 = vmatpush3.msra.mxu1 %v586_v8  ;;  %14642 = vmatpush3.msra.mxu0 %v12407_v9  ;;  %v16347_v28 = vld [vmem:[%s16256_s21 + $0x61] sm:$0xff]  ;;  %20689 = vst [vmem:[#allocation8_spill] sm:$0xff] %v16350_v29  ;;  %v16365_v32 = vld [vmem:[%s16256_s21 + $0x69] sm:$0xff]  ;;  %v16370_v33 = vld [vmem:[%s16256_s21 + $0x38] sm:$0xff] }
  0x18   : > { %14587 = vmatprep.subr.mxu1 %v585_v10  ;;  %14540 = vmatprep.mubr.msk.f32.mxu0 %vm441_vm0, %v16282_v11  ;;  %v16373_v34 = vld [vmem:[%s16256_s21 + $0x79] sm:$0xff]  ;;  %v16376_v35 = vld [vmem:[%s16256_s21 + $0x48] sm:$0xff]  ;;  %v16398_v39 = vld [vmem:[%s16256_s21 + $0x50] sm:$0xff] }
  0x19   : > { %14582 = vmatprep.mubr.msk.f32.mxu1 %vm441_vm0, %v16285_v12  ;;  %14588 = vmatpush3.msra.mxu1 %v585_v10  ;;  %20690 = vst [vmem:[#allocation9_spill] sm:$0xff] %v16376_v35  ;;  %v16393_v38 = vld [vmem:[%s16256_s21 + $0x81] sm:$0xff]  ;;  %20691 = vst [vmem:[#allocation10_spill] sm:$0xff] %v16398_v39  ;;  %v16401_v40 = vld [vmem:[%s16256_s21 + $0x91] sm:$0xff] }
  0x1a   : > { %14541 = vmatmul.mubr.msk.f32.gmra.mxu0 %vm441_vm0, %v16288_v13  ;;  %14583 = vmatmul.mubr.msk.f32.gmra.mxu1 %vm441_vm0, %v16291_v14  ;;  %v16404_v41 = vld [vmem:[%s16256_s21 + $0x60] sm:$0xff]  ;;  %v16427_v45 = vld [vmem:[%s16256_s21 + $0x68] sm:$0xff]  ;;  %v16433_v47 = vld [vmem:[%s16256_s21 + $0x78] sm:$0xff] }
  0x1b   : > { %14589 = vmatprep.subr.mxu1 %v584_v15  ;;  %14543 = vmatprep.mubr.msk.f32.mxu0 %vm441_vm0, %v16299_v16  ;;  %20692 = vst [vmem:[#allocation11_spill] sm:$0xff] %v16404_v41  ;;  %v16417_v43 = vld [vmem:[%s16256_s21 + $0x99] sm:$0xff]  ;;  %20693 = vst [vmem:[#allocation12_spill] sm:$0xff] %v16427_v45  ;;  %v16430_v46 = vld [vmem:[%s16256_s21 + $0xa9] sm:$0xff] }
  0x1c   : > { %14590 = vmatpush3.msra.mxu1 %v584_v15  ;;  %14593 = vmatprep.mubr.msk.f32.mxu1 %vm441_vm0, %v551_v17  ;;  %20694 = vst [vmem:[#allocation13_spill] sm:$0xff] %v16433_v47  ;;  %v16443_v48 = vld [vmem:[%s16256_s21 + $0xb1] sm:$0xff]  ;;  %v16448_v49 = vld [vmem:[%s16256_s21 + $0x80] sm:$0xff]  ;;  %v16463_v52 = vld [vmem:[%s16256_s21 + $0xc9] sm:$0xff] }
  0x1d   : > { %14591 = vmatprep.subr.mxu1 %v583_v18  ;;  %14643 = vmatprep.subr.mxu0 %v12406_v19  ;;  %20695 = vst [vmem:[#allocation14_spill] sm:$0xff] %v16448_v49  ;;  %v16451_v50 = vld [vmem:[%s16256_s21 + $0xc1] sm:$0xff]  ;;  %v16454_v51 = vld [vmem:[%s16256_s21 + $0x90] sm:$0xff]  ;;  %v16468_v53 = vld [vmem:[%s16256_s21 + $0x98] sm:$0xff] }
  0x1e   : > { %14592 = vmatpush3.msra.mxu1 %v583_v18  ;;  %14544 = vmatmul.mubr.msk.f32.gmra.mxu0 %vm441_vm0, %v16317_v20  ;;  %20696 = vst [vmem:[#allocation15_spill] sm:$0xff] %v16454_v51  ;;  %20697 = vst [vmem:[#allocation16_spill] sm:$0xff] %v16468_v53  ;;  %v16471_v54 = vld [vmem:[%s16256_s21 + $0xd9] sm:$0xff]  ;;  %v16474_v55 = vld [vmem:[%s16256_s21 + $0xa8] sm:$0xff] }
  0x1f   : > { %14594 = vmatmul.mubr.msk.f32.vlgmr.msra.gmra.mxu1 %vm441_vm0, %v552_v21  ;;  %14546 = vmatprep.mubr.msk.f32.mxu0 %vm441_vm0, %v16322_v22  ;;  %20698 = vst [vmem:[#allocation17_spill] sm:$0xff] %v16474_v55  ;;  %v16483_v56 = vld [vmem:[%s16256_s21 + $0xe1] sm:$0xff]  ;;  %v16488_v57 = vld [vmem:[%s16256_s21 + $0xb0] sm:$0xff]  ;;  %v16503_v60 = vld [vmem:[%s16256_s21 + $0xf9] sm:$0xff] }
  0x20   : > { %14596 = vmatprep.mubr.msk.f32.mxu1 %vm441_vm0, %v16325_v23  ;;  %14644 = vmatpush3.msra.mxu0 %v12406_v19  ;;  %20699 = vst [vmem:[#allocation18_spill] sm:$0xff] %v16488_v57  ;;  %v16491_v58 = vld [vmem:[%s16256_s21 + $0xf1] sm:$0xff]  ;;  %v16494_v59 = vld [vmem:[%s16256_s21 + $0xc0] sm:$0xff]  ;;  %v16508_v61 = vld [vmem:[%s16256_s21 + $0xc8] sm:$0xff] }
  0x21   : > { %14645 = vmatprep.subr.mxu0 %v12405_v24  ;;  %14697 = vmatprep.subr.mxu1 %v12475_v25  ;;  %20700 = vst [vmem:[#allocation19_spill] sm:$0xff] %v16494_v59  ;;  %20701 = vst [vmem:[#allocation20_spill] sm:$0xff] %v16508_v61  ;;  %v16511_v62 = vld [vmem:[%s16256_s21 + $0x109] sm:$0xff]  ;;  %v16514_v63 = vld [vmem:[%s16256_s21 + $0xd8] sm:$0xff] }
  0x22   : > { %14547 = vmatmul.mubr.msk.f32.gmra.mxu0 %vm441_vm0, %v16339_v26  ;;  %14698 = vmatpush3.msra.mxu1 %v12475_v25  ;;  %20702 = vst [vmem:[#allocation21_spill] sm:$0xff] %v16511_v62  ;;  %20703 = vst [vmem:[#allocation22_spill] sm:$0xff] %v16514_v63  ;;  %v16523_v0 = vld [vmem:[%s16256_s21 + $0x111] sm:$0xff]  ;;  %v16528_v1 = vld [vmem:[%s16256_s21 + $0xe0] sm:$0xff] }
  0x23   : > { %14597 = vmatmul.mubr.msk.f32.gmra.mxu1 %vm441_vm0, %v16344_v27  ;;  %14549 = vmatprep.mubr.msk.f32.mxu0 %vm441_vm0, %v16347_v28  ;;  %20704 = vst [vmem:[#allocation23_spill] sm:$0xff] %v16523_v0  ;;  %20705 = vst [vmem:[#allocation24_spill] sm:$0xff] %v16528_v1  ;;  %v16531_v2 = vld [vmem:[%s16256_s21 + $0x121] sm:$0xff]  ;;  %v16534_v3 = vld [vmem:[%s16256_s21 + $0xf0] sm:$0xff] }
  0x24   : > { %14599 = vmatprep.mubr.msk.f32.mxu1 %vm441_vm0, %v16350_v29  ;;  %14646 = vmatpush3.msra.mxu0 %v12405_v24  ;;  %20706 = vst [vmem:[#allocation25_spill] sm:$0xff] %v16531_v2  ;;  %v16543_v4 = vld [vmem:[%s16256_s21 + $0x129] sm:$0xff]  ;;  %v16548_v6 = vld [vmem:[%s16256_s21 + $0xf8] sm:$0xff]  ;;  %v16563_v10 = vld [vmem:[%s16256_s21 + $0x141] sm:$0xff] }
  0x25   : > { %14647 = vmatprep.subr.mxu0 %v12404_v30  ;;  %14699 = vmatprep.subr.mxu1 %v12474_v31  ;;  %20707 = vst [vmem:[#allocation26_spill] sm:$0xff] %v16543_v4  ;;  %20708 = vst [vmem:[#allocation27_spill] sm:$0xff] %v16548_v6  ;;  %v16551_v8 = vld [vmem:[%s16256_s21 + $0x139] sm:$0xff]  ;;  %v16554_v9 = vld [vmem:[%s16256_s21 + $0x108] sm:$0xff] }
  0x26   : > { %14550 = vmatmul.mubr.msk.f32.gmra.mxu0 %vm441_vm0, %v16365_v32  ;;  %14700 = vmatpush3.msra.mxu1 %v12474_v31  ;;  %20709 = vst [vmem:[#allocation28_spill] sm:$0xff] %v16551_v8  ;;  %20710 = vst [vmem:[#allocation29_spill] sm:$0xff] %v16563_v10  ;;  %v16568_v15 = vld [vmem:[%s16256_s21 + $0x110] sm:$0xff]  ;;  %v1234_v17 = vld [vmem:[%s16256_s21 + $0x2] sm:$0xff] }
  0x27   : > { %14600 = vmatmul.mubr.msk.f32.gmra.mxu1 %vm441_vm0, %v16370_v33  ;;  %14552 = vmatprep.mubr.msk.f32.mxu0 %vm441_vm0, %v16373_v34  ;;  %v16572_v18 = vld [vmem:[%s16256_s21 + $0x120] sm:$0xff]  ;;  %v1235_v19 = vld [vmem:[%s16256_s21 + $0xa] sm:$0xff]  ;;  %v16586_v24 = vld [vmem:[%s16256_s21 + $0x138] sm:$0xff] }
  0x28   : > { %14602 = vmatprep.mubr.msk.f32.mxu1 %vm441_vm0, %v16376_v35  ;;  %14648 = vmatpush3.msra.mxu0 %v12404_v30  ;;  %20711 = vst [vmem:[#allocation30_spill] sm:$0xff] %v16572_v18  ;;  %v16583_v21 = vld [vmem:[%s16256_s21 + $0x128] sm:$0xff]  ;;  %v16589_v25 = vld [vmem:[%s16256_s21 + $0x1a] sm:$0xff]  ;;  %v12542_v30 = vld [vmem:[%s20626_s1 + $0x90] sm:$0xff] }
  0x29   : > { %14753 = vmatprep.subr.mxu0 %v16383_v36  ;;  %14701 = vmatprep.subr.mxu1 %v12473_v37  ;;  %v16599_v31 = vld [vmem:[%s16256_s21 + $0x22] sm:$0xff]  ;;  %v16629_v14 = vld [vmem:[%s16256_s21 + $0x158] sm:$0xff]  ;;  %v16632_v12 = vld [vmem:[%s16256_s21 + $0x4a] sm:$0xff] }
  0x2a   : > { %14553 = vmatmul.mubr.msk.f32.gmra.mxu0 %vm441_vm0, %v16393_v38  ;;  %14702 = vmatpush3.msra.mxu1 %v12473_v37  ;;  %v16606_v37 = vld [vmem:[%s16256_s21 + $0x140] sm:$0xff]  ;;  %v16635_v7 = vld [vmem:[%s16256_s21 + $0x168] sm:$0xff] }
  0x2b   : > { %14603 = vmatmul.mubr.msk.f32.gmra.mxu1 %vm441_vm0, %v16398_v39  ;;  %14555 = vmatprep.mubr.msk.f32.mxu0 %vm441_vm0, %v16401_v40  ;;  %20712 = vst [vmem:[#allocation31_spill] sm:$0xff] %v16635_v7  ;;  %v12540_v5 = vld [vmem:[%s20626_s1 + $0x80] sm:$0xff] }
  0x2c   : > { %14605 = vmatprep.mubr.msk.f32.mxu1 %vm441_vm0, %v16404_v41  ;;  %14703 = vmatprep.subr.mxu1 %v12472_v42 }
  0x2d   : > { %14704 = vmatpush3.msra.mxu1 %v12472_v42  ;;  %v16609_v42 = vld [vmem:[%s16256_s21 + $0x32] sm:$0xff] }
  0x2e   : > { %14556 = vmatmul.mubr.msk.f32.gmra.mxu0 %vm441_vm0, %v16417_v43  ;;  %14809 = vmatprep.subr.mxu1 %v16422_v44 }
  0x2f   : > { %14606 = vmatmul.mubr.msk.f32.gmra.mxu1 %vm441_vm0, %v16427_v45  ;;  %14558 = vmatprep.mubr.msk.f32.mxu0 %vm441_vm0, %v16430_v46 }
  0x30   : > { %14608 = vmatprep.mubr.msk.f32.mxu1 %vm441_vm0, %v16433_v47 }
  0x32   : > { %14559 = vmatmul.mubr.msk.f32.gmra.mxu0 %vm441_vm0, %v16443_v48 }
  0x33   : > { %14609 = vmatmul.mubr.msk.f32.gmra.mxu1 %vm441_vm0, %v16448_v49  ;;  %14561 = vmatprep.mubr.msk.f32.mxu0 %vm441_vm0, %v16451_v50 }
  0x34   : > { %14611 = vmatprep.mubr.msk.f32.mxu1 %vm441_vm0, %v16454_v51 }
  0x36   : > { %14562 = vmatmul.mubr.msk.f32.gmra.mxu0 %vm441_vm0, %v16463_v52 }
  0x37   : > { %14612 = vmatmul.mubr.msk.f32.gmra.mxu1 %vm441_vm0, %v16468_v53  ;;  %14564 = vmatprep.mubr.msk.f32.mxu0 %vm441_vm0, %v16471_v54 }
  0x38   : > { %14614 = vmatprep.mubr.msk.f32.mxu1 %vm441_vm0, %v16474_v55 }
  0x3a   : > { %14565 = vmatmul.mubr.msk.f32.gmra.mxu0 %vm441_vm0, %v16483_v56 }
  0x3b   : > { %14615 = vmatmul.mubr.msk.f32.gmra.mxu1 %vm441_vm0, %v16488_v57  ;;  %14567 = vmatprep.mubr.msk.f32.mxu0 %vm441_vm0, %v16491_v58 }
  0x3c   : > { %14617 = vmatprep.mubr.msk.f32.mxu1 %vm441_vm0, %v16494_v59 }
  0x3e   : > { %14568 = vmatmul.mubr.msk.f32.gmra.mxu0 %vm441_vm0, %v16503_v60 }
  0x3f   : > { %14618 = vmatmul.mubr.msk.f32.gmra.mxu1 %vm441_vm0, %v16508_v61  ;;  %14570 = vmatprep.mubr.msk.f32.mxu0 %vm441_vm0, %v16511_v62  ;;  %v12609_v62 = vld [vmem:[%s20626_s1 + $0xa8] sm:$0xff] }
  0x40   : > { %14620 = vmatprep.mubr.msk.f32.mxu1 %vm441_vm0, %v16514_v63 }
  0x42   : > { %14571 = vmatmul.mubr.msk.f32.gmra.mxu0 %vm441_vm0, %v16523_v0  ;;  %v12610_v0 = vld [vmem:[%s20626_s1 + $0xb0] sm:$0xff] }
  0x43   : > { %14621 = vmatmul.mubr.msk.f32.gmra.mxu1 %vm441_vm0, %v16528_v1  ;;  %14573 = vmatprep.mubr.msk.f32.mxu0 %vm441_vm0, %v16531_v2  ;;  %v16669_v2 = vld [vmem:[%s16256_s21 + $0x6a] sm:$0xff] }
  0x44   : > { %14623 = vmatprep.mubr.msk.f32.mxu1 %vm441_vm0, %v16534_v3 }
  0x46   : > { %14574 = vmatmul.mubr.msk.f32.gmra.mxu0 %vm441_vm0, %v16543_v4  ;;  %v16662_v4 = vld [vmem:[%s20626_s1 + $0xd8] sm:$0xff] }
  0x47   : > { %14624 = vmatmul.mubr.msk.f32.gmra.mxu1 %vm441_vm0, %v16548_v6  ;;  %14576 = vmatprep.mubr.msk.f32.mxu0 %vm441_vm0, %v16551_v8  ;;  %v16655_v8 = vld [vmem:[%s16256_s21 + $0x62] sm:$0xff] }
  0x48   : > { %14626 = vmatprep.mubr.msk.f32.mxu1 %vm441_vm0, %v16554_v9 }
  0x4a   : > { %14577 = vmatmul.mubr.msk.f32.gmra.mxu0 %vm441_vm0, %v16563_v10  ;;  %v16647_v10 = vld [vmem:[%s16256_s21 + $0x52] sm:$0xff] }
  0x4b   : > { %14627 = vmatmul.mubr.msk.f32.gmra.mxu1 %vm441_vm0, %v16568_v15  ;;  %14649 = vmatprep.mubr.msk.f32.mxu0 %vm441_vm0, %v1234_v17  ;;  %v16612_v17 = vld [vmem:[%s16256_s21 + $0x150] sm:$0xff] }
  0x4c   : > { %14629 = vmatprep.mubr.msk.f32.mxu1 %vm441_vm0, %v16572_v18 }
  0x4e   : > { %14650 = vmatmul.mubr.msk.f32.vlgmr.msra.gmra.mxu0 %vm441_vm0, %v1235_v19  ;;  %v16624_v19 = vld [vmem:[%s16256_s21 + $0x3a] sm:$0xff] }
  0x4f   : > { %14630 = vmatmul.mubr.msk.f32.gmra.mxu1 %vm441_vm0, %v16583_v21  ;;  %14754 = vmatpush3.msra.mxu0 %v16383_v36  ;;  %v12541_v36 = vld [vmem:[%s20626_s1 + $0x88] sm:$0xff] }
  0x50   : > { %14632 = vmatprep.mubr.msk.f32.mxu1 %vm441_vm0, %v16586_v24  ;;  %14652 = vmatprep.mubr.msk.f32.mxu0 %vm441_vm0, %v16589_v25 }
  0x51   : > { %14755 = vmatprep.subr.mxu0 %v12542_v30 }
  0x52   : > { %14653 = vmatmul.mubr.msk.f32.gmra.mxu0 %vm441_vm0, %v16599_v31 }
  0x53   : > { %14633 = vmatmul.mubr.msk.f32.gmra.mxu1 %vm441_vm0, %v16606_v37  ;;  %14655 = vmatprep.mubr.msk.f32.mxu0 %vm441_vm0, %v16609_v42 }
  0x54   : > { %14635 = vmatprep.mubr.msk.f32.mxu1 %vm441_vm0, %v16612_v17  ;;  %14756 = vmatpush3.msra.mxu0 %v12542_v30  ;;  %v16652_v30 = vld [vmem:[%s16256_s21 + $0x170] sm:$0xff] }
  0x55   : > { %14757 = vmatprep.subr.mxu0 %v12541_v36 }
  0x56   : > { %14656 = vmatmul.mubr.msk.f32.gmra.mxu0 %vm441_vm0, %v16624_v19 }
  0x57   : > { %14636 = vmatmul.mubr.msk.f32.gmra.mxu1 %vm441_vm0, %v16629_v14  ;;  %14658 = vmatprep.mubr.msk.f32.mxu0 %vm441_vm0, %v16632_v12 }
  0x58   : > { %14638 = vmatprep.mubr.msk.f32.mxu1 %vm441_vm0, %v16635_v7  ;;  %14758 = vmatpush3.msra.mxu0 %v12541_v36  ;;  %v16674_v36 = vld [vmem:[%s16256_s21 + $0x7a] sm:$0xff] }
  0x59   : > { %14759 = vmatprep.subr.mxu0 %v12540_v5 }
  0x5a   : > { %14659 = vmatmul.mubr.msk.f32.gmra.mxu0 %vm441_vm0, %v16647_v10 }
  0x5b   : > { %14639 = vmatmul.mubr.msk.f32.gmra.mxu1 %vm441_vm0, %v16652_v30  ;;  %14661 = vmatprep.mubr.msk.f32.mxu0 %vm441_vm0, %v16655_v8 }
  0x5c   : > { %14705 = vmatprep.mubr.msk.f32.mxu1 %vm441_vm0, %v16325_v23  ;;  %14760 = vmatpush3.msra.mxu0 %v12540_v5  ;;  %v16687_v23 = vld [vmem:[%s16256_s21 + $0x82] sm:$0xff]  ;;  %v16692_v5 = vld [vmem:[%s16256_s21 + $0x92] sm:$0xff] }
  0x5d   : > { %14865 = vmatprep.subr.mxu0 %v16662_v4 }
  0x5e   : > { %14662 = vmatmul.mubr.msk.f32.gmra.mxu0 %vm441_vm0, %v16669_v2 }
  0x5f   : > { %14706 = vmatmul.mubr.msk.f32.vlgmr.msra.gmra.mxu1 %vm441_vm0, %v16344_v27  ;;  %14664 = vmatprep.mubr.msk.f32.mxu0 %vm441_vm0, %v16674_v36  ;;  %v16705_v27 = vld [vmem:[%s16256_s21 + $0x9a] sm:$0xff] }
  0x60   : > { %14708 = vmatprep.mubr.msk.f32.mxu1 %vm441_vm0, %v16350_v29  ;;  %14810 = vmatpush3.msra.mxu1 %v16422_v44  ;;  %v12608_v44 = vld [vmem:[%s20626_s1 + $0xa0] sm:$0xff]  ;;  %v16713_v29 = vld [vmem:[%s16256_s21 + $0xaa] sm:$0xff] }
  0x61   : > { %14811 = vmatprep.subr.mxu1 %v12610_v0 }
  0x62   : > { %14665 = vmatmul.mubr.msk.f32.gmra.mxu0 %vm441_vm0, %v16687_v23  ;;  %14812 = vmatpush3.msra.mxu1 %v12610_v0  ;;  %v16720_v0 = vld [vmem:[%s20626_s1 + $0xf8] sm:$0xff] }
  0x63   : > { %14709 = vmatmul.mubr.msk.f32.gmra.mxu1 %vm441_vm0, %v16370_v33  ;;  %14667 = vmatprep.mubr.msk.f32.mxu0 %vm441_vm0, %v16692_v5 }
  0x64   : > { %14711 = vmatprep.mubr.msk.f32.mxu1 %vm441_vm0, %v16376_v35  ;;  %14813 = vmatprep.subr.mxu1 %v12609_v62  ;;  %v16727_v35 = vld [vmem:[%s16256_s21 + $0xb2] sm:$0xff] }
  0x65   : > { %14814 = vmatpush3.msra.mxu1 %v12609_v62  ;;  %v16732_v62 = vld [vmem:[%s16256_s21 + $0xc2] sm:$0xff] }
  0x66   : > { %14668 = vmatmul.mubr.msk.f32.gmra.mxu0 %vm441_vm0, %v16705_v27  ;;  %14815 = vmatprep.subr.mxu1 %v12608_v44 }
  0x67   : > { %14712 = vmatmul.mubr.msk.f32.gmra.mxu1 %vm441_vm0, %v16398_v39  ;;  %14670 = vmatprep.mubr.msk.f32.mxu0 %vm441_vm0, %v16713_v29  ;;  %v16742_v39 = vld [vmem:[%s16256_s21 + $0xca] sm:$0xff] }
  0x68   : > { %14714 = vmatprep.mubr.msk.f32.mxu1 %vm441_vm0, %v16404_v41  ;;  %14816 = vmatpush3.msra.mxu1 %v12608_v44  ;;  %v16747_v41 = vld [vmem:[%s16256_s21 + $0xda] sm:$0xff]  ;;  %v16756_v44 = vld [vmem:[%s16256_s21 + $0xe2] sm:$0xff] }
  0x69   : > { %14921 = vmatprep.subr.mxu1 %v16720_v0 }
  0x6a   : > { %14671 = vmatmul.mubr.msk.f32.gmra.mxu0 %vm441_vm0, %v16727_v35 }
  0x6b   : > { %14715 = vmatmul.mubr.msk.f32.gmra.mxu1 %vm441_vm0, %v16427_v45  ;;  %14673 = vmatprep.mubr.msk.f32.mxu0 %vm441_vm0, %v16732_v62  ;;  %v16761_v45 = vld [vmem:[%s16256_s21 + $0xf2] sm:$0xff] }
  0x6c   : > { %14717 = vmatprep.mubr.msk.f32.mxu1 %vm441_vm0, %v16433_v47  ;;  %v16775_v47 = vld [vmem:[%s16256_s21 + $0x10a] sm:$0xff] }
  0x6e   : > { %14674 = vmatmul.mubr.msk.f32.gmra.mxu0 %vm441_vm0, %v16742_v39 }
  0x6f   : > { %14718 = vmatmul.mubr.msk.f32.gmra.mxu1 %vm441_vm0, %v16448_v49  ;;  %14676 = vmatprep.mubr.msk.f32.mxu0 %vm441_vm0, %v16747_v41  ;;  %v16770_v49 = vld [vmem:[%s16256_s21 + $0xfa] sm:$0xff] }
  0x70   : > { %14720 = vmatprep.mubr.msk.f32.mxu1 %vm441_vm0, %v16454_v51  ;;  %v16789_v51 = vld [vmem:[%s16256_s21 + $0x122] sm:$0xff] }
  0x72   : > { %14677 = vmatmul.mubr.msk.f32.gmra.mxu0 %vm441_vm0, %v16756_v44 }
  0x73   : > { %14721 = vmatmul.mubr.msk.f32.gmra.mxu1 %vm441_vm0, %v16468_v53  ;;  %14679 = vmatprep.mubr.msk.f32.mxu0 %vm441_vm0, %v16761_v45  ;;  %v16784_v53 = vld [vmem:[%s16256_s21 + $0x112] sm:$0xff] }
  0x74   : > { %14723 = vmatprep.mubr.msk.f32.mxu1 %vm441_vm0, %v16474_v55  ;;  %v16803_v55 = vld [vmem:[%s16256_s21 + $0x13a] sm:$0xff] }
  0x76   : > { %14680 = vmatmul.mubr.msk.f32.gmra.mxu0 %vm441_vm0, %v16770_v49 }
  0x77   : > { %14724 = vmatmul.mubr.msk.f32.gmra.mxu1 %vm441_vm0, %v16488_v57  ;;  %14682 = vmatprep.mubr.msk.f32.mxu0 %vm441_vm0, %v16775_v47  ;;  %v16798_v57 = vld [vmem:[%s16256_s21 + $0x12a] sm:$0xff] }
  0x78   : > { %14726 = vmatprep.mubr.msk.f32.mxu1 %vm441_vm0, %v16494_v59  ;;  %v16817_v59 = vld [vmem:[%s16256_s21 + $0x152] sm:$0xff] }
  0x7a   : > { %14683 = vmatmul.mubr.msk.f32.gmra.mxu0 %vm441_vm0, %v16784_v53 }
  0x7b   : > { %14727 = vmatmul.mubr.msk.f32.gmra.mxu1 %vm441_vm0, %v16508_v61  ;;  %14685 = vmatprep.mubr.msk.f32.mxu0 %vm441_vm0, %v16789_v51  ;;  %v16812_v61 = vld [vmem:[%s16256_s21 + $0x142] sm:$0xff] }
  0x7c   : > { %14729 = vmatprep.mubr.msk.f32.mxu1 %vm441_vm0, %v16514_v63  ;;  %v16831_v63 = vld [vmem:[%s16256_s21 + $0x16a] sm:$0xff] }
  0x7e   : > { %14686 = vmatmul.mubr.msk.f32.gmra.mxu0 %vm441_vm0, %v16798_v57 }
  0x7f   : > { %14730 = vmatmul.mubr.msk.f32.gmra.mxu1 %vm441_vm0, %v16528_v1  ;;  %14688 = vmatprep.mubr.msk.f32.mxu0 %vm441_vm0, %v16803_v55  ;;  %v16826_v1 = vld [vmem:[%s16256_s21 + $0x15a] sm:$0xff] }
  0x80   : > { %14732 = vmatprep.mubr.msk.f32.mxu1 %vm441_vm0, %v16534_v3 }
  0x82   : > { %14689 = vmatmul.mubr.msk.f32.gmra.mxu0 %vm441_vm0, %v16812_v61 }
  0x83   : > { %14733 = vmatmul.mubr.msk.f32.gmra.mxu1 %vm441_vm0, %v16548_v6  ;;  %14691 = vmatprep.mubr.msk.f32.mxu0 %vm441_vm0, %v16817_v59  ;;  %v16840_v6 = vld [vmem:[%s16256_s21 + $0x172] sm:$0xff] }
  0x84   : > { %14735 = vmatprep.mubr.msk.f32.mxu1 %vm441_vm0, %v16554_v9 }
  0x86   : > { %14692 = vmatmul.mubr.msk.f32.gmra.mxu0 %vm441_vm0, %v16826_v1 }
  0x87   : > { %14736 = vmatmul.mubr.msk.f32.gmra.mxu1 %vm441_vm0, %v16568_v15  ;;  %14694 = vmatprep.mubr.msk.f32.mxu0 %vm441_vm0, %v16831_v63 }
  0x88   : > { %14738 = vmatprep.mubr.msk.f32.mxu1 %vm441_vm0, %v16572_v18  ;;  %v12678_v18 = vld [vmem:[%s20626_s1 + $0xd0] sm:$0xff] }
  0x8a   : > { %14695 = vmatmul.mubr.msk.f32.gmra.mxu0 %vm441_vm0, %v16840_v6 }
  0x8b   : > { %14739 = vmatmul.mubr.msk.f32.gmra.mxu1 %vm441_vm0, %v16583_v21  ;;  %14761 = vmatprep.mubr.msk.f32.mxu0 %vm441_vm0, %v16282_v11  ;;  %v12677_v11 = vld [vmem:[%s20626_s1 + $0xc8] sm:$0xff] }
  0x8c   : > { %14741 = vmatprep.mubr.msk.f32.mxu1 %vm441_vm0, %v16586_v24 }
  0x8e   : > { %14762 = vmatmul.mubr.msk.f32.vlgmr.msra.gmra.mxu0 %vm441_vm0, %v16288_v13  ;;  %v16876_v13 = vld [vmem:[%s16256_s21 + $0x180] sm:$0xff] }
  0x8f   : > { %14742 = vmatmul.mubr.msk.f32.gmra.mxu1 %vm441_vm0, %v16606_v37  ;;  %14866 = vmatpush3.msra.mxu0 %v16662_v4  ;;  %v12676_v4 = vld [vmem:[%s20626_s1 + $0xc0] sm:$0xff] }
  0x90   : > { %14744 = vmatprep.mubr.msk.f32.mxu1 %vm441_vm0, %v16612_v17  ;;  %14764 = vmatprep.mubr.msk.f32.mxu0 %vm441_vm0, %v16299_v16 }
  0x91   : > { %14867 = vmatprep.subr.mxu0 %v12678_v18 }
  0x92   : > { %14765 = vmatmul.mubr.msk.f32.gmra.mxu0 %vm441_vm0, %v16317_v20 }
  0x93   : > { %14745 = vmatmul.mubr.msk.f32.gmra.mxu1 %vm441_vm0, %v16629_v14  ;;  %14767 = vmatprep.mubr.msk.f32.mxu0 %vm441_vm0, %v16322_v22 }
  0x94   : > { %14747 = vmatprep.mubr.msk.f32.mxu1 %vm441_vm0, %v16635_v7  ;;  %14868 = vmatpush3.msra.mxu0 %v12678_v18  ;;  %v16890_v18 = vld [vmem:[%s16256_s21 + $0x188] sm:$0xff]  ;;  %v16897_v7 = vld [vmem:[%s20626_s1 + $0x118] sm:$0xff] }
  0x95   : > { %14869 = vmatprep.subr.mxu0 %v12677_v11 }
  0x96   : > { %14768 = vmatmul.mubr.msk.f32.gmra.mxu0 %vm441_vm0, %v16339_v26 }
  0x97   : > { %14748 = vmatmul.mubr.msk.f32.gmra.mxu1 %vm441_vm0, %v16652_v30  ;;  %14770 = vmatprep.mubr.msk.f32.mxu0 %vm441_vm0, %v16347_v28 }
  0x98   : > { %14750 = vmatprep.mubr.msk.f32.mxu1 %vm441_vm0, %v16876_v13  ;;  %14870 = vmatpush3.msra.mxu0 %v12677_v11  ;;  %v12746_v11 = vld [vmem:[%s20626_s1 + $0xf0] sm:$0xff] }
  0x99   : > { %14871 = vmatprep.subr.mxu0 %v12676_v4 }
  0x9a   : > { %14771 = vmatmul.mubr.msk.f32.gmra.mxu0 %vm441_vm0, %v16365_v32 }
  0x9b   : > { %14751 = vmatmul.mubr.msk.f32.gmra.mxu1 %vm441_vm0, %v16890_v18  ;;  %14773 = vmatprep.mubr.msk.f32.mxu0 %vm441_vm0, %v16373_v34 }
  0x9c   : > { %14817 = vmatprep.mubr.msk.f32.mxu1 %vm441_vm0, %v16589_v25  ;;  %14872 = vmatpush3.msra.mxu0 %v12676_v4  ;;  %v12745_v25 = vld [vmem:[%s20626_s1 + $0xe8] sm:$0xff]  ;;  %v20714_v4 = vld [vmem:[#allocation23_spill] sm:$0xff] }
  0x9d   : > { %14977 = vmatprep.subr.mxu0 %v16897_v7 }
  0x9e   : > { %14774 = vmatmul.mubr.msk.f32.gmra.mxu0 %vm441_vm0, %v16393_v38 }
  0x9f   : > { %14818 = vmatmul.mubr.msk.f32.vlgmr.msra.gmra.mxu1 %vm441_vm0, %v16599_v31  ;;  %14776 = vmatprep.mubr.msk.f32.mxu0 %vm441_vm0, %v16401_v40  ;;  %v12744_v31 = vld [vmem:[%s20626_s1 + $0xe0] sm:$0xff] }
  0xa0   : > { %14820 = vmatprep.mubr.msk.f32.mxu1 %vm441_vm0, %v16609_v42  ;;  %14922 = vmatpush3.msra.mxu1 %v16720_v0  ;;  %v20713_v0 = vld [vmem:[#allocation21_spill] sm:$0xff] }
  0xa1   : > { %14923 = vmatprep.subr.mxu1 %v12746_v11 }
  0xa2   : > { %14777 = vmatmul.mubr.msk.f32.gmra.mxu0 %vm441_vm0, %v16417_v43  ;;  %14924 = vmatpush3.msra.mxu1 %v12746_v11  ;;  %v20715_v11 = vld [vmem:[#allocation25_spill] sm:$0xff] }
  0xa3   : > { %14821 = vmatmul.mubr.msk.f32.gmra.mxu1 %vm441_vm0, %v16624_v19  ;;  %14779 = vmatprep.mubr.msk.f32.mxu0 %vm441_vm0, %v16430_v46 }
  0xa4   : > { %14823 = vmatprep.mubr.msk.f32.mxu1 %vm441_vm0, %v16632_v12  ;;  %14925 = vmatprep.subr.mxu1 %v12745_v25 }
  0xa5   : > { %14926 = vmatpush3.msra.mxu1 %v12745_v25  ;;  %v20716_v25 = vld [vmem:[#allocation26_spill] sm:$0xff] }
  0xa6   : > { %14780 = vmatmul.mubr.msk.f32.gmra.mxu0 %vm441_vm0, %v16443_v48  ;;  %14927 = vmatprep.subr.mxu1 %v12744_v31 }
  0xa7   : > { %14824 = vmatmul.mubr.msk.f32.gmra.mxu1 %vm441_vm0, %v16647_v10  ;;  %14782 = vmatprep.mubr.msk.f32.mxu0 %vm441_vm0, %v16451_v50 }
  0xa8   : > { %14826 = vmatprep.mubr.msk.f32.mxu1 %vm441_vm0, %v16655_v8  ;;  %14928 = vmatpush3.msra.mxu1 %v12744_v31  ;;  %v20720_v31 = vld [vmem:[#allocation5_spill] sm:$0xff] }
  0xaa   : > { %14783 = vmatmul.mubr.msk.f32.gmra.mxu0 %vm441_vm0, %v16463_v52 }
  0xab   : > { %14827 = vmatmul.mubr.msk.f32.gmra.mxu1 %vm441_vm0, %v16669_v2  ;;  %14785 = vmatprep.mubr.msk.f32.mxu0 %vm441_vm0, %v16471_v54 }
  0xac   : > { %14829 = vmatprep.mubr.msk.f32.mxu1 %vm441_vm0, %v16674_v36 }
  0xae   : > { %14786 = vmatmul.mubr.msk.f32.gmra.mxu0 %vm441_vm0, %v16483_v56 }
  0xaf   : > { %14830 = vmatmul.mubr.msk.f32.gmra.mxu1 %vm441_vm0, %v16687_v23  ;;  %14788 = vmatprep.mubr.msk.f32.mxu0 %vm441_vm0, %v16491_v58 }
  0xb0   : > { %14832 = vmatprep.mubr.msk.f32.mxu1 %vm441_vm0, %v16692_v5 }
  0xb2   : > { %14789 = vmatmul.mubr.msk.f32.gmra.mxu0 %vm441_vm0, %v16503_v60 }
  0xb3   : > { %14833 = vmatmul.mubr.msk.f32.gmra.mxu1 %vm441_vm0, %v16705_v27  ;;  %14791 = vmatprep.mubr.msk.f32.mxu0 %vm441_vm0, %v20713_v0 }
  0xb4   : > { %14835 = vmatprep.mubr.msk.f32.mxu1 %vm441_vm0, %v16713_v29  ;;  %v20717_v29 = vld [vmem:[#allocation28_spill] sm:$0xff] }
  0xb6   : > { %14792 = vmatmul.mubr.msk.f32.gmra.mxu0 %vm441_vm0, %v20714_v4 }
  0xb7   : > { %14836 = vmatmul.mubr.msk.f32.gmra.mxu1 %vm441_vm0, %v16727_v35  ;;  %14794 = vmatprep.mubr.msk.f32.mxu0 %vm441_vm0, %v20715_v11  ;;  %v20718_v35 = vld [vmem:[#allocation29_spill] sm:$0xff] }
  0xb8   : > { %14838 = vmatprep.mubr.msk.f32.mxu1 %vm441_vm0, %v16732_v62  ;;  %v20719_v62 = vld [vmem:[#allocation4_spill] sm:$0xff]  ;;  %v17060_v11 = vld [vmem:[%s16256_s21 + $0x18a] sm:$0xff] }
  0xba   : > { %14795 = vmatmul.mubr.msk.f32.gmra.mxu0 %vm441_vm0, %v20716_v25 }
  0xbb   : > { %14839 = vmatmul.mubr.msk.f32.gmra.mxu1 %vm441_vm0, %v16742_v39  ;;  %14797 = vmatprep.mubr.msk.f32.mxu0 %vm441_vm0, %v20717_v29  ;;  %v20721_v39 = vld [vmem:[#allocation6_spill] sm:$0xff] }
  0xbc   : > { %14841 = vmatprep.mubr.msk.f32.mxu1 %vm441_vm0, %v16747_v41  ;;  %v16997_v41 = vld [vmem:[%s16256_s21 + $0x181] sm:$0xff] }
  0xbe   : > { %14798 = vmatmul.mubr.msk.f32.gmra.mxu0 %vm441_vm0, %v20718_v35  ;;  %v20730_v35 = vld [vmem:[#allocation14_spill] sm:$0xff] }
  0xbf   : > { %14842 = vmatmul.mubr.msk.f32.gmra.mxu1 %vm441_vm0, %v16756_v44  ;;  %14800 = vmatprep.mubr.msk.f32.mxu0 %vm441_vm0, %v20719_v62  ;;  %v20722_v44 = vld [vmem:[#allocation7_spill] sm:$0xff] }
  0xc0   : > { %14844 = vmatprep.mubr.msk.f32.mxu1 %vm441_vm0, %v16761_v45  ;;  %v17006_v45 = vld [vmem:[%s16256_s21 + $0x189] sm:$0xff] }
  0xc2   : > { %14801 = vmatmul.mubr.msk.f32.gmra.mxu0 %vm441_vm0, %v20720_v31 }
  0xc3   : > { %14845 = vmatmul.mubr.msk.f32.gmra.mxu1 %vm441_vm0, %v16770_v49  ;;  %14803 = vmatprep.mubr.msk.f32.mxu0 %vm441_vm0, %v20721_v39  ;;  %v12814_v49 = vld [vmem:[%s20626_s1 + $0x110] sm:$0xff] }
  0xc4   : > { %14847 = vmatprep.mubr.msk.f32.mxu1 %vm441_vm0, %v16775_v47  ;;  %v20723_v47 = vld [vmem:[#allocation8_spill] sm:$0xff] }
  0xc6   : > { %14804 = vmatmul.mubr.msk.f32.gmra.mxu0 %vm441_vm0, %v20722_v44  ;;  %v20732_v44 = vld [vmem:[#allocation16_spill] sm:$0xff] }
  0xc7   : > { %14848 = vmatmul.mubr.msk.f32.gmra.mxu1 %vm441_vm0, %v16784_v53  ;;  %14806 = vmatprep.mubr.msk.f32.mxu0 %vm441_vm0, %v16997_v41  ;;  %v20725_v53 = vld [vmem:[#allocation10_spill] sm:$0xff] }
  0xc8   : > { %14850 = vmatprep.mubr.msk.f32.mxu1 %vm441_vm0, %v16789_v51  ;;  %v20724_v51 = vld [vmem:[#allocation9_spill] sm:$0xff] }
  0xca   : > { %14807 = vmatmul.mubr.msk.f32.gmra.mxu0 %vm441_vm0, %v17006_v45 }
  0xcb   : > { %14851 = vmatmul.mubr.msk.f32.gmra.mxu1 %vm441_vm0, %v16798_v57  ;;  %14873 = vmatprep.mubr.msk.f32.mxu0 %vm441_vm0, %v20723_v47 }
  0xcc   : > { %14853 = vmatprep.mubr.msk.f32.mxu1 %vm441_vm0, %v16803_v55  ;;  %v20726_v55 = vld [vmem:[#allocation11_spill] sm:$0xff] }
  0xce   : > { %14874 = vmatmul.mubr.msk.f32.vlgmr.msra.gmra.mxu0 %vm441_vm0, %v16370_v33  ;;  %v12813_v33 = vld [vmem:[%s20626_s1 + $0x108] sm:$0xff] }
  0xcf   : > { %14854 = vmatmul.mubr.msk.f32.gmra.mxu1 %vm441_vm0, %v16812_v61  ;;  %14978 = vmatpush3.msra.mxu0 %v16897_v7  ;;  %v20727_v61 = vld [vmem:[#allocation12_spill] sm:$0xff] }
  0xd0   : > { %14856 = vmatprep.mubr.msk.f32.mxu1 %vm441_vm0, %v16817_v59  ;;  %14876 = vmatprep.mubr.msk.f32.mxu0 %vm441_vm0, %v20724_v51  ;;  %v17044_v59 = vld [vmem:[%s16256_s21 + $0x182] sm:$0xff] }
  0xd1   : > { %14979 = vmatprep.subr.mxu0 %v12814_v49 }
  0xd2   : > { %14877 = vmatmul.mubr.msk.f32.gmra.mxu0 %vm441_vm0, %v20725_v53 }
  0xd3   : > { %14857 = vmatmul.mubr.msk.f32.gmra.mxu1 %vm441_vm0, %v16826_v1  ;;  %14879 = vmatprep.mubr.msk.f32.mxu0 %vm441_vm0, %v20726_v55  ;;  %v12812_v1 = vld [vmem:[%s20626_s1 + $0x100] sm:$0xff] }
  0xd4   : > { %14859 = vmatprep.mubr.msk.f32.mxu1 %vm441_vm0, %v16831_v63  ;;  %14980 = vmatpush3.msra.mxu0 %v12814_v49  ;;  %v20729_v63 = vld [vmem:[#allocation13_spill] sm:$0xff] }
  0xd5   : > { %v14539_v7 = vpop.f32.mrf.mxu0  ;;  %v17041_v57 = vpop.f32.mrf.mxu1  ;;  %14981 = vmatprep.subr.mxu0 %v12813_v33  ;;  %v20733_v49 = vld [vmem:[#allocation17_spill] sm:$0xff] }
  0xd6   : > { %14880 = vmatmul.mubr.msk.f32.gmra.mxu0 %vm441_vm0, %v20727_v61  ;;  %v20734_v61 = vld [vmem:[#allocation18_spill] sm:$0xff] }
  0xd7   : > { %14860 = vmatmul.mubr.msk.f32.gmra.mxu1 %vm441_vm0, %v16840_v6  ;;  %v786_v0 = vpop.f32.mrf.mxu0  ;;  %v17053_v4 = vpop.f32.mrf.mxu1  ;;  %14882 = vmatprep.mubr.msk.f32.mxu0 %vm441_vm0, %v20729_v63  ;;  %v20731_v6 = vld [vmem:[#allocation15_spill] sm:$0xff] }
  0xd8   : > { %20728 = vst [vmem:[#allocation21_spill] sm:$0xff] %v17053_v4  ;;  %14862 = vmatprep.mubr.msk.f32.mxu1 %vm441_vm0, %v17044_v59  ;;  %14982 = vmatpush3.msra.mxu0 %v12813_v33 }
  0xd9   : > { %14983 = vmatprep.subr.mxu0 %v12812_v1 }
  0xda   : > { %v14542_v25 = vpop.f32.mrf.mxu0  ;;  %v14584_v29 = vpop.f32.mrf.mxu1  ;;  %14883 = vmatmul.mubr.msk.f32.gmra.mxu0 %vm441_vm0, %v20730_v35 }
  0xdb   : > { %14863 = vmatmul.mubr.msk.f32.gmra.mxu1 %vm441_vm0, %v17060_v11  ;;  %14885 = vmatprep.mubr.msk.f32.mxu0 %vm441_vm0, %v20731_v6  ;;  %v20736_v25 = vld [vmem:[#allocation20_spill] sm:$0xff]  ;;  %v20737_v29 = vld [vmem:[#allocation22_spill] sm:$0xff] }
  0xdc   : > { %v796_v62 = vpop.f32.mrf.mxu0  ;;  %v922_v31 = vpop.f32.mrf.mxu1  ;;  %14929 = vmatprep.mubr.msk.f32.mxu1 %vm441_vm0, %v16299_v16  ;;  %14984 = vmatpush3.msra.mxu0 %v12812_v1 }
  0xdd   : > { %v20738_v31 = vld [vmem:[#allocation24_spill] sm:$0xff] }
  0xde   : > { %v14545_v39 = vpop.f32.mrf.mxu0  ;;  %14886 = vmatmul.mubr.msk.f32.gmra.mxu0 %vm441_vm0, %v20732_v44 }
  0xdf   : > { %v14595_v47 = vpop.f32.mrf.mxu1  ;;  %14930 = vmatmul.mubr.msk.f32.vlgmr.msra.gmra.mxu1 %vm441_vm0, %v16317_v20  ;;  %14888 = vmatprep.mubr.msk.f32.mxu0 %vm441_vm0, %v20733_v49  ;;  %v20735_v20 = vld [vmem:[#allocation19_spill] sm:$0xff] }
  0xe0   : > { %v17076_v51 = vadd.f32 %v14595_v47, %v14539_v7  ;;  %v804_v53 = vpop.f32.mrf.mxu0  ;;  %14932 = vmatprep.mubr.msk.f32.mxu1 %vm441_vm0, %v16322_v22  ;;  %v20739_v47 = vld [vmem:[#allocation27_spill] sm:$0xff] }
  0xe1   : > { %v1091_v33 = vpop.f32.mrf.mxu1 }
  0xe2   : > { %v17080_v16 = vadd.f32 %v1091_v33, %v786_v0  ;;  %v14548_v55 = vpop.f32.mrf.mxu0  ;;  %14889 = vmatmul.mubr.msk.f32.gmra.mxu0 %vm441_vm0, %v20734_v61 }
  0xe3   : > { %v14598_v1 = vpop.f32.mrf.mxu1  ;;  %14933 = vmatmul.mubr.msk.f32.gmra.mxu1 %vm441_vm0, %v16339_v26  ;;  %14891 = vmatprep.mubr.msk.f32.mxu0 %vm441_vm0, %v20735_v20 }
  0xe4   : > { %v814_v7 = vpop.f32.mrf.mxu0  ;;  %14935 = vmatprep.mubr.msk.f32.mxu1 %vm441_vm0, %v16347_v28 }
  0xe5   : > { %v1101_v63 = vpop.f32.mrf.mxu1 }
  0xe6   : > { %v14551_v22 = vpop.f32.mrf.mxu0  ;;  %14892 = vmatmul.mubr.msk.f32.gmra.mxu0 %vm441_vm0, %v20736_v25 }
  0xe7   : > { %v14601_v0 = vpop.f32.mrf.mxu1  ;;  %14936 = vmatmul.mubr.msk.f32.gmra.mxu1 %vm441_vm0, %v16365_v32  ;;  %14894 = vmatprep.mubr.msk.f32.mxu0 %vm441_vm0, %v20737_v29 }
  0xe8   : > { %v17096_v26 = vadd.f32 %v14601_v0, %v14545_v39  ;;  %v822_v35 = vpop.f32.mrf.mxu0  ;;  %14938 = vmatprep.mubr.msk.f32.mxu1 %vm441_vm0, %v16373_v34 }
  0xe9   : > { %v1109_v6 = vpop.f32.mrf.mxu1 }
  0xea   : > { %v17100_v28 = vadd.f32 %v1109_v6, %v804_v53  ;;  %v14554_v62 = vpop.f32.mrf.mxu0  ;;  %14895 = vmatmul.mubr.msk.f32.gmra.mxu0 %vm441_vm0, %v20738_v31  ;;  %v12674_v6 = vld [vmem:[%s16256_s21 + $0x198] sm:$0xff] }
  0xeb   : > { %v14604_v44 = vpop.f32.mrf.mxu1  ;;  %14939 = vmatmul.mubr.msk.f32.gmra.mxu1 %vm441_vm0, %v16393_v38  ;;  %14897 = vmatprep.mubr.msk.f32.mxu0 %vm441_vm0, %v16534_v3  ;;  %v12734_v31 = vld [vmem:[%s16256_s21 + $0x139] sm:$0xff] }
  0xec   : > { %v832_v32 = vpop.f32.mrf.mxu0  ;;  %14941 = vmatprep.mubr.msk.f32.mxu1 %vm441_vm0, %v16401_v40 }
  0xed   : > { %v1119_v39 = vpop.f32.mrf.mxu1 }
  0xee   : > { %v14557_v34 = vpop.f32.mrf.mxu0  ;;  %14898 = vmatmul.mubr.msk.f32.gmra.mxu0 %vm441_vm0, %v20739_v47 }
  0xef   : > { %v14607_v49 = vpop.f32.mrf.mxu1  ;;  %14942 = vmatmul.mubr.msk.f32.gmra.mxu1 %vm441_vm0, %v16417_v43  ;;  %14900 = vmatprep.mubr.msk.f32.mxu0 %vm441_vm0, %v16554_v9  ;;  %v20740_v43 = vld [vmem:[#allocation30_spill] sm:$0xff] }
  0xf0   : > { %v17116_v38 = vadd.f32 %v14607_v49, %v14551_v22  ;;  %v840_v53 = vpop.f32.mrf.mxu0  ;;  %14944 = vmatprep.mubr.msk.f32.mxu1 %vm441_vm0, %v16430_v46  ;;  %v12736_v49 = vld [vmem:[%s16256_s21 + $0x151] sm:$0xff] }
  0xf1   : > { %v1127_v3 = vpop.f32.mrf.mxu1 }
  0xf2   : > { %v17120_v40 = vadd.f32 %v1127_v3, %v822_v35  ;;  %v14560_v33 = vpop.f32.mrf.mxu0  ;;  %14901 = vmatmul.mubr.msk.f32.gmra.mxu0 %vm441_vm0, %v16568_v15  ;;  %v12733_v35 = vld [vmem:[%s16256_s21 + $0x129] sm:$0xff] }
  0xf3   : > { %v14610_v55 = vpop.f32.mrf.mxu1  ;;  %14945 = vmatmul.mubr.msk.f32.gmra.mxu1 %vm441_vm0, %v16443_v48  ;;  %14903 = vmatprep.mubr.msk.f32.mxu0 %vm441_vm0, %v20740_v43  ;;  %v12737_v33 = vld [vmem:[%s16256_s21 + $0x159] sm:$0xff]  ;;  %v12738_v43 = vld [vmem:[%s16256_s21 + $0x169] sm:$0xff] }
  0xf4   : > { %v850_v9 = vpop.f32.mrf.mxu0  ;;  %14947 = vmatprep.mubr.msk.f32.mxu1 %vm441_vm0, %v16451_v50 }
  0xf5   : > { %v1137_v61 = vpop.f32.mrf.mxu1 }
  0xf6   : > { %v14563_v46 = vpop.f32.mrf.mxu0  ;;  %14904 = vmatmul.mubr.msk.f32.gmra.mxu0 %vm441_vm0, %v16583_v21 }
  0xf7   : > { %v14613_v1 = vpop.f32.mrf.mxu1  ;;  %14948 = vmatmul.mubr.msk.f32.gmra.mxu1 %vm441_vm0, %v16463_v52  ;;  %14906 = vmatprep.mubr.msk.f32.mxu0 %vm441_vm0, %v16586_v24  ;;  %v12730_v24 = vld [vmem:[%s16256_s21 + $0x109] sm:$0xff] }
  0xf8   : > { %v17136_v48 = vadd.f32 %v14613_v1, %v14557_v34  ;;  %v17138_v15 = vpop.f32.mrf.mxu0  ;;  %14950 = vmatprep.mubr.msk.f32.mxu1 %vm441_vm0, %v16471_v54  ;;  %v12735_v34 = vld [vmem:[%s16256_s21 + $0x141] sm:$0xff] }
  0xf9   : > { %v1145_v50 = vpop.f32.mrf.mxu1 }
  0xfa   : > { %v17142_v20 = vadd.f32 %v1145_v50, %v840_v53  ;;  %v14566_v7 = vpop.f32.mrf.mxu0  ;;  %14907 = vmatmul.mubr.msk.f32.gmra.mxu0 %vm441_vm0, %v16606_v37  ;;  %v12739_v50 = vld [vmem:[%s16256_s21 + $0x171] sm:$0xff] }
  0xfb   : > { %v14616_v21 = vpop.f32.mrf.mxu1  ;;  %14951 = vmatmul.mubr.msk.f32.gmra.mxu1 %vm441_vm0, %v16483_v56  ;;  %14909 = vmatprep.mubr.msk.f32.mxu0 %vm441_vm0, %v16612_v17  ;;  %v20741_v56 = vld [vmem:[#allocation31_spill] sm:$0xff] }
  0xfc   : > { %v868_v52 = vpop.f32.mrf.mxu0  ;;  %14953 = vmatprep.mubr.msk.f32.mxu1 %vm441_vm0, %v16491_v58  ;;  %v12731_v58 = vld [vmem:[%s16256_s21 + $0x111] sm:$0xff] }
  0xfd   : > { %v1155_v54 = vpop.f32.mrf.mxu1 }
  0xfe   : > { %v14569_v63 = vpop.f32.mrf.mxu0  ;;  %14910 = vmatmul.mubr.msk.f32.gmra.mxu0 %vm441_vm0, %v16629_v14  ;;  %v12732_v14 = vld [vmem:[%s16256_s21 + $0x121] sm:$0xff] }
  0xff   : > { %v14619_v37 = vpop.f32.mrf.mxu1  ;;  %14954 = vmatmul.mubr.msk.f32.gmra.mxu1 %vm441_vm0, %v16503_v60  ;;  %14912 = vmatprep.mubr.msk.f32.mxu0 %vm441_vm0, %v20741_v56 }
 0x100   : > { %v17159_v17 = vadd.f32 %v14619_v37, %v14563_v46  ;;  %v17161_v22 = vpop.f32.mrf.mxu0  ;;  %14956 = vmatprep.mubr.msk.f32.mxu1 %vm441_vm0, %v12730_v24 }
 0x101   : > { %v17165_v25 = vpop.f32.mrf.mxu1 }
 0x102   : > { %v14572_v0 = vpop.f32.mrf.mxu0  ;;  %14913 = vmatmul.mubr.msk.f32.gmra.mxu0 %vm441_vm0, %v16652_v30 }
 0x103   : > { %v14622_v60 = vpop.f32.mrf.mxu1  ;;  %14957 = vmatmul.mubr.msk.f32.gmra.mxu1 %vm441_vm0, %v12731_v58  ;;  %14915 = vmatprep.mubr.msk.f32.mxu0 %vm441_vm0, %v16876_v13  ;;  %v12675_v13 = vld [vmem:[%s16256_s21 + $0x1a0] sm:$0xff]  ;;  %v12791_v58 = vld [vmem:[%s16256_s21 + $0xb2] sm:$0xff] }
 0x104   : > { %v886_v29 = vpop.f32.mrf.mxu0  ;;  %14959 = vmatprep.mubr.msk.f32.mxu1 %vm441_vm0, %v12732_v14  ;;  %v12792_v0 = vld [vmem:[%s16256_s21 + $0xc2] sm:$0xff] }
 0x105   : > { %v1173_v62 = vpop.f32.mrf.mxu1 }
 0x106   : > { %v14575_v44 = vpop.f32.mrf.mxu0  ;;  %14916 = vmatmul.mubr.msk.f32.gmra.mxu0 %vm441_vm0, %v16890_v18 }
 0x107   : > { %v14625_v30 = vpop.f32.mrf.mxu1  ;;  %14960 = vmatmul.mubr.msk.f32.gmra.mxu1 %vm441_vm0, %v12733_v35  ;;  %14918 = vmatprep.mubr.msk.f32.mxu0 %vm441_vm0, %v12674_v6  ;;  %v12794_v6 = vld [vmem:[%s16256_s21 + $0xda] sm:$0xff] }
 0x108   : > { %v17182_v32 = vadd.f32 %v14625_v30, %v14569_v63  ;;  %v17184_v39 = vpop.f32.mrf.mxu0  ;;  %14962 = vmatprep.mubr.msk.f32.mxu1 %vm441_vm0, %v12734_v31  ;;  %v12795_v30 = vld [vmem:[%s16256_s21 + $0xe2] sm:$0xff] }
 0x109   : > { %v17188_v47 = vpop.f32.mrf.mxu1 }
 0x10a   : > { %v14578_v53 = vpop.f32.mrf.mxu0  ;;  %14919 = vmatmul.mubr.msk.f32.gmra.mxu0 %vm441_vm0, %v12675_v13 }
 0x10b   : > { %v14628_v18 = vpop.f32.mrf.mxu1  ;;  %14963 = vmatmul.mubr.msk.f32.gmra.mxu1 %vm441_vm0, %v12735_v34  ;;  %14985 = vmatprep.mubr.msk.f32.mxu0 %vm441_vm0, %v16609_v42 }
 0x10c   : > { %v904_v3 = vpop.f32.mrf.mxu0  ;;  %14965 = vmatprep.mubr.msk.f32.mxu1 %vm441_vm0, %v12736_v49  ;;  %v12796_v49 = vld [vmem:[%s16256_s21 + $0xf2] sm:$0xff] }
 0x10d   : > { %v1191_v55 = vpop.f32.mrf.mxu1 }
 0x10e   : > { %v14651_v9 = vpop.f32.mrf.mxu0  ;;  %14986 = vmatmul.mubr.msk.f32.vlgmr.msra.gmra.mxu0 %vm441_vm0, %v16624_v19 }
 0x10f   : > { %v14631_v61 = vpop.f32.mrf.mxu1  ;;  %v1577_v46 = vadd.f32 %v14651_v9, %v17076_v51  ;;  %14966 = vmatmul.mubr.msk.f32.gmra.mxu1 %vm441_vm0, %v12737_v33  ;;  %14988 = vmatprep.mubr.msk.f32.mxu0 %vm441_vm0, %v16632_v12 }
 0x110   : > { %v17204_v1 = vadd.f32 %v14631_v61, %v14575_v44  ;;  %v1433_v42 = vpop.f32.mrf.mxu0  ;;  %14968 = vmatprep.mubr.msk.f32.mxu1 %vm441_vm0, %v12738_v43  ;;  %v12798_v43 = vld [vmem:[%s16256_s21 + $0x10a] sm:$0xff] }
 0x111   : > { %v17208_v7 = vpop.f32.mrf.mxu1  ;;  %v17211_v21 = vadd.f32 %v1433_v42, %v17080_v16  ;;  %v12799_v42 = vld [vmem:[%s16256_s21 + $0x112] sm:$0xff] }
 0x112   : > { %v14654_v19 = vpop.f32.mrf.mxu0  ;;  %14989 = vmatmul.mubr.msk.f32.gmra.mxu0 %vm441_vm0, %v16647_v10 }
 0x113   : > { %v14634_v51 = vpop.f32.mrf.mxu1  ;;  %14969 = vmatmul.mubr.msk.f32.gmra.mxu1 %vm441_vm0, %v12739_v50  ;;  %14991 = vmatprep.mubr.msk.f32.mxu0 %vm441_vm0, %v16655_v8 }
 0x114   : > { %v1443_v12 = vpop.f32.mrf.mxu0  ;;  %14971 = vmatprep.mubr.msk.f32.mxu1 %vm441_vm0, %v16997_v41  ;;  %v12800_v51 = vld [vmem:[%s16256_s21 + $0x122] sm:$0xff] }
 0x115   : > { %v1209_v52 = vpop.f32.mrf.mxu1 }
 0x116   : > { %v14657_v54 = vpop.f32.mrf.mxu0  ;;  %14992 = vmatmul.mubr.msk.f32.gmra.mxu0 %vm441_vm0, %v16669_v2 }
 0x117   : > { %v17222_v16 = vpop.f32.mrf.mxu1  ;;  %v1579_v10 = vadd.f32 %v14657_v54, %v17096_v26  ;;  %14972 = vmatmul.mubr.msk.f32.gmra.mxu1 %vm441_vm0, %v17006_v45  ;;  %14994 = vmatprep.mubr.msk.f32.mxu0 %vm441_vm0, %v16674_v36  ;;  %v12790_v26 = vld [vmem:[%s16256_s21 + $0xaa] sm:$0xff] }
 0x118   : > { %v1451_v8 = vpop.f32.mrf.mxu0 }
 0x119   : > { %v17229_v24 = vpop.f32.mrf.mxu1  ;;  %v17232_v41 = vadd.f32 %v1451_v8, %v17100_v28  ;;  %v12802_v8 = vld [vmem:[%s16256_s21 + $0x13a] sm:$0xff] }
 0x11a   : > { %20742 = vst [vmem:[#allocation23_spill] sm:$0xff] %v17229_v24  ;;  %v14660_v63 = vpop.f32.mrf.mxu0  ;;  %14995 = vmatmul.mubr.msk.f32.gmra.mxu0 %vm441_vm0, %v16687_v23 }
 0x11b   : > { %v14640_v2 = vpop.f32.mrf.mxu1  ;;  %14997 = vmatprep.mubr.msk.f32.mxu0 %vm441_vm0, %v16692_v5 }
 0x11c   : > { %v1461_v45 = vpop.f32.mrf.mxu0 }
 0x11d   : > { %v1227_v37 = vpop.f32.mrf.mxu1 }
 0x11e   : > { %v14663_v36 = vpop.f32.mrf.mxu0  ;;  %14998 = vmatmul.mubr.msk.f32.gmra.mxu0 %vm441_vm0, %v16705_v27  ;;  %v12803_v37 = vld [vmem:[%s16256_s21 + $0x142] sm:$0xff] }
 0x11f   : > { %v1581_v28 = vadd.f32 %v14663_v36, %v17116_v38  ;;  %v14707_v56 = vpop.f32.mrf.mxu1  ;;  %15000 = vmatprep.mubr.msk.f32.mxu0 %vm441_vm0, %v12790_v26  ;;  %v12793_v38 = vld [vmem:[%s16256_s21 + $0xca] sm:$0xff] }
 0x120   : > { %v17244_v23 = vadd.f32 %v14707_v56, %v1577_v46  ;;  %v1469_v14 = vpop.f32.mrf.mxu0  ;;  %v12804_v56 = vld [vmem:[%s16256_s21 + $0x152] sm:$0xff] }
 0x121   : > { %v17248_v5 = vadd.f32 %v1469_v14, %v17120_v40  ;;  %v17250_v60 = vpop.f32.mrf.mxu1 }
 0x122   : > { %v14666_v29 = vpop.f32.mrf.mxu0  ;;  %15001 = vmatmul.mubr.msk.f32.gmra.mxu0 %vm441_vm0, %v12791_v58 }
 0x123   : > { %v14710_v27 = vpop.f32.mrf.mxu1  ;;  %15003 = vmatprep.mubr.msk.f32.mxu0 %vm441_vm0, %v12792_v0  ;;  %v12805_v29 = vld [vmem:[%s16256_s21 + $0x15a] sm:$0xff] }
 0x124   : > { %v1479_v35 = vpop.f32.mrf.mxu0  ;;  %v12806_v27 = vld [vmem:[%s16256_s21 + $0x16a] sm:$0xff] }
 0x125   : > { %v1802_v62 = vpop.f32.mrf.mxu1 }
 0x126   : > { %v14669_v31 = vpop.f32.mrf.mxu0  ;;  %15004 = vmatmul.mubr.msk.f32.gmra.mxu0 %vm441_vm0, %v12793_v38 }
 0x127   : > { %v1583_v40 = vadd.f32 %v14669_v31, %v17136_v48  ;;  %v14713_v44 = vpop.f32.mrf.mxu1  ;;  %15006 = vmatprep.mubr.msk.f32.mxu0 %vm441_vm0, %v12794_v6  ;;  %v12797_v48 = vld [vmem:[%s16256_s21 + $0xfa] sm:$0xff]  ;;  %v12807_v31 = vld [vmem:[%s16256_s21 + $0x172] sm:$0xff] }
 0x128   : > { %v17260_v13 = vadd.f32 %v14713_v44, %v1579_v10  ;;  %v1487_v34 = vpop.f32.mrf.mxu0 }
 0x129   : > { %v17264_v53 = vadd.f32 %v1487_v34, %v17142_v20  ;;  %v17266_v18 = vpop.f32.mrf.mxu1 }
 0x12a   : > { %v14672_v3 = vpop.f32.mrf.mxu0  ;;  %15007 = vmatmul.mubr.msk.f32.gmra.mxu0 %vm441_vm0, %v12795_v30 }
 0x12b   : > { %v14716_v33 = vpop.f32.mrf.mxu1  ;;  %15009 = vmatprep.mubr.msk.f32.mxu0 %vm441_vm0, %v12796_v49 }
 0x12c   : > { %v1497_v55 = vpop.f32.mrf.mxu0 }
 0x12d   : > { %v1820_v9 = vpop.f32.mrf.mxu1 }
 0x12e   : > { %v14675_v61 = vpop.f32.mrf.mxu0  ;;  %15010 = vmatmul.mubr.msk.f32.gmra.mxu0 %vm441_vm0, %v12797_v48 }
 0x12f   : > { %v1585_v20 = vadd.f32 %v14675_v61, %v17159_v17  ;;  %v14719_v46 = vpop.f32.mrf.mxu1  ;;  %15012 = vmatprep.mubr.msk.f32.mxu0 %vm441_vm0, %v12798_v43  ;;  %v12801_v17 = vld [vmem:[%s16256_s21 + $0x12a] sm:$0xff] }
 0x130   : > { %v17276_v50 = vadd.f32 %v14719_v46, %v1581_v28  ;;  %v17278_v19 = vpop.f32.mrf.mxu0 }
 0x131   : > { %v17281_v12 = vpop.f32.mrf.mxu1 }
 0x132   : > { %v14678_v52 = vpop.f32.mrf.mxu0  ;;  %15013 = vmatmul.mubr.msk.f32.gmra.mxu0 %vm441_vm0, %v12799_v42 }
 0x133   : > { %v14722_v54 = vpop.f32.mrf.mxu1  ;;  %15015 = vmatprep.mubr.msk.f32.mxu0 %vm441_vm0, %v12800_v51 }
 0x134   : > { %v1515_v10 = vpop.f32.mrf.mxu0 }
 0x135   : > { %v1838_v63 = vpop.f32.mrf.mxu1 }
 0x136   : > { %v14681_v2 = vpop.f32.mrf.mxu0  ;;  %15016 = vmatmul.mubr.msk.f32.gmra.mxu0 %vm441_vm0, %v12801_v17 }
 0x137   : > { %v1587_v45 = vadd.f32 %v14681_v2, %v17182_v32  ;;  %v14725_v26 = vpop.f32.mrf.mxu1  ;;  %15018 = vmatprep.mubr.msk.f32.mxu0 %vm441_vm0, %v12802_v8 }
 0x138   : > { %v17291_v36 = vadd.f32 %v14725_v26, %v1583_v40  ;;  %v17293_v28 = vpop.f32.mrf.mxu0 }
 0x139   : > { %v17296_v58 = vpop.f32.mrf.mxu1 }
 0x13a   : > { %v14684_v14 = vpop.f32.mrf.mxu0  ;;  %15019 = vmatmul.mubr.msk.f32.gmra.mxu0 %vm441_vm0, %v12803_v37 }
 0x13b   : > { %v14728_v0 = vpop.f32.mrf.mxu1  ;;  %15021 = vmatprep.mubr.msk.f32.mxu0 %vm441_vm0, %v12804_v56 }
 0x13c   : > { %v1533_v32 = vpop.f32.mrf.mxu0  ;;  %v20667_v0 = vmov 0.0  }
 0x13d   : > { %v1856_v38 = vpop.f32.mrf.mxu1  ;;  %446 = vst.msk [vmem:[#allocation2 + $0x18] sm:$0xff] %vm441_vm0, %v20667_v0  ;;  %447 = vst.msk [vmem:[#allocation2 + $0x20] sm:$0xff] %vm441_vm0, %v20667_v0 }
 0x13e   : > { %v14687_v35 = vpop.f32.mrf.mxu0  ;;  %15022 = vmatmul.mubr.msk.f32.gmra.mxu0 %vm441_vm0, %v12805_v29  ;;  %442 = vst.msk [vmem:[#allocation2] sm:$0xff] %vm441_vm0, %v20667_v0  ;;  %443 = vst.msk [vmem:[#allocation2 + $0x8] sm:$0xff] %vm441_vm0, %v20667_v0 }
 0x13f   : > { %v1589_v6 = vadd.f32 %v14687_v35, %v17204_v1  ;;  %v14731_v62 = vpop.f32.mrf.mxu1  ;;  %15024 = vmatprep.mubr.msk.f32.mxu0 %vm441_vm0, %v12806_v27  ;;  %v1223_v1 = vadd.f32 %v17222_v16, %v17041_v57  ;;  %449 = vst.msk [vmem:[#allocation2 + $0x30] sm:$0xff] %vm441_vm0, %v20667_v0  ;;  %450 = vst.msk [vmem:[#allocation2 + $0x38] sm:$0xff] %vm441_vm0, %v20667_v0 }
 0x140   : > { %v17306_v40 = vadd.f32 %v14731_v62, %v1585_v20  ;;  %v17308_v44 = vpop.f32.mrf.mxu0  ;;  %452 = vst.msk [vmem:[#allocation2 + $0x48] sm:$0xff] %vm441_vm0, %v20667_v0  ;;  %453 = vst.msk [vmem:[#allocation2 + $0x50] sm:$0xff] %vm441_vm0, %v20667_v0 }
 0x141   : > { %20743 = vst [vmem:[#allocation25_spill] sm:$0xff] %v17308_v44  ;;  %v17310_v30 = vpop.f32.mrf.mxu1  ;;  %455 = vst.msk [vmem:[#allocation2 + $0x60] sm:$0xff] %vm441_vm0, %v20667_v0 }
 0x142   : > { %v14690_v34 = vpop.f32.mrf.mxu0  ;;  %15025 = vmatmul.mubr.msk.f32.gmra.mxu0 %vm441_vm0, %v12807_v31  ;;  %456 = vst.msk [vmem:[#allocation2 + $0x68] sm:$0xff] %vm441_vm0, %v20667_v0  ;;  %458 = vst.msk [vmem:[#allocation2 + $0x78] sm:$0xff] %vm441_vm0, %v20667_v0 }
 0x143   : > { %v14734_v49 = vpop.f32.mrf.mxu1  ;;  %15027 = vmatprep.mubr.msk.f32.mxu0 %vm441_vm0, %v17044_v59  ;;  %459 = vst.msk [vmem:[#allocation2 + $0x80] sm:$0xff] %vm441_vm0, %v20667_v0  ;;  %461 = vst.msk [vmem:[#allocation2 + $0x90] sm:$0xff] %vm441_vm0, %v20667_v0 }
 0x144   : > { %v1551_v3 = vpop.f32.mrf.mxu0  ;;  %462 = vst.msk [vmem:[#allocation2 + $0x98] sm:$0xff] %vm441_vm0, %v20667_v0  ;;  %464 = vst.msk [vmem:[#allocation2 + $0xa8] sm:$0xff] %vm441_vm0, %v20667_v0 }
 0x145   : > { %v1874_v33 = vpop.f32.mrf.mxu1  ;;  %465 = vst.msk [vmem:[#allocation2 + $0xb0] sm:$0xff] %vm441_vm0, %v20667_v0  ;;  %467 = vst.msk [vmem:[#allocation2 + $0xc0] sm:$0xff] %vm441_vm0, %v20667_v0 }
 0x146   : > { %v14693_v48 = vpop.f32.mrf.mxu0  ;;  %15028 = vmatmul.mubr.msk.f32.gmra.mxu0 %vm441_vm0, %v17060_v11  ;;  %468 = vst.msk [vmem:[#allocation2 + $0xc8] sm:$0xff] %vm441_vm0, %v20667_v0  ;;  %470 = vst.msk [vmem:[#allocation2 + $0xd8] sm:$0xff] %vm441_vm0, %v20667_v0 }
 0x147   : > { %v1591_v55 = vadd.f32 %v14693_v48, %v1223_v1  ;;  %v14737_v43 = vpop.f32.mrf.mxu1  ;;  %471 = vst.msk [vmem:[#allocation2 + $0xe0] sm:$0xff] %vm441_vm0, %v20667_v0  ;;  %497 = vst.msk [vmem:[#allocation3] sm:$0xff] %vm441_vm0, %v20667_v0 }
 0x148   : > { %v17319_v9 = vadd.f32 %v14737_v43, %v1587_v45  ;;  %v17321_v61 = vpop.f32.mrf.mxu0  ;;  %498 = vst.msk [vmem:[#allocation3 + $0x8] sm:$0xff] %vm441_vm0, %v20667_v0  ;;  %500 = vst.msk [vmem:[#allocation3 + $0x18] sm:$0xff] %vm441_vm0, %v20667_v0 }
 0x149   : > { %20744 = vst [vmem:[#allocation26_spill] sm:$0xff] %v17321_v61  ;;  %v17323_v20 = vpop.f32.mrf.mxu1  ;;  %501 = vst.msk [vmem:[#allocation3 + $0x20] sm:$0xff] %vm441_vm0, %v20667_v0 }
 0x14a   : > { %v14696_v46 = vpop.f32.mrf.mxu0  ;;  %503 = vst.msk [vmem:[#allocation3 + $0x30] sm:$0xff] %vm441_vm0, %v20667_v0  ;;  %504 = vst.msk [vmem:[#allocation3 + $0x38] sm:$0xff] %vm441_vm0, %v20667_v0 }
 0x14b   : > { %v14740_v42 = vpop.f32.mrf.mxu1  ;;  %506 = vst.msk [vmem:[#allocation3 + $0x48] sm:$0xff] %vm441_vm0, %v20667_v0  ;;  %507 = vst.msk [vmem:[#allocation3 + $0x50] sm:$0xff] %vm441_vm0, %v20667_v0 }
 0x14c   : > { %v1569_v59 = vpop.f32.mrf.mxu0  ;;  %509 = vst.msk [vmem:[#allocation3 + $0x60] sm:$0xff] %vm441_vm0, %v20667_v0  ;;  %510 = vst.msk [vmem:[#allocation3 + $0x68] sm:$0xff] %vm441_vm0, %v20667_v0 }
 0x14d   : > { %v1892_v51 = vpop.f32.mrf.mxu1  ;;  %512 = vst.msk [vmem:[#allocation3 + $0x78] sm:$0xff] %vm441_vm0, %v20667_v0  ;;  %513 = vst.msk [vmem:[#allocation3 + $0x80] sm:$0xff] %vm441_vm0, %v20667_v0  ;;  %v12743_v59 = vld [vmem:[%s16256_s21 + $0x1a1] sm:$0xff] }
 0x14e   : > { %v14763_v52 = vpop.f32.mrf.mxu0  ;;  %515 = vst.msk [vmem:[#allocation3 + $0x90] sm:$0xff] %vm441_vm0, %v20667_v0  ;;  %516 = vst.msk [vmem:[#allocation3 + $0x98] sm:$0xff] %vm441_vm0, %v20667_v0  ;;  %v12850_v51 = vld [vmem:[%s20628_s3 + $0x28] sm:$0xff] }
 0x14f   : > { %v14743_v54 = vpop.f32.mrf.mxu1  ;;  %v17326_v57 = vadd.f32 %v14763_v52, %v17244_v23  ;;  %v12852_v23 = vld [vmem:[%s20628_s3 + $0x38] sm:$0xff]  ;;  %518 = vst.msk [vmem:[#allocation3 + $0xa8] sm:$0xff] %vm441_vm0, %v20667_v0  ;;  %519 = vst.msk [vmem:[#allocation3 + $0xb0] sm:$0xff] %vm441_vm0, %v20667_v0 }
 0x150   : > { %v17328_v16 = vadd.f32 %v14743_v54, %v1589_v6  ;;  %v17330_v11 = vpop.f32.mrf.mxu0  ;;  %15033 = vmatprep.subr.mxu1 %v12852_v23  ;;  %521 = vst.msk [vmem:[#allocation3 + $0xc0] sm:$0xff] %vm441_vm0, %v20667_v0  ;;  %522 = vst.msk [vmem:[#allocation3 + $0xc8] sm:$0xff] %vm441_vm0, %v20667_v0 }
 0x151   : > { %v17332_v17 = vpop.f32.mrf.mxu1  ;;  %524 = vst.msk [vmem:[#allocation3 + $0xd8] sm:$0xff] %vm441_vm0, %v20667_v0  ;;  %525 = vst.msk [vmem:[#allocation3 + $0xe0] sm:$0xff] %vm441_vm0, %v20667_v0  ;;  %15034 = vmatpush3.msra.mxu1 %v12852_v23 }
 0x152   : > { %20745 = vst [vmem:[#allocation28_spill] sm:$0xff] %v17332_v17  ;;  %v14766_v10 = vpop.f32.mrf.mxu0  ;;  %527 = vst.msk [vmem:[#allocation3 + $0xf0] sm:$0xff] %vm441_vm0, %v20667_v0 }
 0x153   : > { %v14746_v8 = vpop.f32.mrf.mxu1  ;;  %528 = vst.msk [vmem:[#allocation3 + $0xf8] sm:$0xff] %vm441_vm0, %v20667_v0  ;;  %530 = vst.msk [vmem:[#allocation3 + $0x108] sm:$0xff] %vm441_vm0, %v20667_v0  ;;  %v12849_v10 = vld [vmem:[%s20628_s3 + $0x20] sm:$0xff] }
 0x154   : > { %v2160_v63 = vpop.f32.mrf.mxu0  ;;  %531 = vst.msk [vmem:[#allocation3 + $0x110] sm:$0xff] %vm441_vm0, %v20667_v0  ;;  %533 = vst.msk [vmem:[#allocation3 + $0x120] sm:$0xff] %vm441_vm0, %v20667_v0 }
 0x155   : > { %v1910_v2 = vpop.f32.mrf.mxu1  ;;  %534 = vst.msk [vmem:[#allocation3 + $0x128] sm:$0xff] %vm441_vm0, %v20667_v0  ;;  %536 = vst.msk [vmem:[#allocation3 + $0x138] sm:$0xff] %vm441_vm0, %v20667_v0  ;;  %v12811_v63 = vld [vmem:[%s16256_s21 + $0x1a2] sm:$0xff] }
 0x156   : > { %v14769_v45 = vpop.f32.mrf.mxu0  ;;  %537 = vst.msk [vmem:[#allocation3 + $0x140] sm:$0xff] %vm441_vm0, %v20667_v0  ;;  %539 = vst.msk [vmem:[#allocation3 + $0x150] sm:$0xff] %vm441_vm0, %v20667_v0  ;;  %v4009_v2 = vld [vmem:[#allocation2 + $0x1] sm:$0xff] }
 0x157   : > { %v14749_v26 = vpop.f32.mrf.mxu1  ;;  %v17335_v37 = vadd.f32 %v14769_v45, %v17260_v13  ;;  %540 = vst.msk [vmem:[#allocation3 + $0x158] sm:$0xff] %vm441_vm0, %v20667_v0  ;;  %542 = vst.msk [vmem:[#allocation3 + $0x168] sm:$0xff] %vm441_vm0, %v20667_v0 }
 0x158   : > { %v17340_v56 = vadd.f32 %v14749_v26, %v1591_v55  ;;  %v17342_v14 = vpop.f32.mrf.mxu0  ;;  %543 = vst.msk [vmem:[#allocation3 + $0x170] sm:$0xff] %vm441_vm0, %v20667_v0  ;;  %545 = vst.msk [vmem:[#allocation3 + $0x180] sm:$0xff] %vm441_vm0, %v20667_v0  ;;  %v12851_v55 = vld [vmem:[%s20628_s3 + $0x30] sm:$0xff]  ;;  %v12896_v26 = vld [vmem:[%s20628_s3 + $0x98] sm:$0xff] }
 0x159   : > { %546 = vst.msk [vmem:[#allocation3 + $0x188] sm:$0xff] %vm441_vm0, %v20667_v0  ;;  %548 = vst.msk [vmem:[#allocation3 + $0x198] sm:$0xff] %vm441_vm0, %v20667_v0  ;;  %v17456_v13 = vpop.f32.mrf.mxu1  ;;  %15035 = vmatprep.subr.mxu1 %v12851_v55  ;;  %15113 = vmatprep.subr.mxu0 %v12896_v26 }
 0x15a   : > { %549 = vst.msk [vmem:[#allocation3 + $0x1a0] sm:$0xff] %vm441_vm0, %v20667_v0  ;;  %20746 = vst [vmem:[#allocation29_spill] sm:$0xff] %v17456_v13  ;;  %v14772_v29 = vpop.f32.mrf.mxu0  ;;  %15036 = vmatpush3.msra.mxu1 %v12851_v55  ;;  %15114 = vmatpush3.msra.mxu0 %v12896_v26 }
 0x15b   : > { %v14752_v32 = vpop.f32.mrf.mxu1  ;;  %15037 = vmatprep.subr.mxu1 %v12850_v51  ;;  %v12895_v29 = vld [vmem:[%s20628_s3 + $0x90] sm:$0xff] }
 0x15c   : > { %v2178_v27 = vpop.f32.mrf.mxu0  ;;  %15038 = vmatpush3.msra.mxu1 %v12850_v51  ;;  %15115 = vmatprep.subr.mxu0 %v12895_v29 }
 0x15d   : > { %v1928_v38 = vpop.f32.mrf.mxu1  ;;  %15039 = vmatprep.subr.mxu1 %v12849_v10  ;;  %15116 = vmatpush3.msra.mxu0 %v12895_v29 }
 0x15e   : > { %v14775_v35 = vpop.f32.mrf.mxu0  ;;  %15040 = vmatpush3.msra.mxu1 %v12849_v10 }
 0x15f   : > { %v2298_v6 = vadd.f32 %v14775_v35, %v17276_v50  ;;  %v14819_v62 = vpop.f32.mrf.mxu1  ;;  %v12742_v50 = vld [vmem:[%s16256_s21 + $0x199] sm:$0xff] }
 0x160   : > { %v17460_v31 = vadd.f32 %v14819_v62, %v17326_v57  ;;  %v17462_v34 = vpop.f32.mrf.mxu0  ;;  %14974 = vmatprep.mubr.msk.f32.mxu1 %vm441_vm0, %v12742_v50 }
 0x161   : > { %v17464_v49 = vpop.f32.mrf.mxu1  ;;  %14975 = vmatmul.mubr.msk.f32.gmra.mxu1 %vm441_vm0, %v12743_v59 }
 0x162   : > { %v14778_v3 = vpop.f32.mrf.mxu0  ;;  %15041 = vmatprep.mubr.msk.f32.mxu1 %vm441_vm0, %v4009_v2 }
 0x163   : > { %v14822_v1 = vpop.f32.mrf.mxu1  ;;  %v12894_v3 = vld [vmem:[%s20628_s3 + $0x88] sm:$0xff] }
 0x164   : > { %v2196_v33 = vpop.f32.mrf.mxu0  ;;  %15117 = vmatprep.subr.mxu0 %v12894_v3 }
 0x165   : > { %v2518_v48 = vpop.f32.mrf.mxu1  ;;  %15118 = vmatpush3.msra.mxu0 %v12894_v3 }
 0x166   : > { %v14781_v43 = vpop.f32.mrf.mxu0  ;;  %v12893_v48 = vld [vmem:[%s20628_s3 + $0x80] sm:$0xff] }
 0x167   : > { %v2300_v46 = vadd.f32 %v14781_v43, %v17291_v36  ;;  %v14825_v42 = vpop.f32.mrf.mxu1  ;;  %v12810_v36 = vld [vmem:[%s16256_s21 + $0x19a] sm:$0xff]  ;;  %15119 = vmatprep.subr.mxu0 %v12893_v48 }
 0x168   : > { %v17477_v52 = vadd.f32 %v14825_v42, %v17335_v37  ;;  %v17479_v54 = vpop.f32.mrf.mxu0  ;;  %15030 = vmatprep.mubr.msk.f32.mxu0 %vm441_vm0, %v12810_v36  ;;  %15120 = vmatpush3.msra.mxu0 %v12893_v48 }
 0x169   : > { %v17482_v57 = vpop.f32.mrf.mxu1  ;;  %15031 = vmatmul.mubr.msk.f32.gmra.mxu0 %vm441_vm0, %v12811_v63 }
 0x16a   : > { %v14784_v8 = vpop.f32.mrf.mxu0 }
 0x16b   : > { %v14828_v45 = vpop.f32.mrf.mxu1 }
 0x16c   : > { %v2214_v37 = vpop.f32.mrf.mxu0 }
 0x16d   : > { %v2536_v23 = vpop.f32.mrf.mxu1 }
 0x16e   : > { %v14787_v32 = vpop.f32.mrf.mxu0 }
 0x16f   : > { %v2302_v27 = vadd.f32 %v14787_v32, %v17306_v40  ;;  %v14831_v38 = vpop.f32.mrf.mxu1 }
 0x170   : > { %v17499_v35 = vadd.f32 %v14831_v38, %v2298_v6  ;;  %v17501_v62 = vpop.f32.mrf.mxu0 }
 0x171   : > { %v17506_v1 = vpop.f32.mrf.mxu1 }
 0x172   : > { %v14790_v33 = vpop.f32.mrf.mxu0 }
 0x173   : > { %v14834_v40 = vpop.f32.mrf.mxu1 }
 0x174   : > { %v2232_v55 = vpop.f32.mrf.mxu0 }
 0x175   : > { %v2554_v6 = vpop.f32.mrf.mxu1 }
 0x176   : > { %v14793_v43 = vpop.f32.mrf.mxu0 }
 0x177   : > { %v2304_v50 = vadd.f32 %v14793_v43, %v17319_v9  ;;  %v14837_v42 = vpop.f32.mrf.mxu1 }
 0x178   : > { %v2658_v59 = vadd.f32 %v14837_v42, %v2300_v46  ;;  %v17512_v51 = vpop.f32.mrf.mxu0 }
 0x179   : > { %v17514_v36 = vpop.f32.mrf.mxu1 }
 0x17a   : > { %v14796_v10 = vpop.f32.mrf.mxu0 }
 0x17b   : > { %v14840_v8 = vpop.f32.mrf.mxu1 }
 0x17c   : > { %v2250_v63 = vpop.f32.mrf.mxu0 }
 0x17d   : > { %v2572_v2 = vpop.f32.mrf.mxu1 }
 0x17e   : > { %v14799_v45 = vpop.f32.mrf.mxu0 }
 0x17f   : > { %v2306_v26 = vadd.f32 %v14799_v45, %v17328_v16  ;;  %v14843_v37 = vpop.f32.mrf.mxu1 }
 0x180   : > { %v2660_v23 = vadd.f32 %v14843_v37, %v2302_v27  ;;  %v17517_v29 = vpop.f32.mrf.mxu0 }
 0x181   : > { %20747 = vst [vmem:[#allocation4_spill] sm:$0xff] %v17517_v29  ;;  %v17519_v32 = vpop.f32.mrf.mxu1 }
 0x182   : > { %v14802_v9 = vpop.f32.mrf.mxu0 }
 0x183   : > { %v14846_v38 = vpop.f32.mrf.mxu1 }
 0x184   : > { %v2268_v46 = vpop.f32.mrf.mxu0 }
 0x185   : > { %v2590_v3 = vpop.f32.mrf.mxu1 }
 0x186   : > { %v14805_v33 = vpop.f32.mrf.mxu0 }
 0x187   : > { %v2308_v48 = vadd.f32 %v14805_v33, %v17340_v56  ;;  %v14849_v40 = vpop.f32.mrf.mxu1 }
 0x188   : > { %v2662_v55 = vadd.f32 %v14849_v40, %v2304_v50  ;;  %v17522_v6 = vpop.f32.mrf.mxu0 }
 0x189   : > { %20748 = vst [vmem:[#allocation5_spill] sm:$0xff] %v17522_v6  ;;  %v17524_v43 = vpop.f32.mrf.mxu1 }
 0x18a   : > { %20749 = vst [vmem:[#allocation6_spill] sm:$0xff] %v17524_v43  ;;  %v14808_v16 = vpop.f32.mrf.mxu0 }
 0x18b   : > { %v14852_v42 = vpop.f32.mrf.mxu1 }
 0x18c   : > { %v2286_v27 = vpop.f32.mrf.mxu0 }
 0x18d   : > { %v2608_v10 = vpop.f32.mrf.mxu1 }
 0x18e   : > { %v14875_v8 = vpop.f32.mrf.mxu0 }
 0x18f   : > { %v14855_v63 = vpop.f32.mrf.mxu1  ;;  %v17527_v2 = vadd.f32 %v14875_v8, %v17460_v31  ;;  %v17541_v31 = vld [vmem:[%s20628_s3 + $0x18] sm:$0xff] }
 0x190   : > { %v2664_v45 = vadd.f32 %v14855_v63, %v2306_v26  ;;  %v17529_v37 = vpop.f32.mrf.mxu0  ;;  %15053 = vmatprep.subr.mxu1 %v17541_v31 }
 0x191   : > { %v17531_v9 = vpop.f32.mrf.mxu1 }
 0x192   : > { %20750 = vst [vmem:[#allocation7_spill] sm:$0xff] %v17531_v9  ;;  %v14878_v56 = vpop.f32.mrf.mxu0 }
 0x193   : > { %v14858_v50 = vpop.f32.mrf.mxu1 }
 0x194   : > { %v2877_v38 = vpop.f32.mrf.mxu0 }
 0x195   : > { %v2626_v46 = vpop.f32.mrf.mxu1  ;;  %v17554_v38 = vld [vmem:[%s20628_s3 + $0xd8] sm:$0xff] }
 0x196   : > { %v14881_v3 = vpop.f32.mrf.mxu0  ;;  %20752 = vst [vmem:[#allocation9_spill] sm:$0xff] %v17554_v38  ;;  %15153 = vmatprep.subr.mxu0 %v17554_v38 }
 0x197   : > { %v14861_v33 = vpop.f32.mrf.mxu1  ;;  %v17534_v40 = vadd.f32 %v14881_v3, %v17477_v52 }
 0x198   : > { %v2666_v16 = vadd.f32 %v14861_v33, %v2308_v48  ;;  %v17536_v42 = vpop.f32.mrf.mxu0 }
 0x199   : > { %v17543_v26 = vpop.f32.mrf.mxu1 }
 0x19a   : > { %20751 = vst [vmem:[#allocation8_spill] sm:$0xff] %v17543_v26  ;;  %v14884_v27 = vpop.f32.mrf.mxu0 }
 0x19b   : > { %v14864_v10 = vpop.f32.mrf.mxu1 }
 0x19c   : > { %v2895_v8 = vpop.f32.mrf.mxu0 }
 0x19d   : > { %v2644_v63 = vpop.f32.mrf.mxu1 }
 0x19e   : > { %v14887_v56 = vpop.f32.mrf.mxu0 }
 0x19f   : > { %v17547_v52 = vadd.f32 %v14887_v56, %v17499_v35  ;;  %v14931_v48 = vpop.f32.mrf.mxu1 }
 0x1a0   : > { %v17549_v50 = vpop.f32.mrf.mxu0 }
 0x1a1   : > { %v3225_v46 = vpop.f32.mrf.mxu1 }
 0x1a2   : > { %v14890_v3 = vpop.f32.mrf.mxu0 }
 0x1a3   : > { %v14934_v33 = vpop.f32.mrf.mxu1 }
 0x1a4   : > { %v2913_v27 = vpop.f32.mrf.mxu0 }
 0x1a5   : > { %v3235_v10 = vpop.f32.mrf.mxu1 }
 0x1a6   : > { %v14893_v8 = vpop.f32.mrf.mxu0 }
 0x1a7   : > { %v17557_v63 = vadd.f32 %v14893_v8, %v2658_v59  ;;  %v17559_v35 = vpop.f32.mrf.mxu1 }
 0x1a8   : > { %v17561_v56 = vpop.f32.mrf.mxu0 }
 0x1a9   : > { %v17563_v0 = vpop.f32.mrf.mxu1 }
 0x1aa   : > { %v14896_v26 = vpop.f32.mrf.mxu0 }
 0x1ab   : > { %v14940_v6 = vpop.f32.mrf.mxu1 }
 0x1ac   : > { %v2931_v13 = vpop.f32.mrf.mxu0 }
 0x1ad   : > { %v3253_v9 = vpop.f32.mrf.mxu1 }
 0x1ae   : > { %v14899_v61 = vpop.f32.mrf.mxu0 }
 0x1af   : > { %v17565_v29 = vadd.f32 %v14899_v61, %v2660_v23  ;;  %v17567_v3 = vpop.f32.mrf.mxu1 }
 0x1b0   : > { %v17569_v33 = vpop.f32.mrf.mxu0 }
 0x1b1   : > { %v17571_v27 = vpop.f32.mrf.mxu1 }
 0x1b2   : > { %v14902_v59 = vpop.f32.mrf.mxu0 }
 0x1b3   : > { %v14946_v10 = vpop.f32.mrf.mxu1 }
 0x1b4   : > { %v2949_v8 = vpop.f32.mrf.mxu0 }
 0x1b5   : > { %v3271_v24 = vpop.f32.mrf.mxu1 }
 0x1b6   : > { %v14905_v4 = vpop.f32.mrf.mxu0 }
 0x1b7   : > { %v17573_v17 = vadd.f32 %v14905_v4, %v2662_v55  ;;  %v17575_v26 = vpop.f32.mrf.mxu1 }
 0x1b8   : > { %v17577_v13 = vpop.f32.mrf.mxu0 }
 0x1b9   : > { %20753 = vst [vmem:[#allocation10_spill] sm:$0xff] %v17573_v17  ;;  %20754 = vst [vmem:[#allocation11_spill] sm:$0xff] %v17577_v13  ;;  %v17579_v6 = vpop.f32.mrf.mxu1 }
 0x1ba   : > { %v14908_v61 = vpop.f32.mrf.mxu0 }
 0x1bb   : > { %v14952_v23 = vpop.f32.mrf.mxu1  ;;  %v1935_v61 = vadd.f32 %v17250_v60, %v17211_v21 }
 0x1bc   : > { %v2967_v9 = vpop.f32.mrf.mxu0 }
 0x1bd   : > { %v3289_v44 = vpop.f32.mrf.mxu1 }
 0x1be   : > { %v14911_v43 = vpop.f32.mrf.mxu0 }
 0x1bf   : > { %v17581_v38 = vadd.f32 %v14911_v43, %v2664_v45  ;;  %v17583_v59 = vpop.f32.mrf.mxu1  ;;  %v2293_v45 = vadd.f32 %v17330_v11, %v1935_v61  ;;  %v1937_v11 = vadd.f32 %v17266_v18, %v17232_v41 }
 0x1c0   : > { %v17585_v10 = vpop.f32.mrf.mxu0 }
 0x1c1   : > { %20755 = vst [vmem:[#allocation12_spill] sm:$0xff] %v17581_v38  ;;  %20756 = vst [vmem:[#allocation13_spill] sm:$0xff] %v17585_v10  ;;  %v17587_v24 = vpop.f32.mrf.mxu1  ;;  %v3369_v38 = vadd.f32 %v14931_v48, %v17527_v2 }
 0x1c2   : > { %v14914_v4 = vpop.f32.mrf.mxu0 }
 0x1c3   : > { %v14958_v55 = vpop.f32.mrf.mxu1  ;;  %v2651_v4 = vadd.f32 %v17464_v49, %v2293_v45  ;;  %v2295_v45 = vadd.f32 %v17342_v14, %v1937_v11  ;;  %v3371_v14 = vadd.f32 %v17559_v35, %v17534_v40 }
 0x1c4   : > { %v2985_v8 = vpop.f32.mrf.mxu0 }
 0x1c5   : > { %v3307_v17 = vpop.f32.mrf.mxu1 }
 0x1c6   : > { %v14917_v13 = vpop.f32.mrf.mxu0  ;;  %v3010_v17 = vadd.f32 %v17529_v37, %v2651_v4 }
 0x1c7   : > { %v17591_v23 = vadd.f32 %v14917_v13, %v2666_v16  ;;  %v17593_v44 = vpop.f32.mrf.mxu1  ;;  %v17606_v16 = vld [vmem:[%s20627_s2] ss:$0 sm:$0xff] }
 0x1c8   : > { %v17595_v43 = vpop.f32.mrf.mxu0  ;;  %v3368_v13 = vadd.f32 %v3225_v46, %v3010_v17 }
 0x1c9   : > { %20757 = vst [vmem:[#allocation14_spill] sm:$0xff] %v17595_v43  ;;  %v17598_v9 = vpop.f32.mrf.mxu1 }
 0x1ca   : > { %v14920_v10 = vpop.f32.mrf.mxu0 }
 0x1cb   : > { %v14964_v55 = vpop.f32.mrf.mxu1 }
 0x1cc   : > { %v3003_v8 = vpop.f32.mrf.mxu0  ;;  %v2653_v55 = vadd.f32 %v17482_v57, %v2295_v45  ;;  %v1941_v57 = vadd.f32 %v17296_v58, %v17264_v53 }
 0x1cd   : > { %v3325_v21 = vpop.f32.mrf.mxu1 }
 0x1ce   : > { %v14987_v60 = vpop.f32.mrf.mxu0  ;;  %v3012_v41 = vadd.f32 %v17536_v42, %v2653_v55 }
 0x1cf   : > { %v17610_v10 = vpop.f32.mrf.mxu1  ;;  %v3727_v49 = vadd.f32 %v14987_v60, %v3369_v38  ;;  %v1939_v60 = vadd.f32 %v17281_v12, %v17248_v5 }
 0x1d0   : > { %v3583_v61 = vpop.f32.mrf.mxu0  ;;  %v3370_v11 = vadd.f32 %v17563_v0, %v3012_v41 }
 0x1d1   : > { %v3750_v37 = vadd.f32 %v17606_v16, %v3727_v49  ;;  %v17614_v2 = vpop.f32.mrf.mxu1  ;;  %v3726_v48 = vadd.f32 %v3583_v61, %v3368_v13  ;;  %v2297_v45 = vadd.f32 %v17462_v34, %v1939_v60  ;;  %v3373_v34 = vadd.f32 %v17567_v3, %v17547_v52 }
 0x1d2   : > { %v14990_v4 = vpop.f32.mrf.mxu0 }
 0x1d3   : > { %v3749_v8 = vadd.f32 %v17606_v16, %v3726_v48  ;;  %v14970_v21 = vpop.f32.mrf.mxu1  ;;  %v3766_v18 = vmax.f32 %v3750_v37, 0.0  ;;  %v2655_v12 = vadd.f32 %v17506_v1, %v2297_v45 }
 0x1d4   : > { %v3593_v43 = vpop.f32.mrf.mxu0 }
 0x1d5   : > { %v3765_v46 = vmax.f32 %v3749_v8, 0.0  ;;  %v3343_v38 = vpop.f32.mrf.mxu1  ;;  %v3782_v42 = vmin.f32 %v3766_v18, 6.0  ;;  %v3014_v41 = vadd.f32 %v17549_v50, %v2655_v12 }
 0x1d6   : > { %v14993_v17 = vpop.f32.mrf.mxu0 }
 0x1d7   : > { %v3781_v13 = vmin.f32 %v3765_v46, 6.0  ;;  %v3729_v43 = vadd.f32 %v14993_v17, %v3371_v14  ;;  %v3861_v55 = vrot.slane %v3782_v42, 4  ;;  %v3877_v18 = vrot.slane %v3782_v42, 5 }
 0x1d8   : > { %v3601_v49 = vpop.f32.mrf.mxu0  ;;  %v3893_v1 = vrot.slane %v3782_v42, 6 }
 0x1d9   : > { %v3728_v61 = vadd.f32 %v3601_v49, %v3370_v11  ;;  %v3805_v40 = vrot.slane %v3781_v13, 1  ;;  %v3821_v35 = vrot.slane %v3781_v13, 2  ;;  %v3752_v37 = vadd.f32 %v17606_v16, %v3729_v43 }
 0x1da   : > { %v14996_v5 = vpop.f32.mrf.mxu0  ;;  %v3837_v58 = vrot.slane %v3781_v13, 3  ;;  %v3372_v11 = vadd.f32 %v17571_v27, %v3014_v41  ;;  %v2299_v49 = vadd.f32 %v17479_v54, %v1941_v57 }
 0x1db   : > { %v3751_v53 = vadd.f32 %v17606_v16, %v3728_v61  ;;  %v3926_v0 = vsel %vm3925_vm1, %v3781_v13, %v3805_v40  ;;  %v3768_v48 = vmax.f32 %v3752_v37, 0.0  ;;  %v3909_v13 = vrot.slane %v3782_v42, 7 }
 0x1dc   : > { %v3611_v4 = vpop.f32.mrf.mxu0  ;;  %v3935_v8 = vsel %vm3934_vm2, %v3926_v0, %v3821_v35  ;;  %v1164_v40 = vadd.f32 %v17165_v25, %v17138_v15  ;;  %v2657_v42 = vadd.f32 %v17514_v36, %v2299_v49 }
 0x1dd   : > { %v3767_v21 = vmax.f32 %v3751_v53, 0.0  ;;  %v3944_v46 = vsel %vm3943_vm3, %v3935_v8, %v3837_v58  ;;  %v3784_v3 = vmin.f32 %v3768_v48, 6.0  ;;  %v3375_v48 = vadd.f32 %v17575_v26, %v17557_v63 }
 0x1de   : > { %v14999_v38 = vpop.f32.mrf.mxu0  ;;  %v3953_v14 = vsel %vm3952_vm4, %v3944_v46, %v3861_v55  ;;  %v1584_v57 = vadd.f32 %v17278_v19, %v1164_v40  ;;  %v3016_v0 = vadd.f32 %v17561_v56, %v2657_v42 }
 0x1df   : > { %v3783_v17 = vmin.f32 %v3767_v21, 6.0  ;;  %v3731_v60 = vadd.f32 %v14999_v38, %v3373_v34  ;;  %v3962_v52 = vsel %vm3961_vm5, %v3953_v14, %v3877_v18  ;;  %v3862_v12 = vrot.slane %v3784_v3, 4 }
 0x1e0   : > { %v3619_v43 = vpop.f32.mrf.mxu0  ;;  %v3971_v50 = vsel %vm3970_vm6, %v3962_v52, %v3893_v1  ;;  %v3878_v4 = vrot.slane %v3784_v3, 5  ;;  %v3894_v34 = vrot.slane %v3784_v3, 6  ;;  %v1943_v41 = vadd.f32 %v17310_v30, %v1584_v57 }
 0x1e1   : > { %v3806_v61 = vrot.slane %v3783_v17, 1  ;;  %v3822_v45 = vrot.slane %v3783_v17, 2  ;;  %v3980_v35 = vsel %vm3979_vm7, %v3971_v50, %v3909_v13  ;;  %v3754_v37 = vadd.f32 %v17606_v16, %v3731_v60 }
 0x1e2   : > { %v3730_v5 = vadd.f32 %v3619_v43, %v3372_v11  ;;  %v15002_v27 = vpop.f32.mrf.mxu0  ;;  %3989 = vst.msk [vmem:[#allocation2 + $0x19] sm:$0xff] %vm441_vm0, %v3980_v35  ;;  %v3838_v53 = vrot.slane %v3783_v17, 3  ;;  %v3910_v18 = vrot.slane %v3784_v3, 7  ;;  %v3374_v56 = vadd.f32 %v17579_v6, %v3016_v0  ;;  %v4007_v6 = vld [vmem:[%s20628_s3 + $0x10] sm:$0xff] }
 0x1e3   : > { %v3927_v54 = vsel %vm3925_vm1, %v3783_v17, %v3806_v61  ;;  %v3770_v8 = vmax.f32 %v3754_v37, 0.0  ;;  %v2301_v26 = vadd.f32 %v17501_v62, %v1943_v41  ;;  %v1182_v11 = vadd.f32 %v17188_v47, %v17161_v22 }
 0x1e4   : > { %v3936_v58 = vsel %vm3934_vm2, %v3927_v54, %v3822_v45  ;;  %v3753_v15 = vadd.f32 %v17606_v16, %v3730_v5  ;;  %v3629_v25 = vpop.f32.mrf.mxu0  ;;  %v17674_v22 = vadd.f32 %v17208_v7, %v17184_v39  ;;  %v3377_v39 = vadd.f32 %v17583_v59, %v17565_v29 }
 0x1e5   : > { %v3945_v36 = vsel %vm3943_vm3, %v3936_v58, %v3838_v53  ;;  %v3786_v30 = vmin.f32 %v3770_v8, 6.0  ;;  %v2659_v62 = vadd.f32 %v17519_v32, %v2301_v26  ;;  %v1586_v47 = vadd.f32 %v17293_v28, %v1182_v11  ;;  %v4006_v32 = vld [vmem:[%s20628_s3 + $0x8] sm:$0xff] }
 0x1e6   : > { %v3954_v55 = vsel %vm3952_vm4, %v3945_v36, %v3862_v12  ;;  %v3769_v21 = vmax.f32 %v3753_v15, 0.0  ;;  %v15005_v19 = vpop.f32.mrf.mxu0 }
 0x1e7   : > { %v3963_v46 = vsel %vm3961_vm5, %v3954_v55, %v3878_v4  ;;  %v3733_v38 = vadd.f32 %v15005_v19, %v3375_v48  ;;  %v3018_v45 = vadd.f32 %v17569_v33, %v2659_v62  ;;  %v3863_v7 = vrot.slane %v3786_v30, 4 }
 0x1e8   : > { %v3972_v1 = vsel %vm3970_vm6, %v3963_v46, %v3894_v34  ;;  %v3637_v63 = vpop.f32.mrf.mxu0  ;;  %v3785_v17 = vmin.f32 %v3769_v21, 6.0  ;;  %v1945_v33 = vadd.f32 %v17323_v20, %v1586_v47  ;;  %v3879_v53 = vrot.slane %v3786_v30, 5  ;;  %v17700_v20 = vld [vmem:[%s20628_s3 + $0x58] sm:$0xff]  ;;  %v20758_v46 = vld [vmem:[#allocation9_spill] sm:$0xff] }
 0x1e9   : > { %v3981_v14 = vsel %vm3979_vm7, %v3972_v1, %v3910_v18  ;;  %v3756_v60 = vadd.f32 %v17606_v16, %v3733_v38  ;;  %v3732_v13 = vadd.f32 %v3637_v63, %v3374_v56  ;;  %v4010_v3 = vld [vmem:[#allocation2 + $0x19] sm:$0xff]  ;;  %v3376_v42 = vadd.f32 %v17587_v24, %v3018_v45  ;;  %v12919_v24 = vld [vmem:[%s20628_s3 + $0xd0] sm:$0xff] }
 0x1ea   : > { %3990 = vst.msk [vmem:[#allocation2 + $0x31] sm:$0xff] %vm441_vm0, %v3981_v14  ;;  %v15008_v52 = vpop.f32.mrf.mxu0  ;;  %v3807_v43 = vrot.slane %v3785_v17, 1  ;;  %v3823_v49 = vrot.slane %v3785_v17, 2  ;;  %15042 = vmatmul.mubr.msk.f32.vlgmr.msra.gmra.mxu1 %vm441_vm0, %v4010_v3  ;;  %15121 = vmatprep.mubr.msk.f32.mxu0 %vm441_vm0, %v4010_v3  ;;  %v3839_v40 = vrot.slane %v3785_v17, 3  ;;  %v3895_v57 = vrot.slane %v3786_v30, 6  ;;  %v20759_v38 = vld [vmem:[#allocation6_spill] sm:$0xff] }
 0x1eb   : > { %v3755_v50 = vadd.f32 %v17606_v16, %v3732_v13  ;;  %15054 = vmatpush3.msra.mxu1 %v17541_v31  ;;  %v3772_v37 = vmax.f32 %v3756_v60, 0.0  ;;  %v4005_v31 = vld [vmem:[%s20628_s3] sm:$0xff]  ;;  %v3911_v15 = vrot.slane %v3786_v30, 7  ;;  %v2303_v36 = vadd.f32 %v17512_v51, %v1945_v33  ;;  %v12918_v51 = vld [vmem:[%s20628_s3 + $0xc8] sm:$0xff]  ;;  %v20760_v1 = vld [vmem:[#allocation10_spill] sm:$0xff] }
 0x1ec   : > { %v3647_v61 = vpop.f32.mrf.mxu0  ;;  %v3928_v35 = vsel %vm3925_vm1, %v3785_v17, %v3807_v43  ;;  %15055 = vmatprep.subr.mxu1 %v4007_v6  ;;  %v3379_v63 = vadd.f32 %v17593_v44, %v20760_v1  ;;  %v12917_v52 = vld [vmem:[%s20628_s3 + $0xc0] sm:$0xff]  ;;  %v20761_v44 = vld [vmem:[#allocation25_spill] sm:$0xff] }
 0x1ed   : > { %v3937_v28 = vsel %vm3934_vm2, %v3928_v35, %v3823_v49  ;;  %v3771_v5 = vmax.f32 %v3755_v50, 0.0  ;;  %15056 = vmatpush3.msra.mxu1 %v4007_v6  ;;  %v3788_v0 = vmin.f32 %v3772_v37, 6.0  ;;  %v2661_v56 = vadd.f32 %v20759_v38, %v2303_v36  ;;  %v20762_v6 = vld [vmem:[#allocation11_spill] sm:$0xff]  ;;  %v20763_v35 = vld [vmem:[#allocation28_spill] sm:$0xff] }
 0x1ee   : > { %v15011_v27 = vpop.f32.mrf.mxu0  ;;  %v3946_v54 = vsel %vm3943_vm3, %v3937_v28, %v3839_v40  ;;  %15057 = vmatprep.subr.mxu1 %v4006_v32  ;;  %v1588_v3 = vadd.f32 %v20761_v44, %v17674_v22  ;;  %v17736_v40 = vld [vmem:[%s20628_s3 + $0x118] sm:$0xff]  ;;  %v20764_v28 = vld [vmem:[#allocation21_spill] sm:$0xff] }
 0x1ef   : > { %v3955_v29 = vsel %vm3952_vm4, %v3946_v54, %v3863_v7  ;;  %v3787_v59 = vmin.f32 %v3771_v5, 6.0  ;;  %v3735_v12 = vadd.f32 %v15011_v27, %v3377_v39  ;;  %15058 = vmatpush3.msra.mxu1 %v4006_v32  ;;  %v3864_v60 = vrot.slane %v3788_v0, 4  ;;  %v20765_v5 = vld [vmem:[#allocation23_spill] sm:$0xff] }
 0x1f0   : > { %v3655_v58 = vpop.f32.mrf.mxu0  ;;  %v3964_v25 = vsel %vm3961_vm5, %v3955_v29, %v3879_v53  ;;  %15059 = vmatprep.subr.mxu1 %v4005_v31  ;;  %v3020_v62 = vadd.f32 %v20762_v6, %v2661_v56  ;;  %v3880_v43 = vrot.slane %v3788_v0, 5  ;;  %v3896_v50 = vrot.slane %v3788_v0, 6  ;;  %v20766_v53 = vld [vmem:[#allocation4_spill] sm:$0xff] }
 0x1f1   : > { %v3734_v48 = vadd.f32 %v3655_v58, %v3376_v42  ;;  %v17695_v4 = vld [vmem:[#allocation2 + $0x31] sm:$0xff]  ;;  %v3973_v34 = vsel %vm3970_vm6, %v3964_v25, %v3895_v57  ;;  %v3808_v55 = vrot.slane %v3787_v59, 1  ;;  %v3824_v8 = vrot.slane %v3787_v59, 2  ;;  %15060 = vmatpush3.msra.mxu1 %v4005_v31 }
 0x1f2   : > { %v15014_v21 = vpop.f32.mrf.mxu0  ;;  %15044 = vmatprep.mubr.msk.f32.mxu1 %vm441_vm0, %v17695_v4  ;;  %15122 = vmatmul.mubr.msk.f32.vlgmr.msra.gmra.mxu0 %vm441_vm0, %v17695_v4  ;;  %v3982_v19 = vsel %vm3979_vm7, %v3973_v34, %v3911_v15  ;;  %v3758_v41 = vadd.f32 %v17606_v16, %v3735_v12  ;;  %v3840_v26 = vrot.slane %v3787_v59, 3  ;;  %v1947_v22 = vadd.f32 %v20763_v35, %v1588_v3  ;;  %v14973_v3 = vpop.f32.mrf.mxu1 }
 0x1f3   : > { %v3757_v18 = vadd.f32 %v17606_v16, %v3734_v48  ;;  %15154 = vmatpush3.msra.mxu0 %v20758_v46  ;;  %3991 = vst.msk [vmem:[#allocation2 + $0x49] sm:$0xff] %vm441_vm0, %v3982_v19  ;;  %v3929_v14 = vsel %vm3925_vm1, %v3787_v59, %v3808_v55  ;;  %15073 = vmatprep.subr.mxu1 %v17700_v20  ;;  %v3912_v37 = vrot.slane %v3788_v0, 7  ;;  %v20768_v48 = vld [vmem:[#allocation7_spill] sm:$0xff]  ;;  %v20770_v46 = vld [vmem:[#allocation13_spill] sm:$0xff] }
 0x1f4   : > { %v3665_v17 = vpop.f32.mrf.mxu0  ;;  %15155 = vmatprep.subr.mxu0 %v12919_v24  ;;  %v3938_v11 = vsel %vm3934_vm2, %v3929_v14, %v3824_v8  ;;  %v3774_v30 = vmax.f32 %v3758_v41, 0.0  ;;  %v1218_v27 = vadd.f32 %v20765_v5, %v20764_v28  ;;  %v3378_v31 = vadd.f32 %v17598_v9, %v3020_v62  ;;  %v20767_v9 = vld [vmem:[#allocation26_spill] sm:$0xff]  ;;  %v20769_v8 = vld [vmem:[#allocation12_spill] sm:$0xff]  ;;  %v20772_v62 = vld [vmem:[#allocation5_spill] sm:$0xff]  ;;  %v3351_v5 = vpop.f32.mrf.mxu1 }
 0x1f5   : > { %v3773_v13 = vmax.f32 %v3757_v18, 0.0  ;;  %15156 = vmatpush3.msra.mxu0 %v12919_v24  ;;  %v3947_v49 = vsel %vm3943_vm3, %v3938_v11, %v3840_v26  ;;  %v2305_v54 = vadd.f32 %v20766_v53, %v1947_v22  ;;  %v3381_v21 = vadd.f32 %v17610_v10, %v20769_v8  ;;  %v20771_v11 = vld [vmem:[#allocation29_spill] sm:$0xff] }
 0x1f6   : > { %v15017_v47 = vpop.f32.mrf.mxu0  ;;  %15157 = vmatprep.subr.mxu0 %v12918_v51  ;;  %v3956_v61 = vsel %vm3952_vm4, %v3947_v49, %v3864_v60  ;;  %v3790_v42 = vmin.f32 %v3774_v30, 6.0  ;;  %v1590_v0 = vadd.f32 %v20767_v9, %v1218_v27  ;;  %v3383_v28 = vadd.f32 %v14973_v3, %v17591_v23 }
 0x1f7   : > { %v3789_v32 = vmin.f32 %v3773_v13, 6.0  ;;  %v3737_v45 = vadd.f32 %v15017_v47, %v3379_v63  ;;  %15158 = vmatpush3.msra.mxu0 %v12918_v51  ;;  %v3965_v39 = vsel %vm3961_vm5, %v3956_v61, %v3880_v43  ;;  %v2663_v24 = vadd.f32 %v20768_v48, %v2305_v54 }
 0x1f8   : > { %v3673_v7 = vpop.f32.mrf.mxu0  ;;  %15159 = vmatprep.subr.mxu0 %v12917_v52  ;;  %v3974_v33 = vsel %vm3970_vm6, %v3965_v39, %v3896_v50  ;;  %v3865_v19 = vrot.slane %v3790_v42, 4  ;;  %v3881_v38 = vrot.slane %v3790_v42, 5  ;;  %v3897_v56 = vrot.slane %v3790_v42, 6 }
 0x1f9   : > { %15160 = vmatpush3.msra.mxu0 %v12917_v52  ;;  %v3983_v57 = vsel %vm3979_vm7, %v3974_v33, %v3912_v37  ;;  %v3809_v29 = vrot.slane %v3789_v32, 1  ;;  %v3825_v59 = vrot.slane %v3789_v32, 2  ;;  %v3760_v58 = vadd.f32 %v17606_v16, %v3737_v45 }
 0x1fa   : > { %v15020_v12 = vpop.f32.mrf.mxu0  ;;  %15193 = vmatprep.subr.mxu0 %v17736_v40  ;;  %3992 = vst.msk [vmem:[#allocation2 + $0x61] sm:$0xff] %vm441_vm0, %v3983_v57  ;;  %v3736_v15 = vadd.f32 %v3673_v7, %v3378_v31  ;;  %v17749_v25 = vld [vmem:[#allocation2 + $0x49] sm:$0xff]  ;;  %v3841_v36 = vrot.slane %v3789_v32, 3  ;;  %v3022_v51 = vadd.f32 %v20770_v46, %v2663_v24  ;;  %v1949_v30 = vadd.f32 %v20771_v11, %v1590_v0 }
 0x1fb   : > { %v3930_v34 = vsel %vm3925_vm1, %v3789_v32, %v3809_v29  ;;  %15045 = vmatmul.mubr.msk.f32.gmra.mxu1 %vm441_vm0, %v17749_v25  ;;  %15124 = vmatprep.mubr.msk.f32.mxu0 %vm441_vm0, %v17749_v25  ;;  %v3776_v14 = vmax.f32 %v3760_v58, 0.0  ;;  %v3913_v10 = vrot.slane %v3790_v42, 7  ;;  %v20774_v31 = vld [vmem:[#allocation14_spill] sm:$0xff] }
 0x1fc   : > { %v3683_v55 = vpop.f32.mrf.mxu0  ;;  %v3939_v41 = vsel %vm3934_vm2, %v3930_v34, %v3825_v59  ;;  %v3759_v18 = vadd.f32 %v17606_v16, %v3736_v15  ;;  %v3380_v44 = vadd.f32 %v17614_v2, %v3022_v51  ;;  %v2307_v43 = vadd.f32 %v20772_v62, %v1949_v30  ;;  %v20773_v2 = vld [vmem:[#allocation8_spill] sm:$0xff] }
 0x1fd   : > { %v3948_v1 = vsel %vm3943_vm3, %v3939_v41, %v3841_v36  ;;  %v3792_v45 = vmin.f32 %v3776_v14, 6.0 }
 0x1fe   : > { %v15023_v63 = vpop.f32.mrf.mxu0  ;;  %v3957_v26 = vsel %vm3952_vm4, %v3948_v1, %v3865_v19  ;;  %v3775_v17 = vmax.f32 %v3759_v18, 0.0  ;;  %v2665_v22 = vadd.f32 %v20773_v2, %v2307_v43 }
 0x1ff   : > { %v3739_v60 = vadd.f32 %v15023_v63, %v3381_v21  ;;  %v3966_v13 = vsel %vm3961_vm5, %v3957_v26, %v3881_v38  ;;  %v3866_v29 = vrot.slane %v3792_v45, 4  ;;  %v3882_v9 = vrot.slane %v3792_v45, 5 }
 0x200   : > { %v3691_v52 = vpop.f32.mrf.mxu0  ;;  %v3975_v6 = vsel %vm3970_vm6, %v3966_v13, %v3897_v56  ;;  %v3791_v47 = vmin.f32 %v3775_v17, 6.0  ;;  %v3024_v33 = vadd.f32 %v20774_v31, %v2665_v22  ;;  %v3898_v48 = vrot.slane %v3792_v45, 6 }
 0x201   : > { %v3984_v49 = vsel %vm3979_vm7, %v3975_v6, %v3913_v10  ;;  %v3762_v50 = vadd.f32 %v17606_v16, %v3739_v60  ;;  %v17772_v32 = vld [vmem:[#allocation2 + $0x61] sm:$0xff]  ;;  %v3738_v35 = vadd.f32 %v3691_v52, %v3380_v44  ;;  %v3914_v24 = vrot.slane %v3792_v45, 7 }
 0x202   : > { %v15026_v61 = vpop.f32.mrf.mxu0  ;;  %3993 = vst.msk [vmem:[#allocation2 + $0x79] sm:$0xff] %vm441_vm0, %v3984_v49  ;;  %15047 = vmatprep.mubr.msk.f32.mxu1 %vm441_vm0, %v17772_v32  ;;  %15125 = vmatmul.mubr.msk.f32.gmra.mxu0 %vm441_vm0, %v17772_v32  ;;  %v3810_v37 = vrot.slane %v3791_v47, 1  ;;  %v3826_v39 = vrot.slane %v3791_v47, 2  ;;  %v3842_v42 = vrot.slane %v3791_v47, 3  ;;  %v3382_v15 = vadd.f32 %v3351_v5, %v3024_v33 }
 0x203   : > { %v3761_v27 = vadd.f32 %v17606_v16, %v3738_v35  ;;  %v3778_v54 = vmax.f32 %v3762_v50, 0.0 }
 0x204   : > { %v3701_v7 = vpop.f32.mrf.mxu0  ;;  %v3931_v53 = vsel %vm3925_vm1, %v3791_v47, %v3810_v37 }
 0x205   : > { %v3940_v59 = vsel %vm3934_vm2, %v3931_v53, %v3826_v39  ;;  %v3777_v12 = vmax.f32 %v3761_v27, 0.0  ;;  %v3794_v8 = vmin.f32 %v3778_v54, 6.0  ;;  %v3997_v27 = vld [vmem:[#allocation2] sm:$0xff]  ;;  %v12871_v53 = vld [vmem:[%s20628_s3 + $0x50] sm:$0xff] }
 0x206   : > { %v15029_v57 = vpop.f32.mrf.mxu0  ;;  %v3949_v0 = vsel %vm3943_vm3, %v3940_v59, %v3842_v42  ;;  %v17828_v42 = vld [vmem:[#allocation2 + $0x18] sm:$0xff]  ;;  %v17835_v54 = vld [vmem:[#allocation2 + $0x30] sm:$0xff]  ;;  %v12870_v59 = vld [vmem:[%s20628_s3 + $0x48] sm:$0xff] }
 0x207   : > { %v3741_v58 = vadd.f32 %v15029_v57, %v3383_v28  ;;  %v3958_v36 = vsel %vm3952_vm4, %v3949_v0, %v3866_v29  ;;  %v3793_v34 = vmin.f32 %v3777_v12, 6.0  ;;  %v3867_v26 = vrot.slane %v3794_v8, 4  ;;  %v17840_v57 = vld [vmem:[#allocation2 + $0x48] sm:$0xff]  ;;  %v17851_v12 = vld [vmem:[#allocation2 + $0x60] sm:$0xff] }
 0x208   : > { %v3709_v23 = vpop.f32.mrf.mxu0  ;;  %v3967_v55 = vsel %vm3961_vm5, %v3958_v36, %v3882_v9  ;;  %v3883_v11 = vrot.slane %v3794_v8, 5  ;;  %v3899_v10 = vrot.slane %v3794_v8, 6  ;;  %v3915_v52 = vrot.slane %v3794_v8, 7  ;;  %v12943_v9 = vld [vmem:[%s20628_s3 + $0x110] sm:$0xff]  ;;  %v12884_v36 = vld [vmem:[%s20628_s3 + $0x78] sm:$0xff] }
 0x209   : > { %v3764_v21 = vadd.f32 %v17606_v16, %v3741_v58  ;;  %v3740_v19 = vadd.f32 %v3709_v23, %v3382_v15  ;;  %v17789_v41 = vld [vmem:[#allocation2 + $0x79] sm:$0xff]  ;;  %v3976_v18 = vsel %vm3970_vm6, %v3967_v55, %v3898_v48  ;;  %v3811_v46 = vrot.slane %v3793_v34, 1  ;;  %v4280_v23 = vld [vmem:[#allocation2 + $0x2] sm:$0xff] }
 0x20a   : > { %v3827_v51 = vrot.slane %v3793_v34, 2  ;;  %15048 = vmatmul.mubr.msk.f32.gmra.mxu1 %vm441_vm0, %v17789_v41  ;;  %15127 = vmatprep.mubr.msk.f32.mxu0 %vm441_vm0, %v17789_v41  ;;  %v3985_v38 = vsel %vm3979_vm7, %v3976_v18, %v3914_v24  ;;  %v3843_v1 = vrot.slane %v3793_v34, 3  ;;  %v12869_v58 = vld [vmem:[%s20628_s3 + $0x40] sm:$0xff] }
 0x20b   : > { %v3763_v56 = vadd.f32 %v17606_v16, %v3740_v19  ;;  %3994 = vst.msk [vmem:[#allocation2 + $0x91] sm:$0xff] %vm441_vm0, %v3985_v38  ;;  %v3932_v63 = vsel %vm3925_vm1, %v3793_v34, %v3811_v46  ;;  %v3780_v17 = vmax.f32 %v3764_v21, 0.0  ;;  %v17891_v8 = vld [vmem:[#allocation2 + $0x1a] sm:$0xff]  ;;  %v12883_v21 = vld [vmem:[%s20628_s3 + $0x70] sm:$0xff] }
 0x20c   : > { %v3941_v14 = vsel %vm3934_vm2, %v3932_v63, %v3827_v51  ;;  %v17900_v19 = vld [vmem:[#allocation2 + $0x32] sm:$0xff]  ;;  %v4283_v51 = vld [vmem:[#allocation2 + $0x4a] sm:$0xff]  ;;  %v12941_v38 = vld [vmem:[%s20628_s3 + $0x100] sm:$0xff] }
 0x20d   : > { %v3779_v60 = vmax.f32 %v3763_v56, 0.0  ;;  %v3950_v30 = vsel %vm3943_vm3, %v3941_v14, %v3843_v1  ;;  %v3796_v6 = vmin.f32 %v3780_v17, 6.0  ;;  %v4888_v46 = vld [vmem:[#allocation2 + $0xd8] sm:$0xff]  ;;  %v12882_v56 = vld [vmem:[%s20628_s3 + $0x68] sm:$0xff] }
 0x20e   : > { %v3959_v13 = vsel %vm3952_vm4, %v3950_v30, %v3867_v26  ;;  %v4284_v1 = vld [vmem:[#allocation2 + $0x62] sm:$0xff]  ;;  %v4285_v63 = vld [vmem:[#allocation2 + $0x7a] sm:$0xff] }
 0x20f   : > { %v3968_v44 = vsel %vm3961_vm5, %v3959_v13, %v3883_v11  ;;  %v3795_v16 = vmin.f32 %v3779_v60, 6.0  ;;  %v3868_v45 = vrot.slane %v3796_v6, 4  ;;  %v3884_v2 = vrot.slane %v3796_v6, 5  ;;  %v12881_v26 = vld [vmem:[%s20628_s3 + $0x60] sm:$0xff]  ;;  %v12908_v60 = vld [vmem:[%s20628_s3 + $0xb8] sm:$0xff]  ;;  %v12907_v11 = vld [vmem:[%s20628_s3 + $0xb0] sm:$0xff] }
 0x210   : > { %v3977_v3 = vsel %vm3970_vm6, %v3968_v44, %v3899_v10  ;;  %v3900_v37 = vrot.slane %v3796_v6, 6  ;;  %v3916_v7 = vrot.slane %v3796_v6, 7  ;;  %v12906_v10 = vld [vmem:[%s20628_s3 + $0xa8] sm:$0xff]  ;;  %v12905_v13 = vld [vmem:[%s20628_s3 + $0xa0] sm:$0xff]  ;;  %v12932_v44 = vld [vmem:[%s20628_s3 + $0xf8] sm:$0xff] }
 0x211   : > { %v3986_v62 = vsel %vm3979_vm7, %v3977_v3, %v3915_v52  ;;  %v3812_v43 = vrot.slane %v3795_v16, 1  ;;  %v3828_v49 = vrot.slane %v3795_v16, 2  ;;  %v3844_v50 = vrot.slane %v3795_v16, 3  ;;  %v5188_v52 = vld [vmem:[#allocation2 + $0xda] sm:$0xff]  ;;  %v12930_v3 = vld [vmem:[%s20628_s3 + $0xe8] sm:$0xff] }
 0x212   : > { %3995 = vst.msk [vmem:[#allocation2 + $0xa9] sm:$0xff] %vm441_vm0, %v3986_v62  ;;  %v17807_v47 = vld [vmem:[#allocation2 + $0x91] sm:$0xff]  ;;  %v12929_v6 = vld [vmem:[%s20628_s3 + $0xe0] sm:$0xff] }
 0x213   : > { %v3933_v61 = vsel %vm3925_vm1, %v3795_v16, %v3812_v43  ;;  %15050 = vmatprep.mubr.msk.f32.mxu1 %vm441_vm0, %v17807_v47  ;;  %15128 = vmatmul.mubr.msk.f32.gmra.mxu0 %vm441_vm0, %v17807_v47  ;;  %v17866_v15 = vld [vmem:[#allocation2 + $0x90] sm:$0xff]  ;;  %v5038_v62 = vld [vmem:[#allocation2 + $0xd9] sm:$0xff]  ;;  %v12955_v43 = vld [vmem:[%s20630_s5 + $0x28] sm:$0xff] }
 0x214   : > { %v3942_v35 = vsel %vm3934_vm2, %v3933_v61, %v3828_v49  ;;  %v4286_v14 = vld [vmem:[#allocation2 + $0x92] sm:$0xff]  ;;  %v5380_v49 = vld [vmem:[%s20630_s5 + $0x8] sm:$0xff] }
 0x215   : > { %v3951_v22 = vsel %vm3943_vm3, %v3942_v35, %v3844_v50  ;;  %v12931_v16 = vld [vmem:[%s20628_s3 + $0xf0] sm:$0xff]  ;;  %v5379_v50 = vld [vmem:[%s20630_s5] sm:$0xff]  ;;  %v18022_v35 = vld [vmem:[%s20630_s5 + $0x58] sm:$0xff] }
 0x216   : > { %v3960_v39 = vsel %vm3952_vm4, %v3951_v22, %v3868_v45  ;;  %v5383_v61 = vld [vmem:[#allocation3 + $0x1] sm:$0xff]  ;;  %20775 = vst [vmem:[#allocation15_spill] sm:$0xff] %v18022_v35 }
 0x217   : > { %v3969_v28 = vsel %vm3961_vm5, %v3960_v39, %v3884_v2  ;;  %v5371_v45 = vld [vmem:[#allocation3] sm:$0xff]  ;;  %v18028_v2 = vld [vmem:[%s20630_s5 + $0x78] sm:$0xff] }
 0x218   : > { %v3978_v5 = vsel %vm3970_vm6, %v3969_v28, %v3900_v37  ;;  %20776 = vst [vmem:[#allocation16_spill] sm:$0xff] %v18028_v2 }
 0x219   : > { %v3987_v31 = vsel %vm3979_vm7, %v3978_v5, %v3916_v7  ;;  %v17820_v33 = vld [vmem:[#allocation2 + $0xa9] sm:$0xff] }
 0x21a   : > { %3996 = vst.msk [vmem:[#allocation2 + $0xc1] sm:$0xff] %vm441_vm0, %v3987_v31  ;;  %15051 = vmatmul.mubr.msk.f32.gmra.mxu1 %vm441_vm0, %v17820_v33  ;;  %15130 = vmatprep.mubr.msk.f32.mxu0 %vm441_vm0, %v17820_v33  ;;  %v17876_v24 = vld [vmem:[#allocation2 + $0xa8] sm:$0xff] }
 0x21b   : > { %15061 = vmatprep.mubr.msk.f32.mxu1 %vm441_vm0, %v3997_v27  ;;  %v4287_v17 = vld [vmem:[#allocation2 + $0xaa] sm:$0xff] }
 0x21e   : > { %15062 = vmatmul.mubr.msk.f32.vlgmr.msra.gmra.mxu1 %vm441_vm0, %v17828_v42 }
 0x21f   : > { %15064 = vmatprep.mubr.msk.f32.mxu1 %vm441_vm0, %v17835_v54  ;;  %15074 = vmatpush3.msra.mxu1 %v17700_v20  ;;  %v17857_v20 = vld [vmem:[#allocation2 + $0x78] sm:$0xff] }
 0x220   : > { %15075 = vmatprep.subr.mxu1 %v12871_v53 }
 0x221   : > { %v17842_v29 = vld [vmem:[#allocation2 + $0xc1] sm:$0xff]  ;;  %15076 = vmatpush3.msra.mxu1 %v12871_v53  ;;  %v14976_v0 = vpop.f32.mrf.mxu1 }
 0x222   : > { %15065 = vmatmul.mubr.msk.f32.gmra.mxu1 %vm441_vm0, %v17840_v57  ;;  %15131 = vmatmul.mubr.msk.f32.gmra.mxu0 %vm441_vm0, %v17842_v29  ;;  %v4887_v18 = vld [vmem:[#allocation2 + $0xc0] sm:$0xff] }
 0x223   : > { %15067 = vmatprep.mubr.msk.f32.mxu1 %vm441_vm0, %v17851_v12  ;;  %15161 = vmatprep.mubr.msk.f32.mxu0 %vm441_vm0, %v17835_v54  ;;  %v3361_v48 = vpop.f32.mrf.mxu1  ;;  %v5187_v30 = vld [vmem:[#allocation2 + $0xc2] sm:$0xff] }
 0x224   : > { %15077 = vmatprep.subr.mxu1 %v12870_v59 }
 0x225   : > { %15078 = vmatpush3.msra.mxu1 %v12870_v59 }
 0x226   : > { %15068 = vmatmul.mubr.msk.f32.gmra.mxu1 %vm441_vm0, %v17857_v20  ;;  %15162 = vmatmul.mubr.msk.f32.vlgmr.msra.gmra.mxu0 %vm441_vm0, %v17840_v57 }
 0x227   : > { %15070 = vmatprep.mubr.msk.f32.mxu1 %vm441_vm0, %v17866_v15  ;;  %15164 = vmatprep.mubr.msk.f32.mxu0 %vm441_vm0, %v17851_v12 }
 0x228   : > { %15079 = vmatprep.subr.mxu1 %v12869_v58  ;;  %15194 = vmatpush3.msra.mxu0 %v17736_v40  ;;  %v12942_v40 = vld [vmem:[%s20628_s3 + $0x108] sm:$0xff] }
 0x229   : > { %15080 = vmatpush3.msra.mxu1 %v12869_v58  ;;  %15195 = vmatprep.subr.mxu0 %v12943_v9  ;;  %v15032_v34 = vpop.f32.mrf.mxu0 }
 0x22a   : > { %15071 = vmatmul.mubr.msk.f32.gmra.mxu1 %vm441_vm0, %v17876_v24  ;;  %15165 = vmatmul.mubr.msk.f32.gmra.mxu0 %vm441_vm0, %v17857_v20 }
 0x22b   : > { %15167 = vmatprep.mubr.msk.f32.mxu0 %vm441_vm0, %v17866_v15  ;;  %15081 = vmatprep.mubr.msk.f32.mxu1 %vm441_vm0, %v4280_v23  ;;  %v3719_v55 = vpop.f32.mrf.mxu0 }
 0x22c   : > { %15093 = vmatprep.subr.mxu1 %v12884_v36  ;;  %15196 = vmatpush3.msra.mxu0 %v12943_v9 }
 0x22d   : > { %15197 = vmatprep.subr.mxu0 %v12942_v40 }
 0x22e   : > { %15082 = vmatmul.mubr.msk.f32.vlgmr.msra.gmra.mxu1 %vm441_vm0, %v17891_v8  ;;  %15168 = vmatmul.mubr.msk.f32.gmra.mxu0 %vm441_vm0, %v17876_v24 }
 0x22f   : > { %15084 = vmatprep.mubr.msk.f32.mxu1 %vm441_vm0, %v17900_v19  ;;  %15094 = vmatpush3.msra.mxu1 %v12884_v36 }
 0x230   : > { %15170 = vmatprep.mubr.msk.f32.mxu0 %vm441_vm0, %v4887_v18  ;;  %15095 = vmatprep.subr.mxu1 %v12883_v21 }
 0x231   : > { %15096 = vmatpush3.msra.mxu1 %v12883_v21  ;;  %15198 = vmatpush3.msra.mxu0 %v12942_v40 }
 0x232   : > { %15085 = vmatmul.mubr.msk.f32.gmra.mxu1 %vm441_vm0, %v4283_v51  ;;  %15171 = vmatmul.mubr.msk.f32.gmra.mxu0 %vm441_vm0, %v4888_v46 }
 0x233   : > { %15087 = vmatprep.mubr.msk.f32.mxu1 %vm441_vm0, %v4284_v1  ;;  %15201 = vmatprep.mubr.msk.f32.mxu0 %vm441_vm0, %v17900_v19 }
 0x234   : > { %15199 = vmatprep.subr.mxu0 %v12941_v38  ;;  %15097 = vmatprep.subr.mxu1 %v12882_v56 }
 0x235   : > { %15200 = vmatpush3.msra.mxu0 %v12941_v38  ;;  %15098 = vmatpush3.msra.mxu1 %v12882_v56 }
 0x236   : > { %15088 = vmatmul.mubr.msk.f32.gmra.mxu1 %vm441_vm0, %v4285_v63  ;;  %15202 = vmatmul.mubr.msk.f32.vlgmr.msra.gmra.mxu0 %vm441_vm0, %v4283_v51 }
 0x237   : > { %15090 = vmatprep.mubr.msk.f32.mxu1 %vm441_vm0, %v4286_v14  ;;  %15204 = vmatprep.mubr.msk.f32.mxu0 %vm441_vm0, %v4284_v1 }
 0x238   : > { %15099 = vmatprep.subr.mxu1 %v12881_v26 }
 0x239   : > { %15100 = vmatpush3.msra.mxu1 %v12881_v26 }
 0x23a   : > { %15091 = vmatmul.mubr.msk.f32.gmra.mxu1 %vm441_vm0, %v4287_v17  ;;  %15205 = vmatmul.mubr.msk.f32.gmra.mxu0 %vm441_vm0, %v4285_v63 }
 0x23b   : > { %15101 = vmatprep.mubr.msk.f32.mxu1 %vm441_vm0, %v17828_v42  ;;  %15207 = vmatprep.mubr.msk.f32.mxu0 %vm441_vm0, %v4286_v14 }
 0x23c   : > { %15133 = vmatprep.subr.mxu1 %v12908_v60 }
 0x23e   : > { %15102 = vmatmul.mubr.msk.f32.vlgmr.msra.gmra.mxu1 %vm441_vm0, %v17835_v54  ;;  %15208 = vmatmul.mubr.msk.f32.gmra.mxu0 %vm441_vm0, %v4287_v17 }
 0x23f   : > { %15104 = vmatprep.mubr.msk.f32.mxu1 %vm441_vm0, %v17840_v57  ;;  %15134 = vmatpush3.msra.mxu1 %v12908_v60 }
 0x240   : > { %15210 = vmatprep.mubr.msk.f32.mxu0 %vm441_vm0, %v5187_v30  ;;  %15135 = vmatprep.subr.mxu1 %v12907_v11 }
 0x241   : > { %15136 = vmatpush3.msra.mxu1 %v12907_v11 }
 0x242   : > { %15105 = vmatmul.mubr.msk.f32.gmra.mxu1 %vm441_vm0, %v17851_v12  ;;  %15137 = vmatprep.subr.mxu1 %v12906_v10 }
 0x243   : > { %15107 = vmatprep.mubr.msk.f32.mxu1 %vm441_vm0, %v17857_v20  ;;  %15138 = vmatpush3.msra.mxu1 %v12906_v10 }
 0x244   : > { %15139 = vmatprep.subr.mxu1 %v12905_v13  ;;  %15211 = vmatmul.mubr.msk.f32.gmra.mxu0 %vm441_vm0, %v5188_v52 }
 0x245   : > { %15140 = vmatpush3.msra.mxu1 %v12905_v13  ;;  %15241 = vmatprep.mubr.msk.f32.mxu0 %vm441_vm0, %v5371_v45 }
 0x246   : > { %15108 = vmatmul.mubr.msk.f32.gmra.mxu1 %vm441_vm0, %v17866_v15  ;;  %15173 = vmatprep.subr.mxu1 %v12932_v44 }
 0x247   : > { %15110 = vmatprep.mubr.msk.f32.mxu1 %vm441_vm0, %v17876_v24 }
 0x24a   : > { %15111 = vmatmul.mubr.msk.f32.gmra.mxu1 %vm441_vm0, %v4887_v18 }
 0x24b   : > { %15141 = vmatprep.mubr.msk.f32.mxu1 %vm441_vm0, %v17891_v8 }
 0x24e   : > { %15142 = vmatmul.mubr.msk.f32.vlgmr.msra.gmra.mxu1 %vm441_vm0, %v17900_v19 }
 0x24f   : > { %15144 = vmatprep.mubr.msk.f32.mxu1 %vm441_vm0, %v4283_v51  ;;  %15174 = vmatpush3.msra.mxu1 %v12932_v44 }
 0x250   : > { %15175 = vmatprep.subr.mxu1 %v12931_v16 }
 0x251   : > { %15176 = vmatpush3.msra.mxu1 %v12931_v16 }
 0x252   : > { %15145 = vmatmul.mubr.msk.f32.gmra.mxu1 %vm441_vm0, %v4284_v1  ;;  %15177 = vmatprep.subr.mxu1 %v12930_v3 }
 0x253   : > { %15147 = vmatprep.mubr.msk.f32.mxu1 %vm441_vm0, %v4285_v63  ;;  %15178 = vmatpush3.msra.mxu1 %v12930_v3 }
 0x254   : > { %15179 = vmatprep.subr.mxu1 %v12929_v6 }
 0x255   : > { %15180 = vmatpush3.msra.mxu1 %v12929_v6 }
 0x256   : > { %15148 = vmatmul.mubr.msk.f32.gmra.mxu1 %vm441_vm0, %v4286_v14 }
 0x257   : > { %15150 = vmatprep.mubr.msk.f32.mxu1 %vm441_vm0, %v4287_v17 }
 0x25a   : > { %15151 = vmatmul.mubr.msk.f32.gmra.mxu1 %vm441_vm0, %v5187_v30 }
 0x25b   : > { %15181 = vmatprep.mubr.msk.f32.mxu1 %vm441_vm0, %v17695_v4  ;;  %v12957_v4 = vld [vmem:[%s20630_s5 + $0x38] sm:$0xff] }
 0x25c   : > { %15213 = vmatprep.subr.mxu1 %v12957_v4 }
 0x25e   : > { %15182 = vmatmul.mubr.msk.f32.vlgmr.msra.gmra.mxu1 %vm441_vm0, %v17749_v25  ;;  %v5382_v25 = vld [vmem:[%s20630_s5 + $0x18] sm:$0xff] }
 0x25f   : > { %15184 = vmatprep.mubr.msk.f32.mxu1 %vm441_vm0, %v17772_v32  ;;  %15233 = vmatprep.subr.mxu0 %v5382_v25  ;;  %v12956_v32 = vld [vmem:[%s20630_s5 + $0x30] sm:$0xff] }
 0x260   : > { %15214 = vmatpush3.msra.mxu1 %v12957_v4  ;;  %15234 = vmatpush3.msra.mxu0 %v5382_v25 }
 0x261   : > { %15215 = vmatprep.subr.mxu1 %v12956_v32 }
 0x262   : > { %15185 = vmatmul.mubr.msk.f32.gmra.mxu1 %vm441_vm0, %v17789_v41  ;;  %v5381_v41 = vld [vmem:[%s20630_s5 + $0x10] sm:$0xff] }
 0x263   : > { %15187 = vmatprep.mubr.msk.f32.mxu1 %vm441_vm0, %v17807_v47  ;;  %15235 = vmatprep.subr.mxu0 %v5381_v41  ;;  %v12954_v47 = vld [vmem:[%s20630_s5 + $0x20] sm:$0xff] }
 0x264   : > { %15216 = vmatpush3.msra.mxu1 %v12956_v32  ;;  %15236 = vmatpush3.msra.mxu0 %v5381_v41 }
 0x265   : > { %15217 = vmatprep.subr.mxu1 %v12955_v43  ;;  %15237 = vmatprep.subr.mxu0 %v5380_v49 }
 0x266   : > { %15188 = vmatmul.mubr.msk.f32.gmra.mxu1 %vm441_vm0, %v17820_v33  ;;  %15238 = vmatpush3.msra.mxu0 %v5380_v49 }
 0x267   : > { %15190 = vmatprep.mubr.msk.f32.mxu1 %vm441_vm0, %v17842_v29  ;;  %15218 = vmatpush3.msra.mxu1 %v12955_v43 }
 0x268   : > { %15219 = vmatprep.subr.mxu1 %v12954_v47  ;;  %15239 = vmatprep.subr.mxu0 %v5379_v50 }
 0x269   : > { %15220 = vmatpush3.msra.mxu1 %v12954_v47  ;;  %15240 = vmatpush3.msra.mxu0 %v5379_v50 }
 0x26a   : > { %15191 = vmatmul.mubr.msk.f32.gmra.mxu1 %vm441_vm0, %v5038_v62  ;;  %15253 = vmatprep.subr.mxu1 %v18022_v35 }
 0x26b   : > { %15221 = vmatprep.mubr.msk.f32.mxu1 %vm441_vm0, %v5383_v61  ;;  %15273 = vmatprep.subr.mxu0 %v18028_v2 }
 0x2aa   : > { %v15043_v22 = vpop.f32.mrf.mxu1 }
 0x2ac   : > { %v4112_v37 = vpop.f32.mrf.mxu1 }
 0x2b2   : > { %v15123_v27 = vpop.f32.mrf.mxu0 }
 0x2b4   : > { %v18035_v42 = vpop.f32.mrf.mxu0 }
 0x2bb   : > { %v15046_v39 = vpop.f32.mrf.mxu1 }
 0x2bd   : > { %v4122_v7 = vpop.f32.mrf.mxu1 }
 0x2c2   : > { %v18037_v54 = vpop.f32.mrf.mxu0 }
 0x2c4   : > { %v18039_v59 = vpop.f32.mrf.mxu0 }
 0x2ca   : > { %v15049_v28 = vpop.f32.mrf.mxu1 }
 0x2cc   : > { %v4132_v5 = vpop.f32.mrf.mxu1 }
 0x2d3   : > { %v18041_v20 = vpop.f32.mrf.mxu0 }
 0x2d5   : > { %v18043_v9 = vpop.f32.mrf.mxu0 }
 0x2da   : > { %v18031_v31 = vpop.f32.mrf.mxu1 }
 0x2dc   : > { %v18033_v33 = vpop.f32.mrf.mxu1 }
 0x2de   : > { %v15063_v53 = vpop.f32.mrf.mxu1 }
 0x2df   : > { %v4247_v16 = vadd.f32 %v15063_v53, %v15043_v22 }
 0x2e0   : > { %v4241_v57 = vpop.f32.mrf.mxu1 }
 0x2e1   : > { %v4242_v62 = vadd.f32 %v4241_v57, %v4112_v37 }
 0x2e2   : > { %v15066_v29 = vpop.f32.mrf.mxu1  ;;  %v18045_v23 = vpop.f32.mrf.mxu0 }
 0x2e3   : > { %v4257_v32 = vadd.f32 %v15066_v29, %v15046_v39 }
 0x2e4   : > { %v4251_v12 = vpop.f32.mrf.mxu1  ;;  %v18047_v36 = vpop.f32.mrf.mxu0 }
 0x2e5   : > { %20777 = vst [vmem:[#allocation17_spill] sm:$0xff] %v18047_v36  ;;  %v4252_v50 = vadd.f32 %v4251_v12, %v4122_v7 }
 0x2e6   : > { %v15069_v58 = vpop.f32.mrf.mxu1  ;;  %v15163_v55 = vpop.f32.mrf.mxu0 }
 0x2e8   : > { %v4261_v15 = vpop.f32.mrf.mxu1  ;;  %v18049_v19 = vpop.f32.mrf.mxu0 }
 0x2e9   : > { %v4262_v22 = vadd.f32 %v4261_v15, %v4132_v5 }
 0x2ea   : > { %v15072_v0 = vpop.f32.mrf.mxu1  ;;  %v18051_v51 = vpop.f32.mrf.mxu0 }
 0x2eb   : > { %v4277_v39 = vadd.f32 %v15072_v0, %v18031_v31 }
 0x2ec   : > { %v4271_v48 = vpop.f32.mrf.mxu1  ;;  %v18053_v1 = vpop.f32.mrf.mxu0 }
 0x2ee   : > { %v15083_v24 = vpop.f32.mrf.mxu1  ;;  %v18055_v14 = vpop.f32.mrf.mxu0 }
 0x2ef   : > { %20778 = vst [vmem:[#allocation18_spill] sm:$0xff] %v18055_v14  ;;  %v4423_v4 = vadd.f32 %v15083_v24, %v4247_v16  ;;  %v4267_v14 = vadd.f32 %v15069_v58, %v15049_v28 }
 0x2f0   : > { %v4383_v34 = vpop.f32.mrf.mxu1  ;;  %v18057_v11 = vpop.f32.mrf.mxu0 }
 0x2f1   : > { %20779 = vst [vmem:[#allocation19_spill] sm:$0xff] %v18057_v11  ;;  %v4422_v41 = vadd.f32 %v4383_v34, %v4242_v62 }
 0x2f2   : > { %v15086_v40 = vpop.f32.mrf.mxu1  ;;  %v18059_v13 = vpop.f32.mrf.mxu0 }
 0x2f3   : > { %20780 = vst [vmem:[#allocation20_spill] sm:$0xff] %v18059_v13  ;;  %v4425_v61 = vadd.f32 %v15086_v40, %v4257_v32  ;;  %v4272_v40 = vadd.f32 %v4271_v48, %v18033_v33 }
 0x2f4   : > { %v4393_v8 = vpop.f32.mrf.mxu1  ;;  %v18061_v3 = vpop.f32.mrf.mxu0 }
 0x2f5   : > { %20781 = vst [vmem:[#allocation22_spill] sm:$0xff] %v18061_v3  ;;  %v4424_v35 = vadd.f32 %v4393_v8, %v4252_v50 }
 0x2f6   : > { %v15089_v21 = vpop.f32.mrf.mxu1  ;;  %v15203_v49 = vpop.f32.mrf.mxu0 }
 0x2f7   : > { %v4427_v29 = vadd.f32 %v15089_v21, %v4267_v14 }
 0x2f8   : > { %v4403_v18 = vpop.f32.mrf.mxu1  ;;  %v5284_v53 = vpop.f32.mrf.mxu0  ;;  %v20784_v32 = vld [vmem:[#allocation19_spill] sm:$0xff] }
 0x2f9   : > { %v4426_v24 = vadd.f32 %v4403_v18, %v4262_v22 }
 0x2fa   : > { %v15092_v46 = vpop.f32.mrf.mxu1  ;;  %v20785_v22 = vld [vmem:[#allocation20_spill] sm:$0xff] }
 0x2fb   : > { %v4429_v8 = vadd.f32 %v15092_v46, %v4277_v39  ;;  %v18074_v46 = vld [vmem:[%s20629_s4] ss:$0 sm:$0xff] }
 0x2fc   : > { %v4413_v38 = vpop.f32.mrf.mxu1 }
 0x2fe   : > { %v15103_v56 = vpop.f32.mrf.mxu1 }
 0x2ff   : > { %v4573_v43 = vadd.f32 %v15103_v56, %v4423_v4  ;;  %v20783_v4 = vld [vmem:[#allocation18_spill] sm:$0xff] }
 0x300   : > { %v4533_v63 = vpop.f32.mrf.mxu1 }
 0x301   : > { %v4572_v45 = vadd.f32 %v4533_v63, %v4422_v41  ;;  %v4723_v11 = vadd.f32 %v15123_v27, %v4573_v43  ;;  %v15206_v27 = vpop.f32.mrf.mxu0 }
 0x302   : > { %v15106_v26 = vpop.f32.mrf.mxu1 }
 0x303   : > { %v4575_v13 = vadd.f32 %v15106_v26, %v4425_v61  ;;  %v4722_v57 = vadd.f32 %v18035_v42, %v4572_v45  ;;  %v4428_v42 = vadd.f32 %v4413_v38, %v4272_v40  ;;  %v5294_v26 = vpop.f32.mrf.mxu0 }
 0x304   : > { %v4543_v17 = vpop.f32.mrf.mxu1 }
 0x305   : > { %v4574_v36 = vadd.f32 %v4543_v17, %v4424_v35  ;;  %v4725_v12 = vadd.f32 %v18037_v54, %v4575_v13 }
 0x306   : > { %v15109_v60 = vpop.f32.mrf.mxu1 }
 0x307   : > { %v4577_v28 = vadd.f32 %v15109_v60, %v4427_v29  ;;  %v4724_v35 = vadd.f32 %v18039_v59, %v4574_v36 }
 0x308   : > { %v4553_v30 = vpop.f32.mrf.mxu1 }
 0x309   : > { %v4576_v5 = vadd.f32 %v4553_v30, %v4426_v24  ;;  %v4727_v33 = vadd.f32 %v18041_v20, %v4577_v28 }
 0x30a   : > { %v15112_v10 = vpop.f32.mrf.mxu1 }
 0x30b   : > { %v4579_v63 = vadd.f32 %v15112_v10, %v4429_v8  ;;  %v4726_v48 = vadd.f32 %v18043_v9, %v4576_v5  ;;  %v15209_v10 = vpop.f32.mrf.mxu0 }
 0x30c   : > { %v4563_v52 = vpop.f32.mrf.mxu1 }
 0x30d   : > { %v4578_v54 = vadd.f32 %v4563_v52, %v4428_v42  ;;  %v20782_v52 = vld [vmem:[#allocation17_spill] sm:$0xff]  ;;  %v5304_v50 = vpop.f32.mrf.mxu0 }
 0x30e   : > { %v15143_v44 = vpop.f32.mrf.mxu1 }
 0x30f   : > { %v4873_v37 = vadd.f32 %v15143_v44, %v4723_v11  ;;  %v4728_v44 = vadd.f32 %v20782_v52, %v4578_v54 }
 0x310   : > { %v4833_v6 = vpop.f32.mrf.mxu1 }
 0x311   : > { %v4872_v7 = vadd.f32 %v4833_v6, %v4722_v57  ;;  %v5024_v56 = vadd.f32 %v15163_v55, %v4873_v37 }
 0x312   : > { %v15146_v25 = vpop.f32.mrf.mxu1 }
 0x313   : > { %v4875_v15 = vadd.f32 %v15146_v25, %v4725_v12  ;;  %v5023_v18 = vadd.f32 %v18049_v19, %v4872_v7  ;;  %v4729_v19 = vadd.f32 %v18045_v23, %v4579_v63  ;;  %v15212_v7 = vpop.f32.mrf.mxu0  ;;  %v20786_v12 = vld [vmem:[#allocation22_spill] sm:$0xff] }
 0x314   : > { %v4843_v47 = vpop.f32.mrf.mxu1 }
 0x315   : > { %v4874_v0 = vadd.f32 %v4843_v47, %v4724_v35  ;;  %v5026_v38 = vadd.f32 %v18051_v51, %v4875_v15 }
 0x316   : > { %v15149_v2 = vpop.f32.mrf.mxu1 }
 0x317   : > { %v4877_v14 = vadd.f32 %v15149_v2, %v4727_v33  ;;  %v5025_v9 = vadd.f32 %v18053_v1, %v4874_v0  ;;  %v5314_v0 = vpop.f32.mrf.mxu0 }
 0x318   : > { %v4853_v3 = vpop.f32.mrf.mxu1 }
 0x319   : > { %v4876_v17 = vadd.f32 %v4853_v3, %v4726_v48  ;;  %v5028_v23 = vadd.f32 %v20783_v4, %v4877_v14  ;;  %v12986_v4 = vld [vmem:[%s20630_s5 + $0x60] sm:$0xff] }
 0x31a   : > { %v15152_v34 = vpop.f32.mrf.mxu1 }
 0x31b   : > { %v4879_v13 = vadd.f32 %v15152_v34, %v4729_v19  ;;  %v5027_v41 = vadd.f32 %v20784_v32, %v4876_v17  ;;  %v5646_v32 = vld [vmem:[#allocation3 + $0x2] sm:$0xff] }
 0x31c   : > { %v4863_v58 = vpop.f32.mrf.mxu1 }
 0x31d   : > { %v4878_v3 = vadd.f32 %v4863_v58, %v4728_v44 }
 0x31e   : > { %v15183_v31 = vpop.f32.mrf.mxu1 }
 0x31f   : > { %v5174_v21 = vadd.f32 %v15183_v31, %v5024_v56  ;;  %v5029_v40 = vadd.f32 %v20786_v12, %v4878_v3  ;;  %v13037_v12 = vld [vmem:[%s20630_s5 + $0xf8] sm:$0xff] }
 0x320   : > { %v5134_v59 = vpop.f32.mrf.mxu1 }
 0x321   : > { %v5324_v36 = vadd.f32 %v15203_v49, %v5174_v21  ;;  %v5173_v55 = vadd.f32 %v5134_v59, %v5023_v18 }
 0x322   : > { %v15186_v60 = vpop.f32.mrf.mxu1 }
 0x323   : > { %v5339_v11 = vadd.f32 %v18074_v46, %v5324_v36  ;;  %v5323_v20 = vadd.f32 %v5284_v53, %v5173_v55  ;;  %v5176_v30 = vadd.f32 %v15186_v60, %v5026_v38  ;;  %v5030_v53 = vadd.f32 %v20785_v22, %v4879_v13  ;;  %v12976_v38 = vld [vmem:[%s20630_s5 + $0x50] sm:$0xff]  ;;  %v12975_v13 = vld [vmem:[%s20630_s5 + $0x48] sm:$0xff] }
 0x324   : > { %v5144_v16 = vpop.f32.mrf.mxu1  ;;  %v12988_v60 = vld [vmem:[%s20630_s5 + $0x70] sm:$0xff]  ;;  %v12999_v22 = vld [vmem:[%s20630_s5 + $0x88] sm:$0xff] }
 0x325   : > { %v5347_v6 = vmax.f32 %v5339_v11, 0.0  ;;  %v5338_v62 = vadd.f32 %v18074_v46, %v5323_v20  ;;  %v5326_v51 = vadd.f32 %v15206_v27, %v5176_v30  ;;  %v5175_v2 = vadd.f32 %v5144_v16, %v5025_v9  ;;  %v20787_v20 = vld [vmem:[#allocation15_spill] sm:$0xff]  ;;  %v20788_v30 = vld [vmem:[#allocation16_spill] sm:$0xff]  ;;  %v12987_v16 = vld [vmem:[%s20630_s5 + $0x68] sm:$0xff] }
 0x326   : > { %v15189_v25 = vpop.f32.mrf.mxu1 }
 0x327   : > { %v5355_v43 = vmin.f32 %v5347_v6, 6.0  ;;  %v5346_v49 = vmax.f32 %v5338_v62, 0.0  ;;  %v5341_v1 = vadd.f32 %v18074_v46, %v5326_v51  ;;  %v5325_v47 = vadd.f32 %v5294_v26, %v5175_v2  ;;  %v12974_v51 = vld [vmem:[%s20630_s5 + $0x40] sm:$0xff] }
 0x328   : > { %v5178_v61 = vadd.f32 %v15189_v25, %v5028_v23  ;;  %v5154_v45 = vpop.f32.mrf.mxu1 }
 0x329   : > { %5364 = vst.msk [vmem:[#allocation3 + $0x31] sm:$0xff] %vm441_vm0, %v5355_v43  ;;  %v5354_v37 = vmin.f32 %v5346_v49, 6.0  ;;  %v5349_v57 = vmax.f32 %v5341_v1, 0.0  ;;  %v5340_v39 = vadd.f32 %v18074_v46, %v5325_v47  ;;  %v5177_v29 = vadd.f32 %v5154_v45, %v5027_v41  ;;  %v13001_v41 = vld [vmem:[%s20630_s5 + $0x98] sm:$0xff]  ;;  %v13000_v47 = vld [vmem:[%s20630_s5 + $0x90] sm:$0xff] }
 0x32a   : > { %v5328_v24 = vadd.f32 %v15209_v10, %v5178_v61  ;;  %v15192_v34 = vpop.f32.mrf.mxu1  ;;  %v13013_v43 = vld [vmem:[%s20630_s5 + $0xb8] sm:$0xff] }
 0x32b   : > { %5363 = vst.msk [vmem:[#allocation3 + $0x19] sm:$0xff] %vm441_vm0, %v5354_v37  ;;  %v5357_v8 = vmin.f32 %v5349_v57, 6.0  ;;  %v5348_v27 = vmax.f32 %v5340_v39, 0.0  ;;  %v5327_v28 = vadd.f32 %v5304_v50, %v5177_v29  ;;  %v5180_v5 = vadd.f32 %v15192_v34, %v5030_v53  ;;  %v13012_v50 = vld [vmem:[%s20630_s5 + $0xb0] sm:$0xff]  ;;  %v13011_v53 = vld [vmem:[%s20630_s5 + $0xa8] sm:$0xff]  ;;  %v12998_v39 = vld [vmem:[%s20630_s5 + $0x80] sm:$0xff] }
 0x32c   : > { %v5343_v58 = vadd.f32 %v18074_v46, %v5328_v24  ;;  %v5164_v15 = vpop.f32.mrf.mxu1  ;;  %v13010_v29 = vld [vmem:[%s20630_s5 + $0xa0] sm:$0xff] }
 0x32d   : > { %5366 = vst.msk [vmem:[#allocation3 + $0x61] sm:$0xff] %vm441_vm0, %v5357_v8  ;;  %v5356_v35 = vmin.f32 %v5348_v27, 6.0  ;;  %v5342_v56 = vadd.f32 %v18074_v46, %v5327_v28  ;;  %v5330_v42 = vadd.f32 %v15212_v7, %v5180_v5  ;;  %v5179_v63 = vadd.f32 %v5164_v15, %v5029_v40  ;;  %v13025_v7 = vld [vmem:[%s20630_s5 + $0xd8] sm:$0xff]  ;;  %v13024_v40 = vld [vmem:[%s20630_s5 + $0xd0] sm:$0xff]  ;;  %v13023_v27 = vld [vmem:[%s20630_s5 + $0xc8] sm:$0xff] }
 0x32e   : > { %v5351_v31 = vmax.f32 %v5343_v58, 0.0  ;;  %v13036_v8 = vld [vmem:[%s20630_s5 + $0xf0] sm:$0xff]  ;;  %v13035_v28 = vld [vmem:[%s20630_s5 + $0xe8] sm:$0xff]  ;;  %v13022_v5 = vld [vmem:[%s20630_s5 + $0xc0] sm:$0xff] }
 0x32f   : > { %5365 = vst.msk [vmem:[#allocation3 + $0x49] sm:$0xff] %vm441_vm0, %v5356_v35  ;;  %v5350_v21 = vmax.f32 %v5342_v56, 0.0  ;;  %v5345_v18 = vadd.f32 %v18074_v46, %v5330_v42  ;;  %v5329_v26 = vadd.f32 %v5314_v0, %v5179_v63  ;;  %v13034_v58 = vld [vmem:[%s20630_s5 + $0xe0] sm:$0xff]  ;;  %v13049_v56 = vld [vmem:[%s20630_s5 + $0x118] sm:$0xff]  ;;  %v13048_v42 = vld [vmem:[%s20630_s5 + $0x110] sm:$0xff] }
 0x330   : > { %v5359_v54 = vmin.f32 %v5351_v31, 6.0  ;;  %v18106_v19 = vld [vmem:[#allocation3 + $0x31] sm:$0xff] }
 0x331   : > { %v5358_v33 = vmin.f32 %v5350_v21, 6.0  ;;  %v5353_v48 = vmax.f32 %v5345_v18, 0.0  ;;  %v5344_v59 = vadd.f32 %v18074_v46, %v5329_v26  ;;  %v18108_v46 = vld [vmem:[#allocation3 + $0x30] sm:$0xff]  ;;  %v13047_v63 = vld [vmem:[%s20630_s5 + $0x108] sm:$0xff]  ;;  %v13062_v26 = vld [vmem:[%s20632_s7 + $0x38] sm:$0xff] }
 0x332   : > { %5368 = vst.msk [vmem:[#allocation3 + $0x91] sm:$0xff] %vm441_vm0, %v5359_v54  ;;  %v18097_v36 = vld [vmem:[#allocation3 + $0x19] sm:$0xff]  ;;  %v13046_v31 = vld [vmem:[%s20630_s5 + $0x100] sm:$0xff]  ;;  %v6783_v54 = vld [vmem:[%s20632_s7 + $0x18] sm:$0xff] }
 0x333   : > { %v5372_v55 = vld [vmem:[#allocation3 + $0x18] sm:$0xff]  ;;  %5367 = vst.msk [vmem:[#allocation3 + $0x79] sm:$0xff] %vm441_vm0, %v5358_v33  ;;  %v5361_v14 = vmin.f32 %v5353_v48, 6.0  ;;  %v5352_v17 = vmax.f32 %v5344_v59, 0.0  ;;  %15222 = vmatmul.mubr.msk.f32.vlgmr.msra.gmra.mxu1 %vm441_vm0, %v18097_v36  ;;  %v13061_v33 = vld [vmem:[%s20632_s7 + $0x30] sm:$0xff] }
 0x334   : > { %15242 = vmatmul.mubr.msk.f32.vlgmr.msra.gmra.mxu0 %vm441_vm0, %v5372_v55  ;;  %15224 = vmatprep.mubr.msk.f32.mxu1 %vm441_vm0, %v18106_v19  ;;  %v18132_v52 = vld [vmem:[#allocation3 + $0x61] sm:$0xff]  ;;  %v18184_v1 = vld [vmem:[#allocation3 + $0x32] sm:$0xff] }
 0x335   : > { %15244 = vmatprep.mubr.msk.f32.mxu0 %vm441_vm0, %v18108_v46  ;;  %5370 = vst.msk [vmem:[#allocation3 + $0xc1] sm:$0xff] %vm441_vm0, %v5361_v14  ;;  %v5360_v11 = vmin.f32 %v5352_v17, 6.0  ;;  %15254 = vmatpush3.msra.mxu1 %v20787_v20  ;;  %v18134_v44 = vld [vmem:[#allocation3 + $0x60] sm:$0xff]  ;;  %v6222_v0 = vld [vmem:[#allocation3 + $0xd8] sm:$0xff]  ;;  %v6772_v17 = vld [vmem:[#allocation2] sm:$0xff] }
 0x336   : > { %15274 = vmatpush3.msra.mxu0 %v20788_v30  ;;  %v18120_v9 = vld [vmem:[#allocation3 + $0x49] sm:$0xff]  ;;  %15255 = vmatprep.subr.mxu1 %v12976_v38  ;;  %v5647_v49 = vld [vmem:[#allocation3 + $0x1a] sm:$0xff]  ;;  %v6784_v14 = vld [vmem:[#allocation2 + $0x1] sm:$0xff] }
 0x337   : > { %v18122_v10 = vld [vmem:[#allocation3 + $0x48] sm:$0xff]  ;;  %15275 = vmatprep.subr.mxu0 %v12988_v60  ;;  %5369 = vst.msk [vmem:[#allocation3 + $0xa9] sm:$0xff] %vm441_vm0, %v5360_v11  ;;  %15225 = vmatmul.mubr.msk.f32.gmra.mxu1 %vm441_vm0, %v18120_v9  ;;  %v6364_v21 = vld [vmem:[#allocation3 + $0xd9] sm:$0xff] }
 0x338   : > { %15245 = vmatmul.mubr.msk.f32.gmra.mxu0 %vm441_vm0, %v18122_v10  ;;  %15227 = vmatprep.mubr.msk.f32.mxu1 %vm441_vm0, %v18132_v52  ;;  %v18196_v61 = vld [vmem:[#allocation3 + $0x4a] sm:$0xff]  ;;  %v18202_v45 = vld [vmem:[#allocation3 + $0x62] sm:$0xff]  ;;  %v6506_v18 = vld [vmem:[#allocation3 + $0xda] sm:$0xff] }
 0x339   : > { %15247 = vmatprep.mubr.msk.f32.mxu0 %vm441_vm0, %v18134_v44  ;;  %15256 = vmatpush3.msra.mxu1 %v12976_v38  ;;  %v18154_v2 = vld [vmem:[#allocation3 + $0x91] sm:$0xff]  ;;  %v6782_v48 = vld [vmem:[%s20632_s7 + $0x10] sm:$0xff] }
 0x33a   : > { %15276 = vmatpush3.msra.mxu0 %v12988_v60  ;;  %v18143_v6 = vld [vmem:[#allocation3 + $0x79] sm:$0xff]  ;;  %15257 = vmatprep.subr.mxu1 %v12975_v13  ;;  %v18156_v3 = vld [vmem:[#allocation3 + $0x90] sm:$0xff] }
 0x33b   : > { %v18145_v62 = vld [vmem:[#allocation3 + $0x78] sm:$0xff]  ;;  %15277 = vmatprep.subr.mxu0 %v12987_v16  ;;  %15228 = vmatmul.mubr.msk.f32.gmra.mxu1 %vm441_vm0, %v18143_v6  ;;  %v6780_v38 = vld [vmem:[%s20632_s7] sm:$0xff] }
 0x33c   : > { %15248 = vmatmul.mubr.msk.f32.gmra.mxu0 %vm441_vm0, %v18145_v62  ;;  %15230 = vmatprep.mubr.msk.f32.mxu1 %vm441_vm0, %v18154_v2  ;;  %v18214_v37 = vld [vmem:[#allocation3 + $0x7a] sm:$0xff]  ;;  %v18220_v57 = vld [vmem:[#allocation3 + $0x92] sm:$0xff]  ;;  %v6079_v35 = vld [vmem:[#allocation3 + $0xc2] sm:$0xff] }
 0x33d   : > { %15250 = vmatprep.mubr.msk.f32.mxu0 %vm441_vm0, %v18156_v3  ;;  %15258 = vmatpush3.msra.mxu1 %v12975_v13  ;;  %v18234_v34 = vld [vmem:[#allocation3 + $0xc0] sm:$0xff]  ;;  %v13060_v59 = vld [vmem:[%s20632_s7 + $0x28] sm:$0xff] }
 0x33e   : > { %15278 = vmatpush3.msra.mxu0 %v12987_v16  ;;  %v18165_v23 = vld [vmem:[#allocation3 + $0xa9] sm:$0xff]  ;;  %15259 = vmatprep.subr.mxu1 %v12974_v51  ;;  %v5937_v15 = vld [vmem:[#allocation3 + $0xc1] sm:$0xff] }
 0x33f   : > { %v18167_v25 = vld [vmem:[#allocation3 + $0xa8] sm:$0xff]  ;;  %15279 = vmatprep.subr.mxu0 %v12986_v4  ;;  %15231 = vmatmul.mubr.msk.f32.gmra.mxu1 %vm441_vm0, %v18165_v23 }
 0x340   : > { %15251 = vmatmul.mubr.msk.f32.gmra.mxu0 %vm441_vm0, %v18167_v25  ;;  %15260 = vmatpush3.msra.mxu1 %v12974_v51  ;;  %v18232_v24 = vld [vmem:[#allocation3 + $0xaa] sm:$0xff] }
 0x341   : > { %15281 = vmatprep.mubr.msk.f32.mxu0 %vm441_vm0, %v5372_v55  ;;  %15261 = vmatprep.mubr.msk.f32.mxu1 %vm441_vm0, %v5646_v32  ;;  %v13059_v55 = vld [vmem:[%s20632_s7 + $0x20] sm:$0xff] }
 0x342   : > { %15280 = vmatpush3.msra.mxu0 %v12986_v4  ;;  %15293 = vmatprep.subr.mxu1 %v13001_v41 }
 0x343   : > { %15313 = vmatprep.subr.mxu0 %v13013_v43  ;;  %15262 = vmatmul.mubr.msk.f32.vlgmr.msra.gmra.mxu1 %vm441_vm0, %v5647_v49 }
 0x344   : > { %15282 = vmatmul.mubr.msk.f32.vlgmr.msra.gmra.mxu0 %vm441_vm0, %v18108_v46  ;;  %15264 = vmatprep.mubr.msk.f32.mxu1 %vm441_vm0, %v18184_v1 }
 0x345   : > { %15284 = vmatprep.mubr.msk.f32.mxu0 %vm441_vm0, %v18122_v10  ;;  %15294 = vmatpush3.msra.mxu1 %v13001_v41 }
 0x346   : > { %15314 = vmatpush3.msra.mxu0 %v13013_v43  ;;  %15295 = vmatprep.subr.mxu1 %v13000_v47 }
 0x347   : > { %15315 = vmatprep.subr.mxu0 %v13012_v50  ;;  %15265 = vmatmul.mubr.msk.f32.gmra.mxu1 %vm441_vm0, %v18196_v61 }
 0x348   : > { %15285 = vmatmul.mubr.msk.f32.gmra.mxu0 %vm441_vm0, %v18134_v44  ;;  %15267 = vmatprep.mubr.msk.f32.mxu1 %vm441_vm0, %v18202_v45 }
 0x349   : > { %15287 = vmatprep.mubr.msk.f32.mxu0 %vm441_vm0, %v18145_v62  ;;  %15296 = vmatpush3.msra.mxu1 %v13000_v47 }
 0x34a   : > { %15316 = vmatpush3.msra.mxu0 %v13012_v50  ;;  %15297 = vmatprep.subr.mxu1 %v12999_v22 }
 0x34b   : > { %15317 = vmatprep.subr.mxu0 %v13011_v53  ;;  %15268 = vmatmul.mubr.msk.f32.gmra.mxu1 %vm441_vm0, %v18214_v37 }
 0x34c   : > { %15288 = vmatmul.mubr.msk.f32.gmra.mxu0 %vm441_vm0, %v18156_v3  ;;  %15270 = vmatprep.mubr.msk.f32.mxu1 %vm441_vm0, %v18220_v57 }
 0x34d   : > { %15290 = vmatprep.mubr.msk.f32.mxu0 %vm441_vm0, %v18167_v25  ;;  %15298 = vmatpush3.msra.mxu1 %v12999_v22 }
 0x34e   : > { %15318 = vmatpush3.msra.mxu0 %v13011_v53  ;;  %15299 = vmatprep.subr.mxu1 %v12998_v39 }
 0x34f   : > { %15319 = vmatprep.subr.mxu0 %v13010_v29  ;;  %15271 = vmatmul.mubr.msk.f32.gmra.mxu1 %vm441_vm0, %v18232_v24 }
 0x350   : > { %15291 = vmatmul.mubr.msk.f32.gmra.mxu0 %vm441_vm0, %v18234_v34  ;;  %15300 = vmatpush3.msra.mxu1 %v12998_v39 }
 0x351   : > { %15301 = vmatprep.mubr.msk.f32.mxu1 %vm441_vm0, %v18097_v36  ;;  %15321 = vmatprep.mubr.msk.f32.mxu0 %vm441_vm0, %v5647_v49  ;;  %v6781_v36 = vld [vmem:[%s20632_s7 + $0x8] sm:$0xff] }
 0x352   : > { %15320 = vmatpush3.msra.mxu0 %v13010_v29  ;;  %15333 = vmatprep.subr.mxu1 %v13025_v7 }
 0x353   : > { %15353 = vmatprep.subr.mxu0 %v13037_v12  ;;  %15302 = vmatmul.mubr.msk.f32.vlgmr.msra.gmra.mxu1 %vm441_vm0, %v18106_v19 }
 0x354   : > { %15322 = vmatmul.mubr.msk.f32.vlgmr.msra.gmra.mxu0 %vm441_vm0, %v18184_v1  ;;  %15304 = vmatprep.mubr.msk.f32.mxu1 %vm441_vm0, %v18120_v9 }
 0x355   : > { %15324 = vmatprep.mubr.msk.f32.mxu0 %vm441_vm0, %v18196_v61  ;;  %15334 = vmatpush3.msra.mxu1 %v13025_v7 }
 0x356   : > { %15354 = vmatpush3.msra.mxu0 %v13037_v12  ;;  %15335 = vmatprep.subr.mxu1 %v13024_v40 }
 0x357   : > { %15355 = vmatprep.subr.mxu0 %v13036_v8  ;;  %15305 = vmatmul.mubr.msk.f32.gmra.mxu1 %vm441_vm0, %v18132_v52 }
 0x358   : > { %15325 = vmatmul.mubr.msk.f32.gmra.mxu0 %vm441_vm0, %v18202_v45  ;;  %15307 = vmatprep.mubr.msk.f32.mxu1 %vm441_vm0, %v18143_v6 }
 0x359   : > { %15327 = vmatprep.mubr.msk.f32.mxu0 %vm441_vm0, %v18214_v37  ;;  %15336 = vmatpush3.msra.mxu1 %v13024_v40 }
 0x35a   : > { %15356 = vmatpush3.msra.mxu0 %v13036_v8  ;;  %15337 = vmatprep.subr.mxu1 %v13023_v27 }
 0x35b   : > { %15357 = vmatprep.subr.mxu0 %v13035_v28  ;;  %15308 = vmatmul.mubr.msk.f32.gmra.mxu1 %vm441_vm0, %v18154_v2 }
 0x35c   : > { %15328 = vmatmul.mubr.msk.f32.gmra.mxu0 %vm441_vm0, %v18220_v57  ;;  %15310 = vmatprep.mubr.msk.f32.mxu1 %vm441_vm0, %v18165_v23 }
 0x35d   : > { %15330 = vmatprep.mubr.msk.f32.mxu0 %vm441_vm0, %v18232_v24  ;;  %15338 = vmatpush3.msra.mxu1 %v13023_v27 }
 0x35e   : > { %15358 = vmatpush3.msra.mxu0 %v13035_v28  ;;  %15339 = vmatprep.subr.mxu1 %v13022_v5 }
 0x35f   : > { %15359 = vmatprep.subr.mxu0 %v13034_v58  ;;  %15311 = vmatmul.mubr.msk.f32.gmra.mxu1 %vm441_vm0, %v5937_v15 }
 0x360   : > { %15331 = vmatmul.mubr.msk.f32.gmra.mxu0 %vm441_vm0, %v6079_v35  ;;  %15340 = vmatpush3.msra.mxu1 %v13022_v5 }
 0x361   : > { %15341 = vmatprep.mubr.msk.f32.mxu1 %vm441_vm0, %v18108_v46  ;;  %15361 = vmatprep.mubr.msk.f32.mxu0 %vm441_vm0, %v18106_v19  ;;  %v18377_v19 = vld [vmem:[%s20632_s7 + $0x58] sm:$0xff] }
 0x362   : > { %15360 = vmatpush3.msra.mxu0 %v13034_v58  ;;  %15373 = vmatprep.subr.mxu1 %v13049_v56  ;;  %v18383_v46 = vld [vmem:[%s20632_s7 + $0x78] sm:$0xff] }
 0x363   : > { %15342 = vmatmul.mubr.msk.f32.vlgmr.msra.gmra.mxu1 %vm441_vm0, %v18122_v10  ;;  %15393 = vmatprep.subr.mxu0 %v13062_v26 }
 0x364   : > { %15362 = vmatmul.mubr.msk.f32.vlgmr.msra.gmra.mxu0 %vm441_vm0, %v18120_v9  ;;  %15344 = vmatprep.mubr.msk.f32.mxu1 %vm441_vm0, %v18134_v44 }
 0x365   : > { %15364 = vmatprep.mubr.msk.f32.mxu0 %vm441_vm0, %v18132_v52  ;;  %15374 = vmatpush3.msra.mxu1 %v13049_v56 }
 0x366   : > { %15375 = vmatprep.subr.mxu1 %v13048_v42  ;;  %15394 = vmatpush3.msra.mxu0 %v13062_v26 }
 0x367   : > { %15345 = vmatmul.mubr.msk.f32.gmra.mxu1 %vm441_vm0, %v18145_v62  ;;  %15395 = vmatprep.subr.mxu0 %v13061_v33 }
 0x368   : > { %15365 = vmatmul.mubr.msk.f32.gmra.mxu0 %vm441_vm0, %v18143_v6  ;;  %15347 = vmatprep.mubr.msk.f32.mxu1 %vm441_vm0, %v18156_v3 }
 0x369   : > { %15367 = vmatprep.mubr.msk.f32.mxu0 %vm441_vm0, %v18154_v2  ;;  %15376 = vmatpush3.msra.mxu1 %v13048_v42 }
 0x36a   : > { %15377 = vmatprep.subr.mxu1 %v13047_v63  ;;  %15396 = vmatpush3.msra.mxu0 %v13061_v33 }
 0x36b   : > { %15348 = vmatmul.mubr.msk.f32.gmra.mxu1 %vm441_vm0, %v18167_v25  ;;  %15397 = vmatprep.subr.mxu0 %v13060_v59 }
 0x36c   : > { %15368 = vmatmul.mubr.msk.f32.gmra.mxu0 %vm441_vm0, %v18165_v23  ;;  %15350 = vmatprep.mubr.msk.f32.mxu1 %vm441_vm0, %v18234_v34 }
 0x36d   : > { %15370 = vmatprep.mubr.msk.f32.mxu0 %vm441_vm0, %v5937_v15  ;;  %15378 = vmatpush3.msra.mxu1 %v13047_v63 }
 0x36e   : > { %15379 = vmatprep.subr.mxu1 %v13046_v31  ;;  %15398 = vmatpush3.msra.mxu0 %v13060_v59 }
 0x36f   : > { %15351 = vmatmul.mubr.msk.f32.gmra.mxu1 %vm441_vm0, %v6222_v0  ;;  %15399 = vmatprep.subr.mxu0 %v13059_v55 }
 0x370   : > { %15371 = vmatmul.mubr.msk.f32.gmra.mxu0 %vm441_vm0, %v6364_v21  ;;  %15380 = vmatpush3.msra.mxu1 %v13046_v31 }
 0x371   : > { %15381 = vmatprep.mubr.msk.f32.mxu1 %vm441_vm0, %v18184_v1  ;;  %15413 = vmatprep.subr.mxu1 %v6783_v54 }
 0x372   : > { %15400 = vmatpush3.msra.mxu0 %v13059_v55  ;;  %15401 = vmatprep.mubr.msk.f32.mxu0 %vm441_vm0, %v6784_v14 }
 0x373   : > { %15382 = vmatmul.mubr.msk.f32.vlgmr.msra.gmra.mxu1 %vm441_vm0, %v18196_v61  ;;  %15433 = vmatprep.subr.mxu0 %v18377_v19 }
 0x374   : > { %15384 = vmatprep.mubr.msk.f32.mxu1 %vm441_vm0, %v18202_v45  ;;  %15414 = vmatpush3.msra.mxu1 %v6783_v54 }
 0x375   : > { %15415 = vmatprep.subr.mxu1 %v6782_v48 }
 0x376   : > { %15416 = vmatpush3.msra.mxu1 %v6782_v48 }
 0x377   : > { %15385 = vmatmul.mubr.msk.f32.gmra.mxu1 %vm441_vm0, %v18214_v37  ;;  %15417 = vmatprep.subr.mxu1 %v6781_v36 }
 0x378   : > { %15387 = vmatprep.mubr.msk.f32.mxu1 %vm441_vm0, %v18220_v57  ;;  %15418 = vmatpush3.msra.mxu1 %v6781_v36 }
 0x379   : > { %15419 = vmatprep.subr.mxu1 %v6780_v38 }
 0x37a   : > { %15420 = vmatpush3.msra.mxu1 %v6780_v38 }
 0x37b   : > { %15388 = vmatmul.mubr.msk.f32.gmra.mxu1 %vm441_vm0, %v18232_v24  ;;  %15453 = vmatprep.subr.mxu1 %v18383_v46 }
 0x37c   : > { %15390 = vmatprep.mubr.msk.f32.mxu1 %vm441_vm0, %v6079_v35 }
 0x37f   : > { %15391 = vmatmul.mubr.msk.f32.gmra.mxu1 %vm441_vm0, %v6506_v18 }
 0x380   : > { %15421 = vmatprep.mubr.msk.f32.mxu1 %vm441_vm0, %v6772_v17 }
 0x3f3   : > { %v15223_v60 = vpop.f32.mrf.mxu1 }
 0x3f4   : > { %v15243_v11 = vpop.f32.mrf.mxu0 }
 0x3f5   : > { %v5486_v20 = vpop.f32.mrf.mxu1 }
 0x3f6   : > { %v5611_v30 = vpop.f32.mrf.mxu0 }
 0x3f7   : > { %v15226_v9 = vpop.f32.mrf.mxu1  ;;  %v5612_v31 = vadd.f32 %v5611_v30, %v5486_v20 }
 0x3f8   : > { %v15246_v10 = vpop.f32.mrf.mxu0 }
 0x3f9   : > { %v5495_v13 = vpop.f32.mrf.mxu1 }
 0x3fa   : > { %v5620_v52 = vpop.f32.mrf.mxu0 }
 0x3fb   : > { %v15229_v44 = vpop.f32.mrf.mxu1  ;;  %v5621_v33 = vadd.f32 %v5620_v52, %v5495_v13 }
 0x3fc   : > { %v15249_v16 = vpop.f32.mrf.mxu0 }
 0x3fd   : > { %v5504_v6 = vpop.f32.mrf.mxu1 }
 0x3fe   : > { %v5629_v62 = vpop.f32.mrf.mxu0 }
 0x3ff   : > { %v15232_v51 = vpop.f32.mrf.mxu1  ;;  %v5630_v60 = vadd.f32 %v5629_v62, %v5504_v6 }
 0x400   : > { %v15252_v2 = vpop.f32.mrf.mxu0 }
 0x401   : > { %v5513_v3 = vpop.f32.mrf.mxu1 }
 0x402   : > { %v5638_v4 = vpop.f32.mrf.mxu0 }
 0x403   : > { %v15263_v23 = vpop.f32.mrf.mxu1 }
 0x404   : > { %v15283_v25 = vpop.f32.mrf.mxu0 }
 0x405   : > { %v5749_v32 = vpop.f32.mrf.mxu1  ;;  %v5639_v25 = vadd.f32 %v5638_v4, %v5513_v3 }
 0x406   : > { %v5891_v41 = vpop.f32.mrf.mxu0  ;;  %v5784_v18 = vadd.f32 %v5749_v32, %v5612_v31 }
 0x407   : > { %v15266_v43 = vpop.f32.mrf.mxu1 }
 0x408   : > { %v15286_v49 = vpop.f32.mrf.mxu0  ;;  %v5926_v36 = vadd.f32 %v5891_v41, %v5784_v18 }
 0x409   : > { %v5758_v1 = vpop.f32.mrf.mxu1 }
 0x40a   : > { %v5900_v47 = vpop.f32.mrf.mxu0  ;;  %v5785_v55 = vadd.f32 %v5758_v1, %v5621_v33 }
 0x40b   : > { %v15269_v50 = vpop.f32.mrf.mxu1 }
 0x40c   : > { %v15289_v61 = vpop.f32.mrf.mxu0  ;;  %v5927_v10 = vadd.f32 %v5900_v47, %v5785_v55  ;;  %v13058_v47 = vld [vmem:[%s20631_s6] ss:$0 sm:$0xff] }
 0x40d   : > { %v5767_v45 = vpop.f32.mrf.mxu1 }
 0x40e   : > { %v5909_v22 = vpop.f32.mrf.mxu0  ;;  %v5786_v44 = vadd.f32 %v5767_v45, %v5630_v60 }
 0x40f   : > { %v15272_v53 = vpop.f32.mrf.mxu1 }
 0x410   : > { %v15292_v37 = vpop.f32.mrf.mxu0  ;;  %v5928_v52 = vadd.f32 %v5909_v22, %v5786_v44 }
 0x411   : > { %v5776_v57 = vpop.f32.mrf.mxu1 }
 0x412   : > { %v5918_v39 = vpop.f32.mrf.mxu0  ;;  %v5787_v41 = vadd.f32 %v5776_v57, %v5639_v25 }
 0x413   : > { %v15303_v29 = vpop.f32.mrf.mxu1 }
 0x414   : > { %v15323_v24 = vpop.f32.mrf.mxu0  ;;  %v5929_v61 = vadd.f32 %v5918_v39, %v5787_v41 }
 0x415   : > { %v6033_v34 = vpop.f32.mrf.mxu1 }
 0x416   : > { %v6175_v7 = vpop.f32.mrf.mxu0  ;;  %v6068_v17 = vadd.f32 %v6033_v34, %v5926_v36 }
 0x417   : > { %v15306_v12 = vpop.f32.mrf.mxu1 }
 0x418   : > { %v15326_v40 = vpop.f32.mrf.mxu0  ;;  %v6210_v30 = vadd.f32 %v6175_v7, %v6068_v17 }
 0x419   : > { %v6042_v8 = vpop.f32.mrf.mxu1 }
 0x41a   : > { %v6184_v27 = vpop.f32.mrf.mxu0  ;;  %v6069_v51 = vadd.f32 %v6042_v8, %v5927_v10 }
 0x41b   : > { %v15309_v28 = vpop.f32.mrf.mxu1 }
 0x41c   : > { %v15329_v5 = vpop.f32.mrf.mxu0  ;;  %v6211_v43 = vadd.f32 %v6184_v27, %v6069_v51 }
 0x41d   : > { %v6051_v58 = vpop.f32.mrf.mxu1 }
 0x41e   : > { %v6193_v15 = vpop.f32.mrf.mxu0  ;;  %v6070_v49 = vadd.f32 %v6051_v58, %v5928_v52 }
 0x41f   : > { %v15312_v35 = vpop.f32.mrf.mxu1 }
 0x420   : > { %v15332_v56 = vpop.f32.mrf.mxu0  ;;  %v6212_v53 = vadd.f32 %v6193_v15, %v6070_v49 }
 0x421   : > { %v6060_v42 = vpop.f32.mrf.mxu1 }
 0x422   : > { %v6202_v63 = vpop.f32.mrf.mxu0  ;;  %v6071_v29 = vadd.f32 %v6060_v42, %v5929_v61 }
 0x423   : > { %v15343_v0 = vpop.f32.mrf.mxu1 }
 0x424   : > { %v15363_v21 = vpop.f32.mrf.mxu0  ;;  %v6213_v12 = vadd.f32 %v6202_v63, %v6071_v29 }
 0x425   : > { %v6318_v26 = vpop.f32.mrf.mxu1 }
 0x426   : > { %v6460_v54 = vpop.f32.mrf.mxu0  ;;  %v6353_v13 = vadd.f32 %v6318_v26, %v6210_v30 }
 0x427   : > { %v15346_v48 = vpop.f32.mrf.mxu1 }
 0x428   : > { %v15366_v59 = vpop.f32.mrf.mxu0  ;;  %v6495_v50 = vadd.f32 %v6460_v54, %v6353_v13 }
 0x429   : > { %v6327_v38 = vpop.f32.mrf.mxu1 }
 0x42a   : > { %v6469_v14 = vpop.f32.mrf.mxu0  ;;  %v6354_v6 = vadd.f32 %v6327_v38, %v6211_v43 }
 0x42b   : > { %v15349_v11 = vpop.f32.mrf.mxu1 }
 0x42c   : > { %v15369_v9 = vpop.f32.mrf.mxu0  ;;  %v6496_v3 = vadd.f32 %v6469_v14, %v6354_v6 }
 0x42d   : > { %v6336_v16 = vpop.f32.mrf.mxu1 }
 0x42e   : > { %v6478_v20 = vpop.f32.mrf.mxu0  ;;  %v6355_v22 = vadd.f32 %v6336_v16, %v6212_v53 }
 0x42f   : > { %v15352_v2 = vpop.f32.mrf.mxu1 }
 0x430   : > { %v15372_v23 = vpop.f32.mrf.mxu0  ;;  %v6497_v27 = vadd.f32 %v6478_v20, %v6355_v22 }
 0x431   : > { %v6345_v32 = vpop.f32.mrf.mxu1 }
 0x432   : > { %v6356_v5 = vadd.f32 %v6345_v32, %v6213_v12  ;;  %v6487_v56 = vpop.f32.mrf.mxu0 }
 0x433   : > { %v15383_v1 = vpop.f32.mrf.mxu1 }
 0x434   : > { %v6498_v63 = vadd.f32 %v6487_v56, %v6356_v5 }
 0x435   : > { %v6602_v62 = vpop.f32.mrf.mxu1 }
 0x436   : > { %v6637_v45 = vadd.f32 %v6602_v62, %v6495_v50 }
 0x437   : > { %v15386_v37 = vpop.f32.mrf.mxu1 }
 0x438   : > { %v6648_v4 = vadd.f32 %v13058_v47, %v6637_v45 }
 0x439   : > { %v6611_v24 = vpop.f32.mrf.mxu1 }
 0x43a   : > { %v6652_v57 = vmax.f32 %v6648_v4, 0.0  ;;  %v6638_v34 = vadd.f32 %v6611_v24, %v6496_v3 }
 0x43b   : > { %v15389_v7 = vpop.f32.mrf.mxu1 }
 0x43c   : > { %v6656_v40 = vmin.f32 %v6652_v57, 6.0  ;;  %v6649_v8 = vadd.f32 %v13058_v47, %v6638_v34 }
 0x43d   : > { %v6620_v28 = vpop.f32.mrf.mxu1 }
 0x43e   : > { %v6664_v58 = vrot.slane %v6656_v40, 1  ;;  %v6672_v35 = vrot.slane %v6656_v40, 2  ;;  %v6653_v39 = vmax.f32 %v6649_v8, 0.0  ;;  %v6639_v15 = vadd.f32 %v6620_v28, %v6497_v27 }
 0x43f   : > { %v15392_v31 = vpop.f32.mrf.mxu1  ;;  %v6680_v42 = vrot.slane %v6656_v40, 3 }
 0x440   : > { %v6688_v0 = vsel %vm3925_vm1, %v6656_v40, %v6664_v58  ;;  %v6657_v21 = vmin.f32 %v6653_v39, 6.0  ;;  %v6650_v26 = vadd.f32 %v13058_v47, %v6639_v15 }
 0x441   : > { %v6692_v18 = vsel %vm3934_vm2, %v6688_v0, %v6672_v35  ;;  %v6629_v54 = vpop.f32.mrf.mxu1 }
 0x442   : > { %v6696_v33 = vsel %vm3943_vm3, %v6692_v18, %v6680_v42  ;;  %v6665_v48 = vrot.slane %v6657_v21, 1  ;;  %v6673_v59 = vrot.slane %v6657_v21, 2  ;;  %v6681_v55 = vrot.slane %v6657_v21, 3 }
 0x443   : > { %v6704_v36 = vrot.slane %v6696_v33, 7  ;;  %v6654_v14 = vmax.f32 %v6650_v26, 0.0  ;;  %v6640_v17 = vadd.f32 %v6629_v54, %v6498_v63  ;;  %v6712_v60 = vrot.slane %v6696_v33, 6 }
 0x444   : > { %v6689_v38 = vsel %vm3925_vm1, %v6657_v21, %v6665_v48  ;;  %v6720_v30 = vrot.slane %v6696_v33, 5  ;;  %v6728_v51 = vrot.slane %v6696_v33, 4  ;;  %v13093_v48 = vld [vmem:[%s20632_s7 + $0x70] sm:$0xff] }
 0x445   : > { %v6736_v11 = vsel %vm3925_vm1, %v6696_v33, %v6704_v36  ;;  %v6693_v9 = vsel %vm3934_vm2, %v6689_v38, %v6673_v59  ;;  %v6658_v16 = vmin.f32 %v6654_v14, 6.0  ;;  %v6651_v20 = vadd.f32 %v13058_v47, %v6640_v17  ;;  %v13081_v33 = vld [vmem:[%s20632_s7 + $0x50] sm:$0xff] }
 0x446   : > { %v6740_v10 = vsel %vm3934_vm2, %v6736_v11, %v6704_v36  ;;  %v6697_v44 = vsel %vm3943_vm3, %v6693_v9, %v6681_v55 }
 0x447   : > { %v6744_v2 = vsel %vm3943_vm3, %v6740_v10, %v6712_v60  ;;  %v6705_v23 = vrot.slane %v6697_v44, 7  ;;  %v6713_v13 = vrot.slane %v6697_v44, 6  ;;  %v6666_v52 = vrot.slane %v6658_v16, 1 }
 0x448   : > { %v6748_v25 = vsel %vm3952_vm4, %v6744_v2, %v6712_v60  ;;  %v6674_v32 = vrot.slane %v6658_v16, 2  ;;  %v6721_v43 = vrot.slane %v6697_v44, 5  ;;  %v6655_v1 = vmax.f32 %v6651_v20, 0.0  ;;  %v13091_v2 = vld [vmem:[%s20632_s7 + $0x60] sm:$0xff] }
 0x449   : > { %v6752_v41 = vsel %vm3961_vm5, %v6748_v25, %v6720_v30  ;;  %v6737_v49 = vsel %vm3925_vm1, %v6697_v44, %v6705_v23  ;;  %v6682_v62 = vrot.slane %v6658_v16, 3  ;;  %v6690_v47 = vsel %vm3925_vm1, %v6658_v16, %v6666_v52 }
 0x44a   : > { %v6756_v50 = vsel %vm3970_vm6, %v6752_v41, %v6720_v30  ;;  %v6741_v6 = vsel %vm3934_vm2, %v6737_v49, %v6705_v23  ;;  %v6694_v53 = vsel %vm3934_vm2, %v6690_v47, %v6674_v32  ;;  %v6659_v37 = vmin.f32 %v6655_v1, 6.0  ;;  %v13106_v41 = vld [vmem:[%s20632_s7 + $0x98] sm:$0xff]  ;;  %v7055_v49 = vld [vmem:[#allocation2 + $0x2] sm:$0xff]  ;;  %v13105_v47 = vld [vmem:[%s20632_s7 + $0x90] sm:$0xff] }
 0x44b   : > { %v6760_v61 = vsel %vm3979_vm7, %v6756_v50, %v6728_v51  ;;  %v6745_v45 = vsel %vm3943_vm3, %v6741_v6, %v6713_v13  ;;  %v6698_v3 = vsel %vm3943_vm3, %v6694_v53, %v6682_v62  ;;  %v6729_v4 = vrot.slane %v6697_v44, 4  ;;  %v13092_v44 = vld [vmem:[%s20632_s7 + $0x68] sm:$0xff]  ;;  %v13079_v51 = vld [vmem:[%s20632_s7 + $0x40] sm:$0xff] }
 0x44c   : > { %6764 = vst.msk [vmem:[#allocation2 + $0x19] sm:$0xff] %vm441_vm0, %v6760_v61  ;;  %6765 = vst.msk [vmem:[#allocation2 + $0x31] sm:$0xff] %vm441_vm0, %v6760_v61  ;;  %v6749_v29 = vsel %vm3952_vm4, %v6745_v45, %v6713_v13  ;;  %v6706_v24 = vrot.slane %v6698_v3, 7  ;;  %v6667_v34 = vrot.slane %v6659_v37, 1  ;;  %v6675_v7 = vrot.slane %v6659_v37, 2  ;;  %v13117_v61 = vld [vmem:[%s20632_s7 + $0xb0] sm:$0xff] }
 0x44d   : > { %v6753_v22 = vsel %vm3961_vm5, %v6749_v29, %v6721_v43  ;;  %v6714_v40 = vrot.slane %v6698_v3, 6  ;;  %v6683_v28 = vrot.slane %v6659_v37, 3  ;;  %v6722_v58 = vrot.slane %v6698_v3, 5  ;;  %v13116_v29 = vld [vmem:[%s20632_s7 + $0xa8] sm:$0xff] }
 0x44e   : > { %v6757_v57 = vsel %vm3970_vm6, %v6753_v22, %v6721_v43  ;;  %v6738_v8 = vsel %vm3925_vm1, %v6698_v3, %v6706_v24  ;;  %v6691_v5 = vsel %vm3925_vm1, %v6659_v37, %v6667_v34  ;;  %v6730_v31 = vrot.slane %v6698_v3, 4  ;;  %v13118_v43 = vld [vmem:[%s20632_s7 + $0xb8] sm:$0xff]  ;;  %v13104_v37 = vld [vmem:[%s20632_s7 + $0x88] sm:$0xff]  ;;  %v13103_v22 = vld [vmem:[%s20632_s7 + $0x80] sm:$0xff] }
 0x44f   : > { %v6761_v12 = vsel %vm3979_vm7, %v6757_v57, %v6729_v4  ;;  %v6742_v27 = vsel %vm3934_vm2, %v6738_v8, %v6706_v24  ;;  %v6695_v39 = vsel %vm3934_vm2, %v6691_v5, %v6675_v7  ;;  %v13115_v24 = vld [vmem:[%s20632_s7 + $0xa0] sm:$0xff]  ;;  %v13130_v7 = vld [vmem:[%s20632_s7 + $0xd8] sm:$0xff]  ;;  %v13141_v8 = vld [vmem:[%s20632_s7 + $0xf0] sm:$0xff] }
 0x450   : > { %6766 = vst.msk [vmem:[#allocation2 + $0x49] sm:$0xff] %vm441_vm0, %v6761_v12  ;;  %6767 = vst.msk [vmem:[#allocation2 + $0x61] sm:$0xff] %vm441_vm0, %v6761_v12  ;;  %v6746_v35 = vsel %vm3943_vm3, %v6742_v27, %v6714_v40  ;;  %v6699_v15 = vsel %vm3943_vm3, %v6695_v39, %v6683_v28  ;;  %v13142_v12 = vld [vmem:[%s20632_s7 + $0xf8] sm:$0xff]  ;;  %v13128_v27 = vld [vmem:[%s20632_s7 + $0xc8] sm:$0xff] }
 0x451   : > { %v6750_v56 = vsel %vm3952_vm4, %v6746_v35, %v6714_v40  ;;  %v6707_v0 = vrot.slane %v6699_v15, 7  ;;  %v6715_v36 = vrot.slane %v6699_v15, 6  ;;  %v6723_v14 = vrot.slane %v6699_v15, 5  ;;  %v13129_v40 = vld [vmem:[%s20632_s7 + $0xd0] sm:$0xff]  ;;  %v13140_v28 = vld [vmem:[%s20632_s7 + $0xe8] sm:$0xff]  ;;  %v13127_v5 = vld [vmem:[%s20632_s7 + $0xc0] sm:$0xff] }
 0x452   : > { %v6754_v42 = vsel %vm3961_vm5, %v6750_v56, %v6722_v58  ;;  %v6731_v16 = vrot.slane %v6699_v15, 4  ;;  %v13154_v56 = vld [vmem:[%s20632_s7 + $0x118] sm:$0xff] }
 0x453   : > { %v18424_v21 = vld [vmem:[#allocation2 + $0x19] sm:$0xff]  ;;  %v18428_v26 = vld [vmem:[#allocation2 + $0x31] sm:$0xff]  ;;  %v6758_v54 = vsel %vm3970_vm6, %v6754_v42, %v6722_v58  ;;  %v6739_v55 = vsel %vm3925_vm1, %v6699_v15, %v6707_v0 }
 0x454   : > { %v18426_v18 = vld [vmem:[#allocation2 + $0x18] sm:$0xff]  ;;  %15402 = vmatmul.mubr.msk.f32.vlgmr.msra.gmra.mxu0 %vm441_vm0, %v18424_v21  ;;  %v18435_v63 = vld [vmem:[#allocation2 + $0x30] sm:$0xff]  ;;  %v6762_v59 = vsel %vm3979_vm7, %v6758_v54, %v6730_v31  ;;  %v6743_v38 = vsel %vm3934_vm2, %v6739_v55, %v6707_v0  ;;  %v13139_v58 = vld [vmem:[%s20632_s7 + $0xe0] sm:$0xff] }
 0x455   : > { %15422 = vmatmul.mubr.msk.f32.vlgmr.msra.gmra.mxu1 %vm441_vm0, %v18426_v18  ;;  %15404 = vmatprep.mubr.msk.f32.mxu0 %vm441_vm0, %v18428_v26  ;;  %6768 = vst.msk [vmem:[#allocation2 + $0x79] sm:$0xff] %vm441_vm0, %v6762_v59  ;;  %6769 = vst.msk [vmem:[#allocation2 + $0x91] sm:$0xff] %vm441_vm0, %v6762_v59  ;;  %v6747_v17 = vsel %vm3943_vm3, %v6743_v38, %v6715_v36  ;;  %v7056_v6 = vld [vmem:[#allocation2 + $0x1a] sm:$0xff]  ;;  %v18525_v62 = vld [vmem:[#allocation2 + $0x32] sm:$0xff] }
 0x456   : > { %15424 = vmatprep.mubr.msk.f32.mxu1 %vm441_vm0, %v18435_v63  ;;  %15434 = vmatpush3.msra.mxu0 %v18377_v19  ;;  %v6751_v10 = vsel %vm3952_vm4, %v6747_v17, %v6715_v36  ;;  %v13153_v15 = vld [vmem:[%s20632_s7 + $0x110] sm:$0xff]  ;;  %v13152_v31 = vld [vmem:[%s20632_s7 + $0x108] sm:$0xff]  ;;  %v13151_v42 = vld [vmem:[%s20632_s7 + $0x100] sm:$0xff] }
 0x457   : > { %15454 = vmatpush3.msra.mxu1 %v18383_v46  ;;  %v18455_v60 = vld [vmem:[#allocation2 + $0x49] sm:$0xff]  ;;  %15435 = vmatprep.subr.mxu0 %v13081_v33  ;;  %v18459_v9 = vld [vmem:[#allocation2 + $0x61] sm:$0xff]  ;;  %v6755_v20 = vsel %vm3961_vm5, %v6751_v10, %v6723_v14  ;;  %v7662_v0 = vld [vmem:[#allocation2 + $0xd8] sm:$0xff] }
 0x458   : > { %v18457_v11 = vld [vmem:[#allocation2 + $0x48] sm:$0xff]  ;;  %15455 = vmatprep.subr.mxu1 %v13093_v48  ;;  %15405 = vmatmul.mubr.msk.f32.gmra.mxu0 %vm441_vm0, %v18455_v60  ;;  %v18466_v19 = vld [vmem:[#allocation2 + $0x60] sm:$0xff]  ;;  %v6759_v30 = vsel %vm3970_vm6, %v6755_v20, %v6723_v14  ;;  %v13166_v54 = vld [vmem:[%s20634_s9 + $0x30] sm:$0xff] }
 0x459   : > { %15425 = vmatmul.mubr.msk.f32.gmra.mxu1 %vm441_vm0, %v18457_v11  ;;  %v13080_v46 = vld [vmem:[%s20632_s7 + $0x48] sm:$0xff]  ;;  %15407 = vmatprep.mubr.msk.f32.mxu0 %vm441_vm0, %v18459_v9  ;;  %v6763_v23 = vsel %vm3979_vm7, %v6759_v30, %v6731_v16  ;;  %v13164_v55 = vld [vmem:[%s20634_s9 + $0x20] sm:$0xff]  ;;  %v8428_v14 = vld [vmem:[#allocation3 + $0x1] sm:$0xff] }
 0x45a   : > { %15427 = vmatprep.mubr.msk.f32.mxu1 %vm441_vm0, %v18466_v19  ;;  %15436 = vmatpush3.msra.mxu0 %v13081_v33  ;;  %6770 = vst.msk [vmem:[#allocation2 + $0xa9] sm:$0xff] %vm441_vm0, %v6763_v23  ;;  %6771 = vst.msk [vmem:[#allocation2 + $0xc1] sm:$0xff] %vm441_vm0, %v6763_v23  ;;  %v18537_v45 = vld [vmem:[#allocation2 + $0x4a] sm:$0xff]  ;;  %v18543_v53 = vld [vmem:[#allocation2 + $0x62] sm:$0xff]  ;;  %v20789_v33 = vmov 0.0  }
 0x45b   : > { %15456 = vmatpush3.msra.mxu1 %v13093_v48  ;;  %15437 = vmatprep.subr.mxu0 %v13080_v46  ;;  %499 = vst.msk [vmem:[#allocation3 + $0x10] sm:$0x3] %vm444_vm8, %v20789_v33  ;;  %502 = vst.msk [vmem:[#allocation3 + $0x28] sm:$0x3] %vm444_vm8, %v20789_v33  ;;  %v8426_v48 = vld [vmem:[%s20634_s9 + $0x10] sm:$0xff]  ;;  %v13165_v59 = vld [vmem:[%s20634_s9 + $0x28] sm:$0xff] }
 0x45c   : > { %15457 = vmatprep.subr.mxu1 %v13092_v44  ;;  %15438 = vmatpush3.msra.mxu0 %v13080_v46  ;;  %v18489_v25 = vld [vmem:[#allocation2 + $0x79] sm:$0xff]  ;;  %v18493_v52 = vld [vmem:[#allocation2 + $0x91] sm:$0xff]  ;;  %505 = vst.msk [vmem:[#allocation3 + $0x40] sm:$0x3] %vm444_vm8, %v20789_v33  ;;  %508 = vst.msk [vmem:[#allocation3 + $0x58] sm:$0x3] %vm444_vm8, %v20789_v33 }
 0x45d   : > { %15458 = vmatpush3.msra.mxu1 %v13092_v44  ;;  %v18491_v13 = vld [vmem:[#allocation2 + $0x78] sm:$0xff]  ;;  %15439 = vmatprep.subr.mxu0 %v13079_v51  ;;  %v18499_v32 = vld [vmem:[#allocation2 + $0x90] sm:$0xff]  ;;  %511 = vst.msk [vmem:[#allocation3 + $0x70] sm:$0x3] %vm444_vm8, %v20789_v33  ;;  %514 = vst.msk [vmem:[#allocation3 + $0x88] sm:$0x3] %vm444_vm8, %v20789_v33 }
 0x45e   : > { %15459 = vmatprep.subr.mxu1 %v13091_v2  ;;  %15408 = vmatmul.mubr.msk.f32.gmra.mxu0 %vm441_vm0, %v18489_v25  ;;  %v18555_v3 = vld [vmem:[#allocation2 + $0x7a] sm:$0xff]  ;;  %v18561_v4 = vld [vmem:[#allocation2 + $0x92] sm:$0xff]  ;;  %517 = vst.msk [vmem:[#allocation3 + $0xa0] sm:$0x3] %vm444_vm8, %v20789_v33  ;;  %520 = vst.msk [vmem:[#allocation3 + $0xb8] sm:$0x3] %vm444_vm8, %v20789_v33 }
 0x45f   : > { %15428 = vmatmul.mubr.msk.f32.gmra.mxu1 %vm441_vm0, %v18491_v13  ;;  %15410 = vmatprep.mubr.msk.f32.mxu0 %vm441_vm0, %v18493_v52  ;;  %523 = vst.msk [vmem:[#allocation3 + $0xd0] sm:$0x3] %vm444_vm8, %v20789_v33  ;;  %526 = vst.msk [vmem:[#allocation3 + $0xe8] sm:$0x3] %vm444_vm8, %v20789_v33  ;;  %v8425_v36 = vld [vmem:[%s20634_s9 + $0x8] sm:$0xff]  ;;  %v8424_v38 = vld [vmem:[%s20634_s9] sm:$0xff] }
 0x460   : > { %15430 = vmatprep.mubr.msk.f32.mxu1 %vm441_vm0, %v18499_v32  ;;  %15440 = vmatpush3.msra.mxu0 %v13079_v51  ;;  %529 = vst.msk [vmem:[#allocation3 + $0x100] sm:$0x3] %vm444_vm8, %v20789_v33  ;;  %532 = vst.msk [vmem:[#allocation3 + $0x118] sm:$0x3] %vm444_vm8, %v20789_v33  ;;  %v8392_v17 = vld [vmem:[#allocation3] sm:$0xff] }
 0x461   : > { %15460 = vmatpush3.msra.mxu1 %v13091_v2  ;;  %15473 = vmatprep.subr.mxu0 %v13106_v41  ;;  %v18511_v1 = vld [vmem:[#allocation2 + $0xa9] sm:$0xff]  ;;  %v18575_v34 = vld [vmem:[#allocation2 + $0xc0] sm:$0xff]  ;;  %535 = vst.msk [vmem:[#allocation3 + $0x130] sm:$0x3] %vm444_vm8, %v20789_v33  ;;  %538 = vst.msk [vmem:[#allocation3 + $0x148] sm:$0x3] %vm444_vm8, %v20789_v33 }
 0x462   : > { %15493 = vmatprep.subr.mxu1 %v13118_v43  ;;  %v18513_v50 = vld [vmem:[#allocation2 + $0xa8] sm:$0xff]  ;;  %15411 = vmatmul.mubr.msk.f32.gmra.mxu0 %vm441_vm0, %v18511_v1  ;;  %541 = vst.msk [vmem:[#allocation3 + $0x160] sm:$0x3] %vm444_vm8, %v20789_v33  ;;  %544 = vst.msk [vmem:[#allocation3 + $0x178] sm:$0x3] %vm444_vm8, %v20789_v33  ;;  %v13234_v10 = vld [vmem:[%s20634_s9 + $0x50] sm:$0xff] }
 0x463   : > { %15431 = vmatmul.mubr.msk.f32.gmra.mxu1 %vm441_vm0, %v18513_v50  ;;  %15441 = vmatprep.mubr.msk.f32.mxu0 %vm441_vm0, %v7055_v49  ;;  %v18573_v57 = vld [vmem:[#allocation2 + $0xaa] sm:$0xff]  ;;  %v7362_v35 = vld [vmem:[#allocation2 + $0xc1] sm:$0xff]  ;;  %547 = vst.msk [vmem:[#allocation3 + $0x190] sm:$0x3] %vm444_vm8, %v20789_v33  ;;  %550 = vst.msk [vmem:[#allocation3 + $0x1a8] sm:$0x3] %vm444_vm8, %v20789_v33 }
 0x464   : > { %15461 = vmatprep.mubr.msk.f32.mxu1 %vm441_vm0, %v18426_v18  ;;  %v7512_v39 = vld [vmem:[#allocation2 + $0xc2] sm:$0xff]  ;;  %v7962_v18 = vld [vmem:[#allocation2 + $0xda] sm:$0xff] }
 0x466   : > { %15442 = vmatmul.mubr.msk.f32.vlgmr.msra.gmra.mxu0 %vm441_vm0, %v7056_v6 }
 0x467   : > { %15462 = vmatmul.mubr.msk.f32.vlgmr.msra.gmra.mxu1 %vm441_vm0, %v18435_v63  ;;  %15444 = vmatprep.mubr.msk.f32.mxu0 %vm441_vm0, %v18525_v62 }
 0x468   : > { %15464 = vmatprep.mubr.msk.f32.mxu1 %vm441_vm0, %v18457_v11  ;;  %15474 = vmatpush3.msra.mxu0 %v13106_v41  ;;  %v13232_v41 = vld [vmem:[%s20634_s9 + $0x40] sm:$0xff] }
 0x469   : > { %15494 = vmatpush3.msra.mxu1 %v13118_v43  ;;  %15475 = vmatprep.subr.mxu0 %v13105_v47 }
 0x46a   : > { %15495 = vmatprep.subr.mxu1 %v13117_v61  ;;  %15445 = vmatmul.mubr.msk.f32.gmra.mxu0 %vm441_vm0, %v18537_v45 }
 0x46b   : > { %15465 = vmatmul.mubr.msk.f32.gmra.mxu1 %vm441_vm0, %v18466_v19  ;;  %15447 = vmatprep.mubr.msk.f32.mxu0 %vm441_vm0, %v18543_v53 }
 0x46c   : > { %15467 = vmatprep.mubr.msk.f32.mxu1 %vm441_vm0, %v18491_v13  ;;  %15476 = vmatpush3.msra.mxu0 %v13105_v47 }
 0x46d   : > { %15496 = vmatpush3.msra.mxu1 %v13117_v61  ;;  %15477 = vmatprep.subr.mxu0 %v13104_v37 }
 0x46e   : > { %15497 = vmatprep.subr.mxu1 %v13116_v29  ;;  %15448 = vmatmul.mubr.msk.f32.gmra.mxu0 %vm441_vm0, %v18555_v3 }
 0x46f   : > { %15468 = vmatmul.mubr.msk.f32.gmra.mxu1 %vm441_vm0, %v18499_v32  ;;  %15450 = vmatprep.mubr.msk.f32.mxu0 %vm441_vm0, %v18561_v4 }
 0x470   : > { %15470 = vmatprep.mubr.msk.f32.mxu1 %vm441_vm0, %v18513_v50  ;;  %15478 = vmatpush3.msra.mxu0 %v13104_v37 }
 0x471   : > { %15498 = vmatpush3.msra.mxu1 %v13116_v29  ;;  %15479 = vmatprep.subr.mxu0 %v13103_v22 }
 0x472   : > { %15499 = vmatprep.subr.mxu1 %v13115_v24  ;;  %15451 = vmatmul.mubr.msk.f32.gmra.mxu0 %vm441_vm0, %v18573_v57 }
 0x473   : > { %15471 = vmatmul.mubr.msk.f32.gmra.mxu1 %vm441_vm0, %v18575_v34  ;;  %15480 = vmatpush3.msra.mxu0 %v13103_v22  ;;  %v13269_v22 = vld [vmem:[%s20634_s9 + $0x68] sm:$0xff] }
 0x474   : > { %15481 = vmatprep.mubr.msk.f32.mxu0 %vm441_vm0, %v18424_v21  ;;  %15501 = vmatprep.mubr.msk.f32.mxu1 %vm441_vm0, %v7056_v6  ;;  %v7812_v21 = vld [vmem:[#allocation2 + $0xd9] sm:$0xff] }
 0x475   : > { %15500 = vmatpush3.msra.mxu1 %v13115_v24  ;;  %15513 = vmatprep.subr.mxu0 %v13130_v7  ;;  %v13268_v24 = vld [vmem:[%s20634_s9 + $0x60] sm:$0xff] }
 0x476   : > { %15533 = vmatprep.subr.mxu1 %v13142_v12  ;;  %15482 = vmatmul.mubr.msk.f32.vlgmr.msra.gmra.mxu0 %vm441_vm0, %v18428_v26 }
 0x477   : > { %15502 = vmatmul.mubr.msk.f32.vlgmr.msra.gmra.mxu1 %vm441_vm0, %v18525_v62  ;;  %15484 = vmatprep.mubr.msk.f32.mxu0 %vm441_vm0, %v18455_v60 }
 0x478   : > { %15504 = vmatprep.mubr.msk.f32.mxu1 %vm441_vm0, %v18537_v45  ;;  %15514 = vmatpush3.msra.mxu0 %v13130_v7 }
 0x479   : > { %15534 = vmatpush3.msra.mxu1 %v13142_v12  ;;  %15515 = vmatprep.subr.mxu0 %v13129_v40 }
 0x47a   : > { %15535 = vmatprep.subr.mxu1 %v13141_v8  ;;  %15485 = vmatmul.mubr.msk.f32.gmra.mxu0 %vm441_vm0, %v18459_v9 }
 0x47b   : > { %15505 = vmatmul.mubr.msk.f32.gmra.mxu1 %vm441_vm0, %v18543_v53  ;;  %15487 = vmatprep.mubr.msk.f32.mxu0 %vm441_vm0, %v18489_v25 }
 0x47c   : > { %15507 = vmatprep.mubr.msk.f32.mxu1 %vm441_vm0, %v18555_v3  ;;  %15516 = vmatpush3.msra.mxu0 %v13129_v40  ;;  %v18812_v40 = vld [vmem:[%s20634_s9 + $0x98] sm:$0xff] }
 0x47d   : > { %15536 = vmatpush3.msra.mxu1 %v13141_v8  ;;  %15517 = vmatprep.subr.mxu0 %v13128_v27 }
 0x47e   : > { %15537 = vmatprep.subr.mxu1 %v13140_v28  ;;  %15488 = vmatmul.mubr.msk.f32.gmra.mxu0 %vm441_vm0, %v18493_v52 }
 0x47f   : > { %15508 = vmatmul.mubr.msk.f32.gmra.mxu1 %vm441_vm0, %v18561_v4  ;;  %15490 = vmatprep.mubr.msk.f32.mxu0 %vm441_vm0, %v18511_v1 }
 0x480   : > { %15510 = vmatprep.mubr.msk.f32.mxu1 %vm441_vm0, %v18573_v57  ;;  %15518 = vmatpush3.msra.mxu0 %v13128_v27 }
 0x481   : > { %15538 = vmatpush3.msra.mxu1 %v13140_v28  ;;  %15519 = vmatprep.subr.mxu0 %v13127_v5 }
 0x482   : > { %15539 = vmatprep.subr.mxu1 %v13139_v58  ;;  %15491 = vmatmul.mubr.msk.f32.gmra.mxu0 %vm441_vm0, %v7362_v35 }
 0x483   : > { %15511 = vmatmul.mubr.msk.f32.gmra.mxu1 %vm441_vm0, %v7512_v39  ;;  %15520 = vmatpush3.msra.mxu0 %v13127_v5 }
 0x484   : > { %15521 = vmatprep.mubr.msk.f32.mxu0 %vm441_vm0, %v18435_v63  ;;  %15541 = vmatprep.mubr.msk.f32.mxu1 %vm441_vm0, %v18428_v26  ;;  %v13167_v26 = vld [vmem:[%s20634_s9 + $0x38] sm:$0xff] }
 0x485   : > { %15540 = vmatpush3.msra.mxu1 %v13139_v58  ;;  %15553 = vmatprep.subr.mxu0 %v13154_v56  ;;  %v8427_v63 = vld [vmem:[%s20634_s9 + $0x18] sm:$0xff] }
 0x486   : > { %15522 = vmatmul.mubr.msk.f32.vlgmr.msra.gmra.mxu0 %vm441_vm0, %v18457_v11  ;;  %15573 = vmatprep.subr.mxu1 %v13167_v26  ;;  %v8393_v11 = vld [vmem:[#allocation3 + $0x8] sm:$0xff] }
 0x487   : > { %15542 = vmatmul.mubr.msk.f32.vlgmr.msra.gmra.mxu1 %vm441_vm0, %v18455_v60  ;;  %15524 = vmatprep.mubr.msk.f32.mxu0 %vm441_vm0, %v18466_v19  ;;  %v8429_v60 = vld [vmem:[#allocation3 + $0x9] sm:$0xff]  ;;  %v13233_v19 = vld [vmem:[%s20634_s9 + $0x48] sm:$0xff] }
 0x488   : > { %15544 = vmatprep.mubr.msk.f32.mxu1 %vm441_vm0, %v18459_v9  ;;  %15554 = vmatpush3.msra.mxu0 %v13154_v56  ;;  %v13235_v9 = vld [vmem:[%s20634_s9 + $0x58] sm:$0xff] }
 0x489   : > { %15555 = vmatprep.subr.mxu0 %v13153_v15  ;;  %15574 = vmatpush3.msra.mxu1 %v13167_v26 }
 0x48a   : > { %15525 = vmatmul.mubr.msk.f32.gmra.mxu0 %vm441_vm0, %v18491_v13  ;;  %15575 = vmatprep.subr.mxu1 %v13166_v54 }
 0x48b   : > { %15545 = vmatmul.mubr.msk.f32.gmra.mxu1 %vm441_vm0, %v18489_v25  ;;  %15527 = vmatprep.mubr.msk.f32.mxu0 %vm441_vm0, %v18499_v32 }
 0x48c   : > { %15547 = vmatprep.mubr.msk.f32.mxu1 %vm441_vm0, %v18493_v52  ;;  %15556 = vmatpush3.msra.mxu0 %v13153_v15 }
 0x48d   : > { %15557 = vmatprep.subr.mxu0 %v13152_v31  ;;  %15576 = vmatpush3.msra.mxu1 %v13166_v54 }
 0x48e   : > { %15528 = vmatmul.mubr.msk.f32.gmra.mxu0 %vm441_vm0, %v18513_v50  ;;  %15577 = vmatprep.subr.mxu1 %v13165_v59 }
 0x48f   : > { %15548 = vmatmul.mubr.msk.f32.gmra.mxu1 %vm441_vm0, %v18511_v1  ;;  %15530 = vmatprep.mubr.msk.f32.mxu0 %vm441_vm0, %v18575_v34 }
 0x490   : > { %15550 = vmatprep.mubr.msk.f32.mxu1 %vm441_vm0, %v7362_v35  ;;  %15558 = vmatpush3.msra.mxu0 %v13152_v31 }
 0x491   : > { %15559 = vmatprep.subr.mxu0 %v13151_v42  ;;  %15578 = vmatpush3.msra.mxu1 %v13165_v59 }
 0x492   : > { %15531 = vmatmul.mubr.msk.f32.gmra.mxu0 %vm441_vm0, %v7662_v0  ;;  %15579 = vmatprep.subr.mxu1 %v13164_v55 }
 0x493   : > { %15551 = vmatmul.mubr.msk.f32.gmra.mxu1 %vm441_vm0, %v7812_v21  ;;  %15560 = vmatpush3.msra.mxu0 %v13151_v42 }
 0x494   : > { %15561 = vmatprep.mubr.msk.f32.mxu0 %vm441_vm0, %v18525_v62  ;;  %15629 = vmatprep.subr.mxu0 %v8427_v63 }
 0x495   : > { %15580 = vmatpush3.msra.mxu1 %v13164_v55  ;;  %15581 = vmatprep.mubr.msk.f32.mxu1 %vm441_vm0, %v8428_v14 }
 0x496   : > { %15562 = vmatmul.mubr.msk.f32.vlgmr.msra.gmra.mxu0 %vm441_vm0, %v18537_v45  ;;  %15685 = vmatprep.subr.mxu1 %v13235_v9  ;;  %v13271_v45 = vld [vmem:[%s20634_s9 + $0x78] sm:$0xff] }
 0x497   : > { %15564 = vmatprep.mubr.msk.f32.mxu0 %vm441_vm0, %v18543_v53  ;;  %15630 = vmatpush3.msra.mxu0 %v8427_v63  ;;  %v13270_v53 = vld [vmem:[%s20634_s9 + $0x70] sm:$0xff] }
 0x498   : > { %15631 = vmatprep.subr.mxu0 %v8426_v48  ;;  %15582 = vmatmul.mubr.msk.f32.vlgmr.msra.gmra.mxu1 %vm441_vm0, %v8429_v60 }
 0x499   : > { %15632 = vmatpush3.msra.mxu0 %v8426_v48  ;;  %15686 = vmatpush3.msra.mxu1 %v13235_v9 }
 0x49a   : > { %15565 = vmatmul.mubr.msk.f32.gmra.mxu0 %vm441_vm0, %v18555_v3  ;;  %15633 = vmatprep.subr.mxu0 %v8425_v36 }
 0x49b   : > { %15567 = vmatprep.mubr.msk.f32.mxu0 %vm441_vm0, %v18561_v4  ;;  %15634 = vmatpush3.msra.mxu0 %v8425_v36 }
 0x49c   : > { %15635 = vmatprep.subr.mxu0 %v8424_v38  ;;  %15687 = vmatprep.subr.mxu1 %v13234_v10 }
 0x49d   : > { %15636 = vmatpush3.msra.mxu0 %v8424_v38  ;;  %15688 = vmatpush3.msra.mxu1 %v13234_v10 }
 0x49e   : > { %15568 = vmatmul.mubr.msk.f32.gmra.mxu0 %vm441_vm0, %v18573_v57  ;;  %15689 = vmatprep.subr.mxu1 %v13233_v19 }
 0x49f   : > { %15570 = vmatprep.mubr.msk.f32.mxu0 %vm441_vm0, %v7512_v39  ;;  %15690 = vmatpush3.msra.mxu1 %v13233_v19 }
 0x4a0   : > { %15691 = vmatprep.subr.mxu1 %v13232_v41  ;;  %15741 = vmatprep.subr.mxu0 %v13271_v45 }
 0x4a1   : > { %15692 = vmatpush3.msra.mxu1 %v13232_v41 }
 0x4a2   : > { %15571 = vmatmul.mubr.msk.f32.gmra.mxu0 %vm441_vm0, %v7962_v18  ;;  %15797 = vmatprep.subr.mxu1 %v18812_v40 }
 0x4a3   : > { %15637 = vmatprep.mubr.msk.f32.mxu0 %vm441_vm0, %v8392_v17 }
 0x4a6   : > { %15638 = vmatmul.mubr.msk.f32.vlgmr.msra.gmra.mxu0 %vm441_vm0, %v8393_v11 }
 0x4a7   : > { %15742 = vmatpush3.msra.mxu0 %v13271_v45 }
 0x4a8   : > { %15743 = vmatprep.subr.mxu0 %v13270_v53 }
 0x4a9   : > { %15744 = vmatpush3.msra.mxu0 %v13270_v53 }
 0x4aa   : > { %15745 = vmatprep.subr.mxu0 %v13269_v22 }
 0x4ab   : > { %15746 = vmatpush3.msra.mxu0 %v13269_v22 }
 0x4ac   : > { %15747 = vmatprep.subr.mxu0 %v13268_v24 }
 0x4ad   : > { %15748 = vmatpush3.msra.mxu0 %v13268_v24 }
 0x514   : > { %v18762_v46 = vpop.f32.mrf.mxu0 }
 0x515   : > { %v18764_v44 = vpop.f32.mrf.mxu1 }
 0x516   : > { %v18766_v16 = vpop.f32.mrf.mxu0  ;;  %v7022_v48 = vadd.f32 %v18764_v44, %v18762_v46 }
 0x517   : > { %v18768_v20 = vpop.f32.mrf.mxu1 }
 0x518   : > { %v18770_v30 = vpop.f32.mrf.mxu0  ;;  %v7017_v55 = vadd.f32 %v18768_v20, %v18766_v16 }
 0x519   : > { %v18772_v51 = vpop.f32.mrf.mxu1 }
 0x51a   : > { %v18774_v2 = vpop.f32.mrf.mxu0  ;;  %v7032_v60 = vadd.f32 %v18772_v51, %v18770_v30 }
 0x51b   : > { %v18776_v23 = vpop.f32.mrf.mxu1 }
 0x51c   : > { %v7027_v19 = vadd.f32 %v18776_v23, %v18774_v2 }
 0x51e   : > { %v18778_v25 = vpop.f32.mrf.mxu0 }
 0x51f   : > { %v18780_v13 = vpop.f32.mrf.mxu1 }
 0x520   : > { %v18782_v52 = vpop.f32.mrf.mxu0  ;;  %v7042_v44 = vadd.f32 %v18780_v13, %v18778_v25 }
 0x521   : > { %v18784_v32 = vpop.f32.mrf.mxu1 }
 0x522   : > { %v18789_v43 = vpop.f32.mrf.mxu0  ;;  %v7037_v16 = vadd.f32 %v18784_v32, %v18782_v52 }
 0x523   : > { %v18791_v49 = vpop.f32.mrf.mxu1 }
 0x524   : > { %v18793_v1 = vpop.f32.mrf.mxu0  ;;  %v7052_v20 = vadd.f32 %v18791_v49, %v18789_v43 }
 0x525   : > { %v18795_v50 = vpop.f32.mrf.mxu1 }
 0x526   : > { %v15443_v6 = vpop.f32.mrf.mxu0  ;;  %v7047_v25 = vadd.f32 %v18795_v50, %v18793_v1 }
 0x527   : > { %v15463_v62 = vpop.f32.mrf.mxu1  ;;  %v7198_v38 = vadd.f32 %v15443_v6, %v7022_v48 }
 0x528   : > { %v7158_v47 = vpop.f32.mrf.mxu0 }
 0x529   : > { %v7308_v61 = vpop.f32.mrf.mxu1  ;;  %v7197_v11 = vadd.f32 %v7158_v47, %v7017_v55  ;;  %v7348_v41 = vadd.f32 %v15463_v62, %v7198_v38 }
 0x52a   : > { %v15446_v37 = vpop.f32.mrf.mxu0 }
 0x52b   : > { %v15466_v29 = vpop.f32.mrf.mxu1  ;;  %v7200_v46 = vadd.f32 %v15446_v37, %v7032_v60  ;;  %v7347_v45 = vadd.f32 %v7308_v61, %v7197_v11 }
 0x52c   : > { %v7168_v3 = vpop.f32.mrf.mxu0 }
 0x52d   : > { %v7318_v4 = vpop.f32.mrf.mxu1  ;;  %v7199_v30 = vadd.f32 %v7168_v3, %v7027_v19  ;;  %v7350_v23 = vadd.f32 %v15466_v29, %v7200_v46 }
 0x52e   : > { %v15449_v57 = vpop.f32.mrf.mxu0 }
 0x52f   : > { %v15469_v34 = vpop.f32.mrf.mxu1  ;;  %v7202_v53 = vadd.f32 %v15449_v57, %v7042_v44  ;;  %v7349_v37 = vadd.f32 %v7318_v4, %v7199_v30 }
 0x530   : > { %v7178_v7 = vpop.f32.mrf.mxu0 }
 0x531   : > { %v7328_v12 = vpop.f32.mrf.mxu1  ;;  %v7201_v22 = vadd.f32 %v7178_v7, %v7037_v16  ;;  %v7352_v43 = vadd.f32 %v15469_v34, %v7202_v53 }
 0x532   : > { %v15452_v8 = vpop.f32.mrf.mxu0 }
 0x533   : > { %v15472_v27 = vpop.f32.mrf.mxu1  ;;  %v7204_v24 = vadd.f32 %v15452_v8, %v7052_v20  ;;  %v7351_v49 = vadd.f32 %v7328_v12, %v7201_v22 }
 0x534   : > { %v7188_v28 = vpop.f32.mrf.mxu0 }
 0x535   : > { %v18815_v5 = vpop.f32.mrf.mxu1  ;;  %v7354_v61 = vadd.f32 %v15472_v27, %v7204_v24  ;;  %v7203_v3 = vadd.f32 %v7188_v28, %v7047_v25 }
 0x536   : > { %v15483_v58 = vpop.f32.mrf.mxu0 }
 0x537   : > { %v15503_v35 = vpop.f32.mrf.mxu1  ;;  %v7498_v51 = vadd.f32 %v15483_v58, %v7348_v41  ;;  %v7353_v50 = vadd.f32 %v18815_v5, %v7203_v3 }
 0x538   : > { %v7458_v39 = vpop.f32.mrf.mxu0 }
 0x539   : > { %v7608_v56 = vpop.f32.mrf.mxu1  ;;  %v7497_v62 = vadd.f32 %v7458_v39, %v7347_v45  ;;  %v7648_v52 = vadd.f32 %v15503_v35, %v7498_v51 }
 0x53a   : > { %v15486_v15 = vpop.f32.mrf.mxu0 }
 0x53b   : > { %v15506_v31 = vpop.f32.mrf.mxu1  ;;  %v7500_v32 = vadd.f32 %v15486_v15, %v7350_v23  ;;  %v7647_v55 = vadd.f32 %v7608_v56, %v7497_v62 }
 0x53c   : > { %v7468_v42 = vpop.f32.mrf.mxu0 }
 0x53d   : > { %v7618_v0 = vpop.f32.mrf.mxu1  ;;  %v7499_v57 = vadd.f32 %v7468_v42, %v7349_v37  ;;  %v7650_v60 = vadd.f32 %v15506_v31, %v7500_v32  ;;  %v18839_v42 = vld [vmem:[%s20633_s8] ss:$0 sm:$0xff] }
 0x53e   : > { %v15489_v21 = vpop.f32.mrf.mxu0 }
 0x53f   : > { %v15509_v18 = vpop.f32.mrf.mxu1  ;;  %v7502_v8 = vadd.f32 %v15489_v21, %v7352_v43  ;;  %v7649_v35 = vadd.f32 %v7618_v0, %v7499_v57 }
 0x540   : > { %v7478_v26 = vpop.f32.mrf.mxu0 }
 0x541   : > { %v7628_v54 = vpop.f32.mrf.mxu1  ;;  %v7501_v38 = vadd.f32 %v7478_v26, %v7351_v49  ;;  %v7652_v12 = vadd.f32 %v15509_v18, %v7502_v8 }
 0x542   : > { %v15492_v63 = vpop.f32.mrf.mxu0 }
 0x543   : > { %v15512_v33 = vpop.f32.mrf.mxu1  ;;  %v7504_v29 = vadd.f32 %v15492_v63, %v7354_v61  ;;  %v7651_v27 = vadd.f32 %v7628_v54, %v7501_v38 }
 0x544   : > { %v7488_v59 = vpop.f32.mrf.mxu0 }
 0x545   : > { %v18819_v36 = vpop.f32.mrf.mxu1  ;;  %v7654_v28 = vadd.f32 %v15512_v33, %v7504_v29  ;;  %v7503_v19 = vadd.f32 %v7488_v59, %v7353_v50 }
 0x546   : > { %v15523_v14 = vpop.f32.mrf.mxu0 }
 0x547   : > { %v15543_v17 = vpop.f32.mrf.mxu1  ;;  %v7798_v7 = vadd.f32 %v15523_v14, %v7648_v52  ;;  %v7653_v33 = vadd.f32 %v18819_v36, %v7503_v19 }
 0x548   : > { %v7758_v9 = vpop.f32.mrf.mxu0 }
 0x549   : > { %v7908_v10 = vpop.f32.mrf.mxu1  ;;  %v7797_v11 = vadd.f32 %v7758_v9, %v7647_v55  ;;  %v7948_v15 = vadd.f32 %v15543_v17, %v7798_v7 }
 0x54a   : > { %v15526_v6 = vpop.f32.mrf.mxu0 }
 0x54b   : > { %v15546_v47 = vpop.f32.mrf.mxu1  ;;  %v7800_v34 = vadd.f32 %v15526_v6, %v7650_v60  ;;  %v7947_v21 = vadd.f32 %v7908_v10, %v7797_v11 }
 0x54c   : > { %v7768_v2 = vpop.f32.mrf.mxu0 }
 0x54d   : > { %v7918_v48 = vpop.f32.mrf.mxu1  ;;  %v7799_v31 = vadd.f32 %v7768_v2, %v7649_v35  ;;  %v7950_v17 = vadd.f32 %v15546_v47, %v7800_v34 }
 0x54e   : > { %v15529_v13 = vpop.f32.mrf.mxu0 }
 0x54f   : > { %v15549_v1 = vpop.f32.mrf.mxu1  ;;  %v7802_v14 = vadd.f32 %v15529_v13, %v7652_v12  ;;  %v7949_v46 = vadd.f32 %v7918_v48, %v7799_v31 }
 0x550   : > { %v7778_v58 = vpop.f32.mrf.mxu0 }
 0x551   : > { %v7928_v26 = vpop.f32.mrf.mxu1  ;;  %v7801_v5 = vadd.f32 %v7778_v58, %v7651_v27  ;;  %v7952_v20 = vadd.f32 %v15549_v1, %v7802_v14 }
 0x552   : > { %v15532_v39 = vpop.f32.mrf.mxu0 }
 0x553   : > { %v7804_v9 = vadd.f32 %v15532_v39, %v7654_v28  ;;  %v15552_v41 = vpop.f32.mrf.mxu1  ;;  %v18844_v6 = vadd.f32 %v7928_v26, %v7801_v5 }
 0x554   : > { %v7788_v4 = vpop.f32.mrf.mxu0 }
 0x555   : > { %v7803_v45 = vadd.f32 %v7788_v4, %v7653_v33  ;;  %v18846_v30 = vadd.f32 %v15552_v41, %v7804_v9  ;;  %v7938_v12 = vpop.f32.mrf.mxu1 }
 0x556   : > { %v15563_v56 = vpop.f32.mrf.mxu0 }
 0x557   : > { %v8098_v63 = vadd.f32 %v15563_v56, %v7948_v15  ;;  %v7953_v41 = vadd.f32 %v7938_v12, %v7803_v45 }
 0x558   : > { %v8058_v0 = vpop.f32.mrf.mxu0 }
 0x559   : > { %v8113_v18 = vadd.f32 %v18839_v42, %v8098_v63  ;;  %v8097_v54 = vadd.f32 %v8058_v0, %v7947_v21 }
 0x55a   : > { %v15566_v59 = vpop.f32.mrf.mxu0 }
 0x55b   : > { %v8121_v44 = vmax.f32 %v8113_v18, 0.0  ;;  %v8112_v16 = vadd.f32 %v18839_v42, %v8097_v54  ;;  %v8100_v10 = vadd.f32 %v15566_v59, %v7950_v17  ;;  %v18883_v59 = vld [vmem:[%s20634_s9 + $0xb8] sm:$0xff] }
 0x55c   : > { %v8068_v51 = vpop.f32.mrf.mxu0  ;;  %15853 = vmatprep.subr.mxu0 %v18883_v59 }
 0x55d   : > { %v8137_v47 = vrot.slane %v8121_v44, 7  ;;  %v8153_v53 = vrot.slane %v8121_v44, 6  ;;  %v8169_v22 = vrot.slane %v8121_v44, 5  ;;  %v8185_v24 = vrot.slane %v8121_v44, 4 }
 0x55e   : > { %v8201_v2 = vrot.slane %v8121_v44, 3  ;;  %v8217_v23 = vrot.slane %v8121_v44, 2  ;;  %v8233_v36 = vrot.slane %v8121_v44, 1  ;;  %v8120_v62 = vmax.f32 %v8112_v16, 0.0  ;;  %v15569_v25 = vpop.f32.mrf.mxu0 }
 0x55f   : > { %v8249_v13 = vsel %vm3925_vm1, %v8121_v44, %v8137_v47  ;;  %v8115_v37 = vadd.f32 %v18839_v42, %v8100_v10  ;;  %v8099_v52 = vadd.f32 %v8068_v51, %v7949_v46  ;;  %v8102_v32 = vadd.f32 %v15569_v25, %v7952_v20 }
 0x560   : > { %v8257_v48 = vsel %vm3934_vm2, %v8249_v13, %v8137_v47  ;;  %v8305_v43 = vsel %vm3925_vm1, %v8185_v24, %v8201_v2  ;;  %v8136_v49 = vrot.slane %v8120_v62, 7  ;;  %v8152_v61 = vrot.slane %v8120_v62, 6  ;;  %v8078_v39 = vpop.f32.mrf.mxu0 }
 0x561   : > { %v8265_v3 = vsel %vm3943_vm3, %v8257_v48, %v8153_v53  ;;  %v8313_v58 = vsel %vm3934_vm2, %v8305_v43, %v8201_v2  ;;  %v8168_v55 = vrot.slane %v8120_v62, 5  ;;  %v8184_v57 = vrot.slane %v8120_v62, 4 }
 0x562   : > { %v8273_v7 = vsel %vm3952_vm4, %v8265_v3, %v8153_v53  ;;  %v8321_v8 = vsel %vm3943_vm3, %v8313_v58, %v8217_v23  ;;  %v8200_v38 = vrot.slane %v8120_v62, 3  ;;  %v8216_v29 = vrot.slane %v8120_v62, 2  ;;  %v15572_v14 = vpop.f32.mrf.mxu0 }
 0x563   : > { %v8281_v60 = vsel %vm3961_vm5, %v8273_v7, %v8169_v22  ;;  %v8329_v11 = vsel %vm3952_vm4, %v8321_v8, %v8217_v23  ;;  %v8232_v1 = vrot.slane %v8120_v62, 1  ;;  %v8248_v50 = vsel %vm3925_vm1, %v8120_v62, %v8136_v49 }
 0x564   : > { %v8289_v4 = vsel %vm3970_vm6, %v8281_v60, %v8169_v22  ;;  %v8337_v35 = vsel %vm3961_vm5, %v8329_v11, %v8233_v36  ;;  %v8256_v15 = vsel %vm3934_vm2, %v8248_v50, %v8136_v49  ;;  %v8304_v34 = vsel %vm3925_vm1, %v8184_v57, %v8200_v38  ;;  %v8088_v53 = vpop.f32.mrf.mxu0 }
 0x565   : > { %v8297_v27 = vsel %vm3979_vm7, %v8289_v4, %v8185_v24  ;;  %v8345_v28 = vsel %vm3970_vm6, %v8337_v35, %v8233_v36  ;;  %v8264_v19 = vsel %vm3943_vm3, %v8256_v15, %v8152_v61  ;;  %v8312_v56 = vsel %vm3934_vm2, %v8304_v34, %v8200_v38 }
 0x566   : > { %v8353_v21 = vsel %vm3979_vm7, %v8345_v28, %v8121_v44  ;;  %8364 = vst.msk [vmem:[#allocation3 + $0x49] sm:$0xff] %vm441_vm0, %v8297_v27  ;;  %8366 = vst.msk [vmem:[#allocation3 + $0x61] sm:$0xff] %vm441_vm0, %v8297_v27  ;;  %v8272_v31 = vsel %vm3952_vm4, %v8264_v19, %v8152_v61  ;;  %v8320_v26 = vsel %vm3943_vm3, %v8312_v56, %v8216_v29  ;;  %v8123_v63 = vmax.f32 %v8115_v37, 0.0 }
 0x567   : > { %v8280_v5 = vsel %vm3961_vm5, %v8272_v31, %v8168_v55  ;;  %v8328_v9 = vsel %vm3952_vm4, %v8320_v26, %v8216_v29  ;;  %v8114_v0 = vadd.f32 %v18839_v42, %v8099_v52  ;;  %v8117_v17 = vadd.f32 %v18839_v42, %v8102_v32  ;;  %8365 = vst.msk [vmem:[#allocation3 + $0x51] sm:$0xff] %vm441_vm0, %v8353_v21 }
 0x568   : > { %8367 = vst.msk [vmem:[#allocation3 + $0x69] sm:$0xff] %vm441_vm0, %v8353_v21  ;;  %v8288_v18 = vsel %vm3970_vm6, %v8280_v5, %v8168_v55  ;;  %v8336_v54 = vsel %vm3961_vm5, %v8328_v9, %v8232_v1  ;;  %v8139_v33 = vrot.slane %v8123_v63, 7  ;;  %v8155_v16 = vrot.slane %v8123_v63, 6 }
 0x569   : > { %v8296_v46 = vsel %vm3979_vm7, %v8288_v18, %v8184_v57  ;;  %v8344_v44 = vsel %vm3970_vm6, %v8336_v54, %v8232_v1  ;;  %v8187_v10 = vrot.slane %v8123_v63, 4  ;;  %v8171_v45 = vrot.slane %v8123_v63, 5 }
 0x56a   : > { %v8352_v20 = vsel %vm3979_vm7, %v8344_v44, %v8120_v62  ;;  %8360 = vst.msk [vmem:[#allocation3 + $0x19] sm:$0xff] %vm441_vm0, %v8296_v46  ;;  %8362 = vst.msk [vmem:[#allocation3 + $0x31] sm:$0xff] %vm441_vm0, %v8296_v46  ;;  %v8203_v51 = vrot.slane %v8123_v63, 3  ;;  %v8219_v47 = vrot.slane %v8123_v63, 2  ;;  %v8235_v22 = vrot.slane %v8123_v63, 1 }
 0x56b   : > { %v8251_v24 = vsel %vm3925_vm1, %v8123_v63, %v8139_v33  ;;  %v18892_v2 = vmax.f32 %v8114_v0, 0.0  ;;  %v18894_v23 = vmax.f32 %v8117_v17, 0.0  ;;  %8361 = vst.msk [vmem:[#allocation3 + $0x21] sm:$0xff] %vm441_vm0, %v8352_v20  ;;  %8363 = vst.msk [vmem:[#allocation3 + $0x39] sm:$0xff] %vm441_vm0, %v8352_v20  ;;  %v18901_v25 = vadd.f32 %v8078_v39, %v18844_v6 }
 0x56c   : > { %v8259_v36 = vsel %vm3934_vm2, %v8251_v24, %v8139_v33  ;;  %v8307_v62 = vsel %vm3925_vm1, %v8187_v10, %v8203_v51  ;;  %v18904_v13 = vadd.f32 %v15572_v14, %v18846_v30  ;;  %v18909_v48 = vadd.f32 %v8088_v53, %v7953_v41 }
 0x56d   : > { %v8267_v37 = vsel %vm3943_vm3, %v8259_v36, %v8155_v16  ;;  %v8315_v52 = vsel %vm3934_vm2, %v8307_v62, %v8203_v51  ;;  %v8138_v32 = vrot.slane %v18892_v2, 7  ;;  %v8154_v61 = vrot.slane %v18892_v2, 6  ;;  %v19003_v36 = vld [vmem:[#allocation3 + $0x49] sm:$0xff] }
 0x56e   : > { %v8275_v43 = vsel %vm3952_vm4, %v8267_v37, %v8155_v16  ;;  %v8323_v49 = vsel %vm3943_vm3, %v8315_v52, %v8219_v47  ;;  %v8186_v6 = vrot.slane %v18892_v2, 4  ;;  %v8170_v58 = vrot.slane %v18892_v2, 5  ;;  %v19005_v62 = vld [vmem:[#allocation3 + $0x48] sm:$0xff] }
 0x56f   : > { %v8283_v3 = vsel %vm3961_vm5, %v8275_v43, %v8171_v45  ;;  %v8331_v30 = vsel %vm3952_vm4, %v8323_v49, %v8219_v47  ;;  %v8202_v55 = vrot.slane %v18892_v2, 3  ;;  %v8218_v8 = vrot.slane %v18892_v2, 2  ;;  %20792 = vst [vmem:[#allocation30_spill] sm:$0xff] %v19005_v62 }
 0x570   : > { %v8291_v57 = vsel %vm3970_vm6, %v8283_v3, %v8171_v45  ;;  %v8339_v7 = vsel %vm3961_vm5, %v8331_v30, %v8235_v22  ;;  %v8250_v38 = vsel %vm3925_vm1, %v18892_v2, %v8138_v32  ;;  %v8141_v34 = vrot.slane %v18894_v23, 7 }
 0x571   : > { %v8299_v29 = vsel %vm3979_vm7, %v8291_v57, %v8187_v10  ;;  %v8347_v39 = vsel %vm3970_vm6, %v8339_v7, %v8235_v22  ;;  %v8258_v60 = vsel %vm3934_vm2, %v8250_v38, %v8138_v32  ;;  %v8306_v11 = vsel %vm3925_vm1, %v8186_v6, %v8202_v55  ;;  %v18928_v1 = vld [vmem:[#allocation3 + $0x19] sm:$0xff]  ;;  %v18956_v31 = vld [vmem:[#allocation3 + $0x31] sm:$0xff] }
 0x572   : > { %v18930_v50 = vld [vmem:[#allocation3 + $0x18] sm:$0xff]  ;;  %v8355_v4 = vsel %vm3979_vm7, %v8347_v39, %v8123_v63  ;;  %8372 = vst.msk [vmem:[#allocation3 + $0xa9] sm:$0xff] %vm441_vm0, %v8299_v29  ;;  %8374 = vst.msk [vmem:[#allocation3 + $0xc1] sm:$0xff] %vm441_vm0, %v8299_v29  ;;  %v8266_v35 = vsel %vm3943_vm3, %v8258_v60, %v8154_v61  ;;  %v8314_v15 = vsel %vm3934_vm2, %v8306_v11, %v8202_v55  ;;  %15584 = vmatprep.mubr.msk.f32.mxu1 %vm441_vm0, %v18928_v1  ;;  %v18942_v12 = vld [vmem:[#allocation3 + $0x21] sm:$0xff] }
 0x573   : > { %15640 = vmatprep.mubr.msk.f32.mxu0 %vm441_vm0, %v18930_v50  ;;  %v18944_v27 = vld [vmem:[#allocation3 + $0x20] sm:$0xff]  ;;  %v8234_v28 = vrot.slane %v18892_v2, 1  ;;  %v8274_v19 = vsel %vm3952_vm4, %v8266_v35, %v8154_v61  ;;  %v8322_v56 = vsel %vm3943_vm3, %v8314_v15, %v8218_v8  ;;  %v8157_v21 = vrot.slane %v18894_v23, 6  ;;  %8373 = vst.msk [vmem:[#allocation3 + $0xb1] sm:$0xff] %vm441_vm0, %v8355_v4  ;;  %8375 = vst.msk [vmem:[#allocation3 + $0xc9] sm:$0xff] %vm441_vm0, %v8355_v4  ;;  %v18958_v26 = vld [vmem:[#allocation3 + $0x30] sm:$0xff] }
 0x574   : > { %15585 = vmatmul.mubr.msk.f32.gmra.mxu1 %vm441_vm0, %v18942_v12  ;;  %15641 = vmatmul.mubr.msk.f32.gmra.mxu0 %vm441_vm0, %v18944_v27  ;;  %20790 = vst [vmem:[#allocation24_spill] sm:$0xff] %v18958_v26  ;;  %v8282_v63 = vsel %vm3961_vm5, %v8274_v19, %v8170_v58  ;;  %v8330_v14 = vsel %vm3952_vm4, %v8322_v56, %v8218_v8  ;;  %v8189_v5 = vrot.slane %v18894_v23, 4  ;;  %v8205_v9 = vrot.slane %v18894_v23, 3  ;;  %v18979_v16 = vld [vmem:[#allocation3 + $0x39] sm:$0xff]  ;;  %v19026_v61 = vld [vmem:[#allocation3 + $0x50] sm:$0xff] }
 0x575   : > { %15587 = vmatprep.mubr.msk.f32.mxu1 %vm441_vm0, %v18956_v31  ;;  %15643 = vmatprep.mubr.msk.f32.mxu0 %vm441_vm0, %v18958_v26  ;;  %v8290_v0 = vsel %vm3970_vm6, %v8282_v63, %v8170_v58  ;;  %v8338_v17 = vsel %vm3961_vm5, %v8330_v14, %v8234_v28  ;;  %v8173_v41 = vrot.slane %v18894_v23, 5  ;;  %v8221_v18 = vrot.slane %v18894_v23, 2  ;;  %v18991_v47 = vld [vmem:[#allocation3 + $0x38] sm:$0xff]  ;;  %20793 = vst [vmem:[#allocation31_spill] sm:$0xff] %v19026_v61  ;;  %v19048_v8 = vld [vmem:[#allocation3 + $0x60] sm:$0xff]  ;;  %v19070_v63 = vld [vmem:[#allocation3 + $0x68] sm:$0xff] }
 0x576   : > { %v8298_v54 = vsel %vm3979_vm7, %v8290_v0, %v8186_v6  ;;  %v8346_v33 = vsel %vm3970_vm6, %v8338_v17, %v8234_v28  ;;  %v8253_v46 = vsel %vm3925_vm1, %v18894_v23, %v8141_v34  ;;  %v8309_v44 = vsel %vm3925_vm1, %v8189_v5, %v8205_v9  ;;  %20791 = vst [vmem:[#allocation27_spill] sm:$0xff] %v18991_v47  ;;  %v19028_v6 = vld [vmem:[#allocation3 + $0x61] sm:$0xff] }
 0x577   : > { %v8354_v10 = vsel %vm3979_vm7, %v8346_v33, %v18892_v2  ;;  %8368 = vst.msk [vmem:[#allocation3 + $0x79] sm:$0xff] %vm441_vm0, %v8298_v54  ;;  %8370 = vst.msk [vmem:[#allocation3 + $0x91] sm:$0xff] %vm441_vm0, %v8298_v54  ;;  %v8261_v20 = vsel %vm3934_vm2, %v8253_v46, %v8141_v34  ;;  %v8317_v45 = vsel %vm3934_vm2, %v8309_v44, %v8205_v9  ;;  %v19061_v34 = vld [vmem:[#allocation3 + $0x69] sm:$0xff] }
 0x578   : > { %v8116_v51 = vadd.f32 %v18839_v42, %v18901_v25  ;;  %15588 = vmatmul.mubr.msk.f32.gmra.mxu1 %vm441_vm0, %v18979_v16  ;;  %v8269_v53 = vsel %vm3943_vm3, %v8261_v20, %v8157_v21  ;;  %v8325_v22 = vsel %vm3943_vm3, %v8317_v45, %v8221_v18  ;;  %v8119_v24 = vadd.f32 %v18839_v42, %v18904_v13 }
 0x579   : > { %v8118_v2 = vadd.f32 %v18839_v42, %v18909_v48  ;;  %8369 = vst.msk [vmem:[#allocation3 + $0x81] sm:$0xff] %vm441_vm0, %v8354_v10  ;;  %8371 = vst.msk [vmem:[#allocation3 + $0x99] sm:$0xff] %vm441_vm0, %v8354_v10  ;;  %15644 = vmatmul.mubr.msk.f32.gmra.mxu0 %vm441_vm0, %v18991_v47  ;;  %v8237_v25 = vrot.slane %v18894_v23, 1  ;;  %v8333_v37 = vsel %vm3952_vm4, %v8325_v22, %v8221_v18  ;;  %15590 = vmatprep.mubr.msk.f32.mxu1 %vm441_vm0, %v19003_v36  ;;  %v19020_v48 = vld [vmem:[#allocation3 + $0x51] sm:$0xff] }
 0x57a   : > { %v19009_v52 = vmax.f32 %v8116_v51, 0.0  ;;  %15646 = vmatprep.mubr.msk.f32.mxu0 %vm441_vm0, %v19005_v62  ;;  %v8277_v42 = vsel %vm3952_vm4, %v8269_v53, %v8157_v21  ;;  %v19016_v13 = vmax.f32 %v8119_v24, 0.0  ;;  %20794 = vst [vmem:[#allocation9_spill] sm:$0xff] %v19048_v8  ;;  %20795 = vst [vmem:[#allocation6_spill] sm:$0xff] %v19070_v63 }
 0x57b   : > { %v19018_v32 = vmax.f32 %v8118_v2, 0.0  ;;  %v19033_v3 = vsel %vm3961_vm5, %v8277_v42, %v8173_v41  ;;  %v19038_v30 = vsel %vm3961_vm5, %v8333_v37, %v8237_v25 }
 0x57c   : > { %v8140_v43 = vrot.slane %v19009_v52, 7  ;;  %v8188_v49 = vrot.slane %v19009_v52, 4  ;;  %15591 = vmatmul.mubr.msk.f32.gmra.mxu1 %vm441_vm0, %v19020_v48  ;;  %v8156_v58 = vrot.slane %v19009_v52, 6  ;;  %v8172_v55 = vrot.slane %v19009_v52, 5 }
 0x57d   : > { %v8204_v57 = vrot.slane %v19009_v52, 3  ;;  %v8143_v7 = vrot.slane %v19016_v13, 7  ;;  %15647 = vmatmul.mubr.msk.f32.gmra.mxu0 %vm441_vm0, %v19026_v61  ;;  %15593 = vmatprep.mubr.msk.f32.mxu1 %vm441_vm0, %v19028_v6  ;;  %v8220_v38 = vrot.slane %v19009_v52, 2  ;;  %v8236_v29 = vrot.slane %v19009_v52, 1 }
 0x57e   : > { %v8252_v39 = vsel %vm3925_vm1, %v19009_v52, %v8140_v43  ;;  %v8191_v60 = vrot.slane %v19016_v13, 4  ;;  %15649 = vmatprep.mubr.msk.f32.mxu0 %vm441_vm0, %v19048_v8  ;;  %v8159_v35 = vrot.slane %v19016_v13, 6  ;;  %v8207_v15 = vrot.slane %v19016_v13, 3  ;;  %v19080_v18 = vld [vmem:[#allocation3 + $0x79] sm:$0xff] }
 0x57f   : > { %v8260_v11 = vsel %vm3934_vm2, %v8252_v39, %v8140_v43  ;;  %v8308_v4 = vsel %vm3925_vm1, %v8188_v49, %v8204_v57  ;;  %v8223_v56 = vrot.slane %v19016_v13, 2  ;;  %v8255_v21 = vsel %vm3925_vm1, %v19016_v13, %v8143_v7  ;;  %v19088_v10 = vld [vmem:[#allocation3 + $0x78] sm:$0xff] }
 0x580   : > { %v8268_v28 = vsel %vm3943_vm3, %v8260_v11, %v8156_v58  ;;  %v8316_v19 = vsel %vm3934_vm2, %v8308_v4, %v8204_v57  ;;  %15594 = vmatmul.mubr.msk.f32.gmra.mxu1 %vm441_vm0, %v19061_v34  ;;  %v8263_v0 = vsel %vm3934_vm2, %v8255_v21, %v8143_v7  ;;  %v8311_v17 = vsel %vm3925_vm1, %v8191_v60, %v8207_v15  ;;  %v19096_v22 = vld [vmem:[#allocation3 + $0x81] sm:$0xff]  ;;  %v19117_v7 = vld [vmem:[#allocation3 + $0x90] sm:$0xff] }
 0x581   : > { %v8276_v14 = vsel %vm3952_vm4, %v8268_v28, %v8156_v58  ;;  %v8324_v9 = vsel %vm3943_vm3, %v8316_v19, %v8220_v38  ;;  %15650 = vmatmul.mubr.msk.f32.gmra.mxu0 %vm441_vm0, %v19070_v63  ;;  %v8175_v46 = vrot.slane %v19016_v13, 5  ;;  %v8319_v44 = vsel %vm3934_vm2, %v8311_v17, %v8207_v15  ;;  %15596 = vmatprep.mubr.msk.f32.mxu1 %vm441_vm0, %v19080_v18  ;;  %v19106_v43 = vld [vmem:[#allocation3 + $0x80] sm:$0xff]  ;;  %v19108_v58 = vld [vmem:[#allocation3 + $0x91] sm:$0xff] }
 0x582   : > { %v8284_v54 = vsel %vm3961_vm5, %v8276_v14, %v8172_v55  ;;  %v8332_v33 = vsel %vm3952_vm4, %v8324_v9, %v8220_v38  ;;  %20796 = vst [vmem:[#allocation10_spill] sm:$0xff] %v19088_v10  ;;  %v8239_v45 = vrot.slane %v19016_v13, 1  ;;  %v8327_v51 = vsel %vm3943_vm3, %v8319_v44, %v8223_v56  ;;  %15652 = vmatprep.mubr.msk.f32.mxu0 %vm441_vm0, %v19088_v10  ;;  %v19135_v28 = vld [vmem:[#allocation3 + $0x99] sm:$0xff]  ;;  %v19168_v14 = vld [vmem:[#allocation3 + $0xa8] sm:$0xff] }
 0x583   : > { %v8292_v20 = vsel %vm3970_vm6, %v8284_v54, %v8172_v55  ;;  %v8142_v53 = vrot.slane %v19018_v32, 7  ;;  %v8271_v24 = vsel %vm3943_vm3, %v8263_v0, %v8159_v35  ;;  %v8335_v2 = vsel %vm3952_vm4, %v8327_v51, %v8223_v56  ;;  %20797 = vst [vmem:[#allocation25_spill] sm:$0xff] %v19106_v43  ;;  %20798 = vst [vmem:[#allocation11_spill] sm:$0xff] %v19117_v7 }
 0x584   : > { %v8158_v37 = vrot.slane %v19018_v32, 6  ;;  %v8174_v42 = vrot.slane %v19018_v32, 5  ;;  %15597 = vmatmul.mubr.msk.f32.gmra.mxu1 %vm441_vm0, %v19096_v22  ;;  %v8206_v55 = vrot.slane %v19018_v32, 3  ;;  %v8300_v38 = vsel %vm3979_vm7, %v8292_v20, %v8188_v49  ;;  %20799 = vst [vmem:[#allocation28_spill] sm:$0xff] %v19168_v14  ;;  %v19179_v20 = vld [vmem:[#allocation3 + $0xb1] sm:$0xff] }
 0x585   : > { %v8254_v57 = vsel %vm3925_vm1, %v19018_v32, %v8142_v53  ;;  %15653 = vmatmul.mubr.msk.f32.gmra.mxu0 %vm441_vm0, %v19106_v43  ;;  %15599 = vmatprep.mubr.msk.f32.mxu1 %vm441_vm0, %v19108_v58  ;;  %v8340_v39 = vsel %vm3961_vm5, %v8332_v33, %v8236_v29  ;;  %8376 = vst.msk [vmem:[#allocation3 + $0xd9] sm:$0xff] %vm441_vm0, %v8300_v38  ;;  %8378 = vst.msk [vmem:[#allocation3 + $0xf1] sm:$0xff] %vm441_vm0, %v8300_v38  ;;  %v8190_v21 = vrot.slane %v19018_v32, 4 }
 0x586   : > { %v8262_v11 = vsel %vm3934_vm2, %v8254_v57, %v8142_v53  ;;  %15655 = vmatprep.mubr.msk.f32.mxu0 %vm441_vm0, %v19117_v7  ;;  %v8348_v4 = vsel %vm3970_vm6, %v8340_v39, %v8236_v29  ;;  %v8293_v15 = vsel %vm3970_vm6, %v19033_v3, %v8173_v41  ;;  %v8349_v49 = vsel %vm3970_vm6, %v19038_v30, %v8237_v25  ;;  %v19148_v25 = vld [vmem:[#allocation3 + $0x98] sm:$0xff]  ;;  %v19150_v3 = vld [vmem:[#allocation3 + $0xa9] sm:$0xff] }
 0x587   : > { %v8356_v19 = vsel %vm3979_vm7, %v8348_v4, %v19009_v52  ;;  %v8301_v56 = vsel %vm3979_vm7, %v8293_v15, %v8189_v5  ;;  %v8357_v29 = vsel %vm3979_vm7, %v8349_v49, %v18894_v23  ;;  %v8222_v41 = vrot.slane %v19018_v32, 2  ;;  %v19212_v57 = vld [vmem:[#allocation3 + $0xc9] sm:$0xff] }
 0x588   : > { %15600 = vmatmul.mubr.msk.f32.gmra.mxu1 %vm441_vm0, %v19135_v28  ;;  %8377 = vst.msk [vmem:[#allocation3 + $0xe1] sm:$0xff] %vm441_vm0, %v8356_v19  ;;  %8379 = vst.msk [vmem:[#allocation3 + $0xf9] sm:$0xff] %vm441_vm0, %v8356_v19  ;;  %v8270_v23 = vsel %vm3943_vm3, %v8262_v11, %v8158_v37  ;;  %v8279_v5 = vsel %vm3952_vm4, %v8271_v24, %v8159_v35  ;;  %v8343_v52 = vsel %vm3961_vm5, %v8335_v2, %v8239_v45  ;;  %v19218_v39 = vld [vmem:[#allocation3 + $0xc8] sm:$0xff] }
 0x589   : > { %8380 = vst.msk [vmem:[#allocation3 + $0x109] sm:$0xff] %vm441_vm0, %v8301_v56  ;;  %8382 = vst.msk [vmem:[#allocation3 + $0x121] sm:$0xff] %vm441_vm0, %v8301_v56  ;;  %v8238_v30 = vrot.slane %v19018_v32, 1  ;;  %15656 = vmatmul.mubr.msk.f32.gmra.mxu0 %vm441_vm0, %v19148_v25  ;;  %15602 = vmatprep.mubr.msk.f32.mxu1 %vm441_vm0, %v19150_v3  ;;  %v8278_v9 = vsel %vm3952_vm4, %v8270_v23, %v8158_v37  ;;  %v8310_v0 = vsel %vm3925_vm1, %v8190_v21, %v8206_v55  ;;  %v19190_v37 = vld [vmem:[#allocation3 + $0xb0] sm:$0xff] }
 0x58a   : > { %8381 = vst.msk [vmem:[#allocation3 + $0x111] sm:$0xff] %vm441_vm0, %v8357_v29  ;;  %8383 = vst.msk [vmem:[#allocation3 + $0x129] sm:$0xff] %vm441_vm0, %v8357_v29  ;;  %v8287_v17 = vsel %vm3961_vm5, %v8279_v5, %v8175_v46  ;;  %15658 = vmatprep.mubr.msk.f32.mxu0 %vm441_vm0, %v19168_v14  ;;  %v8286_v35 = vsel %vm3961_vm5, %v8278_v9, %v8174_v42  ;;  %v8318_v54 = vsel %vm3934_vm2, %v8310_v0, %v8206_v55 }
 0x58b   : > { %v8295_v33 = vsel %vm3970_vm6, %v8287_v17, %v8175_v46  ;;  %v8351_v44 = vsel %vm3970_vm6, %v8343_v52, %v8239_v45  ;;  %v8294_v51 = vsel %vm3970_vm6, %v8286_v35, %v8174_v42  ;;  %v8326_v53 = vsel %vm3943_vm3, %v8318_v54, %v8222_v41  ;;  %v19192_v46 = vld [vmem:[#allocation3 + $0xc1] sm:$0xff] }
 0x58c   : > { %v8303_v24 = vsel %vm3979_vm7, %v8295_v33, %v8191_v60  ;;  %v8359_v2 = vsel %vm3979_vm7, %v8351_v44, %v19016_v13  ;;  %15603 = vmatmul.mubr.msk.f32.gmra.mxu1 %vm441_vm0, %v19179_v20  ;;  %v8302_v45 = vsel %vm3979_vm7, %v8294_v51, %v8190_v21  ;;  %v8334_v42 = vsel %vm3952_vm4, %v8326_v53, %v8222_v41  ;;  %v19204_v13 = vld [vmem:[#allocation3 + $0xc0] sm:$0xff]  ;;  %v19228_v4 = vld [vmem:[#allocation3 + $0xd8] sm:$0xff]  ;;  %v19244_v19 = vld [vmem:[#allocation3 + $0xf0] sm:$0xff] }
 0x58d   : > { %8388 = vst.msk [vmem:[#allocation3 + $0x169] sm:$0xff] %vm441_vm0, %v8303_v24  ;;  %8390 = vst.msk [vmem:[#allocation3 + $0x181] sm:$0xff] %vm441_vm0, %v8303_v24  ;;  %15659 = vmatmul.mubr.msk.f32.gmra.mxu0 %vm441_vm0, %v19190_v37  ;;  %15605 = vmatprep.mubr.msk.f32.mxu1 %vm441_vm0, %v19192_v46  ;;  %v8342_v60 = vsel %vm3961_vm5, %v8334_v42, %v8238_v30  ;;  %v19220_v11 = vld [vmem:[#allocation3 + $0xd9] sm:$0xff]  ;;  %v19238_v49 = vld [vmem:[#allocation3 + $0xf1] sm:$0xff] }
 0x58e   : > { %8389 = vst.msk [vmem:[#allocation3 + $0x171] sm:$0xff] %vm441_vm0, %v8359_v2  ;;  %8391 = vst.msk [vmem:[#allocation3 + $0x189] sm:$0xff] %vm441_vm0, %v8359_v2  ;;  %15661 = vmatprep.mubr.msk.f32.mxu0 %vm441_vm0, %v19204_v13  ;;  %v8350_v55 = vsel %vm3970_vm6, %v8342_v60, %v8238_v30  ;;  %v9107_v42 = vld [vmem:[#allocation3 + $0x2] sm:$0xff] }
 0x58f   : > { %8384 = vst.msk [vmem:[#allocation3 + $0x139] sm:$0xff] %vm441_vm0, %v8302_v45  ;;  %8386 = vst.msk [vmem:[#allocation3 + $0x151] sm:$0xff] %vm441_vm0, %v8302_v45  ;;  %v8358_v38 = vsel %vm3979_vm7, %v8350_v55, %v19018_v32  ;;  %v19232_v32 = vld [vmem:[#allocation3 + $0xe1] sm:$0xff]  ;;  %v19248_v56 = vld [vmem:[#allocation3 + $0xf9] sm:$0xff] }
 0x590   : > { %15606 = vmatmul.mubr.msk.f32.gmra.mxu1 %vm441_vm0, %v19212_v57  ;;  %8385 = vst.msk [vmem:[#allocation3 + $0x141] sm:$0xff] %vm441_vm0, %v8358_v38  ;;  %8387 = vst.msk [vmem:[#allocation3 + $0x159] sm:$0xff] %vm441_vm0, %v8358_v38  ;;  %v19236_v15 = vld [vmem:[#allocation3 + $0xe0] sm:$0xff]  ;;  %v19252_v29 = vld [vmem:[#allocation3 + $0xf8] sm:$0xff] }
 0x591   : > { %15662 = vmatmul.mubr.msk.f32.gmra.mxu0 %vm441_vm0, %v19218_v39  ;;  %15608 = vmatprep.mubr.msk.f32.mxu1 %vm441_vm0, %v19220_v11  ;;  %v19254_v21 = vld [vmem:[#allocation3 + $0x109] sm:$0xff]  ;;  %v19264_v23 = vld [vmem:[#allocation3 + $0x111] sm:$0xff]  ;;  %v19270_v52 = vld [vmem:[#allocation3 + $0x121] sm:$0xff] }
 0x592   : > { %15664 = vmatprep.mubr.msk.f32.mxu0 %vm441_vm0, %v19228_v4  ;;  %v19260_v41 = vld [vmem:[#allocation3 + $0x108] sm:$0xff]  ;;  %v19268_v5 = vld [vmem:[#allocation3 + $0x110] sm:$0xff]  ;;  %v19276_v30 = vld [vmem:[#allocation3 + $0x120] sm:$0xff] }
 0x593   : > { %v19280_v9 = vld [vmem:[#allocation3 + $0x129] sm:$0xff] }
 0x594   : > { %15609 = vmatmul.mubr.msk.f32.gmra.mxu1 %vm441_vm0, %v19232_v32  ;;  %v19284_v0 = vld [vmem:[#allocation3 + $0x128] sm:$0xff] }
 0x595   : > { %15665 = vmatmul.mubr.msk.f32.gmra.mxu0 %vm441_vm0, %v19236_v15  ;;  %15611 = vmatprep.mubr.msk.f32.mxu1 %vm441_vm0, %v19238_v49  ;;  %v19318_v2 = vld [vmem:[#allocation3 + $0x169] sm:$0xff]  ;;  %v19328_v60 = vld [vmem:[#allocation3 + $0x171] sm:$0xff] }
 0x596   : > { %15667 = vmatprep.mubr.msk.f32.mxu0 %vm441_vm0, %v19244_v19  ;;  %v19286_v17 = vld [vmem:[#allocation3 + $0x139] sm:$0xff]  ;;  %v19302_v44 = vld [vmem:[#allocation3 + $0x151] sm:$0xff]  ;;  %20801 = vst [vmem:[#allocation23_spill] sm:$0xff] %v19318_v2  ;;  %v19324_v45 = vld [vmem:[#allocation3 + $0x168] sm:$0xff] }
 0x597   : > { %v19292_v35 = vld [vmem:[#allocation3 + $0x138] sm:$0xff]  ;;  %v19296_v54 = vld [vmem:[#allocation3 + $0x141] sm:$0xff]  ;;  %v19308_v51 = vld [vmem:[#allocation3 + $0x150] sm:$0xff]  ;;  %20802 = vst [vmem:[#allocation4_spill] sm:$0xff] %v19328_v60 }
 0x598   : > { %15612 = vmatmul.mubr.msk.f32.gmra.mxu1 %vm441_vm0, %v19248_v56  ;;  %v19300_v33 = vld [vmem:[#allocation3 + $0x140] sm:$0xff]  ;;  %v19316_v24 = vld [vmem:[#allocation3 + $0x158] sm:$0xff]  ;;  %v19332_v55 = vld [vmem:[#allocation3 + $0x170] sm:$0xff] }
 0x599   : > { %15668 = vmatmul.mubr.msk.f32.gmra.mxu0 %vm441_vm0, %v19252_v29  ;;  %15614 = vmatprep.mubr.msk.f32.mxu1 %vm441_vm0, %v19254_v21  ;;  %v19312_v53 = vld [vmem:[#allocation3 + $0x159] sm:$0xff]  ;;  %v9108_v38 = vld [vmem:[#allocation3 + $0xa] sm:$0xff] }
 0x59a   : > { %15670 = vmatprep.mubr.msk.f32.mxu0 %vm441_vm0, %v19260_v41  ;;  %20800 = vst [vmem:[#allocation21_spill] sm:$0xff] %v19312_v53 }
 0x59c   : > { %15615 = vmatmul.mubr.msk.f32.gmra.mxu1 %vm441_vm0, %v19264_v23 }
 0x59d   : > { %15671 = vmatmul.mubr.msk.f32.gmra.mxu0 %vm441_vm0, %v19268_v5  ;;  %15617 = vmatprep.mubr.msk.f32.mxu1 %vm441_vm0, %v19270_v52 }
 0x59e   : > { %15673 = vmatprep.mubr.msk.f32.mxu0 %vm441_vm0, %v19276_v30 }
 0x5a0   : > { %15618 = vmatmul.mubr.msk.f32.gmra.mxu1 %vm441_vm0, %v19280_v9 }
 0x5a1   : > { %15674 = vmatmul.mubr.msk.f32.gmra.mxu0 %vm441_vm0, %v19284_v0  ;;  %15620 = vmatprep.mubr.msk.f32.mxu1 %vm441_vm0, %v19286_v17 }
 0x5a2   : > { %15676 = vmatprep.mubr.msk.f32.mxu0 %vm441_vm0, %v19292_v35 }
 0x5a4   : > { %15621 = vmatmul.mubr.msk.f32.gmra.mxu1 %vm441_vm0, %v19296_v54 }
 0x5a5   : > { %15677 = vmatmul.mubr.msk.f32.gmra.mxu0 %vm441_vm0, %v19300_v33  ;;  %15623 = vmatprep.mubr.msk.f32.mxu1 %vm441_vm0, %v19302_v44 }
 0x5a6   : > { %15679 = vmatprep.mubr.msk.f32.mxu0 %vm441_vm0, %v19308_v51 }
 0x5a8   : > { %15624 = vmatmul.mubr.msk.f32.gmra.mxu1 %vm441_vm0, %v19312_v53  ;;  %v13306_v53 = vld [vmem:[%s20634_s9 + $0x90] sm:$0xff] }
 0x5a9   : > { %15680 = vmatmul.mubr.msk.f32.gmra.mxu0 %vm441_vm0, %v19316_v24  ;;  %15626 = vmatprep.mubr.msk.f32.mxu1 %vm441_vm0, %v19318_v2  ;;  %v19340_v2 = vld [vmem:[#allocation3 + $0x1a] sm:$0xff] }
 0x5aa   : > { %15682 = vmatprep.mubr.msk.f32.mxu0 %vm441_vm0, %v19324_v45 }
 0x5ac   : > { %15627 = vmatmul.mubr.msk.f32.gmra.mxu1 %vm441_vm0, %v19328_v60  ;;  %v19446_v60 = vld [vmem:[#allocation3 + $0xaa] sm:$0xff] }
 0x5ad   : > { %15683 = vmatmul.mubr.msk.f32.gmra.mxu0 %vm441_vm0, %v19332_v55  ;;  %15693 = vmatprep.mubr.msk.f32.mxu1 %vm441_vm0, %v9107_v42  ;;  %v13342_v42 = vld [vmem:[%s20634_s9 + $0xb0] sm:$0xff] }
 0x5ae   : > { %15749 = vmatprep.mubr.msk.f32.mxu0 %vm441_vm0, %v18930_v50  ;;  %v19355_v50 = vld [vmem:[#allocation3 + $0x22] sm:$0xff] }
 0x5b0   : > { %15694 = vmatmul.mubr.msk.f32.vlgmr.msra.gmra.mxu1 %vm441_vm0, %v9108_v38  ;;  %v13305_v38 = vld [vmem:[%s20634_s9 + $0x88] sm:$0xff] }
 0x5b1   : > { %15750 = vmatmul.mubr.msk.f32.vlgmr.msra.gmra.mxu0 %vm441_vm0, %v18944_v27  ;;  %15696 = vmatprep.mubr.msk.f32.mxu1 %vm441_vm0, %v19340_v2  ;;  %v19360_v27 = vld [vmem:[#allocation3 + $0x32] sm:$0xff] }
 0x5b2   : > { %15752 = vmatprep.mubr.msk.f32.mxu0 %vm441_vm0, %v18958_v26  ;;  %15798 = vmatpush3.msra.mxu1 %v18812_v40  ;;  %v13341_v40 = vld [vmem:[%s20634_s9 + $0xa8] sm:$0xff]  ;;  %v19378_v26 = vld [vmem:[#allocation3 + $0x4a] sm:$0xff] }
 0x5b3   : > { %15799 = vmatprep.subr.mxu1 %v13306_v53  ;;  %15854 = vmatpush3.msra.mxu0 %v18883_v59  ;;  %v19374_v59 = vld [vmem:[#allocation3 + $0x3a] sm:$0xff] }
 0x5b4   : > { %15697 = vmatmul.mubr.msk.f32.gmra.mxu1 %vm441_vm0, %v19355_v50  ;;  %15855 = vmatprep.subr.mxu0 %v13342_v42 }
 0x5b5   : > { %15753 = vmatmul.mubr.msk.f32.gmra.mxu0 %vm441_vm0, %v18991_v47  ;;  %15699 = vmatprep.mubr.msk.f32.mxu1 %vm441_vm0, %v19360_v27  ;;  %v13304_v47 = vld [vmem:[%s20634_s9 + $0x80] sm:$0xff] }
 0x5b6   : > { %15755 = vmatprep.mubr.msk.f32.mxu0 %vm441_vm0, %v19005_v62  ;;  %15800 = vmatpush3.msra.mxu1 %v13306_v53  ;;  %v13340_v53 = vld [vmem:[%s20634_s9 + $0xa0] sm:$0xff]  ;;  %v19396_v62 = vld [vmem:[#allocation3 + $0x62] sm:$0xff] }
 0x5b7   : > { %15801 = vmatprep.subr.mxu1 %v13305_v38  ;;  %15856 = vmatpush3.msra.mxu0 %v13342_v42  ;;  %v19392_v42 = vld [vmem:[#allocation3 + $0x52] sm:$0xff] }
 0x5b8   : > { %15700 = vmatmul.mubr.msk.f32.gmra.mxu1 %vm441_vm0, %v19374_v59  ;;  %15857 = vmatprep.subr.mxu0 %v13341_v40 }
 0x5b9   : > { %15756 = vmatmul.mubr.msk.f32.gmra.mxu0 %vm441_vm0, %v19026_v61  ;;  %15702 = vmatprep.mubr.msk.f32.mxu1 %vm441_vm0, %v19378_v26  ;;  %v19401_v61 = vld [vmem:[%s20634_s9 + $0xd8] sm:$0xff] }
 0x5ba   : > { %15758 = vmatprep.mubr.msk.f32.mxu0 %vm441_vm0, %v19048_v8  ;;  %15802 = vmatpush3.msra.mxu1 %v13305_v38  ;;  %v19410_v38 = vld [vmem:[%s20634_s9 + $0xf8] sm:$0xff]  ;;  %v19440_v8 = vld [vmem:[#allocation3 + $0x9a] sm:$0xff] }
 0x5bb   : > { %15803 = vmatprep.subr.mxu1 %v13304_v47  ;;  %15858 = vmatpush3.msra.mxu0 %v13341_v40  ;;  %v19414_v40 = vld [vmem:[#allocation3 + $0x6a] sm:$0xff] }
 0x5bc   : > { %15703 = vmatmul.mubr.msk.f32.gmra.mxu1 %vm441_vm0, %v19392_v42  ;;  %15859 = vmatprep.subr.mxu0 %v13340_v53 }
 0x5bd   : > { %15759 = vmatmul.mubr.msk.f32.gmra.mxu0 %vm441_vm0, %v19070_v63  ;;  %15705 = vmatprep.mubr.msk.f32.mxu1 %vm441_vm0, %v19396_v62  ;;  %v19419_v63 = vld [vmem:[#allocation3 + $0x7a] sm:$0xff] }
 0x5be   : > { %15761 = vmatprep.mubr.msk.f32.mxu0 %vm441_vm0, %v19088_v10  ;;  %15804 = vmatpush3.msra.mxu1 %v13304_v47  ;;  %v19428_v47 = vld [vmem:[#allocation3 + $0x82] sm:$0xff]  ;;  %v15639_v10 = vpop.f32.mrf.mxu0 }
 0x5bf   : > { %15860 = vmatpush3.msra.mxu0 %v13340_v53  ;;  %15909 = vmatprep.subr.mxu1 %v19401_v61  ;;  %v19432_v53 = vld [vmem:[#allocation3 + $0x92] sm:$0xff] }
 0x5c0   : > { %15706 = vmatmul.mubr.msk.f32.gmra.mxu1 %vm441_vm0, %v19414_v40  ;;  %15965 = vmatprep.subr.mxu0 %v19410_v38 }
 0x5c1   : > { %15762 = vmatmul.mubr.msk.f32.gmra.mxu0 %vm441_vm0, %v19106_v43  ;;  %15708 = vmatprep.mubr.msk.f32.mxu1 %vm441_vm0, %v19419_v63  ;;  %v15583_v43 = vpop.f32.mrf.mxu1 }
 0x5c2   : > { %15764 = vmatprep.mubr.msk.f32.mxu0 %vm441_vm0, %v19117_v7  ;;  %v19442_v7 = vadd.f32 %v15639_v10, %v15583_v43  ;;  %v19458_v10 = vld [vmem:[#allocation3 + $0xc2] sm:$0xff]  ;;  %v19466_v43 = vld [vmem:[#allocation3 + $0xca] sm:$0xff] }
 0x5c4   : > { %15709 = vmatmul.mubr.msk.f32.gmra.mxu1 %vm441_vm0, %v19428_v47 }
 0x5c5   : > { %15765 = vmatmul.mubr.msk.f32.gmra.mxu0 %vm441_vm0, %v19148_v25  ;;  %15711 = vmatprep.mubr.msk.f32.mxu1 %vm441_vm0, %v19432_v53 }
 0x5c6   : > { %15767 = vmatprep.mubr.msk.f32.mxu0 %vm441_vm0, %v19168_v14  ;;  %v19454_v14 = vld [vmem:[#allocation3 + $0xb2] sm:$0xff] }
 0x5c8   : > { %15712 = vmatmul.mubr.msk.f32.gmra.mxu1 %vm441_vm0, %v19440_v8 }
 0x5c9   : > { %15768 = vmatmul.mubr.msk.f32.gmra.mxu0 %vm441_vm0, %v19190_v37  ;;  %15714 = vmatprep.mubr.msk.f32.mxu1 %vm441_vm0, %v19446_v60  ;;  %v19470_v37 = vld [vmem:[#allocation3 + $0xda] sm:$0xff] }
 0x5ca   : > { %15770 = vmatprep.mubr.msk.f32.mxu0 %vm441_vm0, %v19204_v13  ;;  %v19478_v13 = vld [vmem:[#allocation3 + $0xe2] sm:$0xff] }
 0x5cc   : > { %15715 = vmatmul.mubr.msk.f32.gmra.mxu1 %vm441_vm0, %v19454_v14 }
 0x5cd   : > { %15771 = vmatmul.mubr.msk.f32.gmra.mxu0 %vm441_vm0, %v19218_v39  ;;  %15717 = vmatprep.mubr.msk.f32.mxu1 %vm441_vm0, %v19458_v10  ;;  %v19482_v39 = vld [vmem:[#allocation3 + $0xf2] sm:$0xff] }
 0x5ce   : > { %15773 = vmatprep.mubr.msk.f32.mxu0 %vm441_vm0, %v19228_v4  ;;  %v19490_v4 = vld [vmem:[#allocation3 + $0xfa] sm:$0xff] }
 0x5d0   : > { %15718 = vmatmul.mubr.msk.f32.gmra.mxu1 %vm441_vm0, %v19466_v43 }
 0x5d1   : > { %15774 = vmatmul.mubr.msk.f32.gmra.mxu0 %vm441_vm0, %v19236_v15  ;;  %15720 = vmatprep.mubr.msk.f32.mxu1 %vm441_vm0, %v19470_v37  ;;  %v19494_v15 = vld [vmem:[#allocation3 + $0x10a] sm:$0xff] }
 0x5d2   : > { %15776 = vmatprep.mubr.msk.f32.mxu0 %vm441_vm0, %v19244_v19  ;;  %v19502_v19 = vld [vmem:[#allocation3 + $0x112] sm:$0xff] }
 0x5d4   : > { %15721 = vmatmul.mubr.msk.f32.gmra.mxu1 %vm441_vm0, %v19478_v13 }
 0x5d5   : > { %15777 = vmatmul.mubr.msk.f32.gmra.mxu0 %vm441_vm0, %v19252_v29  ;;  %15723 = vmatprep.mubr.msk.f32.mxu1 %vm441_vm0, %v19482_v39  ;;  %v19506_v29 = vld [vmem:[#allocation3 + $0x122] sm:$0xff] }
 0x5d6   : > { %15779 = vmatprep.mubr.msk.f32.mxu0 %vm441_vm0, %v19260_v41  ;;  %v19514_v41 = vld [vmem:[#allocation3 + $0x12a] sm:$0xff] }
 0x5d8   : > { %15724 = vmatmul.mubr.msk.f32.gmra.mxu1 %vm441_vm0, %v19490_v4 }
 0x5d9   : > { %15780 = vmatmul.mubr.msk.f32.gmra.mxu0 %vm441_vm0, %v19268_v5  ;;  %15726 = vmatprep.mubr.msk.f32.mxu1 %vm441_vm0, %v19494_v15  ;;  %v19518_v5 = vld [vmem:[#allocation3 + $0x13a] sm:$0xff] }
 0x5da   : > { %15782 = vmatprep.mubr.msk.f32.mxu0 %vm441_vm0, %v19276_v30  ;;  %v19526_v30 = vld [vmem:[#allocation3 + $0x142] sm:$0xff] }
 0x5dc   : > { %15727 = vmatmul.mubr.msk.f32.gmra.mxu1 %vm441_vm0, %v19502_v19 }
 0x5dd   : > { %15783 = vmatmul.mubr.msk.f32.gmra.mxu0 %vm441_vm0, %v19284_v0  ;;  %15729 = vmatprep.mubr.msk.f32.mxu1 %vm441_vm0, %v19506_v29  ;;  %v19530_v0 = vld [vmem:[#allocation3 + $0x152] sm:$0xff] }
 0x5de   : > { %15785 = vmatprep.mubr.msk.f32.mxu0 %vm441_vm0, %v19292_v35  ;;  %v19538_v35 = vld [vmem:[#allocation3 + $0x15a] sm:$0xff] }
 0x5e0   : > { %15730 = vmatmul.mubr.msk.f32.gmra.mxu1 %vm441_vm0, %v19514_v41 }
 0x5e1   : > { %15786 = vmatmul.mubr.msk.f32.gmra.mxu0 %vm441_vm0, %v19300_v33  ;;  %15732 = vmatprep.mubr.msk.f32.mxu1 %vm441_vm0, %v19518_v5  ;;  %v19542_v33 = vld [vmem:[#allocation3 + $0x16a] sm:$0xff] }
 0x5e2   : > { %15788 = vmatprep.mubr.msk.f32.mxu0 %vm441_vm0, %v19308_v51  ;;  %v19548_v51 = vld [vmem:[#allocation3 + $0x180] sm:$0xff] }
 0x5e4   : > { %15733 = vmatmul.mubr.msk.f32.gmra.mxu1 %vm441_vm0, %v19526_v30 }
 0x5e5   : > { %15789 = vmatmul.mubr.msk.f32.gmra.mxu0 %vm441_vm0, %v19316_v24  ;;  %15735 = vmatprep.mubr.msk.f32.mxu1 %vm441_vm0, %v19530_v0  ;;  %v19552_v24 = vld [vmem:[#allocation3 + $0x172] sm:$0xff] }
 0x5e6   : > { %15791 = vmatprep.mubr.msk.f32.mxu0 %vm441_vm0, %v19324_v45  ;;  %v19556_v45 = vld [vmem:[#allocation3 + $0x188] sm:$0xff] }
 0x5e8   : > { %15736 = vmatmul.mubr.msk.f32.gmra.mxu1 %vm441_vm0, %v19538_v35 }
 0x5e9   : > { %15792 = vmatmul.mubr.msk.f32.gmra.mxu0 %vm441_vm0, %v19332_v55  ;;  %15738 = vmatprep.mubr.msk.f32.mxu1 %vm441_vm0, %v19542_v33  ;;  %v13378_v55 = vld [vmem:[%s20634_s9 + $0xd0] sm:$0xff] }
 0x5ea   : > { %15794 = vmatprep.mubr.msk.f32.mxu0 %vm441_vm0, %v19548_v51 }
 0x5ec   : > { %15739 = vmatmul.mubr.msk.f32.gmra.mxu1 %vm441_vm0, %v19552_v24 }
 0x5ed   : > { %15795 = vmatmul.mubr.msk.f32.gmra.mxu0 %vm441_vm0, %v19556_v45  ;;  %15805 = vmatprep.mubr.msk.f32.mxu1 %vm441_vm0, %v18928_v1  ;;  %v13414_v1 = vld [vmem:[%s20634_s9 + $0xf0] sm:$0xff] }
 0x5ee   : > { %15861 = vmatprep.mubr.msk.f32.mxu0 %vm441_vm0, %v19340_v2  ;;  %v13376_v2 = vld [vmem:[%s20634_s9 + $0xc0] sm:$0xff] }
 0x5f0   : > { %15806 = vmatmul.mubr.msk.f32.vlgmr.msra.gmra.mxu1 %vm441_vm0, %v18942_v12  ;;  %v13377_v12 = vld [vmem:[%s20634_s9 + $0xc8] sm:$0xff] }
 0x5f1   : > { %15862 = vmatmul.mubr.msk.f32.vlgmr.msra.gmra.mxu0 %vm441_vm0, %v19355_v50  ;;  %15808 = vmatprep.mubr.msk.f32.mxu1 %vm441_vm0, %v18956_v31  ;;  %v19613_v50 = vld [vmem:[%s20634_s9 + $0x118] sm:$0xff] }
 0x5f2   : > { %15864 = vmatprep.mubr.msk.f32.mxu0 %vm441_vm0, %v19360_v27  ;;  %15910 = vmatpush3.msra.mxu1 %v19401_v61  ;;  %v13413_v61 = vld [vmem:[%s20634_s9 + $0xe8] sm:$0xff] }
 0x5f3   : > { %15911 = vmatprep.subr.mxu1 %v13378_v55  ;;  %15966 = vmatpush3.msra.mxu0 %v19410_v38 }
 0x5f4   : > { %15809 = vmatmul.mubr.msk.f32.gmra.mxu1 %vm441_vm0, %v18979_v16  ;;  %15967 = vmatprep.subr.mxu0 %v13414_v1 }
 0x5f5   : > { %15865 = vmatmul.mubr.msk.f32.gmra.mxu0 %vm441_vm0, %v19374_v59  ;;  %15811 = vmatprep.mubr.msk.f32.mxu1 %vm441_vm0, %v19003_v36  ;;  %v20812_v59 = vld [vmem:[#allocation10_spill] sm:$0xff] }
 0x5f6   : > { %15867 = vmatprep.mubr.msk.f32.mxu0 %vm441_vm0, %v19378_v26  ;;  %15912 = vmatpush3.msra.mxu1 %v13378_v55  ;;  %v13412_v26 = vld [vmem:[%s20634_s9 + $0xe0] sm:$0xff] }
 0x5f7   : > { %15913 = vmatprep.subr.mxu1 %v13377_v12  ;;  %15968 = vmatpush3.msra.mxu0 %v13414_v1 }
 0x5f8   : > { %15812 = vmatmul.mubr.msk.f32.gmra.mxu1 %vm441_vm0, %v19020_v48  ;;  %15969 = vmatprep.subr.mxu0 %v13413_v61 }
 0x5f9   : > { %15868 = vmatmul.mubr.msk.f32.gmra.mxu0 %vm441_vm0, %v19392_v42  ;;  %15814 = vmatprep.mubr.msk.f32.mxu1 %vm441_vm0, %v19028_v6 }
 0x5fa   : > { %15870 = vmatprep.mubr.msk.f32.mxu0 %vm441_vm0, %v19396_v62  ;;  %15914 = vmatpush3.msra.mxu1 %v13377_v12  ;;  %v20803_v62 = vld [vmem:[#allocation21_spill] sm:$0xff] }
 0x5fb   : > { %15915 = vmatprep.subr.mxu1 %v13376_v2  ;;  %15970 = vmatpush3.msra.mxu0 %v13413_v61  ;;  %v10680_v61 = vld [vmem:[#allocation3 + $0xc8] sm:$0xff] }
 0x5fc   : > { %15815 = vmatmul.mubr.msk.f32.gmra.mxu1 %vm441_vm0, %v19061_v34  ;;  %15971 = vmatprep.subr.mxu0 %v13412_v26 }
 0x5fd   : > { %15871 = vmatmul.mubr.msk.f32.gmra.mxu0 %vm441_vm0, %v19414_v40  ;;  %15817 = vmatprep.mubr.msk.f32.mxu1 %vm441_vm0, %v19080_v18 }
 0x5fe   : > { %15873 = vmatprep.mubr.msk.f32.mxu0 %vm441_vm0, %v19419_v63  ;;  %15916 = vmatpush3.msra.mxu1 %v13376_v2  ;;  %v20805_v63 = vld [vmem:[#allocation4_spill] sm:$0xff] }
 0x5ff   : > { %15972 = vmatpush3.msra.mxu0 %v13412_v26  ;;  %16021 = vmatprep.subr.mxu1 %v19613_v50 }
 0x600   : > { %15818 = vmatmul.mubr.msk.f32.gmra.mxu1 %vm441_vm0, %v19096_v22 }
 0x601   : > { %15874 = vmatmul.mubr.msk.f32.gmra.mxu0 %vm441_vm0, %v19428_v47  ;;  %15820 = vmatprep.mubr.msk.f32.mxu1 %vm441_vm0, %v19108_v58 }
 0x602   : > { %15876 = vmatprep.mubr.msk.f32.mxu0 %vm441_vm0, %v19432_v53  ;;  %v20813_v53 = vld [vmem:[#allocation25_spill] sm:$0xff] }
 0x604   : > { %15821 = vmatmul.mubr.msk.f32.gmra.mxu1 %vm441_vm0, %v19135_v28  ;;  %v19704_v28 = vld [vmem:[#allocation3 + $0x181] sm:$0xff] }
 0x605   : > { %15877 = vmatmul.mubr.msk.f32.gmra.mxu0 %vm441_vm0, %v19440_v8  ;;  %15823 = vmatprep.mubr.msk.f32.mxu1 %vm441_vm0, %v19150_v3  ;;  %v20804_v8 = vld [vmem:[#allocation23_spill] sm:$0xff] }
 0x606   : > { %15879 = vmatprep.mubr.msk.f32.mxu0 %vm441_vm0, %v19446_v60  ;;  %v19710_v3 = vld [vmem:[#allocation3 + $0x182] sm:$0xff] }
 0x607   : > { %v20811_v60 = vld [vmem:[#allocation6_spill] sm:$0xff] }
 0x608   : > { %15824 = vmatmul.mubr.msk.f32.gmra.mxu1 %vm441_vm0, %v19179_v20  ;;  %v19718_v20 = vld [vmem:[#allocation3 + $0x18a] sm:$0xff] }
 0x609   : > { %15880 = vmatmul.mubr.msk.f32.gmra.mxu0 %vm441_vm0, %v19454_v14  ;;  %15826 = vmatprep.mubr.msk.f32.mxu1 %vm441_vm0, %v19192_v46  ;;  %v19714_v14 = vld [vmem:[#allocation3 + $0x189] sm:$0xff] }
 0x60a   : > { %15882 = vmatprep.mubr.msk.f32.mxu0 %vm441_vm0, %v19458_v10  ;;  %v20806_v46 = vld [vmem:[#allocation24_spill] sm:$0xff] }
 0x60c   : > { %15827 = vmatmul.mubr.msk.f32.gmra.mxu1 %vm441_vm0, %v19212_v57  ;;  %v20807_v57 = vld [vmem:[#allocation27_spill] sm:$0xff] }
 0x60d   : > { %15883 = vmatmul.mubr.msk.f32.gmra.mxu0 %vm441_vm0, %v19466_v43  ;;  %15829 = vmatprep.mubr.msk.f32.mxu1 %vm441_vm0, %v19220_v11  ;;  %v13450_v11 = vld [vmem:[%s20634_s9 + $0x110] sm:$0xff] }
 0x60e   : > { %15885 = vmatprep.mubr.msk.f32.mxu0 %vm441_vm0, %v19470_v37 }
 0x610   : > { %15830 = vmatmul.mubr.msk.f32.gmra.mxu1 %vm441_vm0, %v19232_v32  ;;  %v20808_v32 = vld [vmem:[#allocation30_spill] sm:$0xff] }
 0x611   : > { %15886 = vmatmul.mubr.msk.f32.gmra.mxu0 %vm441_vm0, %v19478_v13  ;;  %15832 = vmatprep.mubr.msk.f32.mxu1 %vm441_vm0, %v19238_v49  ;;  %v19735_v49 = vpop.f32.mrf.mxu1 }
 0x612   : > { %15888 = vmatprep.mubr.msk.f32.mxu0 %vm441_vm0, %v19482_v39 }
 0x614   : > { %15833 = vmatmul.mubr.msk.f32.gmra.mxu1 %vm441_vm0, %v19248_v56  ;;  %v19737_v56 = vpop.f32.mrf.mxu0 }
 0x615   : > { %15889 = vmatmul.mubr.msk.f32.gmra.mxu0 %vm441_vm0, %v19490_v4  ;;  %15835 = vmatprep.mubr.msk.f32.mxu1 %vm441_vm0, %v19254_v21  ;;  %v11066_v4 = vld [vmem:[#allocation3 + $0x99] sm:$0xff] }
 0x616   : > { %15891 = vmatprep.mubr.msk.f32.mxu0 %vm441_vm0, %v19494_v15 }
 0x618   : > { %15836 = vmatmul.mubr.msk.f32.gmra.mxu1 %vm441_vm0, %v19264_v23  ;;  %v20809_v23 = vld [vmem:[#allocation31_spill] sm:$0xff] }
 0x619   : > { %15892 = vmatmul.mubr.msk.f32.gmra.mxu0 %vm441_vm0, %v19502_v19  ;;  %15838 = vmatprep.mubr.msk.f32.mxu1 %vm441_vm0, %v19270_v52  ;;  %v11067_v19 = vld [vmem:[#allocation3 + $0xa9] sm:$0xff] }
 0x61a   : > { %15894 = vmatprep.mubr.msk.f32.mxu0 %vm441_vm0, %v19506_v29 }
 0x61c   : > { %15839 = vmatmul.mubr.msk.f32.gmra.mxu1 %vm441_vm0, %v19280_v9  ;;  %v20810_v9 = vld [vmem:[#allocation9_spill] sm:$0xff] }
 0x61d   : > { %15895 = vmatmul.mubr.msk.f32.gmra.mxu0 %vm441_vm0, %v19514_v41  ;;  %15841 = vmatprep.mubr.msk.f32.mxu1 %vm441_vm0, %v19286_v17 }
 0x61e   : > { %15897 = vmatprep.mubr.msk.f32.mxu0 %vm441_vm0, %v19518_v5  ;;  %v10678_v5 = vld [vmem:[#allocation3 + $0xb0] sm:$0xff] }
 0x620   : > { %15842 = vmatmul.mubr.msk.f32.gmra.mxu1 %vm441_vm0, %v19296_v54 }
 0x621   : > { %15898 = vmatmul.mubr.msk.f32.gmra.mxu0 %vm441_vm0, %v19526_v30  ;;  %15844 = vmatprep.mubr.msk.f32.mxu1 %vm441_vm0, %v19302_v44 }
 0x622   : > { %15900 = vmatprep.mubr.msk.f32.mxu0 %vm441_vm0, %v19530_v0 }
 0x624   : > { %15845 = vmatmul.mubr.msk.f32.gmra.mxu1 %vm441_vm0, %v20803_v62  ;;  %v10681_v62 = vld [vmem:[#allocation3 + $0xd8] sm:$0xff] }
 0x625   : > { %15901 = vmatmul.mubr.msk.f32.gmra.mxu0 %vm441_vm0, %v19538_v35  ;;  %15847 = vmatprep.mubr.msk.f32.mxu1 %vm441_vm0, %v20804_v8  ;;  %v10679_v35 = vld [vmem:[#allocation3 + $0xc0] sm:$0xff] }
 0x626   : > { %15903 = vmatprep.mubr.msk.f32.mxu0 %vm441_vm0, %v19542_v33 }
 0x628   : > { %15848 = vmatmul.mubr.msk.f32.gmra.mxu1 %vm441_vm0, %v20805_v63  ;;  %v11071_v63 = vld [vmem:[#allocation3 + $0xd9] sm:$0xff] }
 0x629   : > { %15904 = vmatmul.mubr.msk.f32.gmra.mxu0 %vm441_vm0, %v19552_v24  ;;  %15850 = vmatprep.mubr.msk.f32.mxu1 %vm441_vm0, %v19704_v28  ;;  %v11069_v24 = vld [vmem:[#allocation3 + $0xc1] sm:$0xff] }
 0x62a   : > { %15906 = vmatprep.mubr.msk.f32.mxu0 %vm441_vm0, %v19710_v3 }
 0x62c   : > { %15851 = vmatmul.mubr.msk.f32.gmra.mxu1 %vm441_vm0, %v19714_v14 }
 0x62d   : > { %15907 = vmatmul.mubr.msk.f32.gmra.mxu0 %vm441_vm0, %v19718_v20  ;;  %15917 = vmatprep.mubr.msk.f32.mxu1 %vm441_vm0, %v20806_v46 }
 0x62e   : > { %15973 = vmatprep.mubr.msk.f32.mxu0 %vm441_vm0, %v18956_v31 }
 0x630   : > { %15918 = vmatmul.mubr.msk.f32.vlgmr.msra.gmra.mxu1 %vm441_vm0, %v20807_v57 }
 0x631   : > { %15974 = vmatmul.mubr.msk.f32.vlgmr.msra.gmra.mxu0 %vm441_vm0, %v18979_v16  ;;  %15920 = vmatprep.mubr.msk.f32.mxu1 %vm441_vm0, %v20808_v32  ;;  %v13449_v16 = vld [vmem:[%s20634_s9 + $0x108] sm:$0xff]  ;;  %v10682_v32 = vld [vmem:[#allocation3 + $0xe0] sm:$0xff] }
 0x632   : > { %15976 = vmatprep.mubr.msk.f32.mxu0 %vm441_vm0, %v19003_v36  ;;  %16022 = vmatpush3.msra.mxu1 %v19613_v50  ;;  %v11070_v50 = vld [vmem:[#allocation3 + $0xc9] sm:$0xff] }
 0x633   : > { %16023 = vmatprep.subr.mxu1 %v13450_v11 }
 0x634   : > { %v15586_v31 = vpop.f32.mrf.mxu1  ;;  %v15642_v21 = vpop.f32.mrf.mxu0  ;;  %15921 = vmatmul.mubr.msk.f32.gmra.mxu1 %vm441_vm0, %v20809_v23  ;;  %v11072_v23 = vld [vmem:[#allocation3 + $0xe1] sm:$0xff] }
 0x635   : > { %v19747_v52 = vadd.f32 %v15642_v21, %v15586_v31  ;;  %15977 = vmatmul.mubr.msk.f32.gmra.mxu0 %vm441_vm0, %v19020_v48  ;;  %15923 = vmatprep.mubr.msk.f32.mxu1 %vm441_vm0, %v20810_v9  ;;  %v13448_v48 = vld [vmem:[%s20634_s9 + $0x100] sm:$0xff] }
 0x636   : > { %15979 = vmatprep.mubr.msk.f32.mxu0 %vm441_vm0, %v19028_v6  ;;  %v8637_v36 = vpop.f32.mrf.mxu1  ;;  %v8958_v17 = vpop.f32.mrf.mxu0  ;;  %16024 = vmatpush3.msra.mxu1 %v13450_v11 }
 0x637   : > { %v19755_v54 = vadd.f32 %v8958_v17, %v8637_v36  ;;  %16025 = vmatprep.subr.mxu1 %v13449_v16  ;;  %v11073_v36 = vld [vmem:[#allocation3 + $0xf1] sm:$0xff] }
 0x638   : > { %v15589_v44 = vpop.f32.mrf.mxu1  ;;  %15924 = vmatmul.mubr.msk.f32.gmra.mxu1 %vm441_vm0, %v20811_v60 }
 0x639   : > { %v15645_v27 = vpop.f32.mrf.mxu0  ;;  %15980 = vmatmul.mubr.msk.f32.gmra.mxu0 %vm441_vm0, %v19061_v34  ;;  %15926 = vmatprep.mubr.msk.f32.mxu1 %vm441_vm0, %v20812_v59  ;;  %v20814_v34 = vld [vmem:[#allocation11_spill] sm:$0xff] }
 0x63a   : > { %v19766_v6 = vadd.f32 %v15645_v27, %v15589_v44  ;;  %15982 = vmatprep.mubr.msk.f32.mxu0 %vm441_vm0, %v19080_v18  ;;  %v8647_v42 = vpop.f32.mrf.mxu1  ;;  %16026 = vmatpush3.msra.mxu1 %v13449_v16  ;;  %v10683_v16 = vld [vmem:[#allocation3 + $0xf0] sm:$0xff] }
 0x63b   : > { %v8968_v38 = vpop.f32.mrf.mxu0  ;;  %16027 = vmatprep.subr.mxu1 %v13448_v48 }
 0x63c   : > { %v19770_v40 = vadd.f32 %v8968_v38, %v8647_v42  ;;  %v15592_v47 = vpop.f32.mrf.mxu1  ;;  %15927 = vmatmul.mubr.msk.f32.gmra.mxu1 %vm441_vm0, %v20813_v53  ;;  %v11074_v42 = vld [vmem:[#allocation3 + $0xf9] sm:$0xff]  ;;  %v10685_v38 = vld [vmem:[#allocation3 + $0x108] sm:$0xff] }
 0x63d   : > { %v15648_v10 = vpop.f32.mrf.mxu0  ;;  %15983 = vmatmul.mubr.msk.f32.gmra.mxu0 %vm441_vm0, %v19096_v22  ;;  %15929 = vmatprep.mubr.msk.f32.mxu1 %vm441_vm0, %v20814_v34  ;;  %v20815_v22 = vld [vmem:[#allocation28_spill] sm:$0xff] }
 0x63e   : > { %v19778_v43 = vadd.f32 %v15648_v10, %v15592_v47  ;;  %15985 = vmatprep.mubr.msk.f32.mxu0 %vm441_vm0, %v19108_v58  ;;  %v8657_v18 = vpop.f32.mrf.mxu1  ;;  %16028 = vmatpush3.msra.mxu1 %v13448_v48  ;;  %v10684_v48 = vld [vmem:[#allocation3 + $0xf8] sm:$0xff]  ;;  %v11075_v53 = vld [vmem:[#allocation3 + $0x109] sm:$0xff] }
 0x63f   : > { %v8978_v37 = vpop.f32.mrf.mxu0 }
 0x640   : > { %v19782_v13 = vadd.f32 %v8978_v37, %v8657_v18  ;;  %v15595_v39 = vpop.f32.mrf.mxu1  ;;  %15930 = vmatmul.mubr.msk.f32.gmra.mxu1 %vm441_vm0, %v19148_v25  ;;  %v11068_v25 = vld [vmem:[#allocation3 + $0xb1] sm:$0xff] }
 0x641   : > { %v15651_v15 = vpop.f32.mrf.mxu0  ;;  %15986 = vmatmul.mubr.msk.f32.gmra.mxu0 %vm441_vm0, %v11066_v4  ;;  %15932 = vmatprep.mubr.msk.f32.mxu1 %vm441_vm0, %v20815_v22  ;;  %v10686_v37 = vld [vmem:[#allocation3 + $0x110] sm:$0xff] }
 0x642   : > { %v19789_v29 = vadd.f32 %v15651_v15, %v15595_v39  ;;  %15988 = vmatprep.mubr.msk.f32.mxu0 %vm441_vm0, %v11067_v19  ;;  %v8667_v58 = vpop.f32.mrf.mxu1  ;;  %v11076_v4 = vld [vmem:[#allocation3 + $0x111] sm:$0xff]  ;;  %v10687_v15 = vld [vmem:[#allocation3 + $0x120] sm:$0xff] }
 0x643   : > { %v8988_v41 = vpop.f32.mrf.mxu0  ;;  %v11077_v19 = vld [vmem:[#allocation3 + $0x121] sm:$0xff] }
 0x644   : > { %v19792_v30 = vadd.f32 %v8988_v41, %v8667_v58  ;;  %v15598_v0 = vpop.f32.mrf.mxu1  ;;  %15933 = vmatmul.mubr.msk.f32.gmra.mxu1 %vm441_vm0, %v10678_v5 }
 0x645   : > { %v15654_v33 = vpop.f32.mrf.mxu0  ;;  %15989 = vmatmul.mubr.msk.f32.gmra.mxu0 %vm441_vm0, %v11068_v25  ;;  %15935 = vmatprep.mubr.msk.f32.mxu1 %vm441_vm0, %v10679_v35  ;;  %v11078_v35 = vld [vmem:[#allocation3 + $0x129] sm:$0xff] }
 0x646   : > { %v19797_v55 = vadd.f32 %v15654_v33, %v15598_v0  ;;  %15991 = vmatprep.mubr.msk.f32.mxu0 %vm441_vm0, %v11069_v24  ;;  %v8677_v1 = vpop.f32.mrf.mxu1  ;;  %v10688_v0 = vld [vmem:[#allocation3 + $0x128] sm:$0xff]  ;;  %v10689_v33 = vld [vmem:[#allocation3 + $0x138] sm:$0xff] }
 0x647   : > { %v8998_v12 = vpop.f32.mrf.mxu0 }
 0x648   : > { %v19800_v2 = vadd.f32 %v8998_v12, %v8677_v1  ;;  %v15601_v26 = vpop.f32.mrf.mxu1  ;;  %15936 = vmatmul.mubr.msk.f32.gmra.mxu1 %vm441_vm0, %v10680_v61  ;;  %v11079_v1 = vld [vmem:[#allocation3 + $0x139] sm:$0xff] }
 0x649   : > { %v15657_v8 = vpop.f32.mrf.mxu0  ;;  %15992 = vmatmul.mubr.msk.f32.gmra.mxu0 %vm441_vm0, %v11070_v50  ;;  %15938 = vmatprep.mubr.msk.f32.mxu1 %vm441_vm0, %v10681_v62  ;;  %v10690_v50 = vld [vmem:[#allocation3 + $0x140] sm:$0xff] }
 0x64a   : > { %v19805_v46 = vadd.f32 %v15657_v8, %v15601_v26  ;;  %15994 = vmatprep.mubr.msk.f32.mxu0 %vm441_vm0, %v11071_v63  ;;  %v8687_v57 = vpop.f32.mrf.mxu1  ;;  %v11080_v8 = vld [vmem:[#allocation3 + $0x141] sm:$0xff]  ;;  %v10691_v63 = vld [vmem:[#allocation3 + $0x150] sm:$0xff] }
 0x64b   : > { %v9008_v11 = vpop.f32.mrf.mxu0 }
 0x64c   : > { %v19808_v31 = vadd.f32 %v9008_v11, %v8687_v57  ;;  %v15604_v21 = vpop.f32.mrf.mxu1  ;;  %15939 = vmatmul.mubr.msk.f32.gmra.mxu1 %vm441_vm0, %v10682_v32  ;;  %v11081_v11 = vld [vmem:[#allocation3 + $0x151] sm:$0xff] }
 0x64d   : > { %v15660_v9 = vpop.f32.mrf.mxu0  ;;  %15995 = vmatmul.mubr.msk.f32.gmra.mxu0 %vm441_vm0, %v11072_v23  ;;  %15941 = vmatprep.mubr.msk.f32.mxu1 %vm441_vm0, %v10683_v16  ;;  %v10692_v16 = vld [vmem:[#allocation3 + $0x158] sm:$0xff] }
 0x64e   : > { %v19813_v17 = vadd.f32 %v15660_v9, %v15604_v21  ;;  %15997 = vmatprep.mubr.msk.f32.mxu0 %vm441_vm0, %v11073_v36  ;;  %v8697_v44 = vpop.f32.mrf.mxu1  ;;  %v11082_v36 = vld [vmem:[#allocation3 + $0x159] sm:$0xff] }
 0x64f   : > { %v9018_v60 = vpop.f32.mrf.mxu0 }
 0x650   : > { %v19816_v27 = vadd.f32 %v9018_v60, %v8697_v44  ;;  %v15607_v59 = vpop.f32.mrf.mxu1  ;;  %15942 = vmatmul.mubr.msk.f32.gmra.mxu1 %vm441_vm0, %v10684_v48  ;;  %v10693_v44 = vld [vmem:[#allocation3 + $0x168] sm:$0xff] }
 0x651   : > { %v15663_v47 = vpop.f32.mrf.mxu0  ;;  %15998 = vmatmul.mubr.msk.f32.gmra.mxu0 %vm441_vm0, %v11074_v42  ;;  %15944 = vmatprep.mubr.msk.f32.mxu1 %vm441_vm0, %v10685_v38  ;;  %v11083_v48 = vld [vmem:[#allocation3 + $0x169] sm:$0xff] }
 0x652   : > { %v19821_v10 = vadd.f32 %v15663_v47, %v15607_v59  ;;  %16000 = vmatprep.mubr.msk.f32.mxu0 %vm441_vm0, %v11075_v53  ;;  %v19824_v34 = vpop.f32.mrf.mxu1  ;;  %v10694_v47 = vld [vmem:[#allocation3 + $0x170] sm:$0xff] }
 0x653   : > { %v19826_v18 = vpop.f32.mrf.mxu0 }
 0x654   : > { %v15610_v39 = vpop.f32.mrf.mxu1  ;;  %15945 = vmatmul.mubr.msk.f32.gmra.mxu1 %vm441_vm0, %v10686_v37  ;;  %v11084_v37 = vld [vmem:[#allocation3 + $0x171] sm:$0xff] }
 0x655   : > { %v15666_v22 = vpop.f32.mrf.mxu0  ;;  %16001 = vmatmul.mubr.msk.f32.gmra.mxu0 %vm441_vm0, %v11076_v4  ;;  %15947 = vmatprep.mubr.msk.f32.mxu1 %vm441_vm0, %v10687_v15 }
 0x656   : > { %v19831_v58 = vadd.f32 %v15666_v22, %v15610_v39  ;;  %16003 = vmatprep.mubr.msk.f32.mxu0 %vm441_vm0, %v11077_v19  ;;  %v19834_v41 = vpop.f32.mrf.mxu1  ;;  %v10697_v22 = vld [vmem:[#allocation3 + $0x198] sm:$0xff] }
 0x657   : > { %v19836_v5 = vpop.f32.mrf.mxu0 }
 0x658   : > { %v15613_v25 = vpop.f32.mrf.mxu1  ;;  %15948 = vmatmul.mubr.msk.f32.gmra.mxu1 %vm441_vm0, %v10688_v0  ;;  %v11087_v0 = vld [vmem:[#allocation3 + $0x199] sm:$0xff] }
 0x659   : > { %v15669_v24 = vpop.f32.mrf.mxu0  ;;  %16004 = vmatmul.mubr.msk.f32.gmra.mxu0 %vm441_vm0, %v11078_v35  ;;  %15950 = vmatprep.mubr.msk.f32.mxu1 %vm441_vm0, %v10689_v33 }
 0x65a   : > { %v19841_v12 = vadd.f32 %v15669_v24, %v15613_v25  ;;  %16006 = vmatprep.mubr.msk.f32.mxu0 %vm441_vm0, %v11079_v1  ;;  %v19844_v61 = vpop.f32.mrf.mxu1  ;;  %v11088_v24 = vld [vmem:[#allocation3 + $0x1a1] sm:$0xff] }
 0x65b   : > { %v19846_v26 = vpop.f32.mrf.mxu0 }
 0x65c   : > { %v15616_v62 = vpop.f32.mrf.mxu1  ;;  %15951 = vmatmul.mubr.msk.f32.gmra.mxu1 %vm441_vm0, %v10690_v50 }
 0x65d   : > { %v15672_v57 = vpop.f32.mrf.mxu0  ;;  %16007 = vmatmul.mubr.msk.f32.gmra.mxu0 %vm441_vm0, %v11080_v8  ;;  %15953 = vmatprep.mubr.msk.f32.mxu1 %vm441_vm0, %v10691_v63 }
 0x65e   : > { %v19851_v32 = vadd.f32 %v15672_v57, %v15616_v62  ;;  %16009 = vmatprep.mubr.msk.f32.mxu0 %vm441_vm0, %v11081_v11  ;;  %v19854_v21 = vpop.f32.mrf.mxu1  ;;  %v11448_v57 = vld [vmem:[#allocation3 + $0x3a] sm:$0xff] }
 0x65f   : > { %v19856_v23 = vpop.f32.mrf.mxu0 }
 0x660   : > { %v15619_v9 = vpop.f32.mrf.mxu1  ;;  %15954 = vmatmul.mubr.msk.f32.gmra.mxu1 %vm441_vm0, %v10692_v16  ;;  %v11449_v16 = vld [vmem:[#allocation3 + $0x4a] sm:$0xff] }
 0x661   : > { %v15675_v60 = vpop.f32.mrf.mxu0  ;;  %16010 = vmatmul.mubr.msk.f32.gmra.mxu0 %vm441_vm0, %v11082_v36  ;;  %15956 = vmatprep.mubr.msk.f32.mxu1 %vm441_vm0, %v10693_v44 }
 0x662   : > { %v19861_v59 = vadd.f32 %v15675_v60, %v15619_v9  ;;  %16012 = vmatprep.mubr.msk.f32.mxu0 %vm441_vm0, %v11083_v48  ;;  %v19864_v42 = vpop.f32.mrf.mxu1 }
 0x663   : > { %v19866_v38 = vpop.f32.mrf.mxu0 }
 0x664   : > { %v15622_v53 = vpop.f32.mrf.mxu1  ;;  %15957 = vmatmul.mubr.msk.f32.gmra.mxu1 %vm441_vm0, %v10694_v47  ;;  %v11450_v47 = vld [vmem:[#allocation3 + $0x52] sm:$0xff] }
 0x665   : > { %v15678_v39 = vpop.f32.mrf.mxu0  ;;  %16013 = vmatmul.mubr.msk.f32.gmra.mxu0 %vm441_vm0, %v11084_v37  ;;  %15959 = vmatprep.mubr.msk.f32.mxu1 %vm441_vm0, %v19548_v51  ;;  %v10698_v51 = vld [vmem:[#allocation3 + $0x1a0] sm:$0xff] }
 0x666   : > { %v19872_v4 = vadd.f32 %v15678_v39, %v15622_v53  ;;  %16015 = vmatprep.mubr.msk.f32.mxu0 %vm441_vm0, %v19704_v28  ;;  %v19876_v15 = vpop.f32.mrf.mxu1  ;;  %v11451_v37 = vld [vmem:[#allocation3 + $0x62] sm:$0xff] }
 0x667   : > { %v19878_v19 = vpop.f32.mrf.mxu0 }
 0x668   : > { %v15625_v25 = vpop.f32.mrf.mxu1  ;;  %15960 = vmatmul.mubr.msk.f32.gmra.mxu1 %vm441_vm0, %v19556_v45  ;;  %v11447_v45 = vld [vmem:[#allocation3 + $0x32] sm:$0xff] }
 0x669   : > { %v15681_v35 = vpop.f32.mrf.mxu0  ;;  %16016 = vmatmul.mubr.msk.f32.gmra.mxu0 %vm441_vm0, %v19714_v14  ;;  %15962 = vmatprep.mubr.msk.f32.mxu1 %vm441_vm0, %v10697_v22 }
 0x66a   : > { %v19885_v33 = vadd.f32 %v15681_v35, %v15625_v25  ;;  %v19887_v28 = vpop.f32.mrf.mxu1  ;;  %16018 = vmatprep.mubr.msk.f32.mxu0 %vm441_vm0, %v11087_v0 }
 0x66b   : > { %v19890_v1 = vpop.f32.mrf.mxu0 }
 0x66c   : > { %v15628_v50 = vpop.f32.mrf.mxu1  ;;  %15963 = vmatmul.mubr.msk.f32.gmra.mxu1 %vm441_vm0, %v10698_v51  ;;  %v11452_v51 = vld [vmem:[#allocation3 + $0x6a] sm:$0xff] }
 0x66d   : > { %v15684_v62 = vpop.f32.mrf.mxu0  ;;  %16029 = vmatprep.mubr.msk.f32.mxu1 %vm441_vm0, %v11447_v45  ;;  %16019 = vmatmul.mubr.msk.f32.gmra.mxu0 %vm441_vm0, %v11088_v24 }
 0x66e   : > { %v19895_v14 = vadd.f32 %v15684_v62, %v15628_v50  ;;  %v19897_v8 = vpop.f32.mrf.mxu1  ;;  %v11453_v50 = vld [vmem:[#allocation3 + $0x7a] sm:$0xff] }
 0x66f   : > { %v19899_v63 = vpop.f32.mrf.mxu0 }
 0x670   : > { %v15695_v11 = vpop.f32.mrf.mxu1  ;;  %16030 = vmatmul.mubr.msk.f32.vlgmr.msra.gmra.mxu1 %vm441_vm0, %v11448_v57 }
 0x671   : > { %v9466_v9 = vadd.f32 %v15695_v11, %v19442_v7  ;;  %v15751_v36 = vpop.f32.mrf.mxu0  ;;  %16032 = vmatprep.mubr.msk.f32.mxu1 %vm441_vm0, %v11449_v16  ;;  %v11454_v16 = vld [vmem:[#allocation3 + $0x82] sm:$0xff] }
 0x672   : > { %v19904_v44 = vpop.f32.mrf.mxu1 }
 0x673   : > { %v19906_v60 = vadd.f32 %v15751_v36, %v9466_v9  ;;  %v19908_v48 = vpop.f32.mrf.mxu0  ;;  %v11455_v36 = vld [vmem:[#allocation3 + $0x92] sm:$0xff] }
 0x674   : > { %v15698_v53 = vpop.f32.mrf.mxu1  ;;  %16033 = vmatmul.mubr.msk.f32.gmra.mxu1 %vm441_vm0, %v11450_v47 }
 0x675   : > { %v9468_v39 = vadd.f32 %v15698_v53, %v19747_v52  ;;  %v15754_v22 = vpop.f32.mrf.mxu0  ;;  %16035 = vmatprep.mubr.msk.f32.mxu1 %vm441_vm0, %v11451_v37 }
 0x676   : > { %v9316_v7 = vpop.f32.mrf.mxu1 }
 0x677   : > { %v19913_v0 = vadd.f32 %v15754_v22, %v9468_v39  ;;  %v19916_v25 = vadd.f32 %v9316_v7, %v19755_v54  ;;  %v19918_v35 = vpop.f32.mrf.mxu0  ;;  %v11456_v7 = vld [vmem:[#allocation3 + $0x9a] sm:$0xff] }
 0x678   : > { %v15701_v24 = vpop.f32.mrf.mxu1  ;;  %16036 = vmatmul.mubr.msk.f32.gmra.mxu1 %vm441_vm0, %v11452_v51 }
 0x679   : > { %v9470_v45 = vadd.f32 %v15701_v24, %v19766_v6  ;;  %v15757_v62 = vpop.f32.mrf.mxu0  ;;  %16038 = vmatprep.mubr.msk.f32.mxu1 %vm441_vm0, %v11453_v50  ;;  %v11911_v6 = vld [vmem:[%s20636_s11 + $0x18] sm:$0xff] }
 0x67a   : > { %v9326_v52 = vpop.f32.mrf.mxu1  ;;  %16077 = vmatprep.subr.mxu0 %v11911_v6 }
 0x67b   : > { %v19923_v57 = vadd.f32 %v15757_v62, %v9470_v45  ;;  %v19926_v11 = vadd.f32 %v9326_v52, %v19770_v40  ;;  %v19928_v54 = vpop.f32.mrf.mxu0  ;;  %16078 = vmatpush3.msra.mxu0 %v11911_v6 }
 0x67c   : > { %v15704_v9 = vpop.f32.mrf.mxu1  ;;  %16039 = vmatmul.mubr.msk.f32.gmra.mxu1 %vm441_vm0, %v11454_v16  ;;  %v11458_v16 = vld [vmem:[#allocation3 + $0xb2] sm:$0xff] }
 0x67d   : > { %v9472_v47 = vadd.f32 %v15704_v9, %v19778_v43  ;;  %v15760_v53 = vpop.f32.mrf.mxu0  ;;  %16041 = vmatprep.mubr.msk.f32.mxu1 %vm441_vm0, %v11455_v36  ;;  %v11457_v43 = vld [vmem:[#allocation3 + $0xaa] sm:$0xff]  ;;  %v11459_v36 = vld [vmem:[#allocation3 + $0xc2] sm:$0xff] }
 0x67e   : > { %v9336_v37 = vpop.f32.mrf.mxu1 }
 0x67f   : > { %v19936_v40 = vadd.f32 %v15760_v53, %v9472_v47  ;;  %v19939_v39 = vadd.f32 %v9336_v37, %v19782_v13  ;;  %v19941_v22 = vpop.f32.mrf.mxu0 }
 0x680   : > { %v15707_v51 = vpop.f32.mrf.mxu1  ;;  %16042 = vmatmul.mubr.msk.f32.gmra.mxu1 %vm441_vm0, %v11456_v7  ;;  %v11460_v7 = vld [vmem:[#allocation3 + $0xca] sm:$0xff] }
 0x681   : > { %v9474_v24 = vadd.f32 %v15707_v51, %v19789_v29  ;;  %v15763_v50 = vpop.f32.mrf.mxu0  ;;  %16044 = vmatprep.mubr.msk.f32.mxu1 %vm441_vm0, %v11457_v43  ;;  %v11461_v43 = vld [vmem:[#allocation3 + $0xda] sm:$0xff] }
 0x682   : > { %v9346_v45 = vpop.f32.mrf.mxu1 }
 0x683   : > { %v19946_v62 = vadd.f32 %v15763_v50, %v9474_v24  ;;  %v19949_v52 = vadd.f32 %v9346_v45, %v19792_v30  ;;  %v19951_v13 = vpop.f32.mrf.mxu0 }
 0x684   : > { %v15710_v9 = vpop.f32.mrf.mxu1  ;;  %16045 = vmatmul.mubr.msk.f32.gmra.mxu1 %vm441_vm0, %v11458_v16 }
 0x685   : > { %v9476_v47 = vadd.f32 %v15710_v9, %v19797_v55  ;;  %v15766_v53 = vpop.f32.mrf.mxu0  ;;  %16047 = vmatprep.mubr.msk.f32.mxu1 %vm441_vm0, %v11459_v36  ;;  %v11462_v9 = vld [vmem:[#allocation3 + $0xe2] sm:$0xff] }
 0x686   : > { %v9356_v29 = vpop.f32.mrf.mxu1 }
 0x687   : > { %v19956_v6 = vadd.f32 %v15766_v53, %v9476_v47  ;;  %v19959_v37 = vadd.f32 %v9356_v29, %v19800_v2  ;;  %v19961_v30 = vpop.f32.mrf.mxu0  ;;  %v11463_v47 = vld [vmem:[#allocation3 + $0xf2] sm:$0xff] }
 0x688   : > { %v15713_v51 = vpop.f32.mrf.mxu1  ;;  %16048 = vmatmul.mubr.msk.f32.gmra.mxu1 %vm441_vm0, %v11460_v7 }
 0x689   : > { %v9478_v24 = vadd.f32 %v15713_v51, %v19805_v46  ;;  %v15769_v50 = vpop.f32.mrf.mxu0  ;;  %16050 = vmatprep.mubr.msk.f32.mxu1 %vm441_vm0, %v11461_v43  ;;  %v11910_v46 = vld [vmem:[%s20636_s11 + $0x10] sm:$0xff] }
 0x68a   : > { %v9366_v55 = vpop.f32.mrf.mxu1  ;;  %16079 = vmatprep.subr.mxu0 %v11910_v46 }
 0x68b   : > { %v19966_v45 = vadd.f32 %v15769_v50, %v9478_v24  ;;  %v19969_v16 = vadd.f32 %v9366_v55, %v19808_v31  ;;  %v19971_v2 = vpop.f32.mrf.mxu0  ;;  %v11464_v24 = vld [vmem:[#allocation3 + $0xfa] sm:$0xff]  ;;  %16080 = vmatpush3.msra.mxu0 %v11910_v46  ;;  %v9029_v55 = vadd.f32 %v19826_v18, %v19824_v34  ;;  %v11467_v46 = vld [vmem:[#allocation3 + $0x122] sm:$0xff] }
 0x68c   : > { %v15716_v36 = vpop.f32.mrf.mxu1  ;;  %16051 = vmatmul.mubr.msk.f32.gmra.mxu1 %vm441_vm0, %v11462_v9 }
 0x68d   : > { %v9480_v53 = vadd.f32 %v15716_v36, %v19813_v17  ;;  %v15772_v29 = vpop.f32.mrf.mxu0  ;;  %16053 = vmatprep.mubr.msk.f32.mxu1 %vm441_vm0, %v11463_v47  ;;  %v11465_v17 = vld [vmem:[#allocation3 + $0x10a] sm:$0xff] }
 0x68e   : > { %v9376_v7 = vpop.f32.mrf.mxu1 }
 0x68f   : > { %v19979_v31 = vadd.f32 %v15772_v29, %v9480_v53  ;;  %v19982_v51 = vadd.f32 %v9376_v7, %v19816_v27  ;;  %v19984_v43 = vpop.f32.mrf.mxu0  ;;  %v11466_v7 = vld [vmem:[#allocation3 + $0x112] sm:$0xff] }
 0x690   : > { %20817 = vst [vmem:[#allocation7_spill] sm:$0xff] %v19984_v43  ;;  %v15719_v50 = vpop.f32.mrf.mxu1  ;;  %16054 = vmatmul.mubr.msk.f32.gmra.mxu1 %vm441_vm0, %v11464_v24  ;;  %v9039_v24 = vadd.f32 %v19836_v5, %v19834_v41  ;;  %v9049_v41 = vadd.f32 %v19846_v26, %v19844_v61  ;;  %v9059_v61 = vadd.f32 %v19856_v23, %v19854_v21  ;;  %v11473_v23 = vld [vmem:[#allocation3 + $0x16a] sm:$0xff] }
 0x691   : > { %20816 = vst [vmem:[#allocation26_spill] sm:$0xff] %v19979_v31  ;;  %v9482_v9 = vadd.f32 %v15719_v50, %v19821_v10  ;;  %v15775_v36 = vpop.f32.mrf.mxu0  ;;  %16056 = vmatprep.mubr.msk.f32.mxu1 %vm441_vm0, %v11465_v17 }
 0x692   : > { %v9386_v47 = vpop.f32.mrf.mxu1 }
 0x693   : > { %v19991_v53 = vadd.f32 %v15775_v36, %v9482_v9  ;;  %v9481_v27 = vadd.f32 %v9386_v47, %v9029_v55  ;;  %v9776_v29 = vpop.f32.mrf.mxu0  ;;  %v11468_v9 = vld [vmem:[#allocation3 + $0x12a] sm:$0xff]  ;;  %v11469_v47 = vld [vmem:[#allocation3 + $0x13a] sm:$0xff] }
 0x694   : > { %v15722_v31 = vpop.f32.mrf.mxu1  ;;  %16057 = vmatmul.mubr.msk.f32.gmra.mxu1 %vm441_vm0, %v11466_v7 }
 0x695   : > { %v19996_v43 = vadd.f32 %v9776_v29, %v9481_v27  ;;  %v9484_v10 = vadd.f32 %v15722_v31, %v19831_v58  ;;  %v15778_v34 = vpop.f32.mrf.mxu0  ;;  %16059 = vmatprep.mubr.msk.f32.mxu1 %vm441_vm0, %v11467_v46 }
 0x696   : > { %v9396_v18 = vpop.f32.mrf.mxu1 }
 0x697   : > { %v20000_v50 = vadd.f32 %v15778_v34, %v9484_v10  ;;  %v9483_v17 = vadd.f32 %v9396_v18, %v9039_v24  ;;  %v9786_v55 = vpop.f32.mrf.mxu0  ;;  %v11470_v24 = vld [vmem:[#allocation3 + $0x142] sm:$0xff]  ;;  %v11471_v34 = vld [vmem:[#allocation3 + $0x152] sm:$0xff] }
 0x698   : > { %v15725_v36 = vpop.f32.mrf.mxu1  ;;  %16060 = vmatmul.mubr.msk.f32.gmra.mxu1 %vm441_vm0, %v11468_v9 }
 0x699   : > { %v20005_v5 = vadd.f32 %v9786_v55, %v9483_v17  ;;  %v9486_v58 = vadd.f32 %v15725_v36, %v19841_v12  ;;  %v15781_v31 = vpop.f32.mrf.mxu0  ;;  %16062 = vmatprep.mubr.msk.f32.mxu1 %vm441_vm0, %v11469_v47  ;;  %v11909_v17 = vld [vmem:[%s20636_s11 + $0x8] sm:$0xff] }
 0x69a   : > { %v9406_v27 = vpop.f32.mrf.mxu1  ;;  %16081 = vmatprep.subr.mxu0 %v11909_v17 }
 0x69b   : > { %v20009_v29 = vadd.f32 %v15781_v31, %v9486_v58  ;;  %v9485_v7 = vadd.f32 %v9406_v27, %v9049_v41  ;;  %v9796_v46 = vpop.f32.mrf.mxu0  ;;  %v11472_v41 = vld [vmem:[#allocation3 + $0x15a] sm:$0xff]  ;;  %16082 = vmatpush3.msra.mxu0 %v11909_v17 }
 0x69c   : > { %v15728_v10 = vpop.f32.mrf.mxu1  ;;  %16063 = vmatmul.mubr.msk.f32.gmra.mxu1 %vm441_vm0, %v11470_v24  ;;  %v11477_v17 = vld [vmem:[#allocation3 + $0x19a] sm:$0xff] }
 0x69d   : > { %v20014_v26 = vadd.f32 %v9796_v46, %v9485_v7  ;;  %v9488_v12 = vadd.f32 %v15728_v10, %v19851_v32  ;;  %v15784_v18 = vpop.f32.mrf.mxu0  ;;  %16065 = vmatprep.mubr.msk.f32.mxu1 %vm441_vm0, %v11471_v34  ;;  %v9069_v32 = vadd.f32 %v19866_v38, %v19864_v42  ;;  %v11474_v34 = vld [vmem:[#allocation3 + $0x172] sm:$0xff] }
 0x69e   : > { %v9416_v55 = vpop.f32.mrf.mxu1 }
 0x69f   : > { %v20021_v9 = vadd.f32 %v15784_v18, %v9488_v12  ;;  %v9487_v36 = vadd.f32 %v9416_v55, %v9059_v61  ;;  %v9806_v47 = vpop.f32.mrf.mxu0  ;;  %v9079_v12 = vadd.f32 %v19878_v19, %v19876_v15  ;;  %v9089_v15 = vadd.f32 %v19890_v1, %v19887_v28 }
 0x6a0   : > { %v15731_v21 = vpop.f32.mrf.mxu1  ;;  %16066 = vmatmul.mubr.msk.f32.gmra.mxu1 %vm441_vm0, %v11472_v41  ;;  %v9099_v28 = vadd.f32 %v19899_v63, %v19897_v8 }
 0x6a1   : > { %v20026_v58 = vadd.f32 %v9806_v47, %v9487_v36  ;;  %v9490_v31 = vadd.f32 %v15731_v21, %v19861_v59  ;;  %v15787_v27 = vpop.f32.mrf.mxu0  ;;  %16068 = vmatprep.mubr.msk.f32.mxu1 %vm441_vm0, %v11473_v23 }
 0x6a2   : > { %v9426_v7 = vpop.f32.mrf.mxu1 }
 0x6a3   : > { %v20030_v46 = vadd.f32 %v15787_v27, %v9490_v31  ;;  %v9489_v24 = vadd.f32 %v9426_v7, %v9069_v32  ;;  %v9816_v10 = vpop.f32.mrf.mxu0  ;;  %v8949_v32 = vadd.f32 %v19737_v56, %v19735_v49  ;;  %v11908_v49 = vld [vmem:[%s20636_s11] sm:$0xff] }
 0x6a4   : > { %v15734_v61 = vpop.f32.mrf.mxu1  ;;  %16069 = vmatmul.mubr.msk.f32.gmra.mxu1 %vm441_vm0, %v11474_v34  ;;  %16083 = vmatprep.subr.mxu0 %v11908_v49 }
 0x6a5   : > { %v20035_v42 = vadd.f32 %v9816_v10, %v9489_v24  ;;  %v9492_v38 = vadd.f32 %v15734_v61, %v19872_v4  ;;  %v15790_v59 = vpop.f32.mrf.mxu0  ;;  %16071 = vmatprep.mubr.msk.f32.mxu1 %vm441_vm0, %v19710_v3  ;;  %v11478_v3 = vld [vmem:[#allocation3 + $0x1a2] sm:$0xff]  ;;  %16084 = vmatpush3.msra.mxu0 %v11908_v49 }
 0x6a6   : > { %v9436_v18 = vpop.f32.mrf.mxu1 }
 0x6a7   : > { %v20040_v55 = vadd.f32 %v15790_v59, %v9492_v38  ;;  %v9491_v36 = vadd.f32 %v9436_v18, %v9079_v12  ;;  %v9826_v47 = vpop.f32.mrf.mxu0 }
 0x6a8   : > { %v15737_v41 = vpop.f32.mrf.mxu1  ;;  %16072 = vmatmul.mubr.msk.f32.gmra.mxu1 %vm441_vm0, %v19718_v20 }
 0x6a9   : > { %v20046_v19 = vadd.f32 %v9826_v47, %v9491_v36  ;;  %v9494_v4 = vadd.f32 %v15737_v41, %v19885_v33  ;;  %v15793_v21 = vpop.f32.mrf.mxu0  ;;  %16074 = vmatprep.mubr.msk.f32.mxu1 %vm441_vm0, %v11477_v17  ;;  %v9465_v33 = vadd.f32 %v19904_v44, %v8949_v32  ;;  %v9857_v47 = vadd.f32 %v19918_v35, %v19916_v25 }
 0x6aa   : > { %v9446_v23 = vpop.f32.mrf.mxu1 }
 0x6ab   : > { %v20052_v31 = vadd.f32 %v15793_v21, %v9494_v4  ;;  %v9493_v27 = vadd.f32 %v9446_v23, %v9089_v15  ;;  %v9836_v7 = vpop.f32.mrf.mxu0  ;;  %v9855_v8 = vadd.f32 %v19908_v48, %v9465_v33 }
 0x6ac   : > { %v15740_v20 = vpop.f32.mrf.mxu1  ;;  %16075 = vmatmul.mubr.msk.f32.gmra.mxu1 %vm441_vm0, %v11478_v3  ;;  %v9859_v3 = vadd.f32 %v19928_v54, %v19926_v11 }
 0x6ad   : > { %v20058_v1 = vadd.f32 %v9836_v7, %v9493_v27  ;;  %v9496_v24 = vadd.f32 %v15740_v20, %v19895_v14  ;;  %v15796_v10 = vpop.f32.mrf.mxu0  ;;  %v9861_v7 = vadd.f32 %v19941_v22, %v19939_v39 }
 0x6ae   : > { %v9456_v56 = vpop.f32.mrf.mxu1 }
 0x6af   : > { %v20064_v34 = vadd.f32 %v15796_v10, %v9496_v24  ;;  %v9495_v61 = vadd.f32 %v9456_v56, %v9099_v28  ;;  %v9846_v12 = vpop.f32.mrf.mxu0  ;;  %v9863_v24 = vadd.f32 %v19951_v13, %v19949_v52 }
 0x6b0   : > { %v15807_v38 = vpop.f32.mrf.mxu1 }
 0x6b1   : > { %v20067_v63 = vadd.f32 %v9846_v12, %v9495_v61  ;;  %v20070_v44 = vadd.f32 %v15807_v38, %v19906_v60  ;;  %v20072_v14 = vpop.f32.mrf.mxu0  ;;  %v9865_v61 = vadd.f32 %v19961_v30, %v19959_v37 }
 0x6b2   : > { %v10086_v59 = vpop.f32.mrf.mxu1 }
 0x6b3   : > { %v20074_v18 = vadd.f32 %v10086_v59, %v9855_v8  ;;  %v20076_v17 = vpop.f32.mrf.mxu0  ;;  %v9867_v59 = vadd.f32 %v19971_v2, %v19969_v16 }
 0x6b4   : > { %v15810_v36 = vpop.f32.mrf.mxu1 }
 0x6b5   : > { %v20081_v41 = vadd.f32 %v15810_v36, %v19913_v0  ;;  %v20083_v48 = vpop.f32.mrf.mxu0 }
 0x6b6   : > { %v10096_v15 = vpop.f32.mrf.mxu1 }
 0x6b7   : > { %v20085_v4 = vadd.f32 %v10096_v15, %v9857_v47  ;;  %v20087_v60 = vpop.f32.mrf.mxu0 }
 0x6b8   : > { %v15813_v21 = vpop.f32.mrf.mxu1 }
 0x6b9   : > { %v20092_v23 = vadd.f32 %v15813_v21, %v19923_v57  ;;  %v20094_v32 = vpop.f32.mrf.mxu0  ;;  %v20818_v21 = vld [vmem:[#allocation7_spill] sm:$0xff] }
 0x6ba   : > { %v10106_v25 = vpop.f32.mrf.mxu1 }
 0x6bb   : > { %v20096_v35 = vadd.f32 %v10106_v25, %v9859_v3  ;;  %v20098_v0 = vpop.f32.mrf.mxu0  ;;  %v9869_v3 = vadd.f32 %v20818_v21, %v19982_v51  ;;  %v20819_v25 = vld [vmem:[#allocation26_spill] sm:$0xff] }
 0x6bc   : > { %v15816_v27 = vpop.f32.mrf.mxu1 }
 0x6bd   : > { %v20103_v20 = vadd.f32 %v15816_v27, %v19936_v40  ;;  %v20105_v28 = vpop.f32.mrf.mxu0 }
 0x6be   : > { %v10116_v11 = vpop.f32.mrf.mxu1 }
 0x6bf   : > { %v20107_v54 = vadd.f32 %v10116_v11, %v9861_v7  ;;  %v20109_v57 = vpop.f32.mrf.mxu0 }
 0x6c0   : > { %v15819_v33 = vpop.f32.mrf.mxu1 }
 0x6c1   : > { %v20114_v10 = vadd.f32 %v15819_v33, %v19946_v62  ;;  %v20116_v49 = vpop.f32.mrf.mxu0 }
 0x6c2   : > { %v10126_v39 = vpop.f32.mrf.mxu1 }
 0x6c3   : > { %v20118_v22 = vadd.f32 %v10126_v39, %v9863_v24  ;;  %v20120_v40 = vpop.f32.mrf.mxu0 }
 0x6c4   : > { %v15822_v56 = vpop.f32.mrf.mxu1 }
 0x6c5   : > { %v20125_v12 = vadd.f32 %v15822_v56, %v19956_v6  ;;  %v20127_v38 = vpop.f32.mrf.mxu0 }
 0x6c6   : > { %v10136_v52 = vpop.f32.mrf.mxu1 }
 0x6c7   : > { %v20129_v13 = vadd.f32 %v10136_v52, %v9865_v61  ;;  %v20131_v62 = vpop.f32.mrf.mxu0 }
 0x6c8   : > { %v15825_v8 = vpop.f32.mrf.mxu1 }
 0x6c9   : > { %v20136_v36 = vadd.f32 %v15825_v8, %v19966_v45  ;;  %v20138_v47 = vpop.f32.mrf.mxu0 }
 0x6ca   : > { %v10146_v37 = vpop.f32.mrf.mxu1 }
 0x6cb   : > { %v20140_v30 = vadd.f32 %v10146_v37, %v9867_v59  ;;  %v20142_v6 = vpop.f32.mrf.mxu0 }
 0x6cc   : > { %v15828_v15 = vpop.f32.mrf.mxu1 }
 0x6cd   : > { %v20147_v27 = vadd.f32 %v15828_v15, %v20819_v25  ;;  %v20149_v7 = vpop.f32.mrf.mxu0 }
 0x6ce   : > { %20820 = vst [vmem:[#allocation12_spill] sm:$0xff] %v20149_v7  ;;  %v10156_v16 = vpop.f32.mrf.mxu1 }
 0x6cf   : > { %v20151_v2 = vadd.f32 %v10156_v16, %v9869_v3  ;;  %v20153_v45 = vpop.f32.mrf.mxu0 }
 0x6d0   : > { %20822 = vst [vmem:[#allocation29_spill] sm:$0xff] %v20153_v45  ;;  %v15831_v11 = vpop.f32.mrf.mxu1 }
 0x6d1   : > { %20821 = vst [vmem:[#allocation13_spill] sm:$0xff] %v20151_v2  ;;  %v20156_v33 = vadd.f32 %v15831_v11, %v19991_v53  ;;  %v20158_v24 = vpop.f32.mrf.mxu0 }
 0x6d2   : > { %20824 = vst [vmem:[#allocation8_spill] sm:$0xff] %v20158_v24  ;;  %v10166_v39 = vpop.f32.mrf.mxu1 }
 0x6d3   : > { %20823 = vst [vmem:[#allocation5_spill] sm:$0xff] %v20156_v33  ;;  %v20161_v56 = vadd.f32 %v10166_v39, %v19996_v43  ;;  %v20163_v51 = vpop.f32.mrf.mxu0 }
 0x6d4   : > { %20826 = vst [vmem:[#allocation17_spill] sm:$0xff] %v20163_v51  ;;  %v15834_v61 = vpop.f32.mrf.mxu1 }
 0x6d5   : > { %20825 = vst [vmem:[#allocation14_spill] sm:$0xff] %v20161_v56  ;;  %v20166_v52 = vadd.f32 %v15834_v61, %v20000_v50  ;;  %v20168_v8 = vpop.f32.mrf.mxu0 }
 0x6d6   : > { %20828 = vst [vmem:[#allocation19_spill] sm:$0xff] %v20168_v8  ;;  %v10176_v59 = vpop.f32.mrf.mxu1 }
 0x6d7   : > { %20827 = vst [vmem:[#allocation18_spill] sm:$0xff] %v20166_v52  ;;  %v20171_v37 = vadd.f32 %v10176_v59, %v20005_v5  ;;  %v20173_v53 = vpop.f32.mrf.mxu0 }
 0x6d8   : > { %20830 = vst [vmem:[#allocation22_spill] sm:$0xff] %v20173_v53  ;;  %v15837_v15 = vpop.f32.mrf.mxu1 }
 0x6d9   : > { %20829 = vst [vmem:[#allocation20_spill] sm:$0xff] %v20171_v37  ;;  %v20176_v21 = vadd.f32 %v15837_v15, %v20009_v29  ;;  %v20178_v43 = vpop.f32.mrf.mxu0 }
 0x6da   : > { %20832 = vst [vmem:[#allocation16_spill] sm:$0xff] %v20178_v43  ;;  %v10186_v3 = vpop.f32.mrf.mxu1 }
 0x6db   : > { %20831 = vst [vmem:[#allocation15_spill] sm:$0xff] %v20176_v21  ;;  %v20181_v25 = vadd.f32 %v10186_v3, %v20014_v26  ;;  %v20183_v50 = vpop.f32.mrf.mxu0 }
 0x6dc   : > { %20834 = vst [vmem:[#allocation23_spill] sm:$0xff] %v20183_v50  ;;  %v15840_v16 = vpop.f32.mrf.mxu1 }
 0x6dd   : > { %20833 = vst [vmem:[#allocation21_spill] sm:$0xff] %v20181_v25  ;;  %v20186_v11 = vadd.f32 %v15840_v16, %v20021_v9  ;;  %v20188_v5 = vpop.f32.mrf.mxu0 }
 0x6de   : > { %20836 = vst [vmem:[#allocation24_spill] sm:$0xff] %v20188_v5  ;;  %v10196_v39 = vpop.f32.mrf.mxu1 }
 0x6df   : > { %20835 = vst [vmem:[#allocation4_spill] sm:$0xff] %v20186_v11  ;;  %v20191_v61 = vadd.f32 %v10196_v39, %v20026_v58  ;;  %v20193_v29 = vpop.f32.mrf.mxu0 }
 0x6e0   : > { %20838 = vst [vmem:[#allocation30_spill] sm:$0xff] %v20193_v29  ;;  %v15843_v59 = vpop.f32.mrf.mxu1 }
 0x6e1   : > { %20837 = vst [vmem:[#allocation27_spill] sm:$0xff] %v20191_v61  ;;  %v20196_v15 = vadd.f32 %v15843_v59, %v20030_v46  ;;  %v20198_v26 = vpop.f32.mrf.mxu0 }
 0x6e2   : > { %20840 = vst [vmem:[#allocation9_spill] sm:$0xff] %v20198_v26  ;;  %v10206_v3 = vpop.f32.mrf.mxu1 }
 0x6e3   : > { %20839 = vst [vmem:[#allocation31_spill] sm:$0xff] %v20196_v15  ;;  %v20201_v50 = vadd.f32 %v10206_v3, %v20035_v42  ;;  %v20203_v9 = vpop.f32.mrf.mxu0 }
 0x6e4   : > { %20842 = vst [vmem:[#allocation10_spill] sm:$0xff] %v20203_v9  ;;  %v15846_v16 = vpop.f32.mrf.mxu1 }
 0x6e5   : > { %20841 = vst [vmem:[#allocation6_spill] sm:$0xff] %v20201_v50  ;;  %v20206_v5 = vadd.f32 %v15846_v16, %v20040_v55  ;;  %v20208_v58 = vpop.f32.mrf.mxu0 }
 0x6e6   : > { %20844 = vst [vmem:[#allocation11_spill] sm:$0xff] %v20208_v58  ;;  %v10216_v39 = vpop.f32.mrf.mxu1 }
 0x6e7   : > { %20843 = vst [vmem:[#allocation25_spill] sm:$0xff] %v20206_v5  ;;  %v20211_v29 = vadd.f32 %v10216_v39, %v20046_v19  ;;  %v20213_v46 = vpop.f32.mrf.mxu0 }
 0x6e8   : > { %20846 = vst [vmem:[#allocation7_spill] sm:$0xff] %v20213_v46  ;;  %v15849_v59 = vpop.f32.mrf.mxu1 }
 0x6e9   : > { %20845 = vst [vmem:[#allocation28_spill] sm:$0xff] %v20211_v29  ;;  %v20216_v26 = vadd.f32 %v15849_v59, %v20052_v31  ;;  %v20218_v42 = vpop.f32.mrf.mxu0 }
 0x6ea   : > { %20848 = vst [vmem:[#allocation32_spill] sm:$0xff] %v20218_v42  ;;  %v10226_v3 = vpop.f32.mrf.mxu1 }
 0x6eb   : > { %20847 = vst [vmem:[#allocation26_spill] sm:$0xff] %v20216_v26  ;;  %v20221_v9 = vadd.f32 %v10226_v3, %v20058_v1  ;;  %v20223_v55 = vpop.f32.mrf.mxu0 }
 0x6ec   : > { %20850 = vst [vmem:[#allocation34_spill] sm:$0xff] %v20223_v55  ;;  %v15852_v16 = vpop.f32.mrf.mxu1 }
 0x6ed   : > { %20849 = vst [vmem:[#allocation33_spill] sm:$0xff] %v20221_v9  ;;  %v20226_v58 = vadd.f32 %v15852_v16, %v20064_v34  ;;  %v20228_v19 = vpop.f32.mrf.mxu0 }
 0x6ee   : > { %20852 = vst [vmem:[#allocation36_spill] sm:$0xff] %v20228_v19  ;;  %v10236_v39 = vpop.f32.mrf.mxu1 }
 0x6ef   : > { %20851 = vst [vmem:[#allocation35_spill] sm:$0xff] %v20226_v58  ;;  %v20231_v46 = vadd.f32 %v10236_v39, %v20067_v63  ;;  %v20233_v31 = vpop.f32.mrf.mxu0 }
 0x6f0   : > { %20854 = vst [vmem:[#allocation38_spill] sm:$0xff] %v20233_v31  ;;  %v15919_v59 = vpop.f32.mrf.mxu1 }
 0x6f1   : > { %20853 = vst [vmem:[#allocation37_spill] sm:$0xff] %v20231_v46  ;;  %v15975_v42 = vpop.f32.mrf.mxu0 }
 0x6f2   : > { %v10866_v26 = vpop.f32.mrf.mxu1 }
 0x6f3   : > { %v11256_v29 = vpop.f32.mrf.mxu0 }
 0x6f4   : > { %v15922_v1 = vpop.f32.mrf.mxu1 }
 0x6f5   : > { %v15978_v9 = vpop.f32.mrf.mxu0 }
 0x6f6   : > { %v10876_v3 = vpop.f32.mrf.mxu1 }
 0x6f7   : > { %v20237_v34 = vpop.f32.mrf.mxu0 }
 0x6f8   : > { %v15925_v55 = vpop.f32.mrf.mxu1 }
 0x6f9   : > { %v20243_v63 = vpop.f32.mrf.mxu0 }
 0x6fa   : > { %v20235_v5 = vpop.f32.mrf.mxu1 }
 0x6fb   : > { %v20249_v46 = vpop.f32.mrf.mxu0 }
 0x6fc   : > { %v20239_v16 = vpop.f32.mrf.mxu1 }
 0x6fd   : > { %v20255_v15 = vpop.f32.mrf.mxu0 }
 0x6fe   : > { %v20241_v19 = vpop.f32.mrf.mxu1 }
 0x6ff   : > { %v20261_v25 = vpop.f32.mrf.mxu0 }
 0x700   : > { %v20245_v39 = vpop.f32.mrf.mxu1 }
 0x701   : > { %v20267_v53 = vpop.f32.mrf.mxu0 }
 0x702   : > { %v20247_v31 = vpop.f32.mrf.mxu1 }
 0x703   : > { %v20273_v52 = vpop.f32.mrf.mxu0 }
 0x704   : > { %v20251_v58 = vpop.f32.mrf.mxu1 }
 0x705   : > { %v20279_v24 = vpop.f32.mrf.mxu0 }
 0x706   : > { %v20253_v50 = vpop.f32.mrf.mxu1 }
 0x708   : > { %v20257_v61 = vpop.f32.mrf.mxu1 }
 0x70a   : > { %v20259_v11 = vpop.f32.mrf.mxu1 }
 0x70b   : > { %20855 = vst [vmem:[#allocation39_spill] sm:$0xff] %v20259_v11 }
 0x70c   : > { %v20263_v43 = vpop.f32.mrf.mxu1 }
 0x70d   : > { %20856 = vst [vmem:[#allocation40_spill] sm:$0xff] %v20263_v43  ;;  %v20285_v43 = vpop.f32.mrf.mxu0 }
 0x70e   : > { %v20265_v21 = vpop.f32.mrf.mxu1  ;;  %20864 = vst [vmem:[#allocation48_spill] sm:$0xff] %v20285_v43 }
 0x70f   : > { %20857 = vst [vmem:[#allocation41_spill] sm:$0xff] %v20265_v21 }
 0x710   : > { %v20269_v37 = vpop.f32.mrf.mxu1 }
 0x711   : > { %20858 = vst [vmem:[#allocation42_spill] sm:$0xff] %v20269_v37  ;;  %v20291_v37 = vpop.f32.mrf.mxu0 }
 0x712   : > { %v20271_v8 = vpop.f32.mrf.mxu1  ;;  %20867 = vst [vmem:[#allocation51_spill] sm:$0xff] %v20291_v37 }
 0x713   : > { %20859 = vst [vmem:[#allocation43_spill] sm:$0xff] %v20271_v8 }
 0x714   : > { %v20275_v51 = vpop.f32.mrf.mxu1 }
 0x715   : > { %20860 = vst [vmem:[#allocation44_spill] sm:$0xff] %v20275_v51  ;;  %v20297_v51 = vpop.f32.mrf.mxu0 }
 0x716   : > { %v20277_v56 = vpop.f32.mrf.mxu1  ;;  %20870 = vst [vmem:[#allocation54_spill] sm:$0xff] %v20297_v51 }
 0x717   : > { %20861 = vst [vmem:[#allocation45_spill] sm:$0xff] %v20277_v56 }
 0x718   : > { %v20281_v33 = vpop.f32.mrf.mxu1 }
 0x719   : > { %20862 = vst [vmem:[#allocation46_spill] sm:$0xff] %v20281_v33  ;;  %v20303_v33 = vpop.f32.mrf.mxu0 }
 0x71a   : > { %v20283_v45 = vpop.f32.mrf.mxu1  ;;  %20873 = vst [vmem:[#allocation57_spill] sm:$0xff] %v20303_v33 }
 0x71b   : > { %20863 = vst [vmem:[#allocation47_spill] sm:$0xff] %v20283_v45 }
 0x71c   : > { %v20287_v21 = vpop.f32.mrf.mxu1 }
 0x71d   : > { %20865 = vst [vmem:[#allocation49_spill] sm:$0xff] %v20287_v21  ;;  %v10636_v21 = vadd.f32 %v20072_v14, %v20070_v44 }
 0x71e   : > { %v20289_v2 = vpop.f32.mrf.mxu1 }
 0x71f   : > { %20866 = vst [vmem:[#allocation50_spill] sm:$0xff] %v20289_v2  ;;  %v11026_v37 = vadd.f32 %v15919_v59, %v10636_v21 }
 0x720   : > { %v20293_v8 = vpop.f32.mrf.mxu1 }
 0x721   : > { %20868 = vst [vmem:[#allocation52_spill] sm:$0xff] %v20293_v8  ;;  %v10635_v8 = vadd.f32 %v20076_v17, %v20074_v18  ;;  %v11416_v44 = vadd.f32 %v15975_v42, %v11026_v37  ;;  %v10640_v18 = vadd.f32 %v20094_v32, %v20092_v23  ;;  %v10642_v37 = vadd.f32 %v20105_v28, %v20103_v20 }
 0x722   : > { %v20295_v11 = vpop.f32.mrf.mxu1 }
 0x723   : > { %20869 = vst [vmem:[#allocation53_spill] sm:$0xff] %v20295_v11  ;;  %v20313_v11 = vpop.f32.mrf.mxu0  ;;  %v11032_v20 = vadd.f32 %v20239_v16, %v10642_v37  ;;  %v10643_v16 = vadd.f32 %v20120_v40, %v20118_v22 }
 0x724   : > { %v20299_v56 = vpop.f32.mrf.mxu1 }
 0x725   : > { %20871 = vst [vmem:[#allocation55_spill] sm:$0xff] %v20299_v56  ;;  %v11025_v56 = vadd.f32 %v10866_v26, %v10635_v8  ;;  %v11033_v40 = vadd.f32 %v20247_v31, %v10643_v16 }
 0x726   : > { %v20301_v7 = vpop.f32.mrf.mxu1 }
 0x727   : > { %20872 = vst [vmem:[#allocation56_spill] sm:$0xff] %v20301_v7  ;;  %v10638_v7 = vadd.f32 %v20083_v48, %v20081_v41  ;;  %v11415_v17 = vadd.f32 %v11256_v29, %v11025_v56  ;;  %v20330_v41 = vld [vmem:[%s20635_s10] ss:$0 sm:$0xff] }
 0x728   : > { %v20305_v45 = vpop.f32.mrf.mxu1 }
 0x729   : > { %20874 = vst [vmem:[#allocation58_spill] sm:$0xff] %v20305_v45  ;;  %v10637_v45 = vadd.f32 %v20087_v60, %v20085_v4  ;;  %v11028_v14 = vadd.f32 %v15922_v1, %v10638_v7  ;;  %v10639_v4 = vadd.f32 %v20098_v0, %v20096_v35  ;;  %v11030_v7 = vadd.f32 %v15925_v55, %v10640_v18 }
 0x72a   : > { %v20309_v2 = vpop.f32.mrf.mxu1  ;;  %v10641_v35 = vadd.f32 %v20109_v57, %v20107_v54  ;;  %v10644_v55 = vadd.f32 %v20116_v49, %v20114_v10  ;;  %v11422_v10 = vadd.f32 %v20255_v15, %v11032_v20 }
 0x72b   : > { %20875 = vst [vmem:[#allocation59_spill] sm:$0xff] %v20309_v2  ;;  %v20323_v2 = vpop.f32.mrf.mxu0  ;;  %v11027_v21 = vadd.f32 %v10876_v3, %v10637_v45  ;;  %v11418_v60 = vadd.f32 %v15978_v9, %v11028_v14  ;;  %v11029_v56 = vadd.f32 %v20235_v5, %v10639_v4  ;;  %v11420_v9 = vadd.f32 %v20243_v63, %v11030_v7 }
 0x72c   : > { %v20315_v51 = vpop.f32.mrf.mxu1  ;;  %v11031_v54 = vadd.f32 %v20241_v19, %v10641_v35  ;;  %v11034_v49 = vadd.f32 %v20245_v39, %v10644_v55  ;;  %v10645_v39 = vadd.f32 %v20131_v62, %v20129_v13  ;;  %v11423_v13 = vadd.f32 %v20273_v52, %v11033_v40  ;;  %v20876_v52 = vld [vmem:[#allocation12_spill] sm:$0xff] }
 0x72d   : > { %v20336_v26 = vpop.f32.mrf.mxu0  ;;  %v11417_v45 = vadd.f32 %v20237_v34, %v11027_v21 }
 0x72e   : > { %v20319_v33 = vpop.f32.mrf.mxu1  ;;  %v11421_v22 = vadd.f32 %v20261_v25, %v11031_v54  ;;  %v10648_v25 = vadd.f32 %v20138_v47, %v20136_v36  ;;  %v11035_v62 = vadd.f32 %v20253_v50, %v10645_v39  ;;  %v10650_v50 = vadd.f32 %v20876_v52, %v20147_v27  ;;  %v20881_v27 = vld [vmem:[#allocation51_spill] sm:$0xff]  ;;  %v20882_v54 = vld [vmem:[#allocation40_spill] sm:$0xff]  ;;  %v20887_v39 = vld [vmem:[#allocation14_spill] sm:$0xff] }
 0x72f   : > { %v20348_v1 = vpop.f32.mrf.mxu0 }
 0x730   : > { %v16031_v43 = vpop.f32.mrf.mxu1  ;;  %v11038_v47 = vadd.f32 %v20257_v61, %v10648_v25  ;;  %v20879_v61 = vld [vmem:[#allocation13_spill] sm:$0xff]  ;;  %v20890_v25 = vld [vmem:[#allocation42_spill] sm:$0xff] }
 0x731   : > { %v11806_v59 = vadd.f32 %v16031_v43, %v11416_v44  ;;  %v11419_v44 = vadd.f32 %v20249_v46, %v11029_v56  ;;  %v10646_v46 = vadd.f32 %v20127_v38, %v20125_v12  ;;  %v20362_v19 = vpop.f32.mrf.mxu0  ;;  %v11424_v12 = vadd.f32 %v20267_v53, %v11034_v49 }
 0x732   : > { %v11646_v48 = vpop.f32.mrf.mxu1 }
 0x733   : > { %v11805_v8 = vadd.f32 %v11646_v48, %v11415_v17  ;;  %v11845_v23 = vadd.f32 %v20330_v41, %v11806_v59  ;;  %v11036_v38 = vadd.f32 %v20251_v58, %v10646_v46  ;;  %v20376_v31 = vpop.f32.mrf.mxu0  ;;  %v10647_v58 = vadd.f32 %v20142_v6, %v20140_v30  ;;  %v20878_v6 = vld [vmem:[#allocation39_spill] sm:$0xff] }
 0x734   : > { %v16034_v32 = vpop.f32.mrf.mxu1 }
 0x735   : > { %v11844_v43 = vadd.f32 %v20330_v41, %v11805_v8  ;;  %v11808_v29 = vadd.f32 %v16034_v32, %v11418_v60  ;;  %v11877_v3 = vmax.f32 %v11845_v23, 0.0  ;;  %v11426_v36 = vadd.f32 %v20279_v24, %v11036_v38  ;;  %v20390_v35 = vpop.f32.mrf.mxu0 }
 0x736   : > { %v11656_v0 = vpop.f32.mrf.mxu1 }
 0x737   : > { %v11876_v28 = vmax.f32 %v11844_v43, 0.0  ;;  %v11807_v42 = vadd.f32 %v11656_v0, %v11417_v45  ;;  %v11847_v5 = vadd.f32 %v20330_v41, %v11808_v29 }
 0x738   : > { %v16037_v34 = vpop.f32.mrf.mxu1 }
 0x739   : > { %v11846_v57 = vadd.f32 %v20330_v41, %v11807_v42  ;;  %v11810_v63 = vadd.f32 %v16037_v34, %v11420_v9  ;;  %16085 = vmatprep.mubr.msk.f32.mxu0 %vm441_vm0, %v11876_v28  ;;  %v11879_v21 = vmax.f32 %v11847_v5, 0.0  ;;  %v20877_v28 = vld [vmem:[#allocation48_spill] sm:$0xff]  ;;  %v11037_v42 = vadd.f32 %v20878_v6, %v10647_v58 }
 0x73a   : > { %v11666_v14 = vpop.f32.mrf.mxu1  ;;  %16086 = vmatmul.mubr.msk.f32.vlgmr.msra.gmra.mxu0 %vm441_vm0, %v11877_v3  ;;  %v11425_v30 = vadd.f32 %v20877_v28, %v11035_v62  ;;  %v20880_v3 = vld [vmem:[#allocation29_spill] sm:$0xff]  ;;  %v20892_v62 = vld [vmem:[#allocation19_spill] sm:$0xff]  ;;  %v20896_v6 = vld [vmem:[#allocation44_spill] sm:$0xff] }
 0x73b   : > { %v11878_v18 = vmax.f32 %v11846_v57, 0.0  ;;  %v11809_v17 = vadd.f32 %v11666_v14, %v11419_v44  ;;  %v11849_v59 = vadd.f32 %v20330_v41, %v11810_v63  ;;  %v10649_v5 = vadd.f32 %v20880_v3, %v20879_v61  ;;  %v20883_v14 = vld [vmem:[#allocation5_spill] sm:$0xff]  ;;  %v20898_v61 = vld [vmem:[#allocation16_spill] sm:$0xff] }
 0x73c   : > { %v16040_v48 = vpop.f32.mrf.mxu1  ;;  %v11428_v44 = vadd.f32 %v20881_v27, %v11038_v47  ;;  %v11040_v57 = vadd.f32 %v20882_v54, %v10650_v50 }
 0x73d   : > { %v11848_v4 = vadd.f32 %v20330_v41, %v11809_v17  ;;  %v11812_v15 = vadd.f32 %v16040_v48, %v11422_v10  ;;  %16088 = vmatprep.mubr.msk.f32.mxu0 %vm441_vm0, %v11878_v18  ;;  %v11881_v37 = vmax.f32 %v11849_v59, 0.0  ;;  %v20884_v10 = vld [vmem:[#allocation8_spill] sm:$0xff]  ;;  %v20404_v18 = vpop.f32.mrf.mxu0  ;;  %v20885_v59 = vld [vmem:[#allocation54_spill] sm:$0xff] }
 0x73e   : > { %v11676_v60 = vpop.f32.mrf.mxu1  ;;  %16089 = vmatmul.mubr.msk.f32.gmra.mxu0 %vm441_vm0, %v11879_v21  ;;  %v10652_v49 = vadd.f32 %v20884_v10, %v20883_v14  ;;  %v11427_v48 = vadd.f32 %v20885_v59, %v11037_v42  ;;  %v20900_v14 = vld [vmem:[#allocation21_spill] sm:$0xff]  ;;  %v20901_v10 = vld [vmem:[#allocation23_spill] sm:$0xff] }
 0x73f   : > { %v11880_v7 = vmax.f32 %v11848_v4, 0.0  ;;  %v11811_v8 = vadd.f32 %v11676_v60, %v11421_v22  ;;  %v11851_v23 = vadd.f32 %v20330_v41, %v11812_v15  ;;  %v20886_v22 = vld [vmem:[#allocation41_spill] sm:$0xff] }
 0x740   : > { %v16043_v32 = vpop.f32.mrf.mxu1  ;;  %v11039_v40 = vadd.f32 %v20886_v22, %v10649_v5  ;;  %v20888_v60 = vld [vmem:[#allocation17_spill] sm:$0xff] }
 0x741   : > { %v11850_v45 = vadd.f32 %v20330_v41, %v11811_v8  ;;  %v11814_v53 = vadd.f32 %v16043_v32, %v11424_v12  ;;  %16091 = vmatprep.mubr.msk.f32.mxu0 %vm441_vm0, %v11880_v7  ;;  %v11883_v0 = vmax.f32 %v11851_v23, 0.0  ;;  %v10651_v12 = vadd.f32 %v20888_v60, %v20887_v39  ;;  %v20889_v7 = vld [vmem:[#allocation57_spill] sm:$0xff] }
 0x742   : > { %v11686_v56 = vpop.f32.mrf.mxu1  ;;  %16092 = vmatmul.mubr.msk.f32.gmra.mxu0 %vm441_vm0, %v11881_v37  ;;  %v11430_v8 = vadd.f32 %v20889_v7, %v11040_v57  ;;  %v11042_v37 = vadd.f32 %v20890_v25, %v10652_v49  ;;  %v11429_v47 = vadd.f32 %v20313_v11, %v11039_v40  ;;  %v20897_v11 = vld [vmem:[#allocation15_spill] sm:$0xff]  ;;  %v20899_v57 = vld [vmem:[#allocation45_spill] sm:$0xff]  ;;  %v10655_v49 = vadd.f32 %v20901_v10, %v20900_v14  ;;  %v20904_v40 = vld [vmem:[#allocation24_spill] sm:$0xff] }
 0x743   : > { %v11882_v43 = vmax.f32 %v11850_v45, 0.0  ;;  %v11813_v29 = vadd.f32 %v11686_v56, %v11423_v13  ;;  %v11853_v9 = vadd.f32 %v20330_v41, %v11814_v53  ;;  %v20891_v13 = vld [vmem:[#allocation18_spill] sm:$0xff]  ;;  %v20418_v53 = vpop.f32.mrf.mxu0  ;;  %v10656_v3 = vadd.f32 %v20898_v61, %v20897_v11  ;;  %v20905_v7 = vld [vmem:[#allocation47_spill] sm:$0xff]  ;;  %v20914_v61 = vld [vmem:[#allocation52_spill] sm:$0xff] }
 0x744   : > { %v16046_v20 = vpop.f32.mrf.mxu1  ;;  %v10654_v45 = vadd.f32 %v20892_v62, %v20891_v13  ;;  %v20917_v10 = vld [vmem:[#allocation53_spill] sm:$0xff] }
 0x745   : > { %v11852_v55 = vadd.f32 %v20330_v41, %v11813_v29  ;;  %v11816_v24 = vadd.f32 %v16046_v20, %v11426_v36  ;;  %16094 = vmatprep.mubr.msk.f32.mxu0 %vm441_vm0, %v11882_v43  ;;  %v11885_v17 = vmax.f32 %v11853_v9, 0.0  ;;  %v20893_v43 = vld [vmem:[#allocation43_spill] sm:$0xff]  ;;  %v20895_v9 = vld [vmem:[#allocation22_spill] sm:$0xff]  ;;  %v20432_v5 = vpop.f32.mrf.mxu0 }
 0x746   : > { %v11696_v34 = vpop.f32.mrf.mxu1  ;;  %16095 = vmatmul.mubr.msk.f32.gmra.mxu0 %vm441_vm0, %v11883_v0  ;;  %v11041_v29 = vadd.f32 %v20893_v43, %v10651_v12  ;;  %v20894_v0 = vld [vmem:[#allocation20_spill] sm:$0xff]  ;;  %v11044_v42 = vadd.f32 %v20896_v6, %v10654_v45  ;;  %v20908_v45 = vld [vmem:[#allocation49_spill] sm:$0xff] }
 0x747   : > { %v11884_v63 = vmax.f32 %v11852_v55, 0.0  ;;  %v11815_v16 = vadd.f32 %v11696_v34, %v11425_v30  ;;  %v11855_v46 = vadd.f32 %v20330_v41, %v11816_v24  ;;  %v10653_v20 = vadd.f32 %v20895_v9, %v20894_v0 }
 0x748   : > { %v16049_v21 = vpop.f32.mrf.mxu1  ;;  %v11432_v30 = vadd.f32 %v20323_v2, %v11042_v37  ;;  %v11431_v54 = vadd.f32 %v20336_v26, %v11041_v29  ;;  %v20903_v26 = vld [vmem:[#allocation4_spill] sm:$0xff] }
 0x749   : > { %v11854_v4 = vadd.f32 %v20330_v41, %v11815_v16  ;;  %v11818_v15 = vadd.f32 %v16049_v21, %v11428_v44  ;;  %16097 = vmatprep.mubr.msk.f32.mxu0 %vm441_vm0, %v11884_v63  ;;  %v11887_v58 = vmax.f32 %v11855_v46, 0.0  ;;  %v11043_v63 = vadd.f32 %v20899_v57, %v10653_v20  ;;  %v20902_v21 = vld [vmem:[#allocation46_spill] sm:$0xff] }
 0x74a   : > { %v11706_v38 = vpop.f32.mrf.mxu1  ;;  %16098 = vmatmul.mubr.msk.f32.gmra.mxu0 %vm441_vm0, %v11885_v17  ;;  %v11434_v46 = vadd.f32 %v20348_v1, %v11044_v42  ;;  %v11046_v59 = vadd.f32 %v20902_v21, %v10656_v3  ;;  %v20906_v1 = vld [vmem:[#allocation27_spill] sm:$0xff]  ;;  %v20911_v20 = vld [vmem:[#allocation50_spill] sm:$0xff] }
 0x74b   : > { %v11886_v23 = vmax.f32 %v11854_v4, 0.0  ;;  %v11817_v32 = vadd.f32 %v11706_v38, %v11427_v48  ;;  %v11857_v56 = vadd.f32 %v20330_v41, %v11818_v15  ;;  %v10658_v4 = vadd.f32 %v20904_v40, %v20903_v26  ;;  %v11376_v15 = vpop.f32.mrf.mxu0  ;;  %v20913_v42 = vld [vmem:[#allocation10_spill] sm:$0xff]  ;;  %v20919_v21 = vld [vmem:[#allocation7_spill] sm:$0xff] }
 0x74c   : > { %v16052_v36 = vpop.f32.mrf.mxu1  ;;  %v11433_v38 = vadd.f32 %v20362_v19, %v11043_v63  ;;  %v11436_v62 = vadd.f32 %v20376_v31, %v11046_v59  ;;  %v20909_v19 = vld [vmem:[#allocation31_spill] sm:$0xff]  ;;  %v20912_v31 = vld [vmem:[#allocation6_spill] sm:$0xff] }
 0x74d   : > { %v11856_v52 = vadd.f32 %v20330_v41, %v11817_v32  ;;  %v11820_v50 = vadd.f32 %v16052_v36, %v11430_v8  ;;  %16100 = vmatprep.mubr.msk.f32.mxu0 %vm441_vm0, %v11886_v23  ;;  %v11889_v34 = vmax.f32 %v11857_v56, 0.0  ;;  %v11045_v8 = vadd.f32 %v20905_v7, %v10655_v49  ;;  %v20907_v23 = vld [vmem:[#allocation30_spill] sm:$0xff]  ;;  %v16014_v29 = vpop.f32.mrf.mxu0  ;;  %v20920_v26 = vld [vmem:[#allocation55_spill] sm:$0xff] }
 0x74e   : > { %v11716_v28 = vpop.f32.mrf.mxu1  ;;  %16101 = vmatmul.mubr.msk.f32.gmra.mxu0 %vm441_vm0, %v11887_v58  ;;  %v10657_v32 = vadd.f32 %v20907_v23, %v20906_v1  ;;  %v11048_v58 = vadd.f32 %v20908_v45, %v10658_v4  ;;  %v20923_v1 = vld [vmem:[#allocation56_spill] sm:$0xff] }
 0x74f   : > { %v11888_v55 = vmax.f32 %v11856_v52, 0.0  ;;  %v11819_v24 = vadd.f32 %v11716_v28, %v11429_v47  ;;  %v11859_v27 = vadd.f32 %v20330_v41, %v11820_v50  ;;  %v20910_v47 = vld [vmem:[#allocation9_spill] sm:$0xff]  ;;  %v11435_v9 = vadd.f32 %v20390_v35, %v11045_v8  ;;  %v11386_v57 = vpop.f32.mrf.mxu0 }
 0x750   : > { %v16055_v44 = vpop.f32.mrf.mxu1  ;;  %v10660_v43 = vadd.f32 %v20910_v47, %v20909_v19  ;;  %v11047_v28 = vadd.f32 %v20911_v20, %v10657_v32  ;;  %v11438_v11 = vadd.f32 %v20404_v18, %v11048_v58  ;;  %v20915_v35 = vld [vmem:[#allocation25_spill] sm:$0xff]  ;;  %v20918_v18 = vld [vmem:[#allocation28_spill] sm:$0xff] }
 0x751   : > { %v11858_v16 = vadd.f32 %v20330_v41, %v11819_v24  ;;  %v11822_v2 = vadd.f32 %v16055_v44, %v11432_v30  ;;  %16103 = vmatprep.mubr.msk.f32.mxu0 %vm441_vm0, %v11888_v55  ;;  %v11891_v39 = vmax.f32 %v11859_v27, 0.0  ;;  %v10659_v55 = vadd.f32 %v20913_v42, %v20912_v31  ;;  %v20916_v44 = vld [vmem:[#allocation11_spill] sm:$0xff] }
 0x752   : > { %v11726_v17 = vpop.f32.mrf.mxu1  ;;  %16104 = vmatmul.mubr.msk.f32.gmra.mxu0 %vm441_vm0, %v11889_v34  ;;  %v11050_v3 = vadd.f32 %v20914_v61, %v10660_v43  ;;  %v11437_v14 = vadd.f32 %v20418_v53, %v11047_v28  ;;  %v10661_v59 = vadd.f32 %v20919_v21, %v20918_v18  ;;  %v20921_v53 = vld [vmem:[#allocation26_spill] sm:$0xff] }
 0x753   : > { %v11890_v48 = vmax.f32 %v11858_v16, 0.0  ;;  %v11821_v22 = vadd.f32 %v11726_v17, %v11431_v54  ;;  %v11861_v60 = vadd.f32 %v20330_v41, %v11822_v2  ;;  %v10662_v54 = vadd.f32 %v20916_v44, %v20915_v35 }
 0x754   : > { %v16058_v12 = vpop.f32.mrf.mxu1  ;;  %v11049_v49 = vadd.f32 %v20917_v10, %v10659_v55  ;;  %v11051_v23 = vadd.f32 %v20923_v1, %v10661_v59 }
 0x755   : > { %v11860_v25 = vadd.f32 %v20330_v41, %v11821_v22  ;;  %v11824_v37 = vadd.f32 %v16058_v12, %v11434_v46  ;;  %16106 = vmatprep.mubr.msk.f32.mxu0 %vm441_vm0, %v11890_v48  ;;  %v11893_v52 = vmax.f32 %v11861_v60, 0.0  ;;  %v11440_v22 = vadd.f32 %v20432_v5, %v11050_v3  ;;  %v20922_v60 = vld [vmem:[#allocation32_spill] sm:$0xff]  ;;  %v20924_v5 = vld [vmem:[#allocation33_spill] sm:$0xff] }
 0x756   : > { %v11736_v13 = vpop.f32.mrf.mxu1  ;;  %16107 = vmatmul.mubr.msk.f32.gmra.mxu0 %vm441_vm0, %v11891_v39  ;;  %v11052_v40 = vadd.f32 %v20920_v26, %v10662_v54  ;;  %v10664_v12 = vadd.f32 %v20922_v60, %v20921_v53 }
 0x757   : > { %v11892_v56 = vmax.f32 %v11860_v25, 0.0  ;;  %v11823_v36 = vadd.f32 %v11736_v13, %v11433_v38  ;;  %v11863_v50 = vadd.f32 %v20330_v41, %v11824_v37  ;;  %v16017_v38 = vpop.f32.mrf.mxu0  ;;  %v11439_v37 = vadd.f32 %v11376_v15, %v11049_v49  ;;  %v20928_v15 = vld [vmem:[#allocation36_spill] sm:$0xff] }
 0x758   : > { %v16061_v0 = vpop.f32.mrf.mxu1 }
 0x759   : > { %v11862_v30 = vadd.f32 %v20330_v41, %v11823_v36  ;;  %v11826_v6 = vadd.f32 %v16061_v0, %v11436_v62  ;;  %16109 = vmatprep.mubr.msk.f32.mxu0 %vm441_vm0, %v11892_v56  ;;  %v11895_v63 = vmax.f32 %v11863_v50, 0.0  ;;  %v20925_v62 = vld [vmem:[#allocation34_spill] sm:$0xff]  ;;  %v11442_v56 = vadd.f32 %v16014_v29, %v11052_v40  ;;  %v11396_v0 = vpop.f32.mrf.mxu0  ;;  %v20930_v29 = vld [vmem:[#allocation37_spill] sm:$0xff] }
 0x75a   : > { %v11746_v24 = vpop.f32.mrf.mxu1  ;;  %16110 = vmatmul.mubr.msk.f32.gmra.mxu0 %vm441_vm0, %v11893_v52  ;;  %v10663_v45 = vadd.f32 %v20925_v62, %v20924_v5  ;;  %v20926_v36 = vld [vmem:[#allocation58_spill] sm:$0xff]  ;;  %v20927_v52 = vld [vmem:[#allocation35_spill] sm:$0xff] }
 0x75b   : > { %v11894_v34 = vmax.f32 %v11862_v30, 0.0  ;;  %v11825_v27 = vadd.f32 %v11746_v24, %v11435_v9  ;;  %v11865_v16 = vadd.f32 %v20330_v41, %v11826_v6  ;;  %v11054_v19 = vadd.f32 %v20926_v36, %v10664_v12  ;;  %v20929_v6 = vld [vmem:[#allocation59_spill] sm:$0xff]  ;;  %v20931_v24 = vld [vmem:[#allocation38_spill] sm:$0xff]  ;;  %v16020_v61 = vpop.f32.mrf.mxu0 }
 0x75c   : > { %v16064_v2 = vpop.f32.mrf.mxu1  ;;  %v10666_v50 = vadd.f32 %v20928_v15, %v20927_v52  ;;  %v11441_v30 = vadd.f32 %v11386_v57, %v11051_v23  ;;  %v11053_v31 = vadd.f32 %v20929_v6, %v10663_v45 }
 0x75d   : > { %v11864_v17 = vadd.f32 %v20330_v41, %v11825_v27  ;;  %v11828_v46 = vadd.f32 %v16064_v2, %v11438_v11  ;;  %16112 = vmatprep.mubr.msk.f32.mxu0 %vm441_vm0, %v11894_v34  ;;  %v11897_v7 = vmax.f32 %v11865_v16, 0.0  ;;  %v10665_v11 = vadd.f32 %v20931_v24, %v20930_v29  ;;  %v11406_v49 = vpop.f32.mrf.mxu0 }
 0x75e   : > { %v11756_v48 = vpop.f32.mrf.mxu1  ;;  %16113 = vmatmul.mubr.msk.f32.gmra.mxu0 %vm441_vm0, %v11895_v63  ;;  %v11444_v34 = vadd.f32 %v16017_v38, %v11054_v19  ;;  %v11056_v27 = vadd.f32 %v20315_v51, %v10666_v50  ;;  %v11443_v16 = vadd.f32 %v11396_v0, %v11053_v31 }
 0x75f   : > { %v11896_v4 = vmax.f32 %v11864_v17, 0.0  ;;  %v11827_v39 = vadd.f32 %v11756_v48, %v11437_v14  ;;  %v11867_v8 = vadd.f32 %v20330_v41, %v11828_v46  ;;  %v11055_v2 = vadd.f32 %v20319_v33, %v10665_v11 }
 0x760   : > { %v16067_v25 = vpop.f32.mrf.mxu1  ;;  %v11446_v46 = vadd.f32 %v16020_v61, %v11056_v27 }
 0x761   : > { %v11866_v32 = vadd.f32 %v20330_v41, %v11827_v39  ;;  %v11830_v13 = vadd.f32 %v16067_v25, %v11440_v22  ;;  %16115 = vmatprep.mubr.msk.f32.mxu0 %vm441_vm0, %v11896_v4  ;;  %v11899_v9 = vmax.f32 %v11867_v8, 0.0  ;;  %v11445_v22 = vadd.f32 %v11406_v49, %v11055_v2  ;;  %v20519_v8 = vld [vmem:[%s20637_s12] ss:$0 sm:$0xff] }
 0x762   : > { %v11766_v58 = vpop.f32.mrf.mxu1  ;;  %16116 = vmatmul.mubr.msk.f32.gmra.mxu0 %vm441_vm0, %v11897_v7 }
 0x763   : > { %v11898_v47 = vmax.f32 %v11866_v32, 0.0  ;;  %v11829_v43 = vadd.f32 %v11766_v58, %v11439_v37  ;;  %v11869_v20 = vadd.f32 %v20330_v41, %v11830_v13 }
 0x764   : > { %v16070_v28 = vpop.f32.mrf.mxu1 }
 0x765   : > { %v11868_v42 = vadd.f32 %v20330_v41, %v11829_v43  ;;  %v11832_v55 = vadd.f32 %v16070_v28, %v11442_v56  ;;  %16118 = vmatprep.mubr.msk.f32.mxu0 %vm441_vm0, %v11898_v47  ;;  %v11901_v54 = vmax.f32 %v11869_v20, 0.0 }
 0x766   : > { %v11776_v3 = vpop.f32.mrf.mxu1  ;;  %16119 = vmatmul.mubr.msk.f32.gmra.mxu0 %vm441_vm0, %v11899_v9 }
 0x767   : > { %v11900_v35 = vmax.f32 %v11868_v42, 0.0  ;;  %v11831_v44 = vadd.f32 %v11776_v3, %v11441_v30  ;;  %v11871_v57 = vadd.f32 %v20330_v41, %v11832_v55 }
 0x768   : > { %v16073_v63 = vpop.f32.mrf.mxu1 }
 0x769   : > { %v11870_v14 = vadd.f32 %v20330_v41, %v11831_v44  ;;  %v11834_v10 = vadd.f32 %v16073_v63, %v11444_v34  ;;  %16121 = vmatprep.mubr.msk.f32.mxu0 %vm441_vm0, %v11900_v35  ;;  %v11903_v21 = vmax.f32 %v11871_v57, 0.0 }
 0x76a   : > { %v11786_v17 = vpop.f32.mrf.mxu1  ;;  %16122 = vmatmul.mubr.msk.f32.gmra.mxu0 %vm441_vm0, %v11901_v54 }
 0x76b   : > { %v11902_v51 = vmax.f32 %v11870_v14, 0.0  ;;  %v11833_v18 = vadd.f32 %v11786_v17, %v11443_v16  ;;  %v11873_v59 = vadd.f32 %v20330_v41, %v11834_v10 }
 0x76c   : > { %v16076_v48 = vpop.f32.mrf.mxu1 }
 0x76d   : > { %v11872_v26 = vadd.f32 %v20330_v41, %v11833_v18  ;;  %v11836_v33 = vadd.f32 %v16076_v48, %v11446_v46  ;;  %16124 = vmatprep.mubr.msk.f32.mxu0 %vm441_vm0, %v11902_v51  ;;  %v11905_v53 = vmax.f32 %v11873_v59, 0.0 }
 0x76e   : > { %v11796_v40 = vpop.f32.mrf.mxu1  ;;  %16125 = vmatmul.mubr.msk.f32.gmra.mxu0 %vm441_vm0, %v11903_v21 }
 0x76f   : > { %v11904_v4 = vmax.f32 %v11872_v26, 0.0  ;;  %v11835_v39 = vadd.f32 %v11796_v40, %v11445_v22  ;;  %v11875_v60 = vadd.f32 %v20330_v41, %v11836_v33 }
 0x771   : > { %v11874_v12 = vadd.f32 %v20330_v41, %v11835_v39  ;;  %16127 = vmatprep.mubr.msk.f32.mxu0 %vm441_vm0, %v11904_v4  ;;  %v11907_v7 = vmax.f32 %v11875_v60, 0.0 }
 0x772   : > { %16128 = vmatmul.mubr.msk.f32.gmra.mxu0 %vm441_vm0, %v11905_v53 }
 0x773   : > { %v11906_v38 = vmax.f32 %v11874_v12, 0.0 }
 0x775   : > { %16130 = vmatprep.mubr.msk.f32.mxu0 %vm441_vm0, %v11906_v38 }
 0x776   : > { %16131 = vmatmul.mubr.msk.f32.gmra.mxu0 %vm441_vm0, %v11907_v7 }
 0x7fa   : > { %v16087_v41 = vpop.f32.mrf.mxu0 }
 0x7fb   : > { %v12087_v25 = vadd.f32 %v16087_v41, %v20519_v8 }
 0x7fc   : > { %v12081_v37 = vpop.f32.mrf.mxu0 }
 0x7fd   : > { %12242 = vst.msk [vmem:[%s20524_s29 + $0x8] sm:$0xff] %vm12240_vm9, %v12087_v25  ;;  %v12082_v1 = vadd.f32 %v20519_v8, %v12081_v37 }
 0x7fe   : > { %v16090_v23 = vpop.f32.mrf.mxu0 }
 0x7ff   : > { %12241 = vst.msk [vmem:[%s20524_s29] sm:$0xff] %vm12240_vm9, %v12082_v1  ;;  %v12097_v32 = vadd.f32 %v16090_v23, %v20519_v8 }
 0x800   : > { %v12091_v13 = vpop.f32.mrf.mxu0 }
 0x801   : > { %12244 = vst.msk [vmem:[%s20524_s29 + $0x18] sm:$0xff] %vm12240_vm9, %v12097_v32  ;;  %v12092_v5 = vadd.f32 %v20519_v8, %v12091_v13 }
 0x802   : > { %v16093_v62 = vpop.f32.mrf.mxu0 }
 0x803   : > { %12243 = vst.msk [vmem:[%s20524_s29 + $0x10] sm:$0xff] %vm12240_vm9, %v12092_v5  ;;  %v12107_v45 = vadd.f32 %v16093_v62, %v20519_v8 }
 0x804   : > { %v12101_v58 = vpop.f32.mrf.mxu0 }
 0x805   : > { %12246 = vst.msk [vmem:[%s20524_s29 + $0x28] sm:$0xff] %vm12240_vm9, %v12107_v45  ;;  %v12102_v56 = vadd.f32 %v20519_v8, %v12101_v58 }
 0x806   : > { %v16096_v36 = vpop.f32.mrf.mxu0 }
 0x807   : > { %12245 = vst.msk [vmem:[%s20524_s29 + $0x20] sm:$0xff] %vm12240_vm9, %v12102_v56  ;;  %v12117_v19 = vadd.f32 %v16096_v36, %v20519_v8 }
 0x808   : > { %v12111_v47 = vpop.f32.mrf.mxu0 }
 0x809   : > { %12248 = vst.msk [vmem:[%s20524_s29 + $0x38] sm:$0xff] %vm12240_vm9, %v12117_v19  ;;  %v12112_v43 = vadd.f32 %v20519_v8, %v12111_v47 }
 0x80a   : > { %v16099_v52 = vpop.f32.mrf.mxu0 }
 0x80b   : > { %12247 = vst.msk [vmem:[%s20524_s29 + $0x30] sm:$0xff] %vm12240_vm9, %v12112_v43  ;;  %v12127_v15 = vadd.f32 %v16099_v52, %v20519_v8 }
 0x80c   : > { %v12121_v50 = vpop.f32.mrf.mxu0 }
 0x80d   : > { %12250 = vst.msk [vmem:[%s20524_s29 + $0x48] sm:$0xff] %vm12240_vm9, %v12127_v15  ;;  %v12122_v0 = vadd.f32 %v20519_v8, %v12121_v50 }
 0x80e   : > { %v16102_v9 = vpop.f32.mrf.mxu0 }
 0x80f   : > { %12249 = vst.msk [vmem:[%s20524_s29 + $0x40] sm:$0xff] %vm12240_vm9, %v12122_v0  ;;  %v12137_v20 = vadd.f32 %v16102_v9, %v20519_v8 }
 0x810   : > { %v12131_v28 = vpop.f32.mrf.mxu0 }
 0x811   : > { %12252 = vst.msk [vmem:[%s20524_s29 + $0x58] sm:$0xff] %vm12240_vm9, %v12137_v20  ;;  %v12132_v30 = vadd.f32 %v20519_v8, %v12131_v28 }
 0x812   : > { %v16105_v6 = vpop.f32.mrf.mxu0 }
 0x813   : > { %12251 = vst.msk [vmem:[%s20524_s29 + $0x50] sm:$0xff] %vm12240_vm9, %v12132_v30  ;;  %v12147_v31 = vadd.f32 %v16105_v6, %v20519_v8 }
 0x814   : > { %v12141_v42 = vpop.f32.mrf.mxu0 }
 0x815   : > { %12254 = vst.msk [vmem:[%s20524_s29 + $0x68] sm:$0xff] %vm12240_vm9, %v12147_v31  ;;  %v12142_v55 = vadd.f32 %v20519_v8, %v12141_v42 }
 0x816   : > { %v16108_v29 = vpop.f32.mrf.mxu0 }
 0x817   : > { %12253 = vst.msk [vmem:[%s20524_s29 + $0x60] sm:$0xff] %vm12240_vm9, %v12142_v55  ;;  %v12157_v24 = vadd.f32 %v16108_v29, %v20519_v8 }
 0x818   : > { %v12151_v11 = vpop.f32.mrf.mxu0 }
 0x819   : > { %12256 = vst.msk [vmem:[%s20524_s29 + $0x78] sm:$0xff] %vm12240_vm9, %v12157_v24  ;;  %v12152_v61 = vadd.f32 %v20519_v8, %v12151_v11 }
 0x81a   : > { %v16111_v3 = vpop.f32.mrf.mxu0 }
 0x81b   : > { %12255 = vst.msk [vmem:[%s20524_s29 + $0x70] sm:$0xff] %vm12240_vm9, %v12152_v61  ;;  %v12167_v34 = vadd.f32 %v16111_v3, %v20519_v8 }
 0x81c   : > { %v12161_v27 = vpop.f32.mrf.mxu0 }
 0x81d   : > { %12258 = vst.msk [vmem:[%s20524_s29 + $0x88] sm:$0xff] %vm12240_vm9, %v12167_v34  ;;  %v12162_v35 = vadd.f32 %v20519_v8, %v12161_v27 }
 0x81e   : > { %v16114_v44 = vpop.f32.mrf.mxu0 }
 0x81f   : > { %12257 = vst.msk [vmem:[%s20524_s29 + $0x80] sm:$0xff] %vm12240_vm9, %v12162_v35  ;;  %v12177_v54 = vadd.f32 %v16114_v44, %v20519_v8 }
 0x820   : > { %v12171_v57 = vpop.f32.mrf.mxu0 }
 0x821   : > { %12260 = vst.msk [vmem:[%s20524_s29 + $0x98] sm:$0xff] %vm12240_vm9, %v12177_v54  ;;  %v12172_v63 = vadd.f32 %v20519_v8, %v12171_v57 }
 0x822   : > { %v16117_v16 = vpop.f32.mrf.mxu0 }
 0x823   : > { %12259 = vst.msk [vmem:[%s20524_s29 + $0x90] sm:$0xff] %vm12240_vm9, %v12172_v63  ;;  %v12187_v2 = vadd.f32 %v16117_v16, %v20519_v8 }
 0x824   : > { %v12181_v14 = vpop.f32.mrf.mxu0 }
 0x825   : > { %12262 = vst.msk [vmem:[%s20524_s29 + $0xa8] sm:$0xff] %vm12240_vm9, %v12187_v2  ;;  %v12182_v10 = vadd.f32 %v20519_v8, %v12181_v14 }
 0x826   : > { %v16120_v49 = vpop.f32.mrf.mxu0 }
 0x827   : > { %12261 = vst.msk [vmem:[%s20524_s29 + $0xa0] sm:$0xff] %vm12240_vm9, %v12182_v10  ;;  %v12197_v17 = vadd.f32 %v16120_v49, %v20519_v8 }
 0x828   : > { %v12191_v46 = vpop.f32.mrf.mxu0 }
 0x829   : > { %12264 = vst.msk [vmem:[%s20524_s29 + $0xb8] sm:$0xff] %vm12240_vm9, %v12197_v17  ;;  %v12192_v51 = vadd.f32 %v20519_v8, %v12191_v46 }
 0x82a   : > { %v16123_v18 = vpop.f32.mrf.mxu0 }
 0x82b   : > { %12263 = vst.msk [vmem:[%s20524_s29 + $0xb0] sm:$0xff] %vm12240_vm9, %v12192_v51  ;;  %v12207_v21 = vadd.f32 %v16123_v18, %v20519_v8 }
 0x82c   : > { %v12201_v59 = vpop.f32.mrf.mxu0 }
 0x82d   : > { %12266 = vst.msk [vmem:[%s20524_s29 + $0xc8] sm:$0xff] %vm12240_vm9, %v12207_v21  ;;  %v12202_v48 = vadd.f32 %v20519_v8, %v12201_v59 }
 0x82e   : > { %v16126_v22 = vpop.f32.mrf.mxu0 }
 0x82f   : > { %12265 = vst.msk [vmem:[%s20524_s29 + $0xc0] sm:$0xff] %vm12240_vm9, %v12202_v48  ;;  %v12217_v26 = vadd.f32 %v16126_v22, %v20519_v8 }
 0x830   : > { %v12211_v33 = vpop.f32.mrf.mxu0 }
 0x831   : > { %12268 = vst.msk [vmem:[%s20524_s29 + $0xd8] sm:$0xff] %vm12240_vm9, %v12217_v26  ;;  %v12212_v40 = vadd.f32 %v20519_v8, %v12211_v33 }
 0x832   : > { %v16129_v4 = vpop.f32.mrf.mxu0 }
 0x833   : > { %12267 = vst.msk [vmem:[%s20524_s29 + $0xd0] sm:$0xff] %vm12240_vm9, %v12212_v40  ;;  %v12227_v39 = vadd.f32 %v16129_v4, %v20519_v8 }
 0x834   : > { %v12221_v53 = vpop.f32.mrf.mxu0 }
 0x835   : > { %12270 = vst.msk [vmem:[%s20524_s29 + $0xe8] sm:$0xff] %vm12240_vm9, %v12227_v39  ;;  %v12222_v60 = vadd.f32 %v20519_v8, %v12221_v53 }
 0x836   : > { %v16132_v12 = vpop.f32.mrf.mxu0 }
 0x837   : > { %12269 = vst.msk [vmem:[%s20524_s29 + $0xe0] sm:$0xff] %vm12240_vm9, %v12222_v60  ;;  %v12237_v38 = vadd.f32 %v16132_v12, %v20519_v8 }
 0x838   : > { %v12231_v7 = vpop.f32.mrf.mxu0 }
 0x839   : > { %12272 = vst.msk [vmem:[%s20524_s29 + $0xf8] sm:$0xff] %vm12240_vm9, %v12237_v38  ;;  %v12232_v41 = vadd.f32 %v20519_v8, %v12231_v7 }
 0x83b   : > { %12271 = vst.msk [vmem:[%s20524_s29 + $0xf0] sm:$0xff] %vm12240_vm9, %v12232_v41 }
 0x83c PF: > { %s23_s25 = sadd.s32 1, %s16157_s25  }
 0x83d   : > { %p20_p4 = scmp.ge.s32.totalorder %s23_s25, 4  }
 0x83f   :  { %22 = sbr.rel (!%p20_p4) target bundleno = 1 (0x1), region = 148 }

</bundles_post_ra>
